<compile_context>
chip_gen: v6e
topology: v6e:2x2x1
jax: 0.10.0
libtpu: 0.0.40
codegen_flags: <defaults>
</compile_context>

<pallas_src>
import numpy as np
import jax
import jax.numpy as jnp
from jax.experimental import pallas as pl
from jax.experimental.pallas import tpu as pltpu

HIDDEN = 128
N_CLASSES = 5
IMG = 275          # minimal spatial size supported by the conv stack
N_VISUAL = 24      # feature-extractor output size at 1x1 spatial

# ---- layer geometry for the 275x275 input (flat row-strides / lengths) ----
PW = 36                   # padded width of each 8x8 phase plane of the image
XPH_LEN = PW * PW         # 1296 : flat length of one phase plane
SLAB_LEN = 1225           # conv1 parity-slab flat length (row stride 36)
P1_LEN = 33 * PW          # 1188 : pool1 flat length (33 rows x row-stride 36)
P2_PW = 17                # phase-plane width of the 2x2-phased pool1 map
P2_LEN = P2_PW * P2_PW    # 289
C2_LEN = 14 * 17 + 15     # 253 : conv2 flat length (row stride 17)
M2_LEN = 12 * 17 + 13     # 217 : stride-1 3x3-max flat length
POOL2_LEN = 49            # 7x7
C3_LEN = 4 * 7 + 5        # 33  : conv3 flat length (row stride 7)
C4_LEN = 2 * 7 + 3        # 17  : conv4 flat length (row stride 7)


def _fs(shape):
    """Whole-array BlockSpec (everything here comfortably fits VMEM)."""
    n = len(shape)
    return pl.BlockSpec(shape, lambda i, _n=n: (0,) * _n)


_CPARAMS = pltpu.CompilerParams(dimension_semantics=("arbitrary",),
                                vmem_limit_bytes=32 * 1024 * 1024)


# ---------------------------------------------------------------------------
# Kernel A: conv1 + ReLU + maxpool1, fully in VMEM.
# ---------------------------------------------------------------------------
def _conv1_pool1_kernel(xph_ref, w1e_ref, b1_ref, out_ref, slab_ref):
    """xph_ref : (64, 1296) bf16  8x8 phase planes of the image (row stride 36)
       w1e_ref : (16, 12, 64) bf16 effective conv1 weights, index (a,b,dh,dw)
       b1_ref  : (12, 1) f32
       out_ref : (12, 1188) f32   pool1 output, flat row-stride 36 (33x33 valid)
       slab_ref: (12, 1225) f32   scratch: one conv1 output-parity slab
    """
    out_ref[...] = jnp.zeros_like(out_ref)
    for a in range(2):            # conv1-output row parity
        for b in range(2):        # conv1-output column parity
            acc = jnp.zeros((12, SLAB_LEN), jnp.float32)
            for dh in range(2):
                for dw in range(2):
                    k = a * 8 + b * 4 + dh * 2 + dw
                    off = dh * PW + dw
                    acc += jnp.dot(w1e_ref[k],
                                   xph_ref[:, off:off + SLAB_LEN],
                                   preferred_element_type=jnp.float32)
            slab_ref[...] = jnp.maximum(acc + b1_ref[...], 0.0)
            # fold this parity slab into the 3x3 / stride-2 max-pool output
            for dh in ((0, 1) if a == 0 else (0,)):
                for dw in ((0, 1) if b == 0 else (0,)):
                    off = dh * PW + dw
                    out_ref[...] = jnp.maximum(
                        out_ref[...], slab_ref[:, off:off + P1_LEN])


def conv1_pool1(xph, w1e, b1):
    return pl.pallas_call(
        _conv1_pool1_kernel,
        grid=(1,),
        in_specs=[_fs((64, XPH_LEN)), _fs((16, 12, 64)), _fs((12, 1))],
        out_specs=_fs((12, P1_LEN)),
        out_shape=jax.ShapeDtypeStruct((12, P1_LEN), jnp.float32),
        scratch_shapes=[pltpu.VMEM((12, SLAB_LEN), jnp.float32)],
        compiler_params=_CPARAMS,
    )(xph, w1e, b1)


# ---------------------------------------------------------------------------
# Kernel B: conv2..pool3 + LSTM cell + classifier + log_softmax, fused.
# ---------------------------------------------------------------------------
def _tail_kernel(p2_ref, w2e_ref, b2_ref, dsel_ref, w3e_ref, b3_ref,
                 w4e_ref, b4_ref, wih_ref, whh_ref, blstm_ref, h0_ref, c0_ref,
                 wcls_ref, bcls_ref,
                 logp_ref, hn_ref, cn_ref,
                 c2_ref, p2s_ref, c3_ref):
    # ---- conv2 (5x5, stride 2) + bias + ReLU, from 2x2-phased pool1 ----
    acc2 = jnp.zeros((24, C2_LEN), jnp.float32)
    for dh in range(3):
        for dw in range(3):
            off = dh * 17 + dw
            acc2 += jnp.dot(w2e_ref[dh * 3 + dw],
                            p2_ref[:, off:off + C2_LEN],
                            preferred_element_type=jnp.float32)
    c2_ref[...] = jnp.maximum(acc2 + b2_ref[...], 0.0)

    # ---- maxpool2 (3x3, s2): stride-1 running max, then selection matmul ----
    m = c2_ref[:, 0:M2_LEN]
    for kh in range(3):
        for kw in range(3):
            if kh == 0 and kw == 0:
                continue
            off = kh * 17 + kw
            m = jnp.maximum(m, c2_ref[:, off:off + M2_LEN])
    p2s_ref[...] = jnp.dot(m, dsel_ref[...],
                           preferred_element_type=jnp.float32)   # (24, 49)

    # ---- conv3 (3x3, stride 1, no activation) ----
    acc3 = jnp.zeros((24, C3_LEN), jnp.float32)
    for kh in range(3):
        for kw in range(3):
            off = kh * 7 + kw
            acc3 += jnp.dot(w3e_ref[kh * 3 + kw],
                            p2s_ref[:, off:off + C3_LEN].astype(jnp.bfloat16),
                            preferred_element_type=jnp.float32)
    c3_ref[...] = acc3 + b3_ref[...]

    # ---- conv4 (3x3, stride 1) + bias + ReLU ----
    acc4 = jnp.zeros((24, C4_LEN), jnp.float32)
    for kh in range(3):
        for kw in range(3):
            off = kh * 7 + kw
            acc4 += jnp.dot(w4e_ref[kh * 3 + kw],
                            c3_ref[:, off:off + C4_LEN].astype(jnp.bfloat16),
                            preferred_element_type=jnp.float32)
    c4 = jnp.maximum(acc4 + b4_ref[...], 0.0)

    # ---- maxpool3: the 3x3 window covers the whole 3x3 map -> (24, 1) ----
    lane = jax.lax.broadcasted_iota(jnp.int32, (24, C4_LEN), 1)
    valid = (lane < 3) | ((lane >= 7) & (lane < 10)) | ((lane >= 14) & (lane < 17))
    feat = jnp.max(jnp.where(valid, c4, 0.0), axis=1, keepdims=True)

    # ---- LSTM cell (single timestep), PyTorch gate order (i, f, g, o) ----
    gates = (jnp.dot(wih_ref[...], feat.astype(jnp.bfloat16),
                     preferred_element_type=jnp.float32)
             + jnp.dot(whh_ref[...], h0_ref[...].astype(jnp.bfloat16),
                       preferred_element_type=jnp.float32)
             + blstm_ref[...])
    i_g = jax.nn.sigmoid(gates[0 * HIDDEN:1 * HIDDEN])
    f_g = jax.nn.sigmoid(gates[1 * HIDDEN:2 * HIDDEN])
    g_g = jnp.tanh(gates[2 * HIDDEN:3 * HIDDEN])
    o_g = jax.nn.sigmoid(gates[3 * HIDDEN:4 * HIDDEN])
    c_new = f_g * c0_ref[...] + i_g * g_g
    h_new = o_g * jnp.tanh(c_new)

    # ---- classifier + log_softmax (column orientation: no transposes) ----
    logits = jnp.dot(wcls_ref[...], h_new.astype(jnp.bfloat16),
                     preferred_element_type=jnp.float32) + bcls_ref[...]
    mx = jnp.max(logits, axis=0, keepdims=True)
    z = logits - mx
    lse = jnp.log(jnp.sum(jnp.exp(z), axis=0, keepdims=True))
    logp_ref[...] = z - lse
    hn_ref[...] = h_new
    cn_ref[...] = c_new


def tail(p2, w2e, b2, dsel, w3e, b3, w4e, b4, wih, whh, blstm, h0, c0,
         wcls, bcls):
    return pl.pallas_call(
        _tail_kernel,
        grid=(1,),
        in_specs=[_fs((48, P2_LEN)), _fs((9, 24, 48)), _fs((24, 1)),
                  _fs((M2_LEN, POOL2_LEN)), _fs((9, 24, 24)), _fs((24, 1)),
                  _fs((9, 24, 24)), _fs((24, 1)),
                  _fs((4 * HIDDEN, N_VISUAL)), _fs((4 * HIDDEN, HIDDEN)),
                  _fs((4 * HIDDEN, 1)), _fs((HIDDEN, 1)), _fs((HIDDEN, 1)),
                  _fs((N_CLASSES, HIDDEN)), _fs((N_CLASSES, 1))],
        out_specs=(_fs((N_CLASSES, 1)), _fs((HIDDEN, 1)), _fs((HIDDEN, 1))),
        out_shape=(jax.ShapeDtypeStruct((N_CLASSES, 1), jnp.float32),
                   jax.ShapeDtypeStruct((HIDDEN, 1), jnp.float32),
                   jax.ShapeDtypeStruct((HIDDEN, 1), jnp.float32)),
        scratch_shapes=[pltpu.VMEM((24, C2_LEN), jnp.float32),
                        pltpu.VMEM((24, POOL2_LEN), jnp.float32),
                        pltpu.VMEM((24, C3_LEN), jnp.float32)],
        compiler_params=_CPARAMS,
    )(p2, w2e, b2, dsel, w3e, b3, w4e, b4, wih, whh, blstm, h0, c0, wcls, bcls)


# ---------------------------------------------------------------------------
# Wrapper-side one-time re-layouts (tiny layout plumbing, not compute).
# ---------------------------------------------------------------------------
def _prep_image_phases(img):
    """(275,275) f32 -> (64, 1296) bf16 : xph[p*8+q, i*36+j] = img[8i+p, 8j+q]."""
    xpad = jnp.pad(img, ((0, 8 * PW - IMG), (0, 8 * PW - IMG)))   # (288, 288)
    xph = xpad.reshape(PW, 8, PW, 8).transpose(1, 3, 0, 2)        # (p,q,i,j)
    return xph.reshape(64, XPH_LEN).astype(jnp.bfloat16)


def _prep_conv1_weights(w1):
    """(12,1,11,11) -> (16,12,64) bf16 effective weights, index (a,b,dh,dw)."""
    w1s = w1[:, 0]                                      # (12, 11, 11)
    w1pad = jnp.pad(w1s, ((0, 0), (4, 5), (4, 5)))      # (12, 20, 20)
    idx = np.array([[[8 * dh + p - 4 * a + 4 for p in range(8)]
                     for dh in range(2)] for a in range(2)],
                   dtype=np.int32).reshape(-1)          # 32 = (a, dh, p)
    t = jnp.take(w1pad, idx, axis=1)                    # (12, 32, 20)
    t = jnp.take(t, idx, axis=2)                        # (12, 32, 32)
    t = t.reshape(12, 2, 2, 8, 2, 2, 8)                 # (c,a,dh,p,b,dw,q)
    t = t.transpose(1, 4, 2, 5, 0, 3, 6)                # (a,b,dh,dw,c,p,q)
    return t.reshape(16, 12, 64).astype(jnp.bfloat16)


def _prep_conv2_weights(w2):
    """(24,12,5,5) -> (9,24,48) bf16 effective weights, index dh*3+dw."""
    w2pad = jnp.pad(w2, ((0, 0), (0, 0), (0, 1), (0, 1)))   # (24,12,6,6)
    idx = np.array([[2 * d + p for p in range(2)] for d in range(3)],
                   dtype=np.int32).reshape(-1)              # 6 = (d, p)
    t = jnp.take(w2pad, idx, axis=2)
    t = jnp.take(t, idx, axis=3)                            # (24,12,6,6)
    t = t.reshape(24, 12, 3, 2, 3, 2)                       # (c2,c,dh,p,dw,q)
    t = t.transpose(2, 4, 0, 1, 3, 5)                       # (dh,dw,c2,c,p,q)
    return t.reshape(9, 24, 48).astype(jnp.bfloat16)


def _prep_3x3_weights(w):
    """(24,24,3,3) -> (9,24,24) bf16, tap-major."""
    return jnp.transpose(w, (2, 3, 0, 1)).reshape(9, 24, 24).astype(jnp.bfloat16)


def _pool2_selection_matrix():
    """(217, 49) 0/1 matrix: stride-2 decimation of the 13x13 running max."""
    d = np.zeros((M2_LEN, POOL2_LEN), np.float32)
    for i in range(7):
        for j in range(7):
            d[(2 * i) * 17 + 2 * j, i * 7 + j] = 1.0
    return jnp.asarray(d)


# ---------------------------------------------------------------------------
# Model forward
# ---------------------------------------------------------------------------
def lstm_singleshot_forward(params, x, hc):
    T, C, H, W = x.shape
    assert T == 1 and C == 1 and H == IMG and W == IMG, (
        "kernels are specialized to one 1x275x275 frame; the reference "
        "classifier Linear(128, n) requires timesteps == 1 anyway")

    h0 = hc[0].reshape(HIDDEN, 1).astype(jnp.float32)
    c0 = hc[1].reshape(HIDDEN, 1).astype(jnp.float32)

    # --- one-time parameter re-layouts (few hundred KB total) ---
    w1e = _prep_conv1_weights(params["conv1_w"])
    b1 = params["conv1_b"].reshape(12, 1).astype(jnp.float32)
    w2e = _prep_conv2_weights(params["conv2_w"])
    b2 = params["conv2_b"].reshape(24, 1).astype(jnp.float32)
    w3e = _prep_3x3_weights(params["conv3_w"])
    b3 = params["conv3_b"].reshape(24, 1).astype(jnp.float32)
    w4e = _prep_3x3_weights(params["conv4_w"])
    b4 = params["conv4_b"].reshape(24, 1).astype(jnp.float32)
    dsel = _pool2_selection_matrix()
    wih = params["w_ih"].astype(jnp.bfloat16)                       # (512, 24)
    whh = params["w_hh"].astype(jnp.bfloat16)                       # (512, 128)
    blstm = (params["b_ih"] + params["b_hh"]).reshape(4 * HIDDEN, 1).astype(jnp.float32)
    wcls = params["cls_w"].astype(jnp.bfloat16)                     # (5, 128)
    bcls = params["cls_b"].reshape(N_CLASSES, 1).astype(jnp.float32)

    # --- kernel A: conv1 + ReLU + pool1 ---
    xph = _prep_image_phases(x[0, 0].astype(jnp.float32))
    p1 = conv1_pool1(xph, w1e, b1)                                  # (12, 1188)

    # --- glue: 2x2 phase re-layout of the 33x33 pool1 map (~55 KB) ---
    p1 = p1.reshape(12, 33, PW)[:, :, :33]
    p1 = jnp.pad(p1, ((0, 0), (0, 1), (0, 1)))                      # (12,34,34)
    p1 = p1.reshape(12, P2_PW, 2, P2_PW, 2).transpose(0, 2, 4, 1, 3)
    p2 = p1.reshape(48, P2_LEN).astype(jnp.bfloat16)

    # --- kernel B: conv2..pool3 + LSTM + classifier + log_softmax ---
    logp, h_new, c_new = tail(p2, w2e, b2, dsel, w3e, b3, w4e, b4,
                              wih, whh, blstm, h0, c0, wcls, bcls)

    log_probs = logp.reshape(1, N_CLASSES)
    h_n = h_new.reshape(1, 1, HIDDEN)
    c_n = c_new.reshape(1, 1, HIDDEN)
    return log_probs, (h_n, c_n)


# ---------------------------------------------------------------------------
# Deterministic parameter initialization (PyTorch-like fan-in bounds)
# ---------------------------------------------------------------------------
def _uniform(key, shape, bound):
    return jax.random.uniform(key, shape, jnp.float32, minval=-bound, maxval=bound)


def init_params(key, n_visual_features=N_VISUAL, hidden=HIDDEN,
                n_classes=N_CLASSES):
    ks = jax.random.split(key, 14)
    p = {}
    conv_cfg = [("conv1", 1, 12, 11), ("conv2", 12, 24, 5),
                ("conv3", 24, 24, 3), ("conv4", 24, 24, 3)]
    i = 0
    for name, cin, cout, k in conv_cfg:
        bound = 1.0 / np.sqrt(cin * k * k)
        p[f"{name}_w"] = _uniform(ks[i], (cout, cin, k, k), bound); i += 1
        p[f"{name}_b"] = _uniform(ks[i], (cout,), bound); i += 1
    bound = 1.0 / np.sqrt(hidden)
    p["w_ih"] = _uniform(ks[i], (4 * hidden, n_visual_features), bound); i += 1
    p["w_hh"] = _uniform(ks[i], (4 * hidden, hidden), bound); i += 1
    p["b_ih"] = _uniform(ks[i], (4 * hidden,), bound); i += 1
    p["b_hh"] = _uniform(ks[i], (4 * hidden,), bound); i += 1
    p["cls_w"] = _uniform(ks[i], (n_classes, hidden), bound); i += 1
    p["cls_b"] = _uniform(ks[i], (n_classes,), bound); i += 1
    return p


# TODO(synk): optimizer (Adam) and criterion (NLLLoss) in __init__ are training
# utilities, not part of the forward pass, and are intentionally not translated.

if __name__ == "__main__":
    key = jax.random.PRNGKey(0)
    k_x, k_h, k_c = jax.random.split(key, 3)

    # timesteps=1, channels=1, spatial 275x275 (minimum supported by the stack)
    x = jax.random.normal(k_x, (1, 1, IMG, IMG), jnp.float32)
    h0 = 0.1 * jax.random.normal(k_h, (1, 1, HIDDEN), jnp.float32)
    c0 = 0.1 * jax.random.normal(k_c, (1, 1, HIDDEN), jnp.float32)

    params = init_params(jax.random.PRNGKey(42))

    fwd = jax.jit(lstm_singleshot_forward)
    log_probs, (h_n, c_n) = fwd(params, x, (h0, c0))
    jax.block_until_ready(log_probs)
    jax.block_until_ready(h_n)
    jax.block_until_ready(c_n)

    assert log_probs.shape == (1, N_CLASSES)
    assert h_n.shape == (1, 1, HIDDEN) and c_n.shape == (1, 1, HIDDEN)
    # log_softmax sanity: exp(log_probs) sums to 1
    assert np.allclose(np.exp(np.asarray(log_probs)).sum(), 1.0, atol=1e-3)

    print("KERNEL_OK")
</pallas_src>

<mosaic_0001>
module attributes {stable_mosaic.version = 11 : i64} {
  func.func @_conv1_pool1_kernel(%arg0: i32, %arg1: memref<64x1296xbf16, #tpu.memory_space<vmem>>, %arg2: memref<16x12x64xbf16, #tpu.memory_space<vmem>>, %arg3: memref<12x1xf32, #tpu.memory_space<vmem>>, %arg4: memref<12x1188xf32, #tpu.memory_space<vmem>>, %arg5: memref<12x1225xf32, #tpu.memory_space<vmem>>) attributes {dimension_semantics = [#tpu.dimension_semantics<arbitrary>], iteration_bounds = array<i64: 1>, scalar_prefetch = 0 : i64, scratch_operands = 1 : i64, tpu.core_type = #tpu.core_type<tc>, window_params = [{pipeline_mode = #tpu.pipeline_mode<synchronous>, transform_indices = @transform_0, window_bounds = array<i64: 64, 1296>}, {pipeline_mode = #tpu.pipeline_mode<synchronous>, transform_indices = @transform_1, window_bounds = array<i64: 16, 12, 64>}, {pipeline_mode = #tpu.pipeline_mode<synchronous>, transform_indices = @transform_2, window_bounds = array<i64: 12, 1>}, {pipeline_mode = #tpu.pipeline_mode<synchronous>, transform_indices = @transform_3, window_bounds = array<i64: 12, 1188>}]} {
    %cst = arith.constant 0.000000e+00 : f32
    %0 = vector.broadcast %cst : f32 to vector<12x1188xf32>
    %c0 = arith.constant 0 : index
    %c0_0 = arith.constant 0 : index
    %1 = vector.load %arg4[%c0, %c0_0] : memref<12x1188xf32, #tpu.memory_space<vmem>>, vector<12x1188xf32>
    tpu.vector_store %arg4[%c0, %c0_0], %0 {strides = array<i32>} : memref<12x1188xf32, #tpu.memory_space<vmem>>, vector<12x1188xf32>,
    %cst_1 = arith.constant 0.000000e+00 : f32
    %2 = vector.broadcast %cst_1 : f32 to vector<12x1225xf32>
    %c0_2 = arith.constant 0 : index
    %c0_3 = arith.constant 0 : index
    %c0_4 = arith.constant 0 : index
    %3 = vector.load %arg2[%c0_2, %c0_3, %c0_4] : memref<16x12x64xbf16, #tpu.memory_space<vmem>>, vector<1x12x64xbf16>
    %4 = vector.shape_cast %3 : vector<1x12x64xbf16> to vector<12x64xbf16>
    %c0_5 = arith.constant 0 : index
    %c0_6 = arith.constant 0 : index
    %5 = vector.load %arg1[%c0_5, %c0_6] : memref<64x1296xbf16, #tpu.memory_space<vmem>>, vector<64x1225xbf16>
    %cst_7 = arith.constant dense<0.000000e+00> : vector<12x1225xf32>
    %6 = tpu.matmul %4, %5, %cst_7 {dimension_numbers = #tpu.dot_dimension_numbers<[1], [0], [0], [1], [0, 0, 1, 1], [], []>} : vector<12x64xbf16>, vector<64x1225xbf16>, vector<12x1225xf32> -> vector<12x1225xf32>
    %7 = arith.addf %2, %6 : vector<12x1225xf32>
    %c1 = arith.constant 1 : index
    %c0_8 = arith.constant 0 : index
    %c0_9 = arith.constant 0 : index
    %8 = vector.load %arg2[%c1, %c0_8, %c0_9] : memref<16x12x64xbf16, #tpu.memory_space<vmem>>, vector<1x12x64xbf16>
    %9 = vector.shape_cast %8 : vector<1x12x64xbf16> to vector<12x64xbf16>
    %c0_10 = arith.constant 0 : index
    %c1_11 = arith.constant 1 : index
    %10 = vector.load %arg1[%c0_10, %c1_11] : memref<64x1296xbf16, #tpu.memory_space<vmem>>, vector<64x1225xbf16>
    %cst_12 = arith.constant dense<0.000000e+00> : vector<12x1225xf32>
    %11 = tpu.matmul %9, %10, %cst_12 {dimension_numbers = #tpu.dot_dimension_numbers<[1], [0], [0], [1], [0, 0, 1, 1], [], []>} : vector<12x64xbf16>, vector<64x1225xbf16>, vector<12x1225xf32> -> vector<12x1225xf32>
    %12 = arith.addf %7, %11 : vector<12x1225xf32>
    %c2 = arith.constant 2 : index
    %c0_13 = arith.constant 0 : index
    %c0_14 = arith.constant 0 : index
    %13 = vector.load %arg2[%c2, %c0_13, %c0_14] : memref<16x12x64xbf16, #tpu.memory_space<vmem>>, vector<1x12x64xbf16>
    %14 = vector.shape_cast %13 : vector<1x12x64xbf16> to vector<12x64xbf16>
    %c0_15 = arith.constant 0 : index
    %c36 = arith.constant 36 : index
    %15 = vector.load %arg1[%c0_15, %c36] : memref<64x1296xbf16, #tpu.memory_space<vmem>>, vector<64x1225xbf16>
    %cst_16 = arith.constant dense<0.000000e+00> : vector<12x1225xf32>
    %16 = tpu.matmul %14, %15, %cst_16 {dimension_numbers = #tpu.dot_dimension_numbers<[1], [0], [0], [1], [0, 0, 1, 1], [], []>} : vector<12x64xbf16>, vector<64x1225xbf16>, vector<12x1225xf32> -> vector<12x1225xf32>
    %17 = arith.addf %12, %16 : vector<12x1225xf32>
    %c3 = arith.constant 3 : index
    %c0_17 = arith.constant 0 : index
    %c0_18 = arith.constant 0 : index
    %18 = vector.load %arg2[%c3, %c0_17, %c0_18] : memref<16x12x64xbf16, #tpu.memory_space<vmem>>, vector<1x12x64xbf16>
    %19 = vector.shape_cast %18 : vector<1x12x64xbf16> to vector<12x64xbf16>
    %c0_19 = arith.constant 0 : index
    %c37 = arith.constant 37 : index
    %20 = vector.load %arg1[%c0_19, %c37] : memref<64x1296xbf16, #tpu.memory_space<vmem>>, vector<64x1225xbf16>
    %cst_20 = arith.constant dense<0.000000e+00> : vector<12x1225xf32>
    %21 = tpu.matmul %19, %20, %cst_20 {dimension_numbers = #tpu.dot_dimension_numbers<[1], [0], [0], [1], [0, 0, 1, 1], [], []>} : vector<12x64xbf16>, vector<64x1225xbf16>, vector<12x1225xf32> -> vector<12x1225xf32>
    %22 = arith.addf %17, %21 : vector<12x1225xf32>
    %c0_21 = arith.constant 0 : index
    %c0_22 = arith.constant 0 : index
    %23 = vector.load %arg3[%c0_21, %c0_22] : memref<12x1xf32, #tpu.memory_space<vmem>>, vector<12x1xf32>
    %24 = vector.broadcast %23 : vector<12x1xf32> to vector<12x1225xf32>
    %25 = arith.addf %22, %24 : vector<12x1225xf32>
    %cst_23 = arith.constant 0.000000e+00 : f32
    %26 = vector.broadcast %cst_23 : f32 to vector<12x1225xf32>
    %27 = arith.maximumf %25, %26 : vector<12x1225xf32>
    %c0_24 = arith.constant 0 : index
    %c0_25 = arith.constant 0 : index
    %28 = vector.load %arg5[%c0_24, %c0_25] : memref<12x1225xf32, #tpu.memory_space<vmem>>, vector<12x1225xf32>
    tpu.vector_store %arg5[%c0_24, %c0_25], %27 {strides = array<i32>} : memref<12x1225xf32, #tpu.memory_space<vmem>>, vector<12x1225xf32>,
    %c0_26 = arith.constant 0 : index
    %c0_27 = arith.constant 0 : index
    %29 = vector.load %arg4[%c0_26, %c0_27] : memref<12x1188xf32, #tpu.memory_space<vmem>>, vector<12x1188xf32>
    %c0_28 = arith.constant 0 : index
    %c0_29 = arith.constant 0 : index
    %30 = vector.load %arg5[%c0_28, %c0_29] : memref<12x1225xf32, #tpu.memory_space<vmem>>, vector<12x1188xf32>
    %31 = arith.maximumf %29, %30 : vector<12x1188xf32>
    %c0_30 = arith.constant 0 : index
    %c0_31 = arith.constant 0 : index
    %32 = vector.load %arg4[%c0_30, %c0_31] : memref<12x1188xf32, #tpu.memory_space<vmem>>, vector<12x1188xf32>
    tpu.vector_store %arg4[%c0_30, %c0_31], %31 {strides = array<i32>} : memref<12x1188xf32, #tpu.memory_space<vmem>>, vector<12x1188xf32>,
    %c0_32 = arith.constant 0 : index
    %c0_33 = arith.constant 0 : index
    %33 = vector.load %arg4[%c0_32, %c0_33] : memref<12x1188xf32, #tpu.memory_space<vmem>>, vector<12x1188xf32>
    %c0_34 = arith.constant 0 : index
    %c1_35 = arith.constant 1 : index
    %34 = vector.load %arg5[%c0_34, %c1_35] : memref<12x1225xf32, #tpu.memory_space<vmem>>, vector<12x1188xf32>
    %35 = arith.maximumf %33, %34 : vector<12x1188xf32>
    %c0_36 = arith.constant 0 : index
    %c0_37 = arith.constant 0 : index
    %36 = vector.load %arg4[%c0_36, %c0_37] : memref<12x1188xf32, #tpu.memory_space<vmem>>, vector<12x1188xf32>
    tpu.vector_store %arg4[%c0_36, %c0_37], %35 {strides = array<i32>} : memref<12x1188xf32, #tpu.memory_space<vmem>>, vector<12x1188xf32>,
    %c0_38 = arith.constant 0 : index
    %c0_39 = arith.constant 0 : index
    %37 = vector.load %arg4[%c0_38, %c0_39] : memref<12x1188xf32, #tpu.memory_space<vmem>>, vector<12x1188xf32>
    %c0_40 = arith.constant 0 : index
    %c36_41 = arith.constant 36 : index
    %38 = vector.load %arg5[%c0_40, %c36_41] : memref<12x1225xf32, #tpu.memory_space<vmem>>, vector<12x1188xf32>
    %39 = arith.maximumf %37, %38 : vector<12x1188xf32>
    %c0_42 = arith.constant 0 : index
    %c0_43 = arith.constant 0 : index
    %40 = vector.load %arg4[%c0_42, %c0_43] : memref<12x1188xf32, #tpu.memory_space<vmem>>, vector<12x1188xf32>
    tpu.vector_store %arg4[%c0_42, %c0_43], %39 {strides = array<i32>} : memref<12x1188xf32, #tpu.memory_space<vmem>>, vector<12x1188xf32>,
    %c0_44 = arith.constant 0 : index
    %c0_45 = arith.constant 0 : index
    %41 = vector.load %arg4[%c0_44, %c0_45] : memref<12x1188xf32, #tpu.memory_space<vmem>>, vector<12x1188xf32>
    %c0_46 = arith.constant 0 : index
    %c37_47 = arith.constant 37 : index
    %42 = vector.load %arg5[%c0_46, %c37_47] : memref<12x1225xf32, #tpu.memory_space<vmem>>, vector<12x1188xf32>
    %43 = arith.maximumf %41, %42 : vector<12x1188xf32>
    %c0_48 = arith.constant 0 : index
    %c0_49 = arith.constant 0 : index
    %44 = vector.load %arg4[%c0_48, %c0_49] : memref<12x1188xf32, #tpu.memory_space<vmem>>, vector<12x1188xf32>
    tpu.vector_store %arg4[%c0_48, %c0_49], %43 {strides = array<i32>} : memref<12x1188xf32, #tpu.memory_space<vmem>>, vector<12x1188xf32>,
    %cst_50 = arith.constant 0.000000e+00 : f32
    %45 = vector.broadcast %cst_50 : f32 to vector<12x1225xf32>
    %c4 = arith.constant 4 : index
    %c0_51 = arith.constant 0 : index
    %c0_52 = arith.constant 0 : index
    %46 = vector.load %arg2[%c4, %c0_51, %c0_52] : memref<16x12x64xbf16, #tpu.memory_space<vmem>>, vector<1x12x64xbf16>
    %47 = vector.shape_cast %46 : vector<1x12x64xbf16> to vector<12x64xbf16>
    %c0_53 = arith.constant 0 : index
    %c0_54 = arith.constant 0 : index
    %48 = vector.load %arg1[%c0_53, %c0_54] : memref<64x1296xbf16, #tpu.memory_space<vmem>>, vector<64x1225xbf16>
    %cst_55 = arith.constant dense<0.000000e+00> : vector<12x1225xf32>
    %49 = tpu.matmul %47, %48, %cst_55 {dimension_numbers = #tpu.dot_dimension_numbers<[1], [0], [0], [1], [0, 0, 1, 1], [], []>} : vector<12x64xbf16>, vector<64x1225xbf16>, vector<12x1225xf32> -> vector<12x1225xf32>
    %50 = arith.addf %45, %49 : vector<12x1225xf32>
    %c5 = arith.constant 5 : index
    %c0_56 = arith.constant 0 : index
    %c0_57 = arith.constant 0 : index
    %51 = vector.load %arg2[%c5, %c0_56, %c0_57] : memref<16x12x64xbf16, #tpu.memory_space<vmem>>, vector<1x12x64xbf16>
    %52 = vector.shape_cast %51 : vector<1x12x64xbf16> to vector<12x64xbf16>
    %c0_58 = arith.constant 0 : index
    %c1_59 = arith.constant 1 : index
    %53 = vector.load %arg1[%c0_58, %c1_59] : memref<64x1296xbf16, #tpu.memory_space<vmem>>, vector<64x1225xbf16>
    %cst_60 = arith.constant dense<0.000000e+00> : vector<12x1225xf32>
    %54 = tpu.matmul %52, %53, %cst_60 {dimension_numbers = #tpu.dot_dimension_numbers<[1], [0], [0], [1], [0, 0, 1, 1], [], []>} : vector<12x64xbf16>, vector<64x1225xbf16>, vector<12x1225xf32> -> vector<12x1225xf32>
    %55 = arith.addf %50, %54 : vector<12x1225xf32>
    %c6 = arith.constant 6 : index
    %c0_61 = arith.constant 0 : index
    %c0_62 = arith.constant 0 : index
    %56 = vector.load %arg2[%c6, %c0_61, %c0_62] : memref<16x12x64xbf16, #tpu.memory_space<vmem>>, vector<1x12x64xbf16>
    %57 = vector.shape_cast %56 : vector<1x12x64xbf16> to vector<12x64xbf16>
    %c0_63 = arith.constant 0 : index
    %c36_64 = arith.constant 36 : index
    %58 = vector.load %arg1[%c0_63, %c36_64] : memref<64x1296xbf16, #tpu.memory_space<vmem>>, vector<64x1225xbf16>
    %cst_65 = arith.constant dense<0.000000e+00> : vector<12x1225xf32>
    %59 = tpu.matmul %57, %58, %cst_65 {dimension_numbers = #tpu.dot_dimension_numbers<[1], [0], [0], [1], [0, 0, 1, 1], [], []>} : vector<12x64xbf16>, vector<64x1225xbf16>, vector<12x1225xf32> -> vector<12x1225xf32>
    %60 = arith.addf %55, %59 : vector<12x1225xf32>
    %c7 = arith.constant 7 : index
    %c0_66 = arith.constant 0 : index
    %c0_67 = arith.constant 0 : index
    %61 = vector.load %arg2[%c7, %c0_66, %c0_67] : memref<16x12x64xbf16, #tpu.memory_space<vmem>>, vector<1x12x64xbf16>
    %62 = vector.shape_cast %61 : vector<1x12x64xbf16> to vector<12x64xbf16>
    %c0_68 = arith.constant 0 : index
    %c37_69 = arith.constant 37 : index
    %63 = vector.load %arg1[%c0_68, %c37_69] : memref<64x1296xbf16, #tpu.memory_space<vmem>>, vector<64x1225xbf16>
    %cst_70 = arith.constant dense<0.000000e+00> : vector<12x1225xf32>
    %64 = tpu.matmul %62, %63, %cst_70 {dimension_numbers = #tpu.dot_dimension_numbers<[1], [0], [0], [1], [0, 0, 1, 1], [], []>} : vector<12x64xbf16>, vector<64x1225xbf16>, vector<12x1225xf32> -> vector<12x1225xf32>
    %65 = arith.addf %60, %64 : vector<12x1225xf32>
    %c0_71 = arith.constant 0 : index
    %c0_72 = arith.constant 0 : index
    %66 = vector.load %arg3[%c0_71, %c0_72] : memref<12x1xf32, #tpu.memory_space<vmem>>, vector<12x1xf32>
    %67 = vector.broadcast %66 : vector<12x1xf32> to vector<12x1225xf32>
    %68 = arith.addf %65, %67 : vector<12x1225xf32>
    %cst_73 = arith.constant 0.000000e+00 : f32
    %69 = vector.broadcast %cst_73 : f32 to vector<12x1225xf32>
    %70 = arith.maximumf %68, %69 : vector<12x1225xf32>
    %c0_74 = arith.constant 0 : index
    %c0_75 = arith.constant 0 : index
    %71 = vector.load %arg5[%c0_74, %c0_75] : memref<12x1225xf32, #tpu.memory_space<vmem>>, vector<12x1225xf32>
    tpu.vector_store %arg5[%c0_74, %c0_75], %70 {strides = array<i32>} : memref<12x1225xf32, #tpu.memory_space<vmem>>, vector<12x1225xf32>,
    %c0_76 = arith.constant 0 : index
    %c0_77 = arith.constant 0 : index
    %72 = vector.load %arg4[%c0_76, %c0_77] : memref<12x1188xf32, #tpu.memory_space<vmem>>, vector<12x1188xf32>
    %c0_78 = arith.constant 0 : index
    %c0_79 = arith.constant 0 : index
    %73 = vector.load %arg5[%c0_78, %c0_79] : memref<12x1225xf32, #tpu.memory_space<vmem>>, vector<12x1188xf32>
    %74 = arith.maximumf %72, %73 : vector<12x1188xf32>
    %c0_80 = arith.constant 0 : index
    %c0_81 = arith.constant 0 : index
    %75 = vector.load %arg4[%c0_80, %c0_81] : memref<12x1188xf32, #tpu.memory_space<vmem>>, vector<12x1188xf32>
    tpu.vector_store %arg4[%c0_80, %c0_81], %74 {strides = array<i32>} : memref<12x1188xf32, #tpu.memory_space<vmem>>, vector<12x1188xf32>,
    %c0_82 = arith.constant 0 : index
    %c0_83 = arith.constant 0 : index
    %76 = vector.load %arg4[%c0_82, %c0_83] : memref<12x1188xf32, #tpu.memory_space<vmem>>, vector<12x1188xf32>
    %c0_84 = arith.constant 0 : index
    %c36_85 = arith.constant 36 : index
    %77 = vector.load %arg5[%c0_84, %c36_85] : memref<12x1225xf32, #tpu.memory_space<vmem>>, vector<12x1188xf32>
    %78 = arith.maximumf %76, %77 : vector<12x1188xf32>
    %c0_86 = arith.constant 0 : index
    %c0_87 = arith.constant 0 : index
    %79 = vector.load %arg4[%c0_86, %c0_87] : memref<12x1188xf32, #tpu.memory_space<vmem>>, vector<12x1188xf32>
    tpu.vector_store %arg4[%c0_86, %c0_87], %78 {strides = array<i32>} : memref<12x1188xf32, #tpu.memory_space<vmem>>, vector<12x1188xf32>,
    %cst_88 = arith.constant 0.000000e+00 : f32
    %80 = vector.broadcast %cst_88 : f32 to vector<12x1225xf32>
    %c8 = arith.constant 8 : index
    %c0_89 = arith.constant 0 : index
    %c0_90 = arith.constant 0 : index
    %81 = vector.load %arg2[%c8, %c0_89, %c0_90] : memref<16x12x64xbf16, #tpu.memory_space<vmem>>, vector<1x12x64xbf16>
    %82 = vector.shape_cast %81 : vector<1x12x64xbf16> to vector<12x64xbf16>
    %c0_91 = arith.constant 0 : index
    %c0_92 = arith.constant 0 : index
    %83 = vector.load %arg1[%c0_91, %c0_92] : memref<64x1296xbf16, #tpu.memory_space<vmem>>, vector<64x1225xbf16>
    %cst_93 = arith.constant dense<0.000000e+00> : vector<12x1225xf32>
    %84 = tpu.matmul %82, %83, %cst_93 {dimension_numbers = #tpu.dot_dimension_numbers<[1], [0], [0], [1], [0, 0, 1, 1], [], []>} : vector<12x64xbf16>, vector<64x1225xbf16>, vector<12x1225xf32> -> vector<12x1225xf32>
    %85 = arith.addf %80, %84 : vector<12x1225xf32>
    %c9 = arith.constant 9 : index
    %c0_94 = arith.constant 0 : index
    %c0_95 = arith.constant 0 : index
    %86 = vector.load %arg2[%c9, %c0_94, %c0_95] : memref<16x12x64xbf16, #tpu.memory_space<vmem>>, vector<1x12x64xbf16>
    %87 = vector.shape_cast %86 : vector<1x12x64xbf16> to vector<12x64xbf16>
    %c0_96 = arith.constant 0 : index
    %c1_97 = arith.constant 1 : index
    %88 = vector.load %arg1[%c0_96, %c1_97] : memref<64x1296xbf16, #tpu.memory_space<vmem>>, vector<64x1225xbf16>
    %cst_98 = arith.constant dense<0.000000e+00> : vector<12x1225xf32>
    %89 = tpu.matmul %87, %88, %cst_98 {dimension_numbers = #tpu.dot_dimension_numbers<[1], [0], [0], [1], [0, 0, 1, 1], [], []>} : vector<12x64xbf16>, vector<64x1225xbf16>, vector<12x1225xf32> -> vector<12x1225xf32>
    %90 = arith.addf %85, %89 : vector<12x1225xf32>
    %c10 = arith.constant 10 : index
    %c0_99 = arith.constant 0 : index
    %c0_100 = arith.constant 0 : index
    %91 = vector.load %arg2[%c10, %c0_99, %c0_100] : memref<16x12x64xbf16, #tpu.memory_space<vmem>>, vector<1x12x64xbf16>
    %92 = vector.shape_cast %91 : vector<1x12x64xbf16> to vector<12x64xbf16>
    %c0_101 = arith.constant 0 : index
    %c36_102 = arith.constant 36 : index
    %93 = vector.load %arg1[%c0_101, %c36_102] : memref<64x1296xbf16, #tpu.memory_space<vmem>>, vector<64x1225xbf16>
    %cst_103 = arith.constant dense<0.000000e+00> : vector<12x1225xf32>
    %94 = tpu.matmul %92, %93, %cst_103 {dimension_numbers = #tpu.dot_dimension_numbers<[1], [0], [0], [1], [0, 0, 1, 1], [], []>} : vector<12x64xbf16>, vector<64x1225xbf16>, vector<12x1225xf32> -> vector<12x1225xf32>
    %95 = arith.addf %90, %94 : vector<12x1225xf32>
    %c11 = arith.constant 11 : index
    %c0_104 = arith.constant 0 : index
    %c0_105 = arith.constant 0 : index
    %96 = vector.load %arg2[%c11, %c0_104, %c0_105] : memref<16x12x64xbf16, #tpu.memory_space<vmem>>, vector<1x12x64xbf16>
    %97 = vector.shape_cast %96 : vector<1x12x64xbf16> to vector<12x64xbf16>
    %c0_106 = arith.constant 0 : index
    %c37_107 = arith.constant 37 : index
    %98 = vector.load %arg1[%c0_106, %c37_107] : memref<64x1296xbf16, #tpu.memory_space<vmem>>, vector<64x1225xbf16>
    %cst_108 = arith.constant dense<0.000000e+00> : vector<12x1225xf32>
    %99 = tpu.matmul %97, %98, %cst_108 {dimension_numbers = #tpu.dot_dimension_numbers<[1], [0], [0], [1], [0, 0, 1, 1], [], []>} : vector<12x64xbf16>, vector<64x1225xbf16>, vector<12x1225xf32> -> vector<12x1225xf32>
    %100 = arith.addf %95, %99 : vector<12x1225xf32>
    %c0_109 = arith.constant 0 : index
    %c0_110 = arith.constant 0 : index
    %101 = vector.load %arg3[%c0_109, %c0_110] : memref<12x1xf32, #tpu.memory_space<vmem>>, vector<12x1xf32>
    %102 = vector.broadcast %101 : vector<12x1xf32> to vector<12x1225xf32>
    %103 = arith.addf %100, %102 : vector<12x1225xf32>
    %cst_111 = arith.constant 0.000000e+00 : f32
    %104 = vector.broadcast %cst_111 : f32 to vector<12x1225xf32>
    %105 = arith.maximumf %103, %104 : vector<12x1225xf32>
    %c0_112 = arith.constant 0 : index
    %c0_113 = arith.constant 0 : index
    %106 = vector.load %arg5[%c0_112, %c0_113] : memref<12x1225xf32, #tpu.memory_space<vmem>>, vector<12x1225xf32>
    tpu.vector_store %arg5[%c0_112, %c0_113], %105 {strides = array<i32>} : memref<12x1225xf32, #tpu.memory_space<vmem>>, vector<12x1225xf32>,
    %c0_114 = arith.constant 0 : index
    %c0_115 = arith.constant 0 : index
    %107 = vector.load %arg4[%c0_114, %c0_115] : memref<12x1188xf32, #tpu.memory_space<vmem>>, vector<12x1188xf32>
    %c0_116 = arith.constant 0 : index
    %c0_117 = arith.constant 0 : index
    %108 = vector.load %arg5[%c0_116, %c0_117] : memref<12x1225xf32, #tpu.memory_space<vmem>>, vector<12x1188xf32>
    %109 = arith.maximumf %107, %108 : vector<12x1188xf32>
    %c0_118 = arith.constant 0 : index
    %c0_119 = arith.constant 0 : index
    %110 = vector.load %arg4[%c0_118, %c0_119] : memref<12x1188xf32, #tpu.memory_space<vmem>>, vector<12x1188xf32>
    tpu.vector_store %arg4[%c0_118, %c0_119], %109 {strides = array<i32>} : memref<12x1188xf32, #tpu.memory_space<vmem>>, vector<12x1188xf32>,
    %c0_120 = arith.constant 0 : index
    %c0_121 = arith.constant 0 : index
    %111 = vector.load %arg4[%c0_120, %c0_121] : memref<12x1188xf32, #tpu.memory_space<vmem>>, vector<12x1188xf32>
    %c0_122 = arith.constant 0 : index
    %c1_123 = arith.constant 1 : index
    %112 = vector.load %arg5[%c0_122, %c1_123] : memref<12x1225xf32, #tpu.memory_space<vmem>>, vector<12x1188xf32>
    %113 = arith.maximumf %111, %112 : vector<12x1188xf32>
    %c0_124 = arith.constant 0 : index
    %c0_125 = arith.constant 0 : index
    %114 = vector.load %arg4[%c0_124, %c0_125] : memref<12x1188xf32, #tpu.memory_space<vmem>>, vector<12x1188xf32>
    tpu.vector_store %arg4[%c0_124, %c0_125], %113 {strides = array<i32>} : memref<12x1188xf32, #tpu.memory_space<vmem>>, vector<12x1188xf32>,
    %cst_126 = arith.constant 0.000000e+00 : f32
    %115 = vector.broadcast %cst_126 : f32 to vector<12x1225xf32>
    %c12 = arith.constant 12 : index
    %c0_127 = arith.constant 0 : index
    %c0_128 = arith.constant 0 : index
    %116 = vector.load %arg2[%c12, %c0_127, %c0_128] : memref<16x12x64xbf16, #tpu.memory_space<vmem>>, vector<1x12x64xbf16>
    %117 = vector.shape_cast %116 : vector<1x12x64xbf16> to vector<12x64xbf16>
    %c0_129 = arith.constant 0 : index
    %c0_130 = arith.constant 0 : index
    %118 = vector.load %arg1[%c0_129, %c0_130] : memref<64x1296xbf16, #tpu.memory_space<vmem>>, vector<64x1225xbf16>
    %cst_131 = arith.constant dense<0.000000e+00> : vector<12x1225xf32>
    %119 = tpu.matmul %117, %118, %cst_131 {dimension_numbers = #tpu.dot_dimension_numbers<[1], [0], [0], [1], [0, 0, 1, 1], [], []>} : vector<12x64xbf16>, vector<64x1225xbf16>, vector<12x1225xf32> -> vector<12x1225xf32>
    %120 = arith.addf %115, %119 : vector<12x1225xf32>
    %c13 = arith.constant 13 : index
    %c0_132 = arith.constant 0 : index
    %c0_133 = arith.constant 0 : index
    %121 = vector.load %arg2[%c13, %c0_132, %c0_133] : memref<16x12x64xbf16, #tpu.memory_space<vmem>>, vector<1x12x64xbf16>
    %122 = vector.shape_cast %121 : vector<1x12x64xbf16> to vector<12x64xbf16>
    %c0_134 = arith.constant 0 : index
    %c1_135 = arith.constant 1 : index
    %123 = vector.load %arg1[%c0_134, %c1_135] : memref<64x1296xbf16, #tpu.memory_space<vmem>>, vector<64x1225xbf16>
    %cst_136 = arith.constant dense<0.000000e+00> : vector<12x1225xf32>
    %124 = tpu.matmul %122, %123, %cst_136 {dimension_numbers = #tpu.dot_dimension_numbers<[1], [0], [0], [1], [0, 0, 1, 1], [], []>} : vector<12x64xbf16>, vector<64x1225xbf16>, vector<12x1225xf32> -> vector<12x1225xf32>
    %125 = arith.addf %120, %124 : vector<12x1225xf32>
    %c14 = arith.constant 14 : index
    %c0_137 = arith.constant 0 : index
    %c0_138 = arith.constant 0 : index
    %126 = vector.load %arg2[%c14, %c0_137, %c0_138] : memref<16x12x64xbf16, #tpu.memory_space<vmem>>, vector<1x12x64xbf16>
    %127 = vector.shape_cast %126 : vector<1x12x64xbf16> to vector<12x64xbf16>
    %c0_139 = arith.constant 0 : index
    %c36_140 = arith.constant 36 : index
    %128 = vector.load %arg1[%c0_139, %c36_140] : memref<64x1296xbf16, #tpu.memory_space<vmem>>, vector<64x1225xbf16>
    %cst_141 = arith.constant dense<0.000000e+00> : vector<12x1225xf32>
    %129 = tpu.matmul %127, %128, %cst_141 {dimension_numbers = #tpu.dot_dimension_numbers<[1], [0], [0], [1], [0, 0, 1, 1], [], []>} : vector<12x64xbf16>, vector<64x1225xbf16>, vector<12x1225xf32> -> vector<12x1225xf32>
    %130 = arith.addf %125, %129 : vector<12x1225xf32>
    %c15 = arith.constant 15 : index
    %c0_142 = arith.constant 0 : index
    %c0_143 = arith.constant 0 : index
    %131 = vector.load %arg2[%c15, %c0_142, %c0_143] : memref<16x12x64xbf16, #tpu.memory_space<vmem>>, vector<1x12x64xbf16>
    %132 = vector.shape_cast %131 : vector<1x12x64xbf16> to vector<12x64xbf16>
    %c0_144 = arith.constant 0 : index
    %c37_145 = arith.constant 37 : index
    %133 = vector.load %arg1[%c0_144, %c37_145] : memref<64x1296xbf16, #tpu.memory_space<vmem>>, vector<64x1225xbf16>
    %cst_146 = arith.constant dense<0.000000e+00> : vector<12x1225xf32>
    %134 = tpu.matmul %132, %133, %cst_146 {dimension_numbers = #tpu.dot_dimension_numbers<[1], [0], [0], [1], [0, 0, 1, 1], [], []>} : vector<12x64xbf16>, vector<64x1225xbf16>, vector<12x1225xf32> -> vector<12x1225xf32>
    %135 = arith.addf %130, %134 : vector<12x1225xf32>
    %c0_147 = arith.constant 0 : index
    %c0_148 = arith.constant 0 : index
    %136 = vector.load %arg3[%c0_147, %c0_148] : memref<12x1xf32, #tpu.memory_space<vmem>>, vector<12x1xf32>
    %137 = vector.broadcast %136 : vector<12x1xf32> to vector<12x1225xf32>
    %138 = arith.addf %135, %137 : vector<12x1225xf32>
    %cst_149 = arith.constant 0.000000e+00 : f32
    %139 = vector.broadcast %cst_149 : f32 to vector<12x1225xf32>
    %140 = arith.maximumf %138, %139 : vector<12x1225xf32>
    %c0_150 = arith.constant 0 : index
    %c0_151 = arith.constant 0 : index
    %141 = vector.load %arg5[%c0_150, %c0_151] : memref<12x1225xf32, #tpu.memory_space<vmem>>, vector<12x1225xf32>
    tpu.vector_store %arg5[%c0_150, %c0_151], %140 {strides = array<i32>} : memref<12x1225xf32, #tpu.memory_space<vmem>>, vector<12x1225xf32>,
    %c0_152 = arith.constant 0 : index
    %c0_153 = arith.constant 0 : index
    %142 = vector.load %arg4[%c0_152, %c0_153] : memref<12x1188xf32, #tpu.memory_space<vmem>>, vector<12x1188xf32>
    %c0_154 = arith.constant 0 : index
    %c0_155 = arith.constant 0 : index
    %143 = vector.load %arg5[%c0_154, %c0_155] : memref<12x1225xf32, #tpu.memory_space<vmem>>, vector<12x1188xf32>
    %144 = arith.maximumf %142, %143 : vector<12x1188xf32>
    %c0_156 = arith.constant 0 : index
    %c0_157 = arith.constant 0 : index
    %145 = vector.load %arg4[%c0_156, %c0_157] : memref<12x1188xf32, #tpu.memory_space<vmem>>, vector<12x1188xf32>
    tpu.vector_store %arg4[%c0_156, %c0_157], %144 {strides = array<i32>} : memref<12x1188xf32, #tpu.memory_space<vmem>>, vector<12x1188xf32>,
    return
  }
  func.func @transform_0(%arg0: i32) -> (i32, i32) {
    %c0_i32 = arith.constant 0 : i32
    %c0_i32_0 = arith.constant 0 : i32
    %c0_i32_1 = arith.constant 0 : i32
    return %c0_i32, %c0_i32_0 : i32, i32
  }
  func.func @transform_1(%arg0: i32) -> (i32, i32, i32) {
    %c0_i32 = arith.constant 0 : i32
    %c0_i32_0 = arith.constant 0 : i32
    %c0_i32_1 = arith.constant 0 : i32
    %c0_i32_2 = arith.constant 0 : i32
    return %c0_i32, %c0_i32_0, %c0_i32_1 : i32, i32, i32
  }
  func.func @transform_2(%arg0: i32) -> (i32, i32) {
    %c0_i32 = arith.constant 0 : i32
    %c0_i32_0 = arith.constant 0 : i32
    %c0_i32_1 = arith.constant 0 : i32
    return %c0_i32, %c0_i32_0 : i32, i32
  }
  func.func @transform_3(%arg0: i32) -> (i32, i32) {
    %c0_i32 = arith.constant 0 : i32
    %c0_i32_0 = arith.constant 0 : i32
    %c0_i32_1 = arith.constant 0 : i32
    return %c0_i32, %c0_i32_0 : i32, i32
  }
}

module attributes {stable_mosaic.version = 11 : i64} {
  func.func @_tail_kernel(%arg0: i32, %arg1: memref<48x289xbf16, #tpu.memory_space<vmem>>, %arg2: memref<9x24x48xbf16, #tpu.memory_space<vmem>>, %arg3: memref<24x1xf32, #tpu.memory_space<vmem>>, %arg4: memref<217x49xf32, #tpu.memory_space<vmem>>, %arg5: memref<9x24x24xbf16, #tpu.memory_space<vmem>>, %arg6: memref<24x1xf32, #tpu.memory_space<vmem>>, %arg7: memref<9x24x24xbf16, #tpu.memory_space<vmem>>, %arg8: memref<24x1xf32, #tpu.memory_space<vmem>>, %arg9: memref<512x24xbf16, #tpu.memory_space<vmem>>, %arg10: memref<512x128xbf16, #tpu.memory_space<vmem>>, %arg11: memref<512x1xf32, #tpu.memory_space<vmem>>, %arg12: memref<128x1xf32, #tpu.memory_space<vmem>>, %arg13: memref<128x1xf32, #tpu.memory_space<vmem>>, %arg14: memref<5x128xbf16, #tpu.memory_space<vmem>>, %arg15: memref<5x1xf32, #tpu.memory_space<vmem>>, %arg16: memref<5x1xf32, #tpu.memory_space<vmem>>, %arg17: memref<128x1xf32, #tpu.memory_space<vmem>>, %arg18: memref<128x1xf32, #tpu.memory_space<vmem>>, %arg19: memref<24x253xf32, #tpu.memory_space<vmem>>, %arg20: memref<24x49xf32, #tpu.memory_space<vmem>>, %arg21: memref<24x33xf32, #tpu.memory_space<vmem>>) attributes {dimension_semantics = [#tpu.dimension_semantics<arbitrary>], iteration_bounds = array<i64: 1>, scalar_prefetch = 0 : i64, scratch_operands = 3 : i64, tpu.core_type = #tpu.core_type<tc>, window_params = [{pipeline_mode = #tpu.pipeline_mode<synchronous>, transform_indices = @transform_0, window_bounds = array<i64: 48, 289>}, {pipeline_mode = #tpu.pipeline_mode<synchronous>, transform_indices = @transform_1, window_bounds = array<i64: 9, 24, 48>}, {pipeline_mode = #tpu.pipeline_mode<synchronous>, transform_indices = @transform_2, window_bounds = array<i64: 24, 1>}, {pipeline_mode = #tpu.pipeline_mode<synchronous>, transform_indices = @transform_3, window_bounds = array<i64: 217, 49>}, {pipeline_mode = #tpu.pipeline_mode<synchronous>, transform_indices = @transform_4, window_bounds = array<i64: 9, 24, 24>}, {pipeline_mode = #tpu.pipeline_mode<synchronous>, transform_indices = @transform_5, window_bounds = array<i64: 24, 1>}, {pipeline_mode = #tpu.pipeline_mode<synchronous>, transform_indices = @transform_6, window_bounds = array<i64: 9, 24, 24>}, {pipeline_mode = #tpu.pipeline_mode<synchronous>, transform_indices = @transform_7, window_bounds = array<i64: 24, 1>}, {pipeline_mode = #tpu.pipeline_mode<synchronous>, transform_indices = @transform_8, window_bounds = array<i64: 512, 24>}, {pipeline_mode = #tpu.pipeline_mode<synchronous>, transform_indices = @transform_9, window_bounds = array<i64: 512, 128>}, {pipeline_mode = #tpu.pipeline_mode<synchronous>, transform_indices = @transform_10, window_bounds = array<i64: 512, 1>}, {pipeline_mode = #tpu.pipeline_mode<synchronous>, transform_indices = @transform_11, window_bounds = array<i64: 128, 1>}, {pipeline_mode = #tpu.pipeline_mode<synchronous>, transform_indices = @transform_12, window_bounds = array<i64: 128, 1>}, {pipeline_mode = #tpu.pipeline_mode<synchronous>, transform_indices = @transform_13, window_bounds = array<i64: 5, 128>}, {pipeline_mode = #tpu.pipeline_mode<synchronous>, transform_indices = @transform_14, window_bounds = array<i64: 5, 1>}, {pipeline_mode = #tpu.pipeline_mode<synchronous>, transform_indices = @transform_15, window_bounds = array<i64: 5, 1>}, {pipeline_mode = #tpu.pipeline_mode<synchronous>, transform_indices = @transform_16, window_bounds = array<i64: 128, 1>}, {pipeline_mode = #tpu.pipeline_mode<synchronous>, transform_indices = @transform_17, window_bounds = array<i64: 128, 1>}]} {
    %cst = arith.constant 0.000000e+00 : f32
    %0 = vector.broadcast %cst : f32 to vector<24x253xf32>
    %c0 = arith.constant 0 : index
    %c0_0 = arith.constant 0 : index
    %c0_1 = arith.constant 0 : index
    %1 = vector.load %arg2[%c0, %c0_0, %c0_1] : memref<9x24x48xbf16, #tpu.memory_space<vmem>>, vector<1x24x48xbf16>
    %2 = vector.shape_cast %1 : vector<1x24x48xbf16> to vector<24x48xbf16>
    %c0_2 = arith.constant 0 : index
    %c0_3 = arith.constant 0 : index
    %3 = vector.load %arg1[%c0_2, %c0_3] : memref<48x289xbf16, #tpu.memory_space<vmem>>, vector<48x253xbf16>
    %cst_4 = arith.constant dense<0.000000e+00> : vector<24x253xf32>
    %4 = tpu.matmul %2, %3, %cst_4 {dimension_numbers = #tpu.dot_dimension_numbers<[1], [0], [0], [1], [0, 0, 1, 1], [], []>} : vector<24x48xbf16>, vector<48x253xbf16>, vector<24x253xf32> -> vector<24x253xf32>
    %5 = arith.addf %0, %4 : vector<24x253xf32>
    %c1 = arith.constant 1 : index
    %c0_5 = arith.constant 0 : index
    %c0_6 = arith.constant 0 : index
    %6 = vector.load %arg2[%c1, %c0_5, %c0_6] : memref<9x24x48xbf16, #tpu.memory_space<vmem>>, vector<1x24x48xbf16>
    %7 = vector.shape_cast %6 : vector<1x24x48xbf16> to vector<24x48xbf16>
    %c0_7 = arith.constant 0 : index
    %c1_8 = arith.constant 1 : index
    %8 = vector.load %arg1[%c0_7, %c1_8] : memref<48x289xbf16, #tpu.memory_space<vmem>>, vector<48x253xbf16>
    %cst_9 = arith.constant dense<0.000000e+00> : vector<24x253xf32>
    %9 = tpu.matmul %7, %8, %cst_9 {dimension_numbers = #tpu.dot_dimension_numbers<[1], [0], [0], [1], [0, 0, 1, 1], [], []>} : vector<24x48xbf16>, vector<48x253xbf16>, vector<24x253xf32> -> vector<24x253xf32>
    %10 = arith.addf %5, %9 : vector<24x253xf32>
    %c2 = arith.constant 2 : index
    %c0_10 = arith.constant 0 : index
    %c0_11 = arith.constant 0 : index
    %11 = vector.load %arg2[%c2, %c0_10, %c0_11] : memref<9x24x48xbf16, #tpu.memory_space<vmem>>, vector<1x24x48xbf16>
    %12 = vector.shape_cast %11 : vector<1x24x48xbf16> to vector<24x48xbf16>
    %c0_12 = arith.constant 0 : index
    %c2_13 = arith.constant 2 : index
    %13 = vector.load %arg1[%c0_12, %c2_13] : memref<48x289xbf16, #tpu.memory_space<vmem>>, vector<48x253xbf16>
    %cst_14 = arith.constant dense<0.000000e+00> : vector<24x253xf32>
    %14 = tpu.matmul %12, %13, %cst_14 {dimension_numbers = #tpu.dot_dimension_numbers<[1], [0], [0], [1], [0, 0, 1, 1], [], []>} : vector<24x48xbf16>, vector<48x253xbf16>, vector<24x253xf32> -> vector<24x253xf32>
    %15 = arith.addf %10, %14 : vector<24x253xf32>
    %c3 = arith.constant 3 : index
    %c0_15 = arith.constant 0 : index
    %c0_16 = arith.constant 0 : index
    %16 = vector.load %arg2[%c3, %c0_15, %c0_16] : memref<9x24x48xbf16, #tpu.memory_space<vmem>>, vector<1x24x48xbf16>
    %17 = vector.shape_cast %16 : vector<1x24x48xbf16> to vector<24x48xbf16>
    %c0_17 = arith.constant 0 : index
    %c17 = arith.constant 17 : index
    %18 = vector.load %arg1[%c0_17, %c17] : memref<48x289xbf16, #tpu.memory_space<vmem>>, vector<48x253xbf16>
    %cst_18 = arith.constant dense<0.000000e+00> : vector<24x253xf32>
    %19 = tpu.matmul %17, %18, %cst_18 {dimension_numbers = #tpu.dot_dimension_numbers<[1], [0], [0], [1], [0, 0, 1, 1], [], []>} : vector<24x48xbf16>, vector<48x253xbf16>, vector<24x253xf32> -> vector<24x253xf32>
    %20 = arith.addf %15, %19 : vector<24x253xf32>
    %c4 = arith.constant 4 : index
    %c0_19 = arith.constant 0 : index
    %c0_20 = arith.constant 0 : index
    %21 = vector.load %arg2[%c4, %c0_19, %c0_20] : memref<9x24x48xbf16, #tpu.memory_space<vmem>>, vector<1x24x48xbf16>
    %22 = vector.shape_cast %21 : vector<1x24x48xbf16> to vector<24x48xbf16>
    %c0_21 = arith.constant 0 : index
    %c18 = arith.constant 18 : index
    %23 = vector.load %arg1[%c0_21, %c18] : memref<48x289xbf16, #tpu.memory_space<vmem>>, vector<48x253xbf16>
    %cst_22 = arith.constant dense<0.000000e+00> : vector<24x253xf32>
    %24 = tpu.matmul %22, %23, %cst_22 {dimension_numbers = #tpu.dot_dimension_numbers<[1], [0], [0], [1], [0, 0, 1, 1], [], []>} : vector<24x48xbf16>, vector<48x253xbf16>, vector<24x253xf32> -> vector<24x253xf32>
    %25 = arith.addf %20, %24 : vector<24x253xf32>
    %c5 = arith.constant 5 : index
    %c0_23 = arith.constant 0 : index
    %c0_24 = arith.constant 0 : index
    %26 = vector.load %arg2[%c5, %c0_23, %c0_24] : memref<9x24x48xbf16, #tpu.memory_space<vmem>>, vector<1x24x48xbf16>
    %27 = vector.shape_cast %26 : vector<1x24x48xbf16> to vector<24x48xbf16>
    %c0_25 = arith.constant 0 : index
    %c19 = arith.constant 19 : index
    %28 = vector.load %arg1[%c0_25, %c19] : memref<48x289xbf16, #tpu.memory_space<vmem>>, vector<48x253xbf16>
    %cst_26 = arith.constant dense<0.000000e+00> : vector<24x253xf32>
    %29 = tpu.matmul %27, %28, %cst_26 {dimension_numbers = #tpu.dot_dimension_numbers<[1], [0], [0], [1], [0, 0, 1, 1], [], []>} : vector<24x48xbf16>, vector<48x253xbf16>, vector<24x253xf32> -> vector<24x253xf32>
    %30 = arith.addf %25, %29 : vector<24x253xf32>
    %c6 = arith.constant 6 : index
    %c0_27 = arith.constant 0 : index
    %c0_28 = arith.constant 0 : index
    %31 = vector.load %arg2[%c6, %c0_27, %c0_28] : memref<9x24x48xbf16, #tpu.memory_space<vmem>>, vector<1x24x48xbf16>
    %32 = vector.shape_cast %31 : vector<1x24x48xbf16> to vector<24x48xbf16>
    %c0_29 = arith.constant 0 : index
    %c34 = arith.constant 34 : index
    %33 = vector.load %arg1[%c0_29, %c34] : memref<48x289xbf16, #tpu.memory_space<vmem>>, vector<48x253xbf16>
    %cst_30 = arith.constant dense<0.000000e+00> : vector<24x253xf32>
    %34 = tpu.matmul %32, %33, %cst_30 {dimension_numbers = #tpu.dot_dimension_numbers<[1], [0], [0], [1], [0, 0, 1, 1], [], []>} : vector<24x48xbf16>, vector<48x253xbf16>, vector<24x253xf32> -> vector<24x253xf32>
    %35 = arith.addf %30, %34 : vector<24x253xf32>
    %c7 = arith.constant 7 : index
    %c0_31 = arith.constant 0 : index
    %c0_32 = arith.constant 0 : index
    %36 = vector.load %arg2[%c7, %c0_31, %c0_32] : memref<9x24x48xbf16, #tpu.memory_space<vmem>>, vector<1x24x48xbf16>
    %37 = vector.shape_cast %36 : vector<1x24x48xbf16> to vector<24x48xbf16>
    %c0_33 = arith.constant 0 : index
    %c35 = arith.constant 35 : index
    %38 = vector.load %arg1[%c0_33, %c35] : memref<48x289xbf16, #tpu.memory_space<vmem>>, vector<48x253xbf16>
    %cst_34 = arith.constant dense<0.000000e+00> : vector<24x253xf32>
    %39 = tpu.matmul %37, %38, %cst_34 {dimension_numbers = #tpu.dot_dimension_numbers<[1], [0], [0], [1], [0, 0, 1, 1], [], []>} : vector<24x48xbf16>, vector<48x253xbf16>, vector<24x253xf32> -> vector<24x253xf32>
    %40 = arith.addf %35, %39 : vector<24x253xf32>
    %c8 = arith.constant 8 : index
    %c0_35 = arith.constant 0 : index
    %c0_36 = arith.constant 0 : index
    %41 = vector.load %arg2[%c8, %c0_35, %c0_36] : memref<9x24x48xbf16, #tpu.memory_space<vmem>>, vector<1x24x48xbf16>
    %42 = vector.shape_cast %41 : vector<1x24x48xbf16> to vector<24x48xbf16>
    %c0_37 = arith.constant 0 : index
    %c36 = arith.constant 36 : index
    %43 = vector.load %arg1[%c0_37, %c36] : memref<48x289xbf16, #tpu.memory_space<vmem>>, vector<48x253xbf16>
    %cst_38 = arith.constant dense<0.000000e+00> : vector<24x253xf32>
    %44 = tpu.matmul %42, %43, %cst_38 {dimension_numbers = #tpu.dot_dimension_numbers<[1], [0], [0], [1], [0, 0, 1, 1], [], []>} : vector<24x48xbf16>, vector<48x253xbf16>, vector<24x253xf32> -> vector<24x253xf32>
    %45 = arith.addf %40, %44 : vector<24x253xf32>
    %c0_39 = arith.constant 0 : index
    %c0_40 = arith.constant 0 : index
    %46 = vector.load %arg3[%c0_39, %c0_40] : memref<24x1xf32, #tpu.memory_space<vmem>>, vector<24x1xf32>
    %47 = vector.broadcast %46 : vector<24x1xf32> to vector<24x253xf32>
    %48 = arith.addf %45, %47 : vector<24x253xf32>
    %cst_41 = arith.constant 0.000000e+00 : f32
    %49 = vector.broadcast %cst_41 : f32 to vector<24x253xf32>
    %50 = arith.maximumf %48, %49 : vector<24x253xf32>
    %c0_42 = arith.constant 0 : index
    %c0_43 = arith.constant 0 : index
    %51 = vector.load %arg19[%c0_42, %c0_43] : memref<24x253xf32, #tpu.memory_space<vmem>>, vector<24x253xf32>
    tpu.vector_store %arg19[%c0_42, %c0_43], %50 {strides = array<i32>} : memref<24x253xf32, #tpu.memory_space<vmem>>, vector<24x253xf32>,
    %c0_44 = arith.constant 0 : index
    %c0_45 = arith.constant 0 : index
    %52 = vector.load %arg19[%c0_44, %c0_45] : memref<24x253xf32, #tpu.memory_space<vmem>>, vector<24x217xf32>
    %c0_46 = arith.constant 0 : index
    %c1_47 = arith.constant 1 : index
    %53 = vector.load %arg19[%c0_46, %c1_47] : memref<24x253xf32, #tpu.memory_space<vmem>>, vector<24x217xf32>
    %54 = arith.maximumf %52, %53 : vector<24x217xf32>
    %c0_48 = arith.constant 0 : index
    %c2_49 = arith.constant 2 : index
    %55 = vector.load %arg19[%c0_48, %c2_49] : memref<24x253xf32, #tpu.memory_space<vmem>>, vector<24x217xf32>
    %56 = arith.maximumf %54, %55 : vector<24x217xf32>
    %c0_50 = arith.constant 0 : index
    %c17_51 = arith.constant 17 : index
    %57 = vector.load %arg19[%c0_50, %c17_51] : memref<24x253xf32, #tpu.memory_space<vmem>>, vector<24x217xf32>
    %58 = arith.maximumf %56, %57 : vector<24x217xf32>
    %c0_52 = arith.constant 0 : index
    %c18_53 = arith.constant 18 : index
    %59 = vector.load %arg19[%c0_52, %c18_53] : memref<24x253xf32, #tpu.memory_space<vmem>>, vector<24x217xf32>
    %60 = arith.maximumf %58, %59 : vector<24x217xf32>
    %c0_54 = arith.constant 0 : index
    %c19_55 = arith.constant 19 : index
    %61 = vector.load %arg19[%c0_54, %c19_55] : memref<24x253xf32, #tpu.memory_space<vmem>>, vector<24x217xf32>
    %62 = arith.maximumf %60, %61 : vector<24x217xf32>
    %c0_56 = arith.constant 0 : index
    %c34_57 = arith.constant 34 : index
    %63 = vector.load %arg19[%c0_56, %c34_57] : memref<24x253xf32, #tpu.memory_space<vmem>>, vector<24x217xf32>
    %64 = arith.maximumf %62, %63 : vector<24x217xf32>
    %c0_58 = arith.constant 0 : index
    %c35_59 = arith.constant 35 : index
    %65 = vector.load %arg19[%c0_58, %c35_59] : memref<24x253xf32, #tpu.memory_space<vmem>>, vector<24x217xf32>
    %66 = arith.maximumf %64, %65 : vector<24x217xf32>
    %c0_60 = arith.constant 0 : index
    %c36_61 = arith.constant 36 : index
    %67 = vector.load %arg19[%c0_60, %c36_61] : memref<24x253xf32, #tpu.memory_space<vmem>>, vector<24x217xf32>
    %68 = arith.maximumf %66, %67 : vector<24x217xf32>
    %c0_62 = arith.constant 0 : index
    %c0_63 = arith.constant 0 : index
    %69 = vector.load %arg4[%c0_62, %c0_63] : memref<217x49xf32, #tpu.memory_space<vmem>>, vector<217x49xf32>
    %cst_64 = arith.constant dense<0.000000e+00> : vector<24x49xf32>
    %70 = tpu.matmul %68, %69, %cst_64 {dimension_numbers = #tpu.dot_dimension_numbers<[1], [0], [0], [1], [0, 0, 1, 1], [], []>} : vector<24x217xf32>, vector<217x49xf32>, vector<24x49xf32> -> vector<24x49xf32>
    %c0_65 = arith.constant 0 : index
    %c0_66 = arith.constant 0 : index
    %71 = vector.load %arg20[%c0_65, %c0_66] : memref<24x49xf32, #tpu.memory_space<vmem>>, vector<24x49xf32>
    tpu.vector_store %arg20[%c0_65, %c0_66], %70 {strides = array<i32>} : memref<24x49xf32, #tpu.memory_space<vmem>>, vector<24x49xf32>,
    %cst_67 = arith.constant 0.000000e+00 : f32
    %72 = vector.broadcast %cst_67 : f32 to vector<24x33xf32>
    %c0_68 = arith.constant 0 : index
    %c0_69 = arith.constant 0 : index
    %c0_70 = arith.constant 0 : index
    %73 = vector.load %arg5[%c0_68, %c0_69, %c0_70] : memref<9x24x24xbf16, #tpu.memory_space<vmem>>, vector<1x24x24xbf16>
    %74 = vector.shape_cast %73 : vector<1x24x24xbf16> to vector<24x24xbf16>
    %c0_71 = arith.constant 0 : index
    %c0_72 = arith.constant 0 : index
    %75 = vector.load %arg20[%c0_71, %c0_72] : memref<24x49xf32, #tpu.memory_space<vmem>>, vector<24x33xf32>
    %76 = arith.truncf %75 : vector<24x33xf32> to vector<24x33xbf16>
    %cst_73 = arith.constant dense<0.000000e+00> : vector<24x33xf32>
    %77 = tpu.matmul %74, %76, %cst_73 {dimension_numbers = #tpu.dot_dimension_numbers<[1], [0], [0], [1], [0, 0, 1, 1], [], []>} : vector<24x24xbf16>, vector<24x33xbf16>, vector<24x33xf32> -> vector<24x33xf32>
    %78 = arith.addf %72, %77 : vector<24x33xf32>
    %c1_74 = arith.constant 1 : index
    %c0_75 = arith.constant 0 : index
    %c0_76 = arith.constant 0 : index
    %79 = vector.load %arg5[%c1_74, %c0_75, %c0_76] : memref<9x24x24xbf16, #tpu.memory_space<vmem>>, vector<1x24x24xbf16>
    %80 = vector.shape_cast %79 : vector<1x24x24xbf16> to vector<24x24xbf16>
    %c0_77 = arith.constant 0 : index
    %c1_78 = arith.constant 1 : index
    %81 = vector.load %arg20[%c0_77, %c1_78] : memref<24x49xf32, #tpu.memory_space<vmem>>, vector<24x33xf32>
    %82 = arith.truncf %81 : vector<24x33xf32> to vector<24x33xbf16>
    %cst_79 = arith.constant dense<0.000000e+00> : vector<24x33xf32>
    %83 = tpu.matmul %80, %82, %cst_79 {dimension_numbers = #tpu.dot_dimension_numbers<[1], [0], [0], [1], [0, 0, 1, 1], [], []>} : vector<24x24xbf16>, vector<24x33xbf16>, vector<24x33xf32> -> vector<24x33xf32>
    %84 = arith.addf %78, %83 : vector<24x33xf32>
    %c2_80 = arith.constant 2 : index
    %c0_81 = arith.constant 0 : index
    %c0_82 = arith.constant 0 : index
    %85 = vector.load %arg5[%c2_80, %c0_81, %c0_82] : memref<9x24x24xbf16, #tpu.memory_space<vmem>>, vector<1x24x24xbf16>
    %86 = vector.shape_cast %85 : vector<1x24x24xbf16> to vector<24x24xbf16>
    %c0_83 = arith.constant 0 : index
    %c2_84 = arith.constant 2 : index
    %87 = vector.load %arg20[%c0_83, %c2_84] : memref<24x49xf32, #tpu.memory_space<vmem>>, vector<24x33xf32>
    %88 = arith.truncf %87 : vector<24x33xf32> to vector<24x33xbf16>
    %cst_85 = arith.constant dense<0.000000e+00> : vector<24x33xf32>
    %89 = tpu.matmul %86, %88, %cst_85 {dimension_numbers = #tpu.dot_dimension_numbers<[1], [0], [0], [1], [0, 0, 1, 1], [], []>} : vector<24x24xbf16>, vector<24x33xbf16>, vector<24x33xf32> -> vector<24x33xf32>
    %90 = arith.addf %84, %89 : vector<24x33xf32>
    %c3_86 = arith.constant 3 : index
    %c0_87 = arith.constant 0 : index
    %c0_88 = arith.constant 0 : index
    %91 = vector.load %arg5[%c3_86, %c0_87, %c0_88] : memref<9x24x24xbf16, #tpu.memory_space<vmem>>, vector<1x24x24xbf16>
    %92 = vector.shape_cast %91 : vector<1x24x24xbf16> to vector<24x24xbf16>
    %c0_89 = arith.constant 0 : index
    %c7_90 = arith.constant 7 : index
    %93 = vector.load %arg20[%c0_89, %c7_90] : memref<24x49xf32, #tpu.memory_space<vmem>>, vector<24x33xf32>
    %94 = arith.truncf %93 : vector<24x33xf32> to vector<24x33xbf16>
    %cst_91 = arith.constant dense<0.000000e+00> : vector<24x33xf32>
    %95 = tpu.matmul %92, %94, %cst_91 {dimension_numbers = #tpu.dot_dimension_numbers<[1], [0], [0], [1], [0, 0, 1, 1], [], []>} : vector<24x24xbf16>, vector<24x33xbf16>, vector<24x33xf32> -> vector<24x33xf32>
    %96 = arith.addf %90, %95 : vector<24x33xf32>
    %c4_92 = arith.constant 4 : index
    %c0_93 = arith.constant 0 : index
    %c0_94 = arith.constant 0 : index
    %97 = vector.load %arg5[%c4_92, %c0_93, %c0_94] : memref<9x24x24xbf16, #tpu.memory_space<vmem>>, vector<1x24x24xbf16>
    %98 = vector.shape_cast %97 : vector<1x24x24xbf16> to vector<24x24xbf16>
    %c0_95 = arith.constant 0 : index
    %c8_96 = arith.constant 8 : index
    %99 = vector.load %arg20[%c0_95, %c8_96] : memref<24x49xf32, #tpu.memory_space<vmem>>, vector<24x33xf32>
    %100 = arith.truncf %99 : vector<24x33xf32> to vector<24x33xbf16>
    %cst_97 = arith.constant dense<0.000000e+00> : vector<24x33xf32>
    %101 = tpu.matmul %98, %100, %cst_97 {dimension_numbers = #tpu.dot_dimension_numbers<[1], [0], [0], [1], [0, 0, 1, 1], [], []>} : vector<24x24xbf16>, vector<24x33xbf16>, vector<24x33xf32> -> vector<24x33xf32>
    %102 = arith.addf %96, %101 : vector<24x33xf32>
    %c5_98 = arith.constant 5 : index
    %c0_99 = arith.constant 0 : index
    %c0_100 = arith.constant 0 : index
    %103 = vector.load %arg5[%c5_98, %c0_99, %c0_100] : memref<9x24x24xbf16, #tpu.memory_space<vmem>>, vector<1x24x24xbf16>
    %104 = vector.shape_cast %103 : vector<1x24x24xbf16> to vector<24x24xbf16>
    %c0_101 = arith.constant 0 : index
    %c9 = arith.constant 9 : index
    %105 = vector.load %arg20[%c0_101, %c9] : memref<24x49xf32, #tpu.memory_space<vmem>>, vector<24x33xf32>
    %106 = arith.truncf %105 : vector<24x33xf32> to vector<24x33xbf16>
    %cst_102 = arith.constant dense<0.000000e+00> : vector<24x33xf32>
    %107 = tpu.matmul %104, %106, %cst_102 {dimension_numbers = #tpu.dot_dimension_numbers<[1], [0], [0], [1], [0, 0, 1, 1], [], []>} : vector<24x24xbf16>, vector<24x33xbf16>, vector<24x33xf32> -> vector<24x33xf32>
    %108 = arith.addf %102, %107 : vector<24x33xf32>
    %c6_103 = arith.constant 6 : index
    %c0_104 = arith.constant 0 : index
    %c0_105 = arith.constant 0 : index
    %109 = vector.load %arg5[%c6_103, %c0_104, %c0_105] : memref<9x24x24xbf16, #tpu.memory_space<vmem>>, vector<1x24x24xbf16>
    %110 = vector.shape_cast %109 : vector<1x24x24xbf16> to vector<24x24xbf16>
    %c0_106 = arith.constant 0 : index
    %c14 = arith.constant 14 : index
    %111 = vector.load %arg20[%c0_106, %c14] : memref<24x49xf32, #tpu.memory_space<vmem>>, vector<24x33xf32>
    %112 = arith.truncf %111 : vector<24x33xf32> to vector<24x33xbf16>
    %cst_107 = arith.constant dense<0.000000e+00> : vector<24x33xf32>
    %113 = tpu.matmul %110, %112, %cst_107 {dimension_numbers = #tpu.dot_dimension_numbers<[1], [0], [0], [1], [0, 0, 1, 1], [], []>} : vector<24x24xbf16>, vector<24x33xbf16>, vector<24x33xf32> -> vector<24x33xf32>
    %114 = arith.addf %108, %113 : vector<24x33xf32>
    %c7_108 = arith.constant 7 : index
    %c0_109 = arith.constant 0 : index
    %c0_110 = arith.constant 0 : index
    %115 = vector.load %arg5[%c7_108, %c0_109, %c0_110] : memref<9x24x24xbf16, #tpu.memory_space<vmem>>, vector<1x24x24xbf16>
    %116 = vector.shape_cast %115 : vector<1x24x24xbf16> to vector<24x24xbf16>
    %c0_111 = arith.constant 0 : index
    %c15 = arith.constant 15 : index
    %117 = vector.load %arg20[%c0_111, %c15] : memref<24x49xf32, #tpu.memory_space<vmem>>, vector<24x33xf32>
    %118 = arith.truncf %117 : vector<24x33xf32> to vector<24x33xbf16>
    %cst_112 = arith.constant dense<0.000000e+00> : vector<24x33xf32>
    %119 = tpu.matmul %116, %118, %cst_112 {dimension_numbers = #tpu.dot_dimension_numbers<[1], [0], [0], [1], [0, 0, 1, 1], [], []>} : vector<24x24xbf16>, vector<24x33xbf16>, vector<24x33xf32> -> vector<24x33xf32>
    %120 = arith.addf %114, %119 : vector<24x33xf32>
    %c8_113 = arith.constant 8 : index
    %c0_114 = arith.constant 0 : index
    %c0_115 = arith.constant 0 : index
    %121 = vector.load %arg5[%c8_113, %c0_114, %c0_115] : memref<9x24x24xbf16, #tpu.memory_space<vmem>>, vector<1x24x24xbf16>
    %122 = vector.shape_cast %121 : vector<1x24x24xbf16> to vector<24x24xbf16>
    %c0_116 = arith.constant 0 : index
    %c16 = arith.constant 16 : index
    %123 = vector.load %arg20[%c0_116, %c16] : memref<24x49xf32, #tpu.memory_space<vmem>>, vector<24x33xf32>
    %124 = arith.truncf %123 : vector<24x33xf32> to vector<24x33xbf16>
    %cst_117 = arith.constant dense<0.000000e+00> : vector<24x33xf32>
    %125 = tpu.matmul %122, %124, %cst_117 {dimension_numbers = #tpu.dot_dimension_numbers<[1], [0], [0], [1], [0, 0, 1, 1], [], []>} : vector<24x24xbf16>, vector<24x33xbf16>, vector<24x33xf32> -> vector<24x33xf32>
    %126 = arith.addf %120, %125 : vector<24x33xf32>
    %c0_118 = arith.constant 0 : index
    %c0_119 = arith.constant 0 : index
    %127 = vector.load %arg6[%c0_118, %c0_119] : memref<24x1xf32, #tpu.memory_space<vmem>>, vector<24x1xf32>
    %128 = vector.broadcast %127 : vector<24x1xf32> to vector<24x33xf32>
    %129 = arith.addf %126, %128 : vector<24x33xf32>
    %c0_120 = arith.constant 0 : index
    %c0_121 = arith.constant 0 : index
    %130 = vector.load %arg21[%c0_120, %c0_121] : memref<24x33xf32, #tpu.memory_space<vmem>>, vector<24x33xf32>
    tpu.vector_store %arg21[%c0_120, %c0_121], %129 {strides = array<i32>} : memref<24x33xf32, #tpu.memory_space<vmem>>, vector<24x33xf32>,
    %cst_122 = arith.constant 0.000000e+00 : f32
    %131 = vector.broadcast %cst_122 : f32 to vector<24x17xf32>
    %c0_123 = arith.constant 0 : index
    %c0_124 = arith.constant 0 : index
    %c0_125 = arith.constant 0 : index
    %132 = vector.load %arg7[%c0_123, %c0_124, %c0_125] : memref<9x24x24xbf16, #tpu.memory_space<vmem>>, vector<1x24x24xbf16>
    %133 = vector.shape_cast %132 : vector<1x24x24xbf16> to vector<24x24xbf16>
    %c0_126 = arith.constant 0 : index
    %c0_127 = arith.constant 0 : index
    %134 = vector.load %arg21[%c0_126, %c0_127] : memref<24x33xf32, #tpu.memory_space<vmem>>, vector<24x17xf32>
    %135 = arith.truncf %134 : vector<24x17xf32> to vector<24x17xbf16>
    %cst_128 = arith.constant dense<0.000000e+00> : vector<24x17xf32>
    %136 = tpu.matmul %133, %135, %cst_128 {dimension_numbers = #tpu.dot_dimension_numbers<[1], [0], [0], [1], [0, 0, 1, 1], [], []>} : vector<24x24xbf16>, vector<24x17xbf16>, vector<24x17xf32> -> vector<24x17xf32>
    %137 = arith.addf %131, %136 : vector<24x17xf32>
    %c1_129 = arith.constant 1 : index
    %c0_130 = arith.constant 0 : index
    %c0_131 = arith.constant 0 : index
    %138 = vector.load %arg7[%c1_129, %c0_130, %c0_131] : memref<9x24x24xbf16, #tpu.memory_space<vmem>>, vector<1x24x24xbf16>
    %139 = vector.shape_cast %138 : vector<1x24x24xbf16> to vector<24x24xbf16>
    %c0_132 = arith.constant 0 : index
    %c1_133 = arith.constant 1 : index
    %140 = vector.load %arg21[%c0_132, %c1_133] : memref<24x33xf32, #tpu.memory_space<vmem>>, vector<24x17xf32>
    %141 = arith.truncf %140 : vector<24x17xf32> to vector<24x17xbf16>
    %cst_134 = arith.constant dense<0.000000e+00> : vector<24x17xf32>
    %142 = tpu.matmul %139, %141, %cst_134 {dimension_numbers = #tpu.dot_dimension_numbers<[1], [0], [0], [1], [0, 0, 1, 1], [], []>} : vector<24x24xbf16>, vector<24x17xbf16>, vector<24x17xf32> -> vector<24x17xf32>
    %143 = arith.addf %137, %142 : vector<24x17xf32>
    %c2_135 = arith.constant 2 : index
    %c0_136 = arith.constant 0 : index
    %c0_137 = arith.constant 0 : index
    %144 = vector.load %arg7[%c2_135, %c0_136, %c0_137] : memref<9x24x24xbf16, #tpu.memory_space<vmem>>, vector<1x24x24xbf16>
    %145 = vector.shape_cast %144 : vector<1x24x24xbf16> to vector<24x24xbf16>
    %c0_138 = arith.constant 0 : index
    %c2_139 = arith.constant 2 : index
    %146 = vector.load %arg21[%c0_138, %c2_139] : memref<24x33xf32, #tpu.memory_space<vmem>>, vector<24x17xf32>
    %147 = arith.truncf %146 : vector<24x17xf32> to vector<24x17xbf16>
    %cst_140 = arith.constant dense<0.000000e+00> : vector<24x17xf32>
    %148 = tpu.matmul %145, %147, %cst_140 {dimension_numbers = #tpu.dot_dimension_numbers<[1], [0], [0], [1], [0, 0, 1, 1], [], []>} : vector<24x24xbf16>, vector<24x17xbf16>, vector<24x17xf32> -> vector<24x17xf32>
    %149 = arith.addf %143, %148 : vector<24x17xf32>
    %c3_141 = arith.constant 3 : index
    %c0_142 = arith.constant 0 : index
    %c0_143 = arith.constant 0 : index
    %150 = vector.load %arg7[%c3_141, %c0_142, %c0_143] : memref<9x24x24xbf16, #tpu.memory_space<vmem>>, vector<1x24x24xbf16>
    %151 = vector.shape_cast %150 : vector<1x24x24xbf16> to vector<24x24xbf16>
    %c0_144 = arith.constant 0 : index
    %c7_145 = arith.constant 7 : index
    %152 = vector.load %arg21[%c0_144, %c7_145] : memref<24x33xf32, #tpu.memory_space<vmem>>, vector<24x17xf32>
    %153 = arith.truncf %152 : vector<24x17xf32> to vector<24x17xbf16>
    %cst_146 = arith.constant dense<0.000000e+00> : vector<24x17xf32>
    %154 = tpu.matmul %151, %153, %cst_146 {dimension_numbers = #tpu.dot_dimension_numbers<[1], [0], [0], [1], [0, 0, 1, 1], [], []>} : vector<24x24xbf16>, vector<24x17xbf16>, vector<24x17xf32> -> vector<24x17xf32>
    %155 = arith.addf %149, %154 : vector<24x17xf32>
    %c4_147 = arith.constant 4 : index
    %c0_148 = arith.constant 0 : index
    %c0_149 = arith.constant 0 : index
    %156 = vector.load %arg7[%c4_147, %c0_148, %c0_149] : memref<9x24x24xbf16, #tpu.memory_space<vmem>>, vector<1x24x24xbf16>
    %157 = vector.shape_cast %156 : vector<1x24x24xbf16> to vector<24x24xbf16>
    %c0_150 = arith.constant 0 : index
    %c8_151 = arith.constant 8 : index
    %158 = vector.load %arg21[%c0_150, %c8_151] : memref<24x33xf32, #tpu.memory_space<vmem>>, vector<24x17xf32>
    %159 = arith.truncf %158 : vector<24x17xf32> to vector<24x17xbf16>
    %cst_152 = arith.constant dense<0.000000e+00> : vector<24x17xf32>
    %160 = tpu.matmul %157, %159, %cst_152 {dimension_numbers = #tpu.dot_dimension_numbers<[1], [0], [0], [1], [0, 0, 1, 1], [], []>} : vector<24x24xbf16>, vector<24x17xbf16>, vector<24x17xf32> -> vector<24x17xf32>
    %161 = arith.addf %155, %160 : vector<24x17xf32>
    %c5_153 = arith.constant 5 : index
    %c0_154 = arith.constant 0 : index
    %c0_155 = arith.constant 0 : index
    %162 = vector.load %arg7[%c5_153, %c0_154, %c0_155] : memref<9x24x24xbf16, #tpu.memory_space<vmem>>, vector<1x24x24xbf16>
    %163 = vector.shape_cast %162 : vector<1x24x24xbf16> to vector<24x24xbf16>
    %c0_156 = arith.constant 0 : index
    %c9_157 = arith.constant 9 : index
    %164 = vector.load %arg21[%c0_156, %c9_157] : memref<24x33xf32, #tpu.memory_space<vmem>>, vector<24x17xf32>
    %165 = arith.truncf %164 : vector<24x17xf32> to vector<24x17xbf16>
    %cst_158 = arith.constant dense<0.000000e+00> : vector<24x17xf32>
    %166 = tpu.matmul %163, %165, %cst_158 {dimension_numbers = #tpu.dot_dimension_numbers<[1], [0], [0], [1], [0, 0, 1, 1], [], []>} : vector<24x24xbf16>, vector<24x17xbf16>, vector<24x17xf32> -> vector<24x17xf32>
    %167 = arith.addf %161, %166 : vector<24x17xf32>
    %c6_159 = arith.constant 6 : index
    %c0_160 = arith.constant 0 : index
    %c0_161 = arith.constant 0 : index
    %168 = vector.load %arg7[%c6_159, %c0_160, %c0_161] : memref<9x24x24xbf16, #tpu.memory_space<vmem>>, vector<1x24x24xbf16>
    %169 = vector.shape_cast %168 : vector<1x24x24xbf16> to vector<24x24xbf16>
    %c0_162 = arith.constant 0 : index
    %c14_163 = arith.constant 14 : index
    %170 = vector.load %arg21[%c0_162, %c14_163] : memref<24x33xf32, #tpu.memory_space<vmem>>, vector<24x17xf32>
    %171 = arith.truncf %170 : vector<24x17xf32> to vector<24x17xbf16>
    %cst_164 = arith.constant dense<0.000000e+00> : vector<24x17xf32>
    %172 = tpu.matmul %169, %171, %cst_164 {dimension_numbers = #tpu.dot_dimension_numbers<[1], [0], [0], [1], [0, 0, 1, 1], [], []>} : vector<24x24xbf16>, vector<24x17xbf16>, vector<24x17xf32> -> vector<24x17xf32>
    %173 = arith.addf %167, %172 : vector<24x17xf32>
    %c7_165 = arith.constant 7 : index
    %c0_166 = arith.constant 0 : index
    %c0_167 = arith.constant 0 : index
    %174 = vector.load %arg7[%c7_165, %c0_166, %c0_167] : memref<9x24x24xbf16, #tpu.memory_space<vmem>>, vector<1x24x24xbf16>
    %175 = vector.shape_cast %174 : vector<1x24x24xbf16> to vector<24x24xbf16>
    %c0_168 = arith.constant 0 : index
    %c15_169 = arith.constant 15 : index
    %176 = vector.load %arg21[%c0_168, %c15_169] : memref<24x33xf32, #tpu.memory_space<vmem>>, vector<24x17xf32>
    %177 = arith.truncf %176 : vector<24x17xf32> to vector<24x17xbf16>
    %cst_170 = arith.constant dense<0.000000e+00> : vector<24x17xf32>
    %178 = tpu.matmul %175, %177, %cst_170 {dimension_numbers = #tpu.dot_dimension_numbers<[1], [0], [0], [1], [0, 0, 1, 1], [], []>} : vector<24x24xbf16>, vector<24x17xbf16>, vector<24x17xf32> -> vector<24x17xf32>
    %179 = arith.addf %173, %178 : vector<24x17xf32>
    %c8_171 = arith.constant 8 : index
    %c0_172 = arith.constant 0 : index
    %c0_173 = arith.constant 0 : index
    %180 = vector.load %arg7[%c8_171, %c0_172, %c0_173] : memref<9x24x24xbf16, #tpu.memory_space<vmem>>, vector<1x24x24xbf16>
    %181 = vector.shape_cast %180 : vector<1x24x24xbf16> to vector<24x24xbf16>
    %c0_174 = arith.constant 0 : index
    %c16_175 = arith.constant 16 : index
    %182 = vector.load %arg21[%c0_174, %c16_175] : memref<24x33xf32, #tpu.memory_space<vmem>>, vector<24x17xf32>
    %183 = arith.truncf %182 : vector<24x17xf32> to vector<24x17xbf16>
    %cst_176 = arith.constant dense<0.000000e+00> : vector<24x17xf32>
    %184 = tpu.matmul %181, %183, %cst_176 {dimension_numbers = #tpu.dot_dimension_numbers<[1], [0], [0], [1], [0, 0, 1, 1], [], []>} : vector<24x24xbf16>, vector<24x17xbf16>, vector<24x17xf32> -> vector<24x17xf32>
    %185 = arith.addf %179, %184 : vector<24x17xf32>
    %c0_177 = arith.constant 0 : index
    %c0_178 = arith.constant 0 : index
    %186 = vector.load %arg8[%c0_177, %c0_178] : memref<24x1xf32, #tpu.memory_space<vmem>>, vector<24x1xf32>
    %187 = vector.broadcast %186 : vector<24x1xf32> to vector<24x17xf32>
    %188 = arith.addf %185, %187 : vector<24x17xf32>
    %cst_179 = arith.constant 0.000000e+00 : f32
    %189 = vector.broadcast %cst_179 : f32 to vector<24x17xf32>
    %190 = arith.maximumf %188, %189 : vector<24x17xf32>
    %191 = tpu.iota {dimensions = array<i32: 1>} : vector<24x17xi32>
    %c3_i32 = arith.constant 3 : i32
    %192 = vector.broadcast %c3_i32 : i32 to vector<24x17xi32>
    %193 = arith.cmpi slt, %191, %192 : vector<24x17xi32>
    %c7_i32 = arith.constant 7 : i32
    %194 = vector.broadcast %c7_i32 : i32 to vector<24x17xi32>
    %195 = arith.cmpi sge, %191, %194 : vector<24x17xi32>
    %c10_i32 = arith.constant 10 : i32
    %196 = vector.broadcast %c10_i32 : i32 to vector<24x17xi32>
    %197 = arith.cmpi slt, %191, %196 : vector<24x17xi32>
    %198 = arith.andi %195, %197 : vector<24x17xi1>
    %199 = arith.ori %193, %198 : vector<24x17xi1>
    %c14_i32 = arith.constant 14 : i32
    %200 = vector.broadcast %c14_i32 : i32 to vector<24x17xi32>
    %201 = arith.cmpi sge, %191, %200 : vector<24x17xi32>
    %c17_i32 = arith.constant 17 : i32
    %202 = vector.broadcast %c17_i32 : i32 to vector<24x17xi32>
    %203 = arith.cmpi slt, %191, %202 : vector<24x17xi32>
    %204 = arith.andi %201, %203 : vector<24x17xi1>
    %205 = arith.ori %199, %204 : vector<24x17xi1>
    %cst_180 = arith.constant 0.000000e+00 : f32
    %206 = vector.broadcast %cst_180 : f32 to vector<24x17xf32>
    %207 = arith.select %205, %190, %206 : vector<24x17xi1>, vector<24x17xf32>
    %cst_181 = arith.constant dense<0xFF800000> : vector<24xf32>
    %208 = vector.multi_reduction <maximumf>, %207, %cst_181 [1] : vector<24x17xf32> to vector<24xf32>
    %209 = vector.shape_cast %208 : vector<24xf32> to vector<24x1xf32>
    %c0_182 = arith.constant 0 : index
    %c0_183 = arith.constant 0 : index
    %210 = vector.load %arg9[%c0_182, %c0_183] : memref<512x24xbf16, #tpu.memory_space<vmem>>, vector<512x24xbf16>
    %211 = arith.truncf %209 : vector<24x1xf32> to vector<24x1xbf16>
    %cst_184 = arith.constant dense<0.000000e+00> : vector<512x1xf32>
    %212 = tpu.matmul %210, %211, %cst_184 {dimension_numbers = #tpu.dot_dimension_numbers<[1], [0], [0], [1], [0, 0, 1, 1], [], []>} : vector<512x24xbf16>, vector<24x1xbf16>, vector<512x1xf32> -> vector<512x1xf32>
    %c0_185 = arith.constant 0 : index
    %c0_186 = arith.constant 0 : index
    %213 = vector.load %arg10[%c0_185, %c0_186] : memref<512x128xbf16, #tpu.memory_space<vmem>>, vector<512x128xbf16>
    %c0_187 = arith.constant 0 : index
    %c0_188 = arith.constant 0 : index
    %214 = vector.load %arg12[%c0_187, %c0_188] : memref<128x1xf32, #tpu.memory_space<vmem>>, vector<128x1xf32>
    %215 = arith.truncf %214 : vector<128x1xf32> to vector<128x1xbf16>
    %cst_189 = arith.constant dense<0.000000e+00> : vector<512x1xf32>
    %216 = tpu.matmul %213, %215, %cst_189 {dimension_numbers = #tpu.dot_dimension_numbers<[1], [0], [0], [1], [0, 0, 1, 1], [], []>} : vector<512x128xbf16>, vector<128x1xbf16>, vector<512x1xf32> -> vector<512x1xf32>
    %217 = arith.addf %212, %216 : vector<512x1xf32>
    %c0_190 = arith.constant 0 : index
    %c0_191 = arith.constant 0 : index
    %218 = vector.load %arg11[%c0_190, %c0_191] : memref<512x1xf32, #tpu.memory_space<vmem>>, vector<512x1xf32>
    %219 = arith.addf %217, %218 : vector<512x1xf32>
    %220 = vector.extract_strided_slice %219 {offsets = [0, 0], sizes = [128, 1], strides = [1, 1]} : vector<512x1xf32> to vector<128x1xf32>
    %221 = arith.negf %220 : vector<128x1xf32>
    %222 = math.exp %221 : vector<128x1xf32>
    %cst_192 = arith.constant 1.000000e+00 : f32
    %223 = vector.broadcast %cst_192 : f32 to vector<128x1xf32>
    %224 = arith.addf %223, %222 : vector<128x1xf32>
    %225 = arith.divf %223, %224 : vector<128x1xf32>
    %226 = vector.extract_strided_slice %219 {offsets = [128, 0], sizes = [128, 1], strides = [1, 1]} : vector<512x1xf32> to vector<128x1xf32>
    %227 = arith.negf %226 : vector<128x1xf32>
    %228 = math.exp %227 : vector<128x1xf32>
    %cst_193 = arith.constant 1.000000e+00 : f32
    %229 = vector.broadcast %cst_193 : f32 to vector<128x1xf32>
    %230 = arith.addf %229, %228 : vector<128x1xf32>
    %231 = arith.divf %229, %230 : vector<128x1xf32>
    %232 = vector.extract_strided_slice %219 {offsets = [256, 0], sizes = [128, 1], strides = [1, 1]} : vector<512x1xf32> to vector<128x1xf32>
    %233 = math.tanh %232 : vector<128x1xf32>
    %234 = vector.extract_strided_slice %219 {offsets = [384, 0], sizes = [128, 1], strides = [1, 1]} : vector<512x1xf32> to vector<128x1xf32>
    %235 = arith.negf %234 : vector<128x1xf32>
    %236 = math.exp %235 : vector<128x1xf32>
    %cst_194 = arith.constant 1.000000e+00 : f32
    %237 = vector.broadcast %cst_194 : f32 to vector<128x1xf32>
    %238 = arith.addf %237, %236 : vector<128x1xf32>
    %239 = arith.divf %237, %238 : vector<128x1xf32>
    %c0_195 = arith.constant 0 : index
    %c0_196 = arith.constant 0 : index
    %240 = vector.load %arg13[%c0_195, %c0_196] : memref<128x1xf32, #tpu.memory_space<vmem>>, vector<128x1xf32>
    %241 = arith.mulf %231, %240 : vector<128x1xf32>
    %242 = arith.mulf %225, %233 : vector<128x1xf32>
    %243 = arith.addf %241, %242 : vector<128x1xf32>
    %244 = math.tanh %243 : vector<128x1xf32>
    %245 = arith.mulf %239, %244 : vector<128x1xf32>
    %c0_197 = arith.constant 0 : index
    %c0_198 = arith.constant 0 : index
    %246 = vector.load %arg14[%c0_197, %c0_198] : memref<5x128xbf16, #tpu.memory_space<vmem>>, vector<5x128xbf16>
    %247 = arith.truncf %245 : vector<128x1xf32> to vector<128x1xbf16>
    %cst_199 = arith.constant dense<0.000000e+00> : vector<5x1xf32>
    %248 = tpu.matmul %246, %247, %cst_199 {dimension_numbers = #tpu.dot_dimension_numbers<[1], [0], [0], [1], [0, 0, 1, 1], [], []>} : vector<5x128xbf16>, vector<128x1xbf16>, vector<5x1xf32> -> vector<5x1xf32>
    %c0_200 = arith.constant 0 : index
    %c0_201 = arith.constant 0 : index
    %249 = vector.load %arg15[%c0_200, %c0_201] : memref<5x1xf32, #tpu.memory_space<vmem>>, vector<5x1xf32>
    %250 = arith.addf %248, %249 : vector<5x1xf32>
    %cst_202 = arith.constant dense<0xFF800000> : vector<1xf32>
    %251 = vector.multi_reduction <maximumf>, %250, %cst_202 [0] : vector<5x1xf32> to vector<1xf32>
    %252 = vector.shape_cast %251 : vector<1xf32> to vector<1x1xf32>
    %253 = vector.broadcast %252 : vector<1x1xf32> to vector<5x1xf32>
    %254 = arith.subf %250, %253 : vector<5x1xf32>
    %255 = math.exp %254 : vector<5x1xf32>
    %cst_203 = arith.constant dense<0.000000e+00> : vector<1xf32>
    %256 = vector.multi_reduction <add>, %255, %cst_203 [0] : vector<5x1xf32> to vector<1xf32>
    %257 = vector.shape_cast %256 : vector<1xf32> to vector<1x1xf32>
    %258 = math.log %257 : vector<1x1xf32>
    %259 = vector.broadcast %258 : vector<1x1xf32> to vector<5x1xf32>
    %260 = arith.subf %254, %259 : vector<5x1xf32>
    %c0_204 = arith.constant 0 : index
    %c0_205 = arith.constant 0 : index
    %261 = vector.load %arg16[%c0_204, %c0_205] : memref<5x1xf32, #tpu.memory_space<vmem>>, vector<5x1xf32>
    tpu.vector_store %arg16[%c0_204, %c0_205], %260 {strides = array<i32>} : memref<5x1xf32, #tpu.memory_space<vmem>>, vector<5x1xf32>,
    %c0_206 = arith.constant 0 : index
    %c0_207 = arith.constant 0 : index
    %262 = vector.load %arg17[%c0_206, %c0_207] : memref<128x1xf32, #tpu.memory_space<vmem>>, vector<128x1xf32>
    tpu.vector_store %arg17[%c0_206, %c0_207], %245 {strides = array<i32>} : memref<128x1xf32, #tpu.memory_space<vmem>>, vector<128x1xf32>,
    %c0_208 = arith.constant 0 : index
    %c0_209 = arith.constant 0 : index
    %263 = vector.load %arg18[%c0_208, %c0_209] : memref<128x1xf32, #tpu.memory_space<vmem>>, vector<128x1xf32>
    tpu.vector_store %arg18[%c0_208, %c0_209], %243 {strides = array<i32>} : memref<128x1xf32, #tpu.memory_space<vmem>>, vector<128x1xf32>,
    return
  }
  func.func @transform_0(%arg0: i32) -> (i32, i32) {
    %c0_i32 = arith.constant 0 : i32
    %c0_i32_0 = arith.constant 0 : i32
    %c0_i32_1 = arith.constant 0 : i32
    return %c0_i32, %c0_i32_0 : i32, i32
  }
  func.func @transform_1(%arg0: i32) -> (i32, i32, i32) {
    %c0_i32 = arith.constant 0 : i32
    %c0_i32_0 = arith.constant 0 : i32
    %c0_i32_1 = arith.constant 0 : i32
    %c0_i32_2 = arith.constant 0 : i32
    return %c0_i32, %c0_i32_0, %c0_i32_1 : i32, i32, i32
  }
  func.func @transform_2(%arg0: i32) -> (i32, i32) {
    %c0_i32 = arith.constant 0 : i32
    %c0_i32_0 = arith.constant 0 : i32
    %c0_i32_1 = arith.constant 0 : i32
    return %c0_i32, %c0_i32_0 : i32, i32
  }
  func.func @transform_3(%arg0: i32) -> (i32, i32) {
    %c0_i32 = arith.constant 0 : i32
    %c0_i32_0 = arith.constant 0 : i32
    %c0_i32_1 = arith.constant 0 : i32
    return %c0_i32, %c0_i32_0 : i32, i32
  }
  func.func @transform_4(%arg0: i32) -> (i32, i32, i32) {
    %c0_i32 = arith.constant 0 : i32
    %c0_i32_0 = arith.constant 0 : i32
    %c0_i32_1 = arith.constant 0 : i32
    %c0_i32_2 = arith.constant 0 : i32
    return %c0_i32, %c0_i32_0, %c0_i32_1 : i32, i32, i32
  }
  func.func @transform_5(%arg0: i32) -> (i32, i32) {
    %c0_i32 = arith.constant 0 : i32
    %c0_i32_0 = arith.constant 0 : i32
    %c0_i32_1 = arith.constant 0 : i32
    return %c0_i32, %c0_i32_0 : i32, i32
  }
  func.func @transform_6(%arg0: i32) -> (i32, i32, i32) {
    %c0_i32 = arith.constant 0 : i32
    %c0_i32_0 = arith.constant 0 : i32
    %c0_i32_1 = arith.constant 0 : i32
    %c0_i32_2 = arith.constant 0 : i32
    return %c0_i32, %c0_i32_0, %c0_i32_1 : i32, i32, i32
  }
  func.func @transform_7(%arg0: i32) -> (i32, i32) {
    %c0_i32 = arith.constant 0 : i32
    %c0_i32_0 = arith.constant 0 : i32
    %c0_i32_1 = arith.constant 0 : i32
    return %c0_i32, %c0_i32_0 : i32, i32
  }
  func.func @transform_8(%arg0: i32) -> (i32, i32) {
    %c0_i32 = arith.constant 0 : i32
    %c0_i32_0 = arith.constant 0 : i32
    %c0_i32_1 = arith.constant 0 : i32
    return %c0_i32, %c0_i32_0 : i32, i32
  }
  func.func @transform_9(%arg0: i32) -> (i32, i32) {
    %c0_i32 = arith.constant 0 : i32
    %c0_i32_0 = arith.constant 0 : i32
    %c0_i32_1 = arith.constant 0 : i32
    return %c0_i32, %c0_i32_0 : i32, i32
  }
  func.func @transform_10(%arg0: i32) -> (i32, i32) {
    %c0_i32 = arith.constant 0 : i32
    %c0_i32_0 = arith.constant 0 : i32
    %c0_i32_1 = arith.constant 0 : i32
    return %c0_i32, %c0_i32_0 : i32, i32
  }
  func.func @transform_11(%arg0: i32) -> (i32, i32) {
    %c0_i32 = arith.constant 0 : i32
    %c0_i32_0 = arith.constant 0 : i32
    %c0_i32_1 = arith.constant 0 : i32
    return %c0_i32, %c0_i32_0 : i32, i32
  }
  func.func @transform_12(%arg0: i32) -> (i32, i32) {
    %c0_i32 = arith.constant 0 : i32
    %c0_i32_0 = arith.constant 0 : i32
    %c0_i32_1 = arith.constant 0 : i32
    return %c0_i32, %c0_i32_0 : i32, i32
  }
  func.func @transform_13(%arg0: i32) -> (i32, i32) {
    %c0_i32 = arith.constant 0 : i32
    %c0_i32_0 = arith.constant 0 : i32
    %c0_i32_1 = arith.constant 0 : i32
    return %c0_i32, %c0_i32_0 : i32, i32
  }
  func.func @transform_14(%arg0: i32) -> (i32, i32) {
    %c0_i32 = arith.constant 0 : i32
    %c0_i32_0 = arith.constant 0 : i32
    %c0_i32_1 = arith.constant 0 : i32
    return %c0_i32, %c0_i32_0 : i32, i32
  }
  func.func @transform_15(%arg0: i32) -> (i32, i32) {
    %c0_i32 = arith.constant 0 : i32
    %c0_i32_0 = arith.constant 0 : i32
    %c0_i32_1 = arith.constant 0 : i32
    return %c0_i32, %c0_i32_0 : i32, i32
  }
  func.func @transform_16(%arg0: i32) -> (i32, i32) {
    %c0_i32 = arith.constant 0 : i32
    %c0_i32_0 = arith.constant 0 : i32
    %c0_i32_1 = arith.constant 0 : i32
    return %c0_i32, %c0_i32_0 : i32, i32
  }
  func.func @transform_17(%arg0: i32) -> (i32, i32) {
    %c0_i32 = arith.constant 0 : i32
    %c0_i32_0 = arith.constant 0 : i32
    %c0_i32_1 = arith.constant 0 : i32
    return %c0_i32, %c0_i32_0 : i32, i32
  }
}

</mosaic_0001>

<bundles_post_ra>
// kernel: lstm_singleshot_forward.2
= control target key start
LH: loop header
LB: loop body
LE: loop exit
PB: predicated region body
PF: predicated region fallthrough
CT: control target
= control target key end

     0   :  { %s8783_s16 = smov 127   ;;  %v15011_v38 = vmov 0   ;;  %s8785_s14 = smov 92   ;;  %vm327_vm0 = vcmask 1039360   ;;  %vm404_vm1 = vcmask 523264   ;;  %vm974_vm2 = vcmask 752640   ;;  %s15007_s0 = inlined_call_operand.vmem [shape: bf16[64,1296], index: 0, kind: input, shape index: {}]   ;;  %s15008_s1 = inlined_call_operand.vmem [shape: bf16[16,12,64], index: 1, kind: input, shape index: {}]   ;;  %s15009_s2 = inlined_call_operand.vmem [shape: f32[12,1], index: 2, kind: input, shape index: {}]   ;;  %s15010_s3 = inlined_call_operand.vmem [shape: f32[12,1188], index: 3, kind: output, shape index: {}]  }
   0x1   :  { %v8811_v0 = vld [vmem:[%s15007_s0 + $0x8] ss:$44 sps:$4 sm:$0xff]   ;;  %v8816_v1 = vld [vmem:[%s15007_s0] ss:$44 sps:$4 sm:$0xff]   ;;  %v8830_v3 = vld [vmem:[%s15007_s0 + $0x4] ss:$44 sps:$4 sm:$0xff]   ;;  %440 = vmatprep.mubr.bf16.mxu0 %v15011_v38  ;;  %483 = vmatprep.mubr.bf16.mxu1 %v15011_v38 }
   0x2   :  { %15088 = vst [vmem:[#allocation3_spill] sm:$0xff] %v8816_v1  ;;  %251 = vrot.lane.b32.xlu1 %v8811_v0, %s8783_s16  ;;  %v8823_v2 = vld [vmem:[%s15007_s0 + $0xc] ss:$44 sps:$4 sm:$0xff]   ;;  %247 = vrot.lane.b32.xlu0 %v8816_v1, %s8783_s16  ;;  %15089 = vst [vmem:[#allocation4_spill] sm:$0xff] %v8830_v3  ;;  %v8837_v4 = vld [vmem:[%s15007_s0 + $0x14] ss:$44 sps:$4 sm:$0xff]  }
   0x3   :  { %v8844_v5 = vld [vmem:[%s15007_s0 + $0x10] ss:$44 sps:$4 sm:$0xff]   ;;  %v8858_v7 = vld [vmem:[%s15007_s0 + $0x18] ss:$44 sps:$4 sm:$0xff]   ;;  %v8872_v9 = vld [vmem:[%s15007_s0 + $0x20] ss:$44 sps:$4 sm:$0xff]   ;;  %8447 = vset.pattern.permute.xlu1 %v15011_v38  ;;  %8446 = vset.pattern.permute.xlu0 %v15011_v38 }
   0x4   :  { %v8851_v6 = vld [vmem:[%s15007_s0 + $0x1c] ss:$44 sps:$4 sm:$0xff]   ;;  %v8865_v8 = vld [vmem:[%s15007_s0 + $0x24] ss:$44 sps:$4 sm:$0xff]   ;;  %v8900_v13 = vld [vmem:[%s15007_s0 + $0x60] ss:$44 sps:$4 sm:$0xff]  }
   0x5   :  { %v8879_v10 = vld [vmem:[%s15007_s0 + $0x5c] ss:$44 sps:$4 sm:$0xff]   ;;  %v8886_v11 = vld [vmem:[%s15007_s0 + $0x58] ss:$44 sps:$4 sm:$0xff]   ;;  %v8919_v16 = vld [vmem:[%s15007_s0 + $0x74] ss:$44 sps:$4 sm:$0xff]  }
   0x6   :  { %253 = vrot.lane.b32.xlu1 %v8823_v2, %s8783_s16  ;;  %249 = vrot.lane.b32.xlu0 %v8830_v3, %s8783_s16  ;;  %15090 = vst [vmem:[#allocation5_spill] sm:$0xff] %v8886_v11  ;;  %v8893_v12 = vld [vmem:[%s15007_s0 + $0x64] ss:$44 sps:$4 sm:$0xff]   ;;  %v8907_v14 = vld [vmem:[%s15007_s0 + $0x6c] ss:$44 sps:$4 sm:$0xff]   ;;  %s8786_s15 = smov 91  }
   0x7   :  { %v8912_v15 = vld [vmem:[%s15007_s0 + $0x68] ss:$44 sps:$4 sm:$0xff]   ;;  %v8924_v17 = vld [vmem:[%s15007_s0 + $0x70] ss:$44 sps:$4 sm:$0xff]   ;;  %v8938_v19 = vld [vmem:[%s15007_s0 + $0x78] ss:$44 sps:$4 sm:$0xff]  }
   0x8   :  { %v8933_v18 = vld [vmem:[%s15007_s0 + $0x7c] ss:$44 sps:$4 sm:$0xff]   ;;  %v8947_v20 = vld [vmem:[%s15007_s0 + $0xb4] ss:$44 sps:$4 sm:$0xff]   ;;  %v8966_v23 = vld [vmem:[%s15007_s0 + $0xb8] ss:$44 sps:$4 sm:$0xff]  }
   0x9   :  { %v8952_v21 = vld [vmem:[%s15007_s0 + $0xb0] ss:$44 sps:$4 sm:$0xff]   ;;  %v8980_v25 = vld [vmem:[%s15007_s0 + $0xc0] ss:$44 sps:$4 sm:$0xff]   ;;  %v8994_v27 = vld [vmem:[%s15007_s0 + $0xc8] ss:$44 sps:$4 sm:$0xff]  }
   0xa   :  { %257 = vrot.lane.b32.xlu1 %v8837_v4, %s8783_s16  ;;  %255 = vrot.lane.b32.xlu0 %v8844_v5, %s8783_s16  ;;  %v8961_v22 = vld [vmem:[%s15007_s0 + $0xbc] ss:$44 sps:$4 sm:$0xff]   ;;  %v8975_v24 = vld [vmem:[%s15007_s0 + $0xc4] ss:$44 sps:$4 sm:$0xff]   ;;  %vm1377_vm3 = vcmask 744448   ;;  %vm24_vm4 = vcmask 293888  }
   0xb   :  { %v8989_v26 = vld [vmem:[%s15007_s0 + $0xcc] ss:$44 sps:$4 sm:$0xff]   ;;  %v9003_v28 = vld [vmem:[%s15007_s0 + $0xd4] ss:$44 sps:$4 sm:$0xff]   ;;  %v9008_v29 = vld [vmem:[%s15007_s0 + $0xd0] ss:$44 sps:$4 sm:$0xff]  }
   0xc   :  { %v9017_v30 = vld [vmem:[%s15007_s0 + $0x10c] ss:$44 sps:$4 sm:$0xff]   ;;  %v9022_v31 = vld [vmem:[%s15007_s0 + $0x108] ss:$44 sps:$4 sm:$0xff]   ;;  %v9036_v33 = vld [vmem:[%s15007_s0 + $0x110] ss:$44 sps:$4 sm:$0xff]  }
   0xd   :  { %v9031_v32 = vld [vmem:[%s15007_s0 + $0x114] ss:$44 sps:$4 sm:$0xff]   ;;  %v9047_v34 = vld [vmem:[%s15007_s0 + $0x11c] ss:$44 sps:$4 sm:$0xff]   ;;  %v9054_v35 = vld [vmem:[%s15007_s0 + $0x118] ss:$44 sps:$4 sm:$0xff]  }
   0xe   :  { %261 = vrot.lane.b32.xlu1 %v8851_v6, %s8783_s16  ;;  %259 = vrot.lane.b32.xlu0 %v8858_v7, %s8783_s16  ;;  %15091 = vst [vmem:[#allocation6_spill] sm:$0xff] %v9047_v34  ;;  %15092 = vst [vmem:[#allocation7_spill] sm:$0xff] %v9054_v35  ;;  %v9059_v36 = vld [vmem:[%s15007_s0 + $0x124] ss:$44 sps:$4 sm:$0xff]   ;;  %v9068_v37 = vld [vmem:[%s15007_s0 + $0x120] ss:$44 sps:$4 sm:$0xff]  }
   0xf   :  { %15093 = vst [vmem:[#allocation8_spill] sm:$0xff] %v9059_v36  ;;  %15094 = vst [vmem:[#allocation9_spill] sm:$0xff] %v9068_v37  ;;  %v9074_v39 = vld [vmem:[%s15007_s0 + $0x12c] ss:$44 sps:$4 sm:$0xff]   ;;  %v9081_v40 = vld [vmem:[%s15007_s0 + $0x128] ss:$44 sps:$4 sm:$0xff]  }
  0x10   :  { %15095 = vst [vmem:[#allocation10_spill] sm:$0xff] %v9074_v39  ;;  %15096 = vst [vmem:[#allocation11_spill] sm:$0xff] %v9081_v40  ;;  %vm35_vm5 = vcmask 289792   ;;  %vm1753_vm6 = vcmask 596992   ;;  %vm1764_vm7 = vcmask 592896  }
  0x12   :  { %265 = vrot.lane.b32.xlu1 %v8865_v8, %s8783_s16  ;;  %263 = vrot.lane.b32.xlu0 %v8872_v9, %s8783_s16 }
  0x16   :  { %269 = vrot.lane.b32.xlu1 %v8879_v10, %s8783_s16  ;;  %267 = vrot.lane.b32.xlu0 %v8886_v11, %s8783_s16 }
  0x1a   :  { %273 = vrot.lane.b32.xlu1 %v8893_v12, %s8783_s16  ;;  %271 = vrot.lane.b32.xlu0 %v8900_v13, %s8783_s16 }
  0x1e   :  { %277 = vrot.lane.b32.xlu1 %v8907_v14, %s8783_s16  ;;  %275 = vrot.lane.b32.xlu0 %v8912_v15, %s8783_s16 }
  0x22   :  { %281 = vrot.lane.b32.xlu1 %v8919_v16, %s8783_s16  ;;  %279 = vrot.lane.b32.xlu0 %v8924_v17, %s8783_s16 }
  0x26   :  { %285 = vrot.lane.b32.xlu1 %v8933_v18, %s8783_s16  ;;  %283 = vrot.lane.b32.xlu0 %v8938_v19, %s8783_s16 }
  0x2a   :  { %289 = vrot.lane.b32.xlu1 %v8947_v20, %s8783_s16  ;;  %287 = vrot.lane.b32.xlu0 %v8952_v21, %s8783_s16 }
  0x2e   :  { %293 = vrot.lane.b32.xlu1 %v8961_v22, %s8783_s16  ;;  %291 = vrot.lane.b32.xlu0 %v8966_v23, %s8783_s16 }
  0x32   :  { %297 = vrot.lane.b32.xlu1 %v8975_v24, %s8783_s16  ;;  %295 = vrot.lane.b32.xlu0 %v8980_v25, %s8783_s16 }
  0x36   :  { %301 = vrot.lane.b32.xlu1 %v8989_v26, %s8783_s16  ;;  %299 = vrot.lane.b32.xlu0 %v8994_v27, %s8783_s16 }
  0x3a   :  { %305 = vrot.lane.b32.xlu1 %v9003_v28, %s8783_s16  ;;  %303 = vrot.lane.b32.xlu0 %v9008_v29, %s8783_s16 }
  0x3e   :  { %309 = vrot.lane.b32.xlu1 %v9017_v30, %s8783_s16  ;;  %307 = vrot.lane.b32.xlu0 %v9022_v31, %s8783_s16 }
  0x42   :  { %313 = vrot.lane.b32.xlu1 %v9031_v32, %s8783_s16  ;;  %311 = vrot.lane.b32.xlu0 %v9036_v33, %s8783_s16 }
  0x46   :  { %317 = vrot.lane.b32.xlu1 %v9047_v34, %s8783_s16  ;;  %315 = vrot.lane.b32.xlu0 %v9054_v35, %s8783_s16 }
  0x4a   :  { %321 = vrot.lane.b32.xlu1 %v9059_v36, %s8783_s16  ;;  %319 = vrot.lane.b32.xlu0 %v9068_v37, %s8783_s16 }
  0x4e   :  { %325 = vrot.lane.b32.xlu1 %v9074_v39, %s8783_s16  ;;  %323 = vrot.lane.b32.xlu0 %v9081_v40, %s8783_s16 }
  0x52   :  { %896 = vrot.lane.b32.xlu1 %v8830_v3, %s8785_s14  ;;  %894 = vrot.lane.b32.xlu0 %v8816_v1, %s8785_s14 }
  0x56   :  { %900 = vrot.lane.b32.xlu1 %v8823_v2, %s8785_s14  ;;  %898 = vrot.lane.b32.xlu0 %v8811_v0, %s8785_s14 }
  0x5a   :  { %904 = vrot.lane.b32.xlu1 %v8837_v4, %s8785_s14  ;;  %902 = vrot.lane.b32.xlu0 %v8844_v5, %s8785_s14 }
  0x5e   :  { %908 = vrot.lane.b32.xlu1 %v8851_v6, %s8785_s14  ;;  %906 = vrot.lane.b32.xlu0 %v8858_v7, %s8785_s14 }
  0x62   :  { %912 = vrot.lane.b32.xlu1 %v8865_v8, %s8785_s14  ;;  %910 = vrot.lane.b32.xlu0 %v8872_v9, %s8785_s14 }
  0x66   :  { %916 = vrot.lane.b32.xlu1 %v8879_v10, %s8785_s14  ;;  %914 = vrot.lane.b32.xlu0 %v8886_v11, %s8785_s14 }
  0x6a   :  { %920 = vrot.lane.b32.xlu1 %v8893_v12, %s8785_s14  ;;  %918 = vrot.lane.b32.xlu0 %v8900_v13, %s8785_s14 }
  0x6e   :  { %924 = vrot.lane.b32.xlu1 %v8907_v14, %s8785_s14  ;;  %922 = vrot.lane.b32.xlu0 %v8912_v15, %s8785_s14 }
  0x72   :  { %928 = vrot.lane.b32.xlu1 %v8919_v16, %s8785_s14  ;;  %926 = vrot.lane.b32.xlu0 %v8924_v17, %s8785_s14 }
  0x74   :  { %v9128_v41 = vpop.permute.xlu1 %251  ;;  %v9130_v42 = vpop.permute.xlu0 %247 }
  0x76   :  { %932 = vrot.lane.b32.xlu1 %v8933_v18, %s8785_s14  ;;  %930 = vrot.lane.b32.xlu0 %v8938_v19, %s8785_s14 }
  0x78   :  { %v9136_v43 = vpop.permute.xlu1 %253  ;;  %v9138_v44 = vpop.permute.xlu0 %249 }
  0x7a   :  { %936 = vrot.lane.b32.xlu1 %v8947_v20, %s8785_s14  ;;  %934 = vrot.lane.b32.xlu0 %v8952_v21, %s8785_s14 }
  0x7c   :  { %v9144_v45 = vpop.permute.xlu1 %257  ;;  %v9146_v46 = vpop.permute.xlu0 %255 }
  0x7e   :  { %940 = vrot.lane.b32.xlu1 %v8961_v22, %s8785_s14  ;;  %938 = vrot.lane.b32.xlu0 %v8966_v23, %s8785_s14 }
  0x80   :  { %v9152_v47 = vpop.permute.xlu1 %261  ;;  %v9154_v48 = vpop.permute.xlu0 %259 }
  0x82   :  { %944 = vrot.lane.b32.xlu1 %v8975_v24, %s8785_s14  ;;  %942 = vrot.lane.b32.xlu0 %v8980_v25, %s8785_s14 }
  0x84   :  { %v9160_v49 = vpop.permute.xlu1 %265  ;;  %v9162_v50 = vpop.permute.xlu0 %263 }
  0x86   :  { %948 = vrot.lane.b32.xlu1 %v8989_v26, %s8785_s14  ;;  %946 = vrot.lane.b32.xlu0 %v8994_v27, %s8785_s14 }
  0x88   :  { %v9168_v51 = vpop.permute.xlu1 %269  ;;  %v9170_v52 = vpop.permute.xlu0 %267 }
  0x8a   :  { %952 = vrot.lane.b32.xlu1 %v9003_v28, %s8785_s14  ;;  %950 = vrot.lane.b32.xlu0 %v9008_v29, %s8785_s14 }
  0x8c   :  { %v9176_v53 = vpop.permute.xlu1 %273  ;;  %v9178_v54 = vpop.permute.xlu0 %271 }
  0x8e   :  { %956 = vrot.lane.b32.xlu1 %v9017_v30, %s8785_s14  ;;  %954 = vrot.lane.b32.xlu0 %v9022_v31, %s8785_s14 }
  0x90   :  { %v9184_v55 = vpop.permute.xlu1 %277  ;;  %v9186_v56 = vpop.permute.xlu0 %275 }
  0x92   :  { %960 = vrot.lane.b32.xlu1 %v9031_v32, %s8785_s14  ;;  %958 = vrot.lane.b32.xlu0 %v9036_v33, %s8785_s14 }
  0x94   :  { %v9192_v57 = vpop.permute.xlu1 %281  ;;  %v9194_v58 = vpop.permute.xlu0 %279 }
  0x96   :  { %964 = vrot.lane.b32.xlu1 %v9047_v34, %s8785_s14  ;;  %962 = vrot.lane.b32.xlu0 %v9054_v35, %s8785_s14 }
  0x98   :  { %v9200_v59 = vpop.permute.xlu1 %285  ;;  %v9202_v60 = vpop.permute.xlu0 %283 }
  0x9a   :  { %968 = vrot.lane.b32.xlu1 %v9059_v36, %s8785_s14  ;;  %966 = vrot.lane.b32.xlu0 %v9068_v37, %s8785_s14 }
  0x9c   :  { %v290_v61 = vpop.permute.xlu1 %289  ;;  %v288_v62 = vpop.permute.xlu0 %287 }
  0x9e   :  { %972 = vrot.lane.b32.xlu1 %v9074_v39, %s8785_s14  ;;  %970 = vrot.lane.b32.xlu0 %v9081_v40, %s8785_s14 }
  0xa0   :  { %v294_v63 = vpop.permute.xlu1 %293  ;;  %v292_v38 = vpop.permute.xlu0 %291 }
  0xa2   :  { %1299 = vrot.lane.b32.xlu1 %v8830_v3, %s8786_s15  ;;  %1297 = vrot.lane.b32.xlu0 %v8816_v1, %s8786_s15 }
  0xa4   :  { %v9216_v36 = vpop.permute.xlu1 %297  ;;  %v9218_v37 = vpop.permute.xlu0 %295 }
  0xa6   :  { %1303 = vrot.lane.b32.xlu1 %v8823_v2, %s8786_s15  ;;  %1301 = vrot.lane.b32.xlu0 %v8811_v0, %s8786_s15 }
  0xa8   :  { %v9224_v40 = vpop.permute.xlu1 %301  ;;  %v9226_v39 = vpop.permute.xlu0 %299 }
  0xaa   :  { %1307 = vrot.lane.b32.xlu1 %v8837_v4, %s8786_s15  ;;  %1305 = vrot.lane.b32.xlu0 %v8844_v5, %s8786_s15 }
  0xac   :  { %v9232_v1 = vpop.permute.xlu1 %305  ;;  %v9234_v35 = vpop.permute.xlu0 %303 }
  0xae   :  { %1311 = vrot.lane.b32.xlu1 %v8851_v6, %s8786_s15  ;;  %1309 = vrot.lane.b32.xlu0 %v8858_v7, %s8786_s15 }
  0xb0   :  { %v310_v0 = vpop.permute.xlu1 %309  ;;  %v308_v2 = vpop.permute.xlu0 %307 }
  0xb1   :  { %v355_v6 = vsel %vm327_vm0, %v308_v2, %v310_v0  ;;  %v338_v2 = vsel %vm327_vm0, %v9168_v51, %v9178_v54 }
  0xb2   :  { %1315 = vrot.lane.b32.xlu1 %v8865_v8, %s8786_s15  ;;  %1313 = vrot.lane.b32.xlu0 %v8872_v9, %s8786_s15  ;;  %v347_v8 = vsel %vm327_vm0, %v290_v61, %v292_v38 }
  0xb4   :  { %v314_v4 = vpop.permute.xlu1 %313  ;;  %v312_v5 = vpop.permute.xlu0 %311 }
  0xb5   :  { %v356_v34 = vsel %vm327_vm0, %v310_v0, %v312_v5 }
  0xb6   :  { %1319 = vrot.lane.b32.xlu1 %v8879_v10, %s8786_s15  ;;  %1317 = vrot.lane.b32.xlu0 %v8886_v11, %s8786_s15  ;;  %v346_v11 = vsel %vm327_vm0, %v288_v62, %v290_v61  ;;  %v329_v62 = vsel %vm327_vm0, %v9138_v44, %v9128_v41 }
  0xb7   :  { %416 = vmatprep.subr.bf16.mxu0 %v356_v34  ;;  %v357_v34 = vsel %vm327_vm0, %v312_v5, %v314_v4 }
  0xb8   :  { %417 = vmatpush1.bf16.msra.mxu0 %v355_v6  ;;  %v318_v7 = vpop.permute.xlu1 %317  ;;  %v316_v9 = vpop.permute.xlu0 %315  ;;  %v349_v6 = vsel %vm327_vm0, %v294_v63, %v9218_v37 }
  0xb9   :  { %418 = vmatprep.subr.bf16.mxu0 %v347_v8  ;;  %v358_v3 = vsel %vm327_vm0, %v314_v4, %v316_v9  ;;  %v340_v4 = vsel %vm327_vm0, %v9176_v53, %v9186_v56 }
  0xba   :  { %1323 = vrot.lane.b32.xlu1 %v8893_v12, %s8786_s15  ;;  %1321 = vrot.lane.b32.xlu0 %v8900_v13, %s8786_s15 }
  0xbb   :  { %459 = vmatprep.subr.bf16.mxu1 %v358_v3  ;;  %v337_v3 = vsel %vm327_vm0, %v9170_v52, %v9168_v51  ;;  %v339_v51 = vsel %vm327_vm0, %v9178_v54, %v9176_v53  ;;  %v9294_v52 = vld [vmem:[%s15008_s1 + $0x8] sm:$0x3f]   ;;  %v359_v53 = vsel %vm327_vm0, %v316_v9, %v318_v7 }
  0xbc   :  { %419 = vmatpush1.bf16.msra.mxu0 %v346_v11  ;;  %460 = vmatpush1.bf16.msra.mxu1 %v357_v34  ;;  %v322_v0 = vpop.permute.xlu1 %321  ;;  %v320_v8 = vpop.permute.xlu0 %319  ;;  %v348_v11 = vsel %vm327_vm0, %v292_v38, %v294_v63  ;;  %v328_v38 = vsel %vm327_vm0, %v9130_v42, %v9138_v44  ;;  %v331_v34 = vsel %vm327_vm0, %v9136_v43, %v9146_v46 }
  0xbd   :  { %420 = vmatprep.subr.bf16.mxu0 %v338_v2  ;;  %461 = vmatprep.subr.bf16.mxu1 %v349_v6  ;;  %v360_v2 = vsel %vm327_vm0, %v318_v7, %v320_v8  ;;  %v330_v44 = vsel %vm327_vm0, %v9128_v41, %v9136_v43  ;;  %v351_v6 = vsel %vm327_vm0, %v9216_v36, %v9226_v39  ;;  %v15097_v41 = vmov 0  }
  0xbe   :  { %1327 = vrot.lane.b32.xlu1 %v8907_v14, %s8786_s15  ;;  %1325 = vrot.lane.b32.xlu0 %v8912_v15, %s8786_s15  ;;  %v350_v43 = vsel %vm327_vm0, %v9218_v37, %v9216_v36  ;;  %v361_v7 = vsel %vm327_vm0, %v320_v8, %v322_v0  ;;  %v341_v36 = vsel %vm327_vm0, %v9186_v56, %v9184_v55 }
  0xbf   :  { %v352_v37 = vsel %vm327_vm0, %v9226_v39, %v9224_v40  ;;  %v333_v8 = vsel %vm327_vm0, %v9144_v45, %v9154_v48  ;;  %v332_v39 = vsel %vm327_vm0, %v9146_v46, %v9144_v45  ;;  %v335_v56 = vsel %vm327_vm0, %v9152_v47, %v9162_v50 }
  0xc0   :  { %421 = vmatpush1.bf16.msra.mxu0 %v337_v3  ;;  %462 = vmatpush1.bf16.msra.mxu1 %v348_v11  ;;  %v9271_v61 = vpop.permute.xlu1 %325  ;;  %v9279_v5 = vpop.permute.xlu0 %323  ;;  %v334_v45 = vsel %vm327_vm0, %v9154_v48, %v9152_v47  ;;  %v354_v47 = vsel %vm327_vm0, %v9234_v35, %v9232_v1 }
  0xc1   :  { %422 = vmatprep.subr.bf16.mxu0 %v329_v62  ;;  %463 = vmatprep.subr.bf16.mxu1 %v340_v4  ;;  %v362_v3 = vsel %vm327_vm0, %v322_v0, %v9279_v5  ;;  %v342_v62 = vsel %vm327_vm0, %v9184_v55, %v9194_v58  ;;  %v353_v4 = vsel %vm327_vm0, %v9224_v40, %v9234_v35 }
  0xc2   :  { %1331 = vrot.lane.b32.xlu1 %v8919_v16, %s8786_s15  ;;  %1329 = vrot.lane.b32.xlu0 %v8924_v17, %s8786_s15  ;;  %v343_v40 = vsel %vm327_vm0, %v9194_v58, %v9192_v57  ;;  %v363_v46 = vsel %vm327_vm0, %v9279_v5, %v9271_v61  ;;  %v15101_v5 = vld [vmem:[#allocation7_spill] sm:$0xff] }
  0xc4   :  { %423 = vmatpush1.bf16.msra.mxu0 %v328_v38  ;;  %464 = vmatpush1.bf16.msra.mxu1 %v339_v51  ;;  %v9296_v63 = vpop.permute.xlu1 %896  ;;  %v9302_v42 = vpop.permute.xlu0 %894  ;;  %v344_v51 = vsel %vm327_vm0, %v9192_v57, %v9202_v60 }
  0xc5   :  { %465 = vmatprep.subr.bf16.mxu1 %v331_v34  ;;  %502 = vmatprep.subr.bf16.mxu0 %v360_v2 }
  0xc6   :  { %1335 = vrot.lane.b32.xlu1 %v8933_v18, %s8786_s15  ;;  %1333 = vrot.lane.b32.xlu0 %v8938_v19, %s8786_s15 }
  0xc7   :  { %8198 = vmatmul.mubr.msk.bf16.vlgmr.msra.gmra.mxu0 %vm404_vm1, %v9294_v52 }
  0xc8   :  { %466 = vmatpush1.bf16.msra.mxu1 %v330_v44  ;;  %503 = vmatpush1.bf16.msra.mxu0 %v359_v53  ;;  %v9314_v54 = vpop.permute.xlu1 %900  ;;  %v9321_v11 = vpop.permute.xlu0 %898  ;;  %v15104_v53 = vld [vmem:[#allocation9_spill] sm:$0xff] }
  0xc9   :  { %504 = vmatprep.subr.bf16.mxu0 %v351_v6  ;;  %545 = vmatprep.subr.bf16.mxu1 %v362_v3  ;;  %v15105_v6 = vld [vmem:[#allocation10_spill] sm:$0xff]  ;;  %v15106_v3 = vld [vmem:[#allocation11_spill] sm:$0xff] }
  0xca   :  { %1339 = vrot.lane.b32.xlu1 %v8947_v20, %s8786_s15  ;;  %526 = vmatprep.mubr.bf16.mxu0 %v15097_v41 }
  0xcb   :  { %1337 = vrot.lane.b32.xlu0 %v8952_v21, %s8786_s15  ;;  %8199 = vmatmul.mubr.msk.bf16.vlgmr.msra.gmra.mxu1 %vm404_vm1, %v9294_v52 }
  0xcc   :  { %505 = vmatpush1.bf16.msra.mxu0 %v350_v43  ;;  %546 = vmatpush1.bf16.msra.mxu1 %v361_v7  ;;  %v9334_v9 = vpop.permute.xlu1 %904  ;;  %v9342_v38 = vpop.permute.xlu0 %902  ;;  %v8703_v7 = vld [vmem:[%s15007_s0 + $0xc] ss:$44 sps:$4 sm:$0xff]  }
  0xcd   :  { %506 = vmatprep.subr.bf16.mxu0 %v342_v62  ;;  %547 = vmatprep.subr.bf16.mxu1 %v353_v4  ;;  %v8704_v62 = vld [vmem:[%s15007_s0 + $0x8] ss:$44 sps:$4 sm:$0xff]  }
  0xce   :  { %1343 = vrot.lane.b32.xlu1 %v8961_v22, %s8786_s15  ;;  %569 = vmatprep.mubr.bf16.mxu1 %v15097_v41 }
  0xcf   :  { %1341 = vrot.lane.b32.xlu0 %v8966_v23, %s8786_s15 }
  0xd0   :  { %507 = vmatpush1.bf16.msra.mxu0 %v341_v36  ;;  %548 = vmatpush1.bf16.msra.mxu1 %v352_v37  ;;  %v9355_v0 = vpop.permute.xlu1 %908  ;;  %v9363_v34 = vpop.permute.xlu0 %906  ;;  %v8705_v36 = vld [vmem:[%s15007_s0 + $0x14] ss:$44 sps:$4 sm:$0xff]  }
  0xd1   :  { %508 = vmatprep.subr.bf16.mxu0 %v333_v8  ;;  %549 = vmatprep.subr.bf16.mxu1 %v344_v51  ;;  %v9529_v37 = vld [vmem:[%s15007_s0 + $0x8] ss:$44 sps:$4 sm:$0xff]   ;;  %v8706_v8 = vld [vmem:[%s15007_s0 + $0x10] ss:$44 sps:$4 sm:$0xff]  }
  0xd2   :  { %1347 = vrot.lane.b32.xlu1 %v8975_v24, %s8786_s15 }
  0xd3   :  { %1345 = vrot.lane.b32.xlu0 %v8980_v25, %s8786_s15 }
  0xd4   :  { %509 = vmatpush1.bf16.msra.mxu0 %v332_v39  ;;  %550 = vmatpush1.bf16.msra.mxu1 %v343_v40  ;;  %v9375_v55 = vpop.permute.xlu1 %912  ;;  %v9381_v2 = vpop.permute.xlu0 %910  ;;  %v9556_v40 = vld [vmem:[%s15007_s0 + $0x10] ss:$44 sps:$4 sm:$0xff]  }
  0xd5   :  { %551 = vmatprep.subr.bf16.mxu1 %v335_v56  ;;  %588 = vmatprep.subr.bf16.mxu0 %v9271_v61 }
  0xd6   :  { %1351 = vrot.lane.b32.xlu1 %v8989_v26, %s8786_s15 }
  0xd7   :  { %1349 = vrot.lane.b32.xlu0 %v8994_v27, %s8786_s15  ;;  %8200 = vmatmul.mubr.msk.bf16.vlgmr.msra.gmra.mxu0 %vm404_vm1, %v9294_v52 }
  0xd8   :  { %552 = vmatpush1.bf16.msra.mxu1 %v334_v45  ;;  %589 = vmatpush1.bf16.msra.mxu0 %v363_v46  ;;  %v9395_v57 = vpop.permute.xlu1 %916  ;;  %v9398_v58 = vpop.permute.xlu0 %914  ;;  %v9581_v46 = vld [vmem:[%s15007_s0 + $0x18] ss:$44 sps:$4 sm:$0xff]  }
  0xd9   :  { %590 = vmatprep.subr.bf16.mxu0 %v9232_v1  ;;  %679 = vmatprep.subr.bf16.mxu1 %v9017_v30  ;;  %v345_v1 = vsel %vm327_vm0, %v9202_v60, %v9200_v59  ;;  %v15099_v60 = vld [vmem:[#allocation4_spill] sm:$0xff] }
  0xda   :  { %1355 = vrot.lane.b32.xlu1 %v9003_v28, %s8786_s15  ;;  %612 = vmatprep.mubr.bf16.mxu0 %v15097_v41 }
  0xdb   :  { %1353 = vrot.lane.b32.xlu0 %v9008_v29, %s8786_s15  ;;  %8201 = vmatmul.mubr.msk.bf16.vlgmr.msra.gmra.mxu1 %vm404_vm1, %v9294_v52 }
  0xdc   :  { %591 = vmatpush1.bf16.msra.mxu0 %v354_v47  ;;  %680 = vmatpush1.bf16.msra.mxu1 %v9022_v31  ;;  %v9412_v48 = vpop.permute.xlu1 %920  ;;  %v9415_v61 = vpop.permute.xlu0 %918  ;;  %v8707_v47 = vld [vmem:[%s15007_s0 + $0x1c] ss:$44 sps:$4 sm:$0xff]  }
  0xdd   :  { %592 = vmatprep.subr.bf16.mxu0 %v9200_v59  ;;  %681 = vmatprep.subr.bf16.mxu1 %v8947_v20 }
  0xde   :  { %1359 = vrot.lane.b32.xlu1 %v9017_v30, %s8786_s15  ;;  %703 = vmatprep.mubr.bf16.mxu1 %v15097_v41  ;;  %v336_v30 = vsel %vm327_vm0, %v9162_v50, %v9160_v49  ;;  %v15102_v50 = vld [vmem:[#allocation3_spill] sm:$0xff] }
  0xdf   :  { %1357 = vrot.lane.b32.xlu0 %v9022_v31, %s8786_s15 }
  0xe0   :  { %593 = vmatpush1.bf16.msra.mxu0 %v345_v1  ;;  %682 = vmatpush1.bf16.msra.mxu1 %v8952_v21  ;;  %v9427_v35 = vpop.permute.xlu1 %924  ;;  %v9430_v20 = vpop.permute.xlu0 %922  ;;  %v15098_v21 = vld [vmem:[#allocation5_spill] sm:$0xff]  ;;  %v9601_v1 = vld [vmem:[%s15007_s0 + $0x20] ss:$44 sps:$4 sm:$0xff]  }
  0xe1   :  { %594 = vmatprep.subr.bf16.mxu0 %v9160_v49  ;;  %683 = vmatprep.subr.bf16.mxu1 %v8879_v10  ;;  %v15100_v10 = vld [vmem:[#allocation6_spill] sm:$0xff]  ;;  %v9456_v49 = vld [vmem:[%s15008_s1] sm:$0x3f]  }
  0xe2   :  { %1363 = vrot.lane.b32.xlu1 %v9031_v32, %s8786_s15 }
  0xe3   :  { %1361 = vrot.lane.b32.xlu0 %v9036_v33, %s8786_s15 }
  0xe4   :  { %595 = vmatpush1.bf16.msra.mxu0 %v336_v30  ;;  %684 = vmatpush1.bf16.msra.mxu1 %v15098_v21  ;;  %v9441_v31 = vpop.permute.xlu1 %928  ;;  %v9443_v59 = vpop.permute.xlu0 %926  ;;  %v8709_v30 = vld [vmem:[%s15007_s0 + $0x24] ss:$44 sps:$4 sm:$0xff]  }
  0xe5   :  { %685 = vmatprep.subr.bf16.mxu1 %v15099_v60  ;;  %722 = vmatprep.subr.bf16.mxu0 %v9031_v32  ;;  %v9618_v60 = vld [vmem:[%s15007_s0 + $0x58] ss:$44 sps:$4 sm:$0xff]  }
  0xe6   :  { %1367 = vrot.lane.b32.xlu1 %v15100_v10, %s8786_s15 }
  0xe7   :  { %1365 = vrot.lane.b32.xlu0 %v15101_v5, %s8786_s15  ;;  %8202 = vmatmul.mubr.msk.bf16.vlgmr.msra.gmra.mxu0 %vm404_vm1, %v9294_v52  ;;  %v15103_v52 = vld [vmem:[#allocation8_spill] sm:$0xff] }
  0xe8   :  { %686 = vmatpush1.bf16.msra.mxu1 %v15102_v50  ;;  %723 = vmatpush1.bf16.msra.mxu0 %v9036_v33  ;;  %v9460_v44 = vpop.permute.xlu1 %932  ;;  %v9462_v32 = vpop.permute.xlu0 %930 }
  0xe9   :  { %724 = vmatprep.subr.bf16.mxu0 %v8961_v22  ;;  %765 = vmatprep.subr.bf16.mxu1 %v15100_v10 }
  0xea   :  { %746 = vmatprep.mubr.bf16.mxu0 %v15097_v41  ;;  %1371 = vrot.lane.b32.xlu1 %v15103_v52, %s8786_s15 }
  0xeb   :  { %8204 = vmatmul.mubr.msk.bf16.vlgmr.msra.gmra.mxu1 %vm404_vm1, %v9456_v49  ;;  %1369 = vrot.lane.b32.xlu0 %v15104_v53, %s8786_s15 }
  0xec   :  { %725 = vmatpush1.bf16.msra.mxu0 %v8966_v23  ;;  %766 = vmatpush1.bf16.msra.mxu1 %v15101_v5  ;;  %v9475_v33 = vpop.permute.xlu1 %936  ;;  %v9477_v22 = vpop.permute.xlu0 %934  ;;  %v1693_v23 = vld [vmem:[%s15009_s2 + $0x8] sm:$0xf]  ;;  %v8710_v5 = vld [vmem:[%s15007_s0 + $0x20] ss:$44 sps:$4 sm:$0xff]  }
  0xed   :  { %726 = vmatprep.subr.bf16.mxu0 %v8893_v12  ;;  %767 = vmatprep.subr.bf16.mxu1 %v8975_v24  ;;  %v1692_v12 = vld [vmem:[%s15009_s2] sm:$0xff] }
  0xee   :  { %789 = vmatprep.mubr.bf16.mxu1 %v15097_v41  ;;  %1375 = vrot.lane.b32.xlu1 %v15105_v6, %s8786_s15 }
  0xef   :  { %1373 = vrot.lane.b32.xlu0 %v15106_v3, %s8786_s15 }
  0xf0   :  { %727 = vmatpush1.bf16.msra.mxu0 %v8900_v13  ;;  %768 = vmatpush1.bf16.msra.mxu1 %v8980_v25  ;;  %v9491_v43 = vpop.permute.xlu1 %940  ;;  %v9496_v24 = vpop.permute.xlu0 %938  ;;  %v9505_v13 = vld [vmem:[%s15007_s0] ss:$44 sps:$4 sm:$0xff]   ;;  %v9510_v25 = vld [vmem:[%s15007_s0 + $0x4] ss:$44 sps:$4 sm:$0xff]  }
  0xf1   :  { %728 = vmatprep.subr.bf16.mxu0 %v8703_v7  ;;  %769 = vmatprep.subr.bf16.mxu1 %v8907_v14  ;;  %v9654_v7 = vld [vmem:[%s15007_s0 + $0x5c] ss:$44 sps:$4 sm:$0xff]  }
  0xf2   :  { %1701 = vperm.xlu1 %8447, %v1693_v23   ;;  %v993_v23 = vsel %vm974_vm2, %v9477_v22, %v9475_v33  ;;  %v9668_v22 = vld [vmem:[%s15007_s0 + $0x68] ss:$44 sps:$4 sm:$0xff]  }
  0xf3   :  { %1696 = vperm.xlu0 %8446, %v1692_v12  }
  0xf4   :  { %729 = vmatpush1.bf16.msra.mxu0 %v8704_v62  ;;  %770 = vmatpush1.bf16.msra.mxu1 %v8912_v15  ;;  %v9516_v14 = vpop.permute.xlu1 %944  ;;  %v9518_v4 = vpop.permute.xlu0 %942  ;;  %v9538_v15 = vld [vmem:[%s15007_s0 + $0xc] ss:$44 sps:$4 sm:$0xff]  }
  0xf5   :  { %771 = vmatprep.subr.bf16.mxu1 %v8705_v36  ;;  %808 = vmatprep.subr.bf16.mxu0 %v15103_v52  ;;  %v994_v52 = vsel %vm974_vm2, %v9475_v33, %v9496_v24  ;;  %v985_v36 = vsel %vm974_vm2, %v9395_v57, %v9415_v61  ;;  %v996_v33 = vsel %vm974_vm2, %v9491_v43, %v9518_v4 }
  0xf6   :  { %2594 = vrot.lane.b32.xlu1 %v9505_v13, %s8783_s16 }
  0xf7   :  { %8205 = vmatmul.mubr.msk.bf16.vlgmr.msra.gmra.mxu0 %vm404_vm1, %v9456_v49  ;;  %2596 = vrot.lane.b32.xlu0 %v9510_v25, %s8783_s16 }
  0xf8   :  { %772 = vmatpush1.bf16.msra.mxu1 %v8706_v8  ;;  %809 = vmatpush1.bf16.msra.mxu0 %v15104_v53  ;;  %v9544_v51 = vpop.permute.xlu1 %948  ;;  %v9546_v39 = vpop.permute.xlu0 %946  ;;  %v984_v8 = vsel %vm974_vm2, %v9398_v58, %v9395_v57  ;;  %v976_v57 = vsel %vm974_vm2, %v9296_v63, %v9321_v11  ;;  %v987_v58 = vsel %vm974_vm2, %v9412_v48, %v9430_v20 }
  0xf9   :  { %810 = vmatprep.subr.bf16.mxu0 %v8989_v26  ;;  %851 = vmatprep.subr.bf16.mxu1 %v15105_v6  ;;  %v9565_v26 = vld [vmem:[%s15007_s0 + $0x14] ss:$44 sps:$4 sm:$0xff]  }
  0xfa   :  { %832 = vmatprep.mubr.bf16.mxu0 %v15097_v41  ;;  %2598 = vrot.lane.b32.xlu1 %v9529_v37, %s8783_s16 }
  0xfb   :  { %8206 = vmatmul.mubr.msk.bf16.vlgmr.msra.gmra.mxu1 %vm404_vm1, %v9456_v49  ;;  %2600 = vrot.lane.b32.xlu0 %v9538_v15, %s8783_s16 }
  0xfc   :  { %811 = vmatpush1.bf16.msra.mxu0 %v8994_v27  ;;  %852 = vmatpush1.bf16.msra.mxu1 %v15106_v3  ;;  %v9569_v56 = vpop.permute.xlu1 %952  ;;  %v9571_v45 = vpop.permute.xlu0 %950  ;;  %v9588_v27 = vld [vmem:[%s15007_s0 + $0x1c] ss:$44 sps:$4 sm:$0xff]   ;;  %v9643_v3 = vld [vmem:[%s15007_s0 + $0x60] ss:$44 sps:$4 sm:$0xff]  }
  0xfd   :  { %812 = vmatprep.subr.bf16.mxu0 %v8919_v16  ;;  %853 = vmatprep.subr.bf16.mxu1 %v9003_v28 }
  0xfe   :  { %875 = vmatprep.mubr.bf16.mxu1 %v15097_v41  ;;  %2602 = vrot.lane.b32.xlu1 %v9556_v40, %s8783_s16 }
  0xff   :  { %2604 = vrot.lane.b32.xlu0 %v9565_v26, %s8783_s16 }
 0x100   :  { %813 = vmatpush1.bf16.msra.mxu0 %v8924_v17  ;;  %854 = vmatpush1.bf16.msra.mxu1 %v9008_v29  ;;  %v957_v16 = vpop.permute.xlu1 %956  ;;  %v955_v28 = vpop.permute.xlu0 %954  ;;  %v8708_v17 = vld [vmem:[%s15007_s0 + $0x18] ss:$44 sps:$4 sm:$0xff]  }
 0x101   :  { %814 = vmatprep.subr.bf16.mxu0 %v8707_v47  ;;  %855 = vmatprep.subr.bf16.mxu1 %v8933_v18  ;;  %v1002_v10 = vsel %vm974_vm2, %v955_v28, %v957_v16  ;;  %v9681_v28 = vld [vmem:[%s15007_s0 + $0x64] ss:$44 sps:$4 sm:$0xff]  }
 0x102   :  { %2606 = vrot.lane.b32.xlu1 %v9581_v46, %s8783_s16 }
 0x103   :  { %2608 = vrot.lane.b32.xlu0 %v9588_v27, %s8783_s16 }
 0x104   :  { %815 = vmatpush1.bf16.msra.mxu0 %v8708_v17  ;;  %856 = vmatpush1.bf16.msra.mxu1 %v8938_v19  ;;  %v961_v29 = vpop.permute.xlu1 %960  ;;  %v959_v18 = vpop.permute.xlu0 %958  ;;  %v9623_v19 = vld [vmem:[%s15007_s0 + $0x24] ss:$44 sps:$4 sm:$0xff]   ;;  %v975_v17 = vsel %vm974_vm2, %v9302_v42, %v9296_v63  ;;  %v978_v42 = vsel %vm974_vm2, %v9314_v54, %v9342_v38 }
 0x105   :  { %857 = vmatprep.subr.bf16.mxu1 %v8709_v30  ;;  %v1003_v21 = vsel %vm974_vm2, %v957_v16, %v959_v18  ;;  %v1004_v12 = vsel %vm974_vm2, %v959_v18, %v961_v29  ;;  %v995_v16 = vsel %vm974_vm2, %v9496_v24, %v9491_v43  ;;  %v9698_v24 = vld [vmem:[%s15007_s0 + $0x70] ss:$44 sps:$4 sm:$0xff]   ;;  %v9716_v30 = vld [vmem:[%s15007_s0 + $0x6c] ss:$44 sps:$4 sm:$0xff]  }
 0x106   :  { %2610 = vrot.lane.b32.xlu1 %v9601_v1, %s8783_s16  ;;  %1062 = vmatprep.subr.bf16.mxu0 %v1003_v21  ;;  %v9709_v18 = vld [vmem:[%s15008_s1 + $0x10] sm:$0x3f]   ;;  %v9731_v21 = vld [vmem:[%s15007_s0 + $0x78] ss:$44 sps:$4 sm:$0xff]  }
 0x107   :  { %8207 = vmatmul.mubr.msk.bf16.vlgmr.msra.gmra.mxu0 %vm404_vm1, %v9456_v49  ;;  %2612 = vrot.lane.b32.xlu0 %v9623_v19, %s8783_s16 }
 0x108   :  { %858 = vmatpush1.bf16.msra.mxu1 %v8710_v5  ;;  %1063 = vmatpush1.bf16.msra.mxu0 %v1002_v10  ;;  %v965_v50 = vpop.permute.xlu1 %964  ;;  %v963_v53 = vpop.permute.xlu0 %962  ;;  %v977_v10 = vsel %vm974_vm2, %v9321_v11, %v9314_v54 }
 0x109   :  { %1064 = vmatprep.subr.bf16.mxu0 %v994_v52  ;;  %1086 = vmatprep.mubr.bf16.mxu0 %v15097_v41  ;;  %v1005_v6 = vsel %vm974_vm2, %v961_v29, %v963_v53  ;;  %v986_v29 = vsel %vm974_vm2, %v9415_v61, %v9412_v48  ;;  %v1006_v5 = vsel %vm974_vm2, %v963_v53, %v965_v50  ;;  %v9744_v52 = vld [vmem:[%s15007_s0 + $0x74] ss:$44 sps:$4 sm:$0xff]  }
 0x10a   :  { %2614 = vrot.lane.b32.xlu1 %v9618_v60, %s8783_s16  ;;  %1105 = vmatprep.subr.bf16.mxu1 %v1005_v6  ;;  %v997_v53 = vsel %vm974_vm2, %v9518_v4, %v9516_v14 }
 0x10b   :  { %8208 = vmatmul.mubr.msk.bf16.vlgmr.msra.gmra.mxu1 %vm404_vm1, %v9456_v49  ;;  %2616 = vrot.lane.b32.xlu0 %v9654_v7, %s8783_s16 }
 0x10c   :  { %1065 = vmatpush1.bf16.msra.mxu0 %v993_v23  ;;  %1106 = vmatpush1.bf16.msra.mxu1 %v1004_v12  ;;  %v969_v62 = vpop.permute.xlu1 %968  ;;  %v967_v49 = vpop.permute.xlu0 %966  ;;  %v998_v23 = vsel %vm974_vm2, %v9516_v14, %v9546_v39  ;;  %v1000_v14 = vsel %vm974_vm2, %v9544_v51, %v9571_v45 }
 0x10d   :  { %1066 = vmatprep.subr.bf16.mxu0 %v985_v36  ;;  %1107 = vmatprep.subr.bf16.mxu1 %v996_v33  ;;  %v1007_v48 = vsel %vm974_vm2, %v965_v50, %v967_v49  ;;  %v9761_v50 = vld [vmem:[%s15007_s0 + $0xb0] ss:$44 sps:$4 sm:$0xff]   ;;  %v1008_v12 = vsel %vm974_vm2, %v967_v49, %v969_v62  ;;  %v988_v49 = vsel %vm974_vm2, %v9430_v20, %v9427_v35 }
 0x10e   :  { %1129 = vmatprep.mubr.bf16.mxu1 %v15097_v41  ;;  %2618 = vrot.lane.b32.xlu1 %v9643_v3, %s8783_s16  ;;  %v9774_v36 = vld [vmem:[%s15007_s0 + $0x7c] ss:$44 sps:$4 sm:$0xff]   ;;  %v991_v20 = vsel %vm974_vm2, %v9441_v31, %v9462_v32 }
 0x10f   :  { %2620 = vrot.lane.b32.xlu0 %v9681_v28, %s8783_s16 }
 0x110   :  { %1067 = vmatpush1.bf16.msra.mxu0 %v984_v8  ;;  %1108 = vmatpush1.bf16.msra.mxu1 %v995_v16  ;;  %v9683_v47 = vpop.permute.xlu1 %972  ;;  %v9691_v43 = vpop.permute.xlu0 %970  ;;  %v989_v8 = vsel %vm974_vm2, %v9427_v35, %v9443_v59  ;;  %v999_v16 = vsel %vm974_vm2, %v9546_v39, %v9544_v51  ;;  %v980_v35 = vsel %vm974_vm2, %v9334_v9, %v9363_v34  ;;  %v8547_v39 = vld [vmem:[%s15007_s0 + $0xc0] ss:$44 sps:$4 sm:$0xff]  }
 0x111   :  { %1068 = vmatprep.subr.bf16.mxu0 %v976_v57  ;;  %1109 = vmatprep.subr.bf16.mxu1 %v987_v58  ;;  %v1009_v54 = vsel %vm974_vm2, %v969_v62, %v9691_v43  ;;  %v9792_v62 = vld [vmem:[%s15007_s0 + $0xb8] ss:$44 sps:$4 sm:$0xff]   ;;  %v9805_v57 = vld [vmem:[%s15007_s0 + $0xb4] ss:$44 sps:$4 sm:$0xff]  }
 0x112   :  { %2622 = vrot.lane.b32.xlu1 %v9668_v22, %s8783_s16 }
 0x113   :  { %2624 = vrot.lane.b32.xlu0 %v9716_v30, %s8783_s16 }
 0x114   :  { %1069 = vmatpush1.bf16.msra.mxu0 %v975_v17  ;;  %1110 = vmatpush1.bf16.msra.mxu1 %v986_v29  ;;  %v9718_v63 = vpop.permute.xlu1 %1299  ;;  %v9724_v61 = vpop.permute.xlu0 %1297  ;;  %v979_v17 = vsel %vm974_vm2, %v9342_v38, %v9334_v9  ;;  %v990_v29 = vsel %vm974_vm2, %v9443_v59, %v9441_v31  ;;  %v982_v9 = vsel %vm974_vm2, %v9355_v0, %v9381_v2  ;;  %v8550_v31 = vld [vmem:[%s15007_s0 + $0xc8] ss:$44 sps:$4 sm:$0xff]  }
 0x115   :  { %1111 = vmatprep.subr.bf16.mxu1 %v978_v42  ;;  %1148 = vmatprep.subr.bf16.mxu0 %v1007_v48  ;;  %v9833_v42 = vld [vmem:[%s15007_s0 + $0xbc] ss:$44 sps:$4 sm:$0xff]   ;;  %v981_v59 = vsel %vm974_vm2, %v9363_v34, %v9355_v0  ;;  %v1001_v34 = vsel %vm974_vm2, %v9571_v45, %v9569_v56  ;;  %v992_v45 = vsel %vm974_vm2, %v9462_v32, %v9460_v44 }
 0x116   :  { %2626 = vrot.lane.b32.xlu1 %v9698_v24, %s8783_s16  ;;  %v8553_v0 = vld [vmem:[%s15007_s0 + $0xd0] ss:$44 sps:$4 sm:$0xff]   ;;  %v983_v32 = vsel %vm974_vm2, %v9381_v2, %v9375_v55 }
 0x117   :  { %8212 = vmatmul.mubr.msk.bf16.vlgmr.msra.gmra.mxu0 %vm404_vm1, %v9709_v18  ;;  %2628 = vrot.lane.b32.xlu0 %v9744_v52, %s8783_s16 }
 0x118   :  { %1112 = vmatpush1.bf16.msra.mxu1 %v977_v10  ;;  %1149 = vmatpush1.bf16.msra.mxu0 %v1006_v5  ;;  %v9746_v6 = vpop.permute.xlu1 %1303  ;;  %v9753_v11 = vpop.permute.xlu0 %1301  ;;  %v1010_v10 = vsel %vm974_vm2, %v9691_v43, %v9683_v47  ;;  %v8552_v5 = vld [vmem:[%s15007_s0 + $0xc4] ss:$44 sps:$4 sm:$0xff]  }
 0x119   :  { %1150 = vmatprep.subr.bf16.mxu0 %v998_v23  ;;  %1191 = vmatprep.subr.bf16.mxu1 %v1009_v54 }
 0x11a   :  { %1172 = vmatprep.mubr.bf16.mxu0 %v15097_v41  ;;  %2630 = vrot.lane.b32.xlu1 %v9731_v21, %s8783_s16 }
 0x11b   :  { %8213 = vmatmul.mubr.msk.bf16.vlgmr.msra.gmra.mxu1 %vm404_vm1, %v9709_v18  ;;  %2632 = vrot.lane.b32.xlu0 %v9774_v36, %s8783_s16 }
 0x11c   :  { %1151 = vmatpush1.bf16.msra.mxu0 %v997_v53  ;;  %1192 = vmatpush1.bf16.msra.mxu1 %v1008_v12  ;;  %v9776_v33 = vpop.permute.xlu1 %1307  ;;  %v9784_v4 = vpop.permute.xlu0 %1305  ;;  %v8558_v12 = vld [vmem:[%s15007_s0 + $0xd4] ss:$44 sps:$4 sm:$0xff]  }
 0x11d   :  { %1152 = vmatprep.subr.bf16.mxu0 %v989_v8  ;;  %1193 = vmatprep.subr.bf16.mxu1 %v1000_v14 }
 0x11e   :  { %1215 = vmatprep.mubr.bf16.mxu1 %v15097_v41  ;;  %2634 = vrot.lane.b32.xlu1 %v9761_v50, %s8783_s16 }
 0x11f   :  { %2636 = vrot.lane.b32.xlu0 %v9805_v57, %s8783_s16 }
 0x120   :  { %1153 = vmatpush1.bf16.msra.mxu0 %v988_v49  ;;  %1194 = vmatpush1.bf16.msra.mxu1 %v999_v16  ;;  %v9807_v58 = vpop.permute.xlu1 %1311  ;;  %v9815_v51 = vpop.permute.xlu0 %1309  ;;  %v9917_v49 = vld [vmem:[%s15007_s0 + $0x10c] ss:$44 sps:$4 sm:$0xff]  }
 0x121   :  { %1154 = vmatprep.subr.bf16.mxu0 %v980_v35  ;;  %1195 = vmatprep.subr.bf16.mxu1 %v991_v20  ;;  %v8562_v20 = vld [vmem:[%s15007_s0 + $0x118] ss:$44 sps:$4 sm:$0xff]  }
 0x122   :  { %2638 = vrot.lane.b32.xlu1 %v9792_v62, %s8783_s16 }
 0x123   :  { %2640 = vrot.lane.b32.xlu0 %v9833_v42, %s8783_s16 }
 0x124   :  { %1155 = vmatpush1.bf16.msra.mxu0 %v979_v17  ;;  %1196 = vmatpush1.bf16.msra.mxu1 %v990_v29  ;;  %v9835_v48 = vpop.permute.xlu1 %1315  ;;  %v9841_v38 = vpop.permute.xlu0 %1313  ;;  %v9951_v17 = vld [vmem:[%s15007_s0 + $0x11c] ss:$44 sps:$4 sm:$0xff]  }
 0x125   :  { %1197 = vmatprep.subr.bf16.mxu1 %v982_v9  ;;  %1234 = vmatprep.subr.bf16.mxu0 %v9683_v47  ;;  %v8555_v47 = vld [vmem:[%s15007_s0 + $0xcc] ss:$44 sps:$4 sm:$0xff]  }
 0x126   :  { %2642 = vrot.lane.b32.xlu1 %v8547_v39, %s8783_s16 }
 0x127   :  { %8214 = vmatmul.mubr.msk.bf16.vlgmr.msra.gmra.mxu0 %vm404_vm1, %v9709_v18  ;;  %2644 = vrot.lane.b32.xlu0 %v8552_v5, %s8783_s16 }
 0x128   :  { %1198 = vmatpush1.bf16.msra.mxu1 %v981_v59  ;;  %1235 = vmatpush1.bf16.msra.mxu0 %v1010_v10  ;;  %v9860_v23 = vpop.permute.xlu1 %1319  ;;  %v9863_v54 = vpop.permute.xlu0 %1317  ;;  %v9962_v59 = vld [vmem:[%s15007_s0 + $0x124] ss:$44 sps:$4 sm:$0xff]  }
 0x129   :  { %1236 = vmatprep.subr.bf16.mxu0 %v9569_v56  ;;  %1258 = vmatprep.mubr.bf16.mxu0 %v15097_v41  ;;  %v9889_v56 = vld [vmem:[%s15007_s0 + $0x108] ss:$44 sps:$4 sm:$0xff]  }
 0x12a   :  { %2646 = vrot.lane.b32.xlu1 %v8550_v31, %s8783_s16  ;;  %v8568_v31 = vld [vmem:[%s15007_s0 + $0x128] ss:$44 sps:$4 sm:$0xff]  }
 0x12b   :  { %8215 = vmatmul.mubr.msk.bf16.vlgmr.msra.gmra.mxu1 %vm404_vm1, %v9709_v18  ;;  %2648 = vrot.lane.b32.xlu0 %v8555_v47, %s8783_s16 }
 0x12c   :  { %1237 = vmatpush1.bf16.msra.mxu0 %v1001_v34  ;;  %v9879_v43 = vpop.permute.xlu1 %1323  ;;  %1489 = vmatprep.mubr.bf16.mxu1 %v15097_v41  ;;  %v9883_v53 = vpop.permute.xlu0 %1321 }
 0x12d   :  { %1238 = vmatprep.subr.bf16.mxu0 %v9460_v44  ;;  %v9908_v44 = vld [vmem:[%s15007_s0 + $0x110] ss:$44 sps:$4 sm:$0xff]  }
 0x12e   :  { %2650 = vrot.lane.b32.xlu1 %v8553_v0, %s8783_s16  ;;  %v8571_v0 = vld [vmem:[%s15007_s0 + $0x12c] ss:$44 sps:$4 sm:$0xff]  }
 0x12f   :  { %2652 = vrot.lane.b32.xlu0 %v8558_v12, %s8783_s16 }
 0x130   :  { %1239 = vmatpush1.bf16.msra.mxu0 %v992_v45  ;;  %v9898_v8 = vpop.permute.xlu1 %1327  ;;  %v9901_v14 = vpop.permute.xlu0 %1325 }
 0x131   :  { %1240 = vmatprep.subr.bf16.mxu0 %v9375_v55  ;;  %v9935_v55 = vld [vmem:[%s15007_s0 + $0x114] ss:$44 sps:$4 sm:$0xff]  }
 0x132   :  { %2654 = vrot.lane.b32.xlu1 %v9889_v56, %s8783_s16 }
 0x133   :  { %2656 = vrot.lane.b32.xlu0 %v9917_v49, %s8783_s16 }
 0x134   :  { %1241 = vmatpush1.bf16.msra.mxu0 %v983_v32  ;;  %v9919_v16 = vpop.permute.xlu1 %1331  ;;  %v9921_v35 = vpop.permute.xlu0 %1329 }
 0x136   :  { %2658 = vrot.lane.b32.xlu1 %v9908_v44, %s8783_s16 }
 0x137   :  { %8216 = vmatmul.mubr.msk.bf16.vlgmr.msra.gmra.mxu0 %vm404_vm1, %v9709_v18  ;;  %v8565_v18 = vld [vmem:[%s15007_s0 + $0x120] ss:$44 sps:$4 sm:$0xff]   ;;  %2660 = vrot.lane.b32.xlu0 %v9935_v55, %s8783_s16 }
 0x138   :  { %v9937_v2 = vpop.permute.xlu1 %1335  ;;  %1532 = vmatprep.mubr.bf16.mxu0 %v15097_v41  ;;  %v9940_v39 = vpop.permute.xlu0 %1333 }
 0x13a   :  { %2662 = vrot.lane.b32.xlu1 %v8562_v20, %s8783_s16 }
 0x13b   :  { %2664 = vrot.lane.b32.xlu0 %v9951_v17, %s8783_s16 }
 0x13c   :  { %v1340_v29 = vpop.permute.xlu1 %1339 }
 0x13d   :  { %v1338_v9 = vpop.permute.xlu0 %1337 }
 0x13e   :  { %2666 = vrot.lane.b32.xlu1 %v8565_v18, %s8783_s16 }
 0x13f   :  { %2668 = vrot.lane.b32.xlu0 %v9962_v59, %s8783_s16 }
 0x140   :  { %v1344_v10 = vpop.permute.xlu1 %1343 }
 0x141   :  { %v1342_v5 = vpop.permute.xlu0 %1341 }
 0x142   :  { %2670 = vrot.lane.b32.xlu1 %v8568_v31, %s8783_s16 }
 0x143   :  { %2672 = vrot.lane.b32.xlu0 %v8571_v0, %s8783_s16  ;;  %v1396_v0 = vsel %vm1377_vm3, %v1338_v9, %v1340_v29  ;;  %v1379_v9 = vsel %vm1377_vm3, %v9718_v63, %v9753_v11 }
 0x144   :  { %v9970_v34 = vpop.permute.xlu1 %1347 }
 0x145   :  { %v9972_v47 = vpop.permute.xlu0 %1345 }
 0x146   :  { %3239 = vrot.lane.b32.xlu1 %v9505_v13, %s8785_s14 }
 0x147   :  { %3241 = vrot.lane.b32.xlu0 %v9510_v25, %s8785_s14 }
 0x148   :  { %v9977_v45 = vpop.permute.xlu1 %1351 }
 0x149   :  { %v9979_v12 = vpop.permute.xlu0 %1349 }
 0x14a   :  { %3243 = vrot.lane.b32.xlu1 %v9529_v37, %s8785_s14 }
 0x14b   :  { %3245 = vrot.lane.b32.xlu0 %v9538_v15, %s8785_s14 }
 0x14c   :  { %v9985_v32 = vpop.permute.xlu1 %1355 }
 0x14d   :  { %v9987_v20 = vpop.permute.xlu0 %1353 }
 0x14e   :  { %3247 = vrot.lane.b32.xlu1 %v9556_v40, %s8785_s14 }
 0x14f   :  { %3249 = vrot.lane.b32.xlu0 %v9565_v26, %s8785_s14 }
 0x150   :  { %v1360_v18 = vpop.permute.xlu1 %1359 }
 0x151   :  { %v1358_v13 = vpop.permute.xlu0 %1357 }
 0x152   :  { %3251 = vrot.lane.b32.xlu1 %v9581_v46, %s8785_s14  ;;  %v1405_v40 = vsel %vm1377_vm3, %v1358_v13, %v1360_v18  ;;  %v1397_v46 = vsel %vm1377_vm3, %v1340_v29, %v1342_v5  ;;  %v1399_v13 = vsel %vm1377_vm3, %v1344_v10, %v9972_v47  ;;  %v1398_v29 = vsel %vm1377_vm3, %v1342_v5, %v1344_v10  ;;  %v10042_v10 = vld [vmem:[%s15008_s1 + $0x18] sm:$0x3f]  }
 0x153   :  { %3253 = vrot.lane.b32.xlu0 %v9588_v27, %s8785_s14  ;;  %v1388_v27 = vsel %vm1377_vm3, %v9860_v23, %v9883_v53 }
 0x154   :  { %v1364_v15 = vpop.permute.xlu1 %1363 }
 0x155   :  { %v1362_v25 = vpop.permute.xlu0 %1361 }
 0x156   :  { %v1406_v37 = vsel %vm1377_vm3, %v1360_v18, %v1362_v25  ;;  %3255 = vrot.lane.b32.xlu1 %v9601_v1, %s8785_s14  ;;  %v1407_v1 = vsel %vm1377_vm3, %v1362_v25, %v1364_v15  ;;  %v1390_v25 = vsel %vm1377_vm3, %v9879_v43, %v9901_v14 }
 0x157   :  { %1465 = vmatprep.subr.bf16.mxu1 %v1406_v37  ;;  %3257 = vrot.lane.b32.xlu0 %v9623_v19, %s8785_s14  ;;  %v1387_v19 = vsel %vm1377_vm3, %v9863_v54, %v9860_v23  ;;  %v1378_v23 = vsel %vm1377_vm3, %v9724_v61, %v9718_v63  ;;  %v1389_v54 = vsel %vm1377_vm3, %v9883_v53, %v9879_v43 }
 0x158   :  { %1466 = vmatpush1.bf16.msra.mxu1 %v1405_v40  ;;  %v1368_v18 = vpop.permute.xlu1 %1367  ;;  %v1380_v43 = vsel %vm1377_vm3, %v9753_v11, %v9746_v6  ;;  %v1401_v53 = vsel %vm1377_vm3, %v9970_v34, %v9979_v12 }
 0x159   :  { %1467 = vmatprep.subr.bf16.mxu1 %v1397_v46  ;;  %v1366_v31 = vpop.permute.xlu0 %1365 }
 0x15a   :  { %v1408_v26 = vsel %vm1377_vm3, %v1364_v15, %v1366_v31  ;;  %3259 = vrot.lane.b32.xlu1 %v9618_v60, %s8785_s14  ;;  %v1409_v63 = vsel %vm1377_vm3, %v1366_v31, %v1368_v18  ;;  %v1383_v31 = vsel %vm1377_vm3, %v9776_v33, %v9815_v51 }
 0x15b   :  { %1508 = vmatprep.subr.bf16.mxu0 %v1408_v26  ;;  %3261 = vrot.lane.b32.xlu0 %v9654_v7, %s8785_s14  ;;  %v1394_v26 = vsel %vm1377_vm3, %v9919_v16, %v9940_v39 }
 0x15c   :  { %1468 = vmatpush1.bf16.msra.mxu1 %v1396_v0  ;;  %1509 = vmatpush1.bf16.msra.mxu0 %v1407_v1  ;;  %v1372_v5 = vpop.permute.xlu1 %1371 }
 0x15d   :  { %1469 = vmatprep.subr.bf16.mxu1 %v1388_v27  ;;  %1510 = vmatprep.subr.bf16.mxu0 %v1399_v13  ;;  %v1370_v37 = vpop.permute.xlu0 %1369  ;;  %v1395_v13 = vsel %vm1377_vm3, %v9940_v39, %v9937_v2 }
 0x15e   :  { %3263 = vrot.lane.b32.xlu1 %v9643_v3, %s8785_s14  ;;  %v1410_v40 = vsel %vm1377_vm3, %v1368_v18, %v1370_v37 }
 0x15f   :  { %3265 = vrot.lane.b32.xlu0 %v9681_v28, %s8785_s14 }
 0x160   :  { %1470 = vmatpush1.bf16.msra.mxu1 %v1387_v19  ;;  %1511 = vmatpush1.bf16.msra.mxu0 %v1398_v29  ;;  %v1376_v46 = vpop.permute.xlu1 %1375 }
 0x161   :  { %1471 = vmatprep.subr.bf16.mxu1 %v1379_v9  ;;  %1512 = vmatprep.subr.bf16.mxu0 %v1390_v25  ;;  %v1374_v15 = vpop.permute.xlu0 %1373 }
 0x162   :  { %3267 = vrot.lane.b32.xlu1 %v9668_v22, %s8785_s14  ;;  %v1381_v22 = vsel %vm1377_vm3, %v9746_v6, %v9784_v4  ;;  %v1412_v61 = vsel %vm1377_vm3, %v1372_v5, %v1374_v15  ;;  %v1392_v6 = vsel %vm1377_vm3, %v9898_v8, %v9921_v35  ;;  %v1413_v0 = vsel %vm1377_vm3, %v1374_v15, %v1376_v46 }
 0x163   :  { %3269 = vrot.lane.b32.xlu0 %v9716_v30, %s8785_s14  ;;  %v1400_v30 = vsel %vm1377_vm3, %v9972_v47, %v9970_v34  ;;  %v1402_v47 = vsel %vm1377_vm3, %v9979_v12, %v9977_v45  ;;  %v1385_v12 = vsel %vm1377_vm3, %v9807_v58, %v9841_v38 }
 0x164   :  { %1472 = vmatpush1.bf16.msra.mxu1 %v1378_v23  ;;  %1513 = vmatpush1.bf16.msra.mxu0 %v1389_v54 }
 0x165   :  { %1514 = vmatprep.subr.bf16.mxu0 %v1381_v22  ;;  %1551 = vmatprep.subr.bf16.mxu1 %v1410_v40 }
 0x166   :  { %3271 = vrot.lane.b32.xlu1 %v9698_v24, %s8785_s14  ;;  %v1411_v24 = vsel %vm1377_vm3, %v1370_v37, %v1372_v5 }
 0x167   :  { %8220 = vmatmul.mubr.msk.bf16.vlgmr.msra.gmra.mxu1 %vm404_vm1, %v10042_v10  ;;  %3273 = vrot.lane.b32.xlu0 %v9744_v52, %s8785_s14  ;;  %v1391_v52 = vsel %vm1377_vm3, %v9901_v14, %v9898_v8 }
 0x168   :  { %1515 = vmatpush1.bf16.msra.mxu0 %v1380_v43  ;;  %1552 = vmatpush1.bf16.msra.mxu1 %v1409_v63 }
 0x169   :  { %1553 = vmatprep.subr.bf16.mxu1 %v1401_v53  ;;  %1594 = vmatprep.subr.bf16.mxu0 %v1412_v61 }
 0x16a   :  { %1575 = vmatprep.mubr.bf16.mxu1 %v15097_v41  ;;  %3275 = vrot.lane.b32.xlu1 %v9731_v21, %s8785_s14  ;;  %v1403_v21 = vsel %vm1377_vm3, %v9977_v45, %v9987_v20  ;;  %v1393_v45 = vsel %vm1377_vm3, %v9921_v35, %v9919_v16 }
 0x16b   :  { %8221 = vmatmul.mubr.msk.bf16.vlgmr.msra.gmra.mxu0 %vm404_vm1, %v10042_v10  ;;  %3277 = vrot.lane.b32.xlu0 %v9774_v36, %s8785_s14  ;;  %v1382_v36 = vsel %vm1377_vm3, %v9784_v4, %v9776_v33  ;;  %v1384_v4 = vsel %vm1377_vm3, %v9815_v51, %v9807_v58  ;;  %v1404_v58 = vsel %vm1377_vm3, %v9987_v20, %v9985_v32 }
 0x16c   :  { %1554 = vmatpush1.bf16.msra.mxu1 %v1400_v30  ;;  %1595 = vmatpush1.bf16.msra.mxu0 %v1411_v24 }
 0x16d   :  { %1555 = vmatprep.subr.bf16.mxu1 %v1392_v6  ;;  %1596 = vmatprep.subr.bf16.mxu0 %v1403_v21  ;;  %v10080_v11 = vpop.permute.xlu1 %1701 }
 0x16e   :  { %15107 = vst [vmem:[#allocation5_spill] sm:$0xff] %v10080_v11  ;;  %1618 = vmatprep.mubr.bf16.mxu0 %v15097_v41  ;;  %v10083_v34 = vpop.permute.xlu0 %1696  ;;  %3279 = vrot.lane.b32.xlu1 %v9761_v50, %s8785_s14 }
 0x16f   :  { %15108 = vst [vmem:[#allocation4_spill] sm:$0xff] %v10083_v34  ;;  %3281 = vrot.lane.b32.xlu0 %v9805_v57, %s8785_s14  ;;  %v15030_v34 = vmov 0.0  }
 0x170   :  { %1556 = vmatpush1.bf16.msra.mxu1 %v1391_v52  ;;  %1597 = vmatpush1.bf16.msra.mxu0 %v1402_v47  ;;  %26 = vst [vmem:[%s15010_s3 + $0x50] sm:$0xf] %v15030_v34  ;;  %27 = vst [vmem:[%s15010_s3 + $0x58] sm:$0xf] %v15030_v34 }
 0x171   :  { %1557 = vmatprep.subr.bf16.mxu1 %v1383_v31  ;;  %1598 = vmatprep.subr.bf16.mxu0 %v1394_v26  ;;  %v10101_v8 = vpop.permute.xlu1 %2594  ;;  %28 = vst [vmem:[%s15010_s3 + $0x60] sm:$0xf] %v15030_v34  ;;  %29 = vst [vmem:[%s15010_s3 + $0x68] sm:$0xf] %v15030_v34 }
 0x172   :  { %v10103_v14 = vpop.permute.xlu0 %2596  ;;  %3283 = vrot.lane.b32.xlu1 %v9792_v62, %s8785_s14  ;;  %30 = vst [vmem:[%s15010_s3 + $0x70] sm:$0xf] %v15030_v34  ;;  %31 = vst [vmem:[%s15010_s3 + $0x78] sm:$0xf] %v15030_v34 }
 0x173   :  { %3285 = vrot.lane.b32.xlu0 %v9833_v42, %s8785_s14  ;;  %32 = vst [vmem:[%s15010_s3 + $0x80] sm:$0xf] %v15030_v34  ;;  %33 = vst [vmem:[%s15010_s3 + $0x88] sm:$0xf] %v15030_v34 }
 0x174   :  { %1558 = vmatpush1.bf16.msra.mxu1 %v1382_v36  ;;  %1599 = vmatpush1.bf16.msra.mxu0 %v1393_v45  ;;  %34 = vst [vmem:[%s15010_s3 + $0x90] sm:$0xf] %v15030_v34 }
 0x175   :  { %1600 = vmatprep.subr.bf16.mxu0 %v1385_v12  ;;  %1637 = vmatprep.subr.bf16.mxu1 %v1376_v46  ;;  %v10119_v1 = vpop.permute.xlu1 %2598 }
 0x176   :  { %v10121_v33 = vpop.permute.xlu0 %2600 }
 0x177   :  { %8222 = vmatmul.mubr.msk.bf16.vlgmr.msra.gmra.mxu1 %vm404_vm1, %v10042_v10 }
 0x178   :  { %1601 = vmatpush1.bf16.msra.mxu0 %v1384_v4  ;;  %1638 = vmatpush1.bf16.msra.mxu1 %v1413_v0 }
 0x179   :  { %1639 = vmatprep.subr.bf16.mxu1 %v9985_v32  ;;  %1661 = vmatprep.mubr.bf16.mxu1 %v15097_v41  ;;  %v10132_v16 = vpop.permute.xlu1 %2602  ;;  %v1386_v32 = vsel %vm1377_vm3, %v9841_v38, %v9835_v48 }
 0x17a   :  { %v10134_v35 = vpop.permute.xlu0 %2604 }
 0x17b   :  { %8223 = vmatmul.mubr.msk.bf16.vlgmr.msra.gmra.mxu0 %vm404_vm1, %v10042_v10 }
 0x17c   :  { %1640 = vmatpush1.bf16.msra.mxu1 %v1404_v58  ;;  %2785 = vmatprep.mubr.bf16.mxu0 %v15097_v41 }
 0x17d   :  { %1641 = vmatprep.subr.bf16.mxu1 %v9937_v2  ;;  %v10143_v51 = vpop.permute.xlu1 %2606 }
 0x17e   :  { %v10145_v27 = vpop.permute.xlu0 %2608 }
 0x180   :  { %1642 = vmatpush1.bf16.msra.mxu1 %v1395_v13 }
 0x181   :  { %1643 = vmatprep.subr.bf16.mxu1 %v9835_v48  ;;  %v10151_v18 = vpop.permute.xlu1 %2610 }
 0x182   :  { %v10153_v37 = vpop.permute.xlu0 %2612 }
 0x184   :  { %1644 = vmatpush1.bf16.msra.mxu1 %v1386_v32 }
 0x185   :  { %v10158_v20 = vpop.permute.xlu1 %2614 }
 0x186   :  { %v10160_v19 = vpop.permute.xlu0 %2616 }
 0x187   :  { %8224 = vmatmul.mubr.msk.bf16.vlgmr.msra.gmra.mxu1 %vm404_vm1, %v10042_v10  ;;  %v10165_v2 = vpop.f32.mrf.mxu0 }
 0x188   :  { %2828 = vmatprep.mubr.bf16.mxu1 %v15097_v41 }
 0x189   :  { %v10167_v39 = vpop.permute.xlu1 %2618  ;;  %v10171_v9 = vpop.f32.mrf.mxu0 }
 0x18a   :  { %v10169_v29 = vpop.permute.xlu0 %2620 }
 0x18b   :  { %v10173_v25 = vpop.f32.mrf.mxu1  ;;  %v10179_v40 = vpop.f32.mrf.mxu0 }
 0x18c   :  { %15109 = vst [vmem:[#allocation6_spill] sm:$0xff] %v10173_v25  ;;  %15110 = vst [vmem:[#allocation7_spill] sm:$0xff] %v10179_v40  ;;  %v2684_v40 = vsel %vm327_vm0, %v10160_v19, %v10167_v39 }
 0x18d   :  { %v10175_v48 = vpop.permute.xlu1 %2622  ;;  %v10181_v23 = vpop.f32.mrf.mxu1 }
 0x18e   :  { %v10177_v38 = vpop.permute.xlu0 %2624  ;;  %15111 = vst [vmem:[#allocation3_spill] sm:$0xff] %v10181_v23  ;;  %v10187_v5 = vpop.f32.mrf.mxu0 }
 0x18f   :  { %15112 = vst [vmem:[#allocation8_spill] sm:$0xff] %v10187_v5  ;;  %v10189_v15 = vpop.f32.mrf.mxu1 }
 0x190   :  { %15113 = vst [vmem:[#allocation9_spill] sm:$0xff] %v10189_v15 }
 0x191   :  { %v10183_v54 = vpop.permute.xlu1 %2626  ;;  %v10197_v43 = vpop.f32.mrf.mxu1 }
 0x192   :  { %v10185_v10 = vpop.permute.xlu0 %2628  ;;  %15115 = vst [vmem:[#allocation11_spill] sm:$0xff] %v10197_v43 }
 0x195   :  { %v10191_v22 = vpop.permute.xlu1 %2630 }
 0x196   :  { %v10193_v63 = vpop.permute.xlu0 %2632 }
 0x197   :  { %v10195_v61 = vpop.f32.mrf.mxu0 }
 0x198   :  { %15114 = vst [vmem:[#allocation10_spill] sm:$0xff] %v10195_v61 }
 0x199   :  { %v2635_v53 = vpop.permute.xlu1 %2634  ;;  %v10199_v46 = vpop.f32.mrf.mxu0 }
 0x19a   :  { %v2637_v24 = vpop.permute.xlu0 %2636  ;;  %15116 = vst [vmem:[#allocation12_spill] sm:$0xff] %v10199_v46 }
 0x19b   :  { %v10201_v30 = vpop.f32.mrf.mxu1  ;;  %v10203_v52 = vpop.f32.mrf.mxu0 }
 0x19c   :  { %15117 = vst [vmem:[#allocation13_spill] sm:$0xff] %v10203_v52 }
 0x19d   :  { %v2639_v6 = vpop.permute.xlu1 %2638  ;;  %v10205_v47 = vpop.f32.mrf.mxu1 }
 0x19e   :  { %v2641_v21 = vpop.permute.xlu0 %2640  ;;  %v10211_v36 = vpop.f32.mrf.mxu0 }
 0x19f   :  { %15118 = vst [vmem:[#allocation14_spill] sm:$0xff] %v10211_v36  ;;  %v10213_v45 = vpop.f32.mrf.mxu1 }
 0x1a0   :  { %15119 = vst [vmem:[#allocation15_spill] sm:$0xff] %v10213_v45 }
 0x1a1   :  { %v10207_v31 = vpop.permute.xlu1 %2642  ;;  %v10221_v58 = vpop.f32.mrf.mxu1 }
 0x1a2   :  { %v10209_v26 = vpop.permute.xlu0 %2644  ;;  %15120 = vst [vmem:[#allocation16_spill] sm:$0xff] %v10221_v58  ;;  %v2693_v58 = vsel %vm327_vm0, %v2637_v24, %v2639_v6 }
 0x1a5   :  { %v10215_v12 = vpop.permute.xlu1 %2646 }
 0x1a6   :  { %v10217_v0 = vpop.permute.xlu0 %2648 }
 0x1a7   :  { %v10219_v4 = vpop.f32.mrf.mxu0 }
 0x1a9   :  { %v10223_v13 = vpop.permute.xlu1 %2650  ;;  %v10227_v46 = vpop.f32.mrf.mxu0 }
 0x1aa   :  { %v10225_v32 = vpop.permute.xlu0 %2652  ;;  %15121 = vst [vmem:[#allocation17_spill] sm:$0xff] %v10227_v46 }
 0x1ab   :  { %v10229_v61 = vpop.f32.mrf.mxu1  ;;  %v10231_v52 = vpop.f32.mrf.mxu0 }
 0x1ac   :  { %15122 = vst [vmem:[#allocation18_spill] sm:$0xff] %v10231_v52  ;;  %v2692_v52 = vsel %vm327_vm0, %v2635_v53, %v2637_v24  ;;  %v2686_v24 = vsel %vm327_vm0, %v10169_v29, %v10175_v48 }
 0x1ad   :  { %v2655_v23 = vpop.permute.xlu1 %2654  ;;  %v10233_v45 = vpop.f32.mrf.mxu1 }
 0x1ae   :  { %v2657_v36 = vpop.permute.xlu0 %2656  ;;  %15123 = vst [vmem:[#allocation19_spill] sm:$0xff] %v10233_v45 }
 0x1af   :  { %v2701_v11 = vsel %vm327_vm0, %v2655_v23, %v2657_v36  ;;  %v10274_v23 = vpop.f32.mrf.mxu0 }
 0x1b0   :  { %15124 = vst [vmem:[#allocation20_spill] sm:$0xff] %v10274_v23 }
 0x1b1   :  { %v2659_v25 = vpop.permute.xlu1 %2658 }
 0x1b2   :  { %v2702_v43 = vsel %vm327_vm0, %v2657_v36, %v2659_v25  ;;  %v2661_v15 = vpop.permute.xlu0 %2660  ;;  %v10276_v36 = vpop.f32.mrf.mxu1 }
 0x1b3   :  { %2761 = vmatprep.subr.bf16.mxu0 %v2702_v43  ;;  %v2703_v5 = vsel %vm327_vm0, %v2659_v25, %v2661_v15  ;;  %v2695_v43 = vsel %vm327_vm0, %v2641_v21, %v10207_v31  ;;  %v2694_v25 = vsel %vm327_vm0, %v2639_v6, %v2641_v21 }
 0x1b4   :  { %2762 = vmatpush1.bf16.msra.mxu0 %v2701_v11  ;;  %v10288_v23 = vpop.f32.mrf.mxu1  ;;  %v2683_v11 = vsel %vm327_vm0, %v10158_v20, %v10160_v19  ;;  %v2674_v20 = vsel %vm327_vm0, %v10101_v8, %v10103_v14  ;;  %v2685_v19 = vsel %vm327_vm0, %v10167_v39, %v10169_v29  ;;  %v2676_v29 = vsel %vm327_vm0, %v10119_v1, %v10121_v33 }
 0x1b5   :  { %2763 = vmatprep.subr.bf16.mxu0 %v2693_v58  ;;  %v2663_v46 = vpop.permute.xlu1 %2662  ;;  %v10319_v58 = vld [vmem:[%s15008_s1 + $0x28] sm:$0x3f]  }
 0x1b6   :  { %v2704_v45 = vsel %vm327_vm0, %v2661_v15, %v2663_v46  ;;  %v2675_v15 = vsel %vm327_vm0, %v10103_v14, %v10119_v1  ;;  %v2696_v1 = vsel %vm327_vm0, %v10207_v31, %v10209_v26 }
 0x1b7   :  { %2804 = vmatprep.subr.bf16.mxu1 %v2704_v45  ;;  %v10286_v34 = vpop.f32.mrf.mxu0  ;;  %v2677_v45 = vsel %vm327_vm0, %v10121_v33, %v10132_v16 }
 0x1b8   :  { %2764 = vmatpush1.bf16.msra.mxu0 %v2692_v52  ;;  %2805 = vmatpush1.bf16.msra.mxu1 %v2703_v5  ;;  %v2665_v5 = vpop.permute.xlu0 %2664 }
 0x1b9   :  { %2765 = vmatprep.subr.bf16.mxu0 %v2684_v40  ;;  %2806 = vmatprep.subr.bf16.mxu1 %v2695_v43  ;;  %v2667_v52 = vpop.permute.xlu1 %2666  ;;  %v10302_v40 = vpop.f32.mrf.mxu0  ;;  %v2705_v39 = vsel %vm327_vm0, %v2663_v46, %v2665_v5 }
 0x1ba   :  { %v2706_v21 = vsel %vm327_vm0, %v2665_v5, %v2667_v52 }
 0x1bb   :  { %v10294_v53 = vpop.f32.mrf.mxu1  ;;  %v10321_v14 = vpop.f32.mrf.mxu0 }
 0x1bc   :  { %2766 = vmatpush1.bf16.msra.mxu0 %v2683_v11  ;;  %2807 = vmatpush1.bf16.msra.mxu1 %v2694_v25  ;;  %v2669_v8 = vpop.permute.xlu0 %2668  ;;  %v2697_v25 = vsel %vm327_vm0, %v10209_v26, %v10215_v12 }
 0x1bd   :  { %2767 = vmatprep.subr.bf16.mxu0 %v2675_v15  ;;  %2808 = vmatprep.subr.bf16.mxu1 %v2686_v24  ;;  %v10310_v6 = vpop.f32.mrf.mxu1  ;;  %v2671_v43 = vpop.permute.xlu1 %2670  ;;  %v2707_v33 = vsel %vm327_vm0, %v2667_v52, %v2669_v8  ;;  %v2687_v52 = vsel %vm327_vm0, %v10175_v48, %v10177_v38  ;;  %v2678_v48 = vsel %vm327_vm0, %v10132_v16, %v10134_v35 }
 0x1be   :  { %v2708_v15 = vsel %vm327_vm0, %v2669_v8, %v2671_v43  ;;  %v10335_v24 = vpop.f32.mrf.mxu0  ;;  %v2679_v8 = vsel %vm327_vm0, %v10134_v35, %v10143_v51  ;;  %v2680_v35 = vsel %vm327_vm0, %v10143_v51, %v10145_v27  ;;  %v2700_v51 = vsel %vm327_vm0, %v10223_v13, %v10225_v32 }
 0x1bf   :  { %v10327_v11 = vpop.f32.mrf.mxu1 }
 0x1c0   :  { %2768 = vmatpush1.bf16.msra.mxu0 %v2674_v20  ;;  %2809 = vmatpush1.bf16.msra.mxu1 %v2685_v19  ;;  %v2688_v20 = vsel %vm327_vm0, %v10177_v38, %v10183_v54  ;;  %v2699_v19 = vsel %vm327_vm0, %v10217_v0, %v10223_v13  ;;  %v2689_v38 = vsel %vm327_vm0, %v10183_v54, %v10185_v10 }
 0x1c1   :  { %2847 = vmatprep.subr.bf16.mxu0 %v2706_v21  ;;  %2810 = vmatprep.subr.bf16.mxu1 %v2677_v45  ;;  %v10341_v5 = vpop.f32.mrf.mxu1  ;;  %v2691_v13 = vsel %vm327_vm0, %v10191_v22, %v10193_v63 }
 0x1c3   :  { %8270 = vmatmul.mubr.msk.bf16.vlgmr.msra.gmra.mxu0 %vm404_vm1, %v10319_v58 }
 0x1c4   :  { %2848 = vmatpush1.bf16.msra.mxu0 %v2705_v39  ;;  %2811 = vmatpush1.bf16.msra.mxu1 %v2676_v29  ;;  %v15125_v29 = vmov 0.0  }
 0x1c5   :  { %2849 = vmatprep.subr.bf16.mxu0 %v2697_v25  ;;  %2890 = vmatprep.subr.bf16.mxu1 %v2708_v15  ;;  %25 = vst.msk [vmem:[%s15010_s3 + $0x48] sm:$0xff] %vm24_vm4, %v15125_v29 }
 0x1c6   :  { %2871 = vmatprep.mubr.bf16.mxu0 %v15097_v41  ;;  %36 = vst.msk [vmem:[%s15010_s3 + $0x98] sm:$0xf] %vm35_vm5, %v15125_v29 }
 0x1c7   :  { %v834_v46 = vpop.f32.mrf.mxu0  ;;  %8271 = vmatmul.mubr.msk.bf16.vlgmr.msra.gmra.mxu1 %vm404_vm1, %v10319_v58 }
 0x1c8   :  { %v10351_v21 = vadd.f32 %v834_v46, %v10201_v30  ;;  %2850 = vmatpush1.bf16.msra.mxu0 %v2696_v1  ;;  %2891 = vmatpush1.bf16.msra.mxu1 %v2707_v33  ;;  %v2698_v30 = vsel %vm327_vm0, %v10215_v12, %v10217_v0  ;;  %v2673_v12 = vpop.permute.xlu0 %2672  ;;  %v2681_v0 = vsel %vm327_vm0, %v10145_v27, %v10151_v18 }
 0x1c9   :  { %v836_v31 = vpop.f32.mrf.mxu0  ;;  %2851 = vmatprep.subr.bf16.mxu0 %v2688_v20  ;;  %2892 = vmatprep.subr.bf16.mxu1 %v2699_v19  ;;  %v2709_v16 = vsel %vm327_vm0, %v2671_v43, %v2673_v12  ;;  %v706_v19 = vadd.f32 %v10229_v61, %v10165_v2 }
 0x1ca   :  { %v10356_v26 = vadd.f32 %v836_v31, %v10205_v47  ;;  %v2690_v47 = vsel %vm327_vm0, %v10185_v10, %v10191_v22  ;;  %2914 = vmatprep.mubr.bf16.mxu1 %v15097_v41 }
 0x1cb   :  { %v877_v45 = vpop.f32.mrf.mxu1  ;;  %v10396_v54 = vpop.f32.mrf.mxu0 }
 0x1cc   :  { %v10372_v39 = vadd.f32 %v877_v45, %v10219_v4  ;;  %2852 = vmatpush1.bf16.msra.mxu0 %v2687_v52  ;;  %2893 = vmatpush1.bf16.msra.mxu1 %v2698_v30  ;;  %v15127_v45 = vld [vmem:[#allocation7_spill] sm:$0xff] }
 0x1cd   :  { %2853 = vmatprep.subr.bf16.mxu0 %v2679_v8  ;;  %2894 = vmatprep.subr.bf16.mxu1 %v2690_v47  ;;  %v10383_v4 = vpop.f32.mrf.mxu1  ;;  %v10413_v27 = vpop.f32.mrf.mxu0  ;;  %v710_v8 = vadd.f32 %v10276_v36, %v15127_v45 }
 0x1cf   :  { %v10398_v10 = vpop.f32.mrf.mxu1 }
 0x1d0   :  { %2854 = vmatpush1.bf16.msra.mxu0 %v2678_v48  ;;  %2895 = vmatpush1.bf16.msra.mxu1 %v2689_v38 }
 0x1d1   :  { %2933 = vmatprep.subr.bf16.mxu0 %v2673_v12  ;;  %2896 = vmatprep.subr.bf16.mxu1 %v2681_v0  ;;  %v10415_v43 = vpop.f32.mrf.mxu1  ;;  %v15128_v12 = vld [vmem:[#allocation8_spill] sm:$0xff] }
 0x1d2   :  { %v712_v2 = vadd.f32 %v10288_v23, %v15128_v12  ;;  %v15129_v0 = vld [vmem:[#allocation4_spill] sm:$0xff] }
 0x1d3   :  { %8272 = vmatmul.mubr.msk.bf16.vlgmr.msra.gmra.mxu0 %vm404_vm1, %v10319_v58 }
 0x1d4   :  { %2934 = vmatpush1.bf16.msra.mxu0 %v2709_v16  ;;  %2897 = vmatpush1.bf16.msra.mxu1 %v2680_v35  ;;  %v15130_v35 = vld [vmem:[#allocation9_spill] sm:$0xff] }
 0x1d5   :  { %2935 = vmatprep.subr.bf16.mxu0 %v10225_v32  ;;  %3024 = vmatprep.subr.bf16.mxu1 %v9917_v49 }
 0x1d6   :  { %2957 = vmatprep.mubr.bf16.mxu0 %v15097_v41 }
 0x1d7   :  { %8273 = vmatmul.mubr.msk.bf16.vlgmr.msra.gmra.mxu1 %vm404_vm1, %v10319_v58  ;;  %v1088_v49 = vpop.f32.mrf.mxu0 }
 0x1d8   :  { %2936 = vmatpush1.bf16.msra.mxu0 %v2700_v51  ;;  %3025 = vmatpush1.bf16.msra.mxu1 %v9889_v56  ;;  %v2682_v56 = vsel %vm327_vm0, %v10151_v18, %v10153_v37  ;;  %v10447_v18 = vld [vmem:[%s15007_s0] ss:$44 sps:$4 sm:$0xff]   ;;  %v1269_v52 = vadd.f32 %v1088_v49, %v706_v19 }
 0x1d9   :  { %2937 = vmatprep.subr.bf16.mxu0 %v10193_v63  ;;  %3026 = vmatprep.subr.bf16.mxu1 %v9805_v57  ;;  %v1090_v25 = vpop.f32.mrf.mxu0  ;;  %v10438_v57 = vld [vmem:[%s15007_s0 + $0x4] ss:$44 sps:$4 sm:$0xff]  }
 0x1da   :  { %3048 = vmatprep.mubr.bf16.mxu1 %v15097_v41 }
 0x1db   :  { %v10424_v32 = vpop.f32.mrf.mxu1 }
 0x1dc   :  { %2938 = vmatpush1.bf16.msra.mxu0 %v2691_v13  ;;  %3027 = vmatpush1.bf16.msra.mxu1 %v9761_v50  ;;  %v1092_v50 = vpop.f32.mrf.mxu0 }
 0x1dd   :  { %2939 = vmatprep.subr.bf16.mxu0 %v10153_v37  ;;  %3028 = vmatprep.subr.bf16.mxu1 %v9654_v7  ;;  %v10432_v22 = vpop.f32.mrf.mxu1  ;;  %v1279_v61 = vadd.f32 %v1092_v50, %v710_v8 }
 0x1df   :  { %v1135_v7 = vpop.f32.mrf.mxu1 }
 0x1e0   :  { %2940 = vmatpush1.bf16.msra.mxu0 %v2682_v56  ;;  %3029 = vmatpush1.bf16.msra.mxu1 %v9618_v60  ;;  %v1094_v60 = vpop.f32.mrf.mxu0 }
 0x1e1   :  { %3030 = vmatprep.subr.bf16.mxu1 %v10438_v57  ;;  %3067 = vmatprep.subr.bf16.mxu0 %v9935_v55  ;;  %v1137_v55 = vpop.f32.mrf.mxu1  ;;  %v1280_v49 = vadd.f32 %v1094_v60, %v712_v2  ;;  %v15133_v2 = vld [vmem:[#allocation6_spill] sm:$0xff] }
 0x1e3   :  { %8274 = vmatmul.mubr.msk.bf16.vlgmr.msra.gmra.mxu0 %vm404_vm1, %v10319_v58 }
 0x1e4   :  { %3031 = vmatpush1.bf16.msra.mxu1 %v10447_v18  ;;  %3068 = vmatpush1.bf16.msra.mxu0 %v9908_v44 }
 0x1e5   :  { %3069 = vmatprep.subr.bf16.mxu0 %v9833_v42  ;;  %3110 = vmatprep.subr.bf16.mxu1 %v9951_v17  ;;  %v10470_v17 = vld [vmem:[%s15007_s0 + $0xc] ss:$44 sps:$4 sm:$0xff]  }
 0x1e6   :  { %3091 = vmatprep.mubr.bf16.mxu0 %v15097_v41 }
 0x1e7   :  { %v10454_v37 = vpop.f32.mrf.mxu0 }
 0x1e8   :  { %3070 = vmatpush1.bf16.msra.mxu0 %v9792_v62  ;;  %v10478_v62 = vld [vmem:[%s15007_s0 + $0x8] ss:$44 sps:$4 sm:$0xff]  }
 0x1e9   :  { %3071 = vmatprep.subr.bf16.mxu0 %v9681_v28  ;;  %v10461_v15 = vpop.f32.mrf.mxu0 }
 0x1eb   :  { %v1217_v63 = vpop.f32.mrf.mxu1  ;;  %v10473_v28 = vpop.f32.mrf.mxu0 }
 0x1ec   :  { %v10459_v58 = vadd.f32 %v1217_v63, %v10351_v21  ;;  %3072 = vmatpush1.bf16.msra.mxu0 %v9643_v3  ;;  %v15131_v63 = vld [vmem:[#allocation11_spill] sm:$0xff] }
 0x1ed   :  { %v1219_v44 = vpop.f32.mrf.mxu1  ;;  %3073 = vmatprep.subr.bf16.mxu0 %v10470_v17  ;;  %v10482_v3 = vpop.f32.mrf.mxu0 }
 0x1ee   :  { %v10465_v42 = vadd.f32 %v1219_v44, %v10356_v26  ;;  %v15126_v26 = vld [vmem:[#allocation19_spill] sm:$0xff]  ;;  %v755_v44 = vadd.f32 %v10335_v24, %v15131_v63 }
 0x1ef   :  { %v10487_v46 = vpop.f32.mrf.mxu1 }
 0x1f0   :  { %3074 = vmatpush1.bf16.msra.mxu0 %v10478_v62  ;;  %v1282_v60 = vadd.f32 %v1137_v55, %v755_v44 }
 0x1f1   :  { %3153 = vmatprep.subr.bf16.mxu0 %v9962_v59  ;;  %v10493_v21 = vpop.f32.mrf.mxu1  ;;  %v708_v59 = vadd.f32 %v15126_v26, %v10171_v9  ;;  %v753_v9 = vadd.f32 %v10321_v14, %v15130_v35  ;;  %v15132_v26 = vld [vmem:[#allocation5_spill] sm:$0xff] }
 0x1f3   :  { %v1270_v47 = vadd.f32 %v1090_v25, %v708_v59  ;;  %v1281_v50 = vadd.f32 %v1135_v7, %v753_v9  ;;  %v1776_v9 = vld [vmem:[%s15010_s3 + $0x50] sm:$0xf] }
 0x1f7   :  { %v1260_v1 = vpop.f32.mrf.mxu0 }
 0x1f8   :  { %v10485_v33 = vadd.f32 %v1260_v1, %v10372_v39 }
 0x1f9   :  { %v10489_v20 = vpop.f32.mrf.mxu0 }
 0x1fb   :  { %v10495_v31 = vpop.f32.mrf.mxu0 }
 0x1fd   :  { %v10501_v48 = vpop.f32.mrf.mxu0 }
 0x227   :  { %v1491_v30 = vpop.f32.mrf.mxu1 }
 0x228   :  { %v1672_v39 = vadd.f32 %v1491_v30, %v1269_v52 }
 0x229   :  { %v1493_v38 = vpop.f32.mrf.mxu1 }
 0x22a   :  { %v1704_v29 = vadd.f32 %v15129_v0, %v1672_v39  ;;  %v1673_v16 = vadd.f32 %v1493_v38, %v1270_v47 }
 0x22b   :  { %v1495_v51 = vpop.f32.mrf.mxu1  ;;  %v1534_v13 = vpop.f32.mrf.mxu0 }
 0x22c   :  { %v10508_v56 = vmax.f32 %v1704_v29, 0.0  ;;  %v1705_v36 = vadd.f32 %v15129_v0, %v1673_v16  ;;  %v1682_v25 = vadd.f32 %v1495_v51, %v1279_v61  ;;  %v749_v61 = vadd.f32 %v10286_v34, %v15133_v2  ;;  %v15134_v16 = vld [vmem:[#allocation13_spill] sm:$0xff]  ;;  %v15135_v51 = vld [vmem:[#allocation3_spill] sm:$0xff]  ;;  %v15136_v34 = vld [vmem:[#allocation14_spill] sm:$0xff] }
 0x22d   :  { %v1497_v1 = vpop.f32.mrf.mxu1  ;;  %v1536_v23 = vpop.f32.mrf.mxu0  ;;  %v796_v35 = vadd.f32 %v10327_v11, %v15134_v16  ;;  %v798_v44 = vadd.f32 %v10341_v5, %v15136_v34 }
 0x22e   :  { %v10513_v19 = vmax.f32 %v1705_v36, 0.0  ;;  %v1714_v59 = vadd.f32 %v15132_v26, %v1682_v25  ;;  %v1683_v52 = vadd.f32 %v1497_v1, %v1280_v49  ;;  %1906 = vrot.lane.b32.xlu1 %v10508_v56, %s8783_s16  ;;  %v751_v49 = vadd.f32 %v10302_v40, %v15135_v51 }
 0x22f   :  { %v1538_v14 = vpop.f32.mrf.mxu0  ;;  %v1271_v36 = vadd.f32 %v10424_v32, %v749_v61  ;;  %v1283_v11 = vadd.f32 %v10473_v28, %v796_v35 }
 0x230   :  { %v1734_v30 = vmax.f32 %v1714_v59, 0.0  ;;  %v1715_v45 = vadd.f32 %v15132_v26, %v1683_v52  ;;  %v1684_v8 = vadd.f32 %v1538_v14, %v1281_v50  ;;  %1908 = vrot.lane.b32.xlu0 %v10513_v19, %s8783_s16  ;;  %v1777_v50 = vld [vmem:[%s15010_s3 + $0x58] sm:$0xf]  ;;  %v1272_v59 = vadd.f32 %v10432_v22, %v751_v49  ;;  %v1778_v22 = vld [vmem:[%s15010_s3 + $0x60] sm:$0xf] }
 0x231   :  { %v1540_v24 = vpop.f32.mrf.mxu0  ;;  %v1674_v52 = vadd.f32 %v1534_v13, %v1271_v36  ;;  %v15139_v13 = vld [vmem:[#allocation12_spill] sm:$0xff] }
 0x232   :  { %1755 = vst [vmem:[#allocation2 + $0x50] sm:$0xf] %v1734_v30  ;;  %v1735_v7 = vmax.f32 %v1715_v45, 0.0  ;;  %v1716_v47 = vadd.f32 %v15132_v26, %v1684_v8  ;;  %v1685_v39 = vadd.f32 %v1540_v24, %v1282_v60  ;;  %2085 = vrot.lane.b32.xlu1 %v10508_v56, %s8785_s14  ;;  %v15137_v30 = vld [vmem:[#allocation10_spill] sm:$0xff]  ;;  %v15138_v45 = vld [vmem:[#allocation15_spill] sm:$0xff]  ;;  %v1284_v8 = vadd.f32 %v10482_v3, %v798_v44 }
 0x233   :  { %v792_v5 = vadd.f32 %v10294_v53, %v15137_v30  ;;  %v839_v28 = vadd.f32 %v10396_v54, %v15138_v45  ;;  %v1675_v53 = vadd.f32 %v1536_v23, %v1272_v59  ;;  %v1779_v23 = vld [vmem:[%s15010_s3 + $0x68] sm:$0xf]  ;;  %v1706_v51 = vadd.f32 %v15129_v0, %v1674_v52  ;;  %v15141_v45 = vld [vmem:[#allocation17_spill] sm:$0xff] }
 0x234   :  { %1756 = vst [vmem:[#allocation2 + $0x58] sm:$0xf] %v1735_v7  ;;  %v1736_v38 = vmax.f32 %v1716_v47, 0.0  ;;  %v1717_v55 = vadd.f32 %v15132_v26, %v1685_v39  ;;  %2087 = vrot.lane.b32.xlu0 %v10513_v19, %s8785_s14  ;;  %v794_v47 = vadd.f32 %v10310_v6, %v15139_v13  ;;  %v15140_v39 = vld [vmem:[#allocation16_spill] sm:$0xff]  ;;  %v15142_v13 = vld [vmem:[#allocation18_spill] sm:$0xff] }
 0x235   :  { %v1273_v2 = vadd.f32 %v10454_v37, %v792_v5  ;;  %v1285_v61 = vadd.f32 %v10487_v46, %v839_v28  ;;  %v880_v28 = vadd.f32 %v10383_v4, %v15141_v45  ;;  %v1780_v4 = vld [vmem:[%s15010_s3 + $0x70] sm:$0xf] }
 0x236   :  { %1757 = vst [vmem:[#allocation2 + $0x60] sm:$0xf] %v1736_v38  ;;  %v1737_v12 = vmax.f32 %v1717_v55, 0.0  ;;  %2264 = vrot.lane.b32.xlu1 %v10508_v56, %s8786_s15  ;;  %v841_v38 = vadd.f32 %v10413_v27, %v15140_v39  ;;  %v1274_v35 = vadd.f32 %v10461_v15, %v794_v47  ;;  %v1707_v15 = vadd.f32 %v15129_v0, %v1675_v53 }
 0x237   :  { %v1577_v29 = vpop.f32.mrf.mxu1  ;;  %v882_v47 = vadd.f32 %v10398_v10, %v15142_v13  ;;  %v1278_v39 = vadd.f32 %v10489_v20, %v880_v28 }
 0x238   :  { %1758 = vst [vmem:[#allocation2 + $0x68] sm:$0xf] %v1737_v12  ;;  %2266 = vrot.lane.b32.xlu0 %v10513_v19, %s8786_s15  ;;  %v1676_v36 = vadd.f32 %v1577_v29, %v1273_v2 }
 0x239   :  { %v1579_v25 = vpop.f32.mrf.mxu1  ;;  %v1876_v63 = vld [vmem:[#allocation2 + $0x50] sm:$0xf] }
 0x23a   :  { %1926 = vrot.lane.b32.xlu1 %v1876_v63, %s8783_s16  ;;  %v1796_v1 = vld [vmem:[#allocation2 + $0x50] sm:$0xf]  ;;  %v1677_v59 = vadd.f32 %v1579_v25, %v1274_v35  ;;  %v1708_v30 = vadd.f32 %v15129_v0, %v1676_v36  ;;  %v1782_v35 = vld [vmem:[%s15010_s3 + $0x80] sm:$0xf]  ;;  %v1783_v36 = vld [vmem:[%s15010_s3 + $0x88] sm:$0xf] }
 0x23b   :  { %v1581_v40 = vpop.f32.mrf.mxu1  ;;  %v10549_v14 = vpop.f32.mrf.mxu0  ;;  %v1877_v32 = vld [vmem:[#allocation2 + $0x58] sm:$0xf]  ;;  %v1816_v60 = vmax.f32 %v1776_v9, %v1796_v1  ;;  %v2055_v54 = vld [vmem:[#allocation2 + $0x50] sm:$0xf]  ;;  %v1286_v9 = vadd.f32 %v10493_v21, %v841_v38 }
 0x23c   :  { %v1686_v24 = vadd.f32 %v1581_v40, %v1283_v11  ;;  %1928 = vrot.lane.b32.xlu0 %v1877_v32, %s8783_s16  ;;  %v1797_v7 = vld [vmem:[#allocation2 + $0x58] sm:$0xf]  ;;  %v2234_v1 = vld [vmem:[#allocation2 + $0x50] sm:$0xf]  ;;  %v10610_v38 = vmax.f32 %v1708_v30, 0.0 }
 0x23d   :  { %v1583_v55 = vpop.f32.mrf.mxu1  ;;  %v10564_v12 = vpop.f32.mrf.mxu0  ;;  %1836 = vst [vmem:[%s15010_s3 + $0x50] sm:$0xf] %v1816_v60  ;;  %v1817_v3 = vmax.f32 %v1777_v50, %v1797_v7  ;;  %v1798_v27 = vld [vmem:[#allocation2 + $0x60] sm:$0xf]  ;;  %v2056_v37 = vld [vmem:[#allocation2 + $0x58] sm:$0xf] }
 0x23e   :  { %v1718_v16 = vadd.f32 %v15132_v26, %v1686_v24  ;;  %v1687_v6 = vadd.f32 %v1583_v55, %v1284_v8  ;;  %2105 = vrot.lane.b32.xlu1 %v2055_v54, %s8785_s14  ;;  %v1818_v46 = vmax.f32 %v1778_v22, %v1798_v27  ;;  %v2235_v32 = vld [vmem:[#allocation2 + $0x58] sm:$0xf]  ;;  %v10593_v60 = vmax.f32 %v1706_v51, 0.0  ;;  %v15143_v55 = vld [vmem:[#allocation20_spill] sm:$0xff]  ;;  %v1878_v45 = vld [vmem:[#allocation2 + $0x60] sm:$0xf] }
 0x23f   :  { %v1624_v49 = vpop.f32.mrf.mxu0  ;;  %1837 = vst [vmem:[%s15010_s3 + $0x58] sm:$0xf] %v1817_v3  ;;  %v1799_v11 = vld [vmem:[#allocation2 + $0x68] sm:$0xf]  ;;  %v10600_v8 = vmax.f32 %v1707_v15, 0.0  ;;  %v1709_v24 = vadd.f32 %v15129_v0, %v1677_v59  ;;  %v884_v54 = vadd.f32 %v10415_v43, %v15143_v55  ;;  %v1287_v3 = vadd.f32 %v10495_v31, %v882_v47 }
 0x240   :  { %v1738_v63 = vmax.f32 %v1718_v16, 0.0  ;;  %v1719_v34 = vadd.f32 %v15132_v26, %v1687_v6  ;;  %v1688_v44 = vadd.f32 %v1624_v49, %v1285_v61  ;;  %2107 = vrot.lane.b32.xlu0 %v2056_v37, %s8785_s14  ;;  %1838 = vst [vmem:[%s15010_s3 + $0x60] sm:$0xf] %v1818_v46  ;;  %v1819_v50 = vmax.f32 %v1779_v23, %v1799_v11  ;;  %v1781_v61 = vld [vmem:[%s15010_s3 + $0x78] sm:$0xf] }
 0x241   :  { %v1626_v21 = vpop.f32.mrf.mxu0  ;;  %v10620_v2 = vmax.f32 %v1709_v24, 0.0  ;;  %v1288_v27 = vadd.f32 %v10501_v48, %v884_v54  ;;  %v1879_v24 = vld [vmem:[#allocation2 + $0x68] sm:$0xf] }
 0x242   :  { %1759 = vst [vmem:[#allocation2 + $0x70] sm:$0xf] %v1738_v63  ;;  %v1739_v52 = vmax.f32 %v1719_v34, 0.0  ;;  %v1720_v29 = vadd.f32 %v15132_v26, %v1688_v44  ;;  %v1689_v40 = vadd.f32 %v1626_v21, %v1286_v9  ;;  %2284 = vrot.lane.b32.xlu1 %v2234_v1, %s8786_s15  ;;  %1839 = vst [vmem:[%s15010_s3 + $0x68] sm:$0xf] %v1819_v50  ;;  %v10670_v50 = vpop.permute.xlu1 %3239 }
 0x243   :  { %15144 = vst [vmem:[#allocation19_spill] sm:$0xff] %v10670_v50  ;;  %v11038_v50 = vld [vmem:[%s15007_s0 + $0x11c] ss:$44 sps:$4 sm:$0xff]  }
 0x244   :  { %1760 = vst [vmem:[#allocation2 + $0x78] sm:$0xf] %v1739_v52  ;;  %v1740_v5 = vmax.f32 %v1720_v29, 0.0  ;;  %v1721_v25 = vadd.f32 %v15132_v26, %v1689_v40  ;;  %2286 = vrot.lane.b32.xlu0 %v2235_v32, %s8786_s15  ;;  %v1784_v52 = vld [vmem:[%s15010_s3 + $0x90] sm:$0xf] }
 0x245   :  { %v1785_v29 = vld [vmem:[%s15010_s3 + $0x98] sm:$0xf] }
 0x246   :  { %1761 = vst [vmem:[#allocation2 + $0x80] sm:$0xf] %v1740_v5  ;;  %v1741_v7 = vmax.f32 %v1721_v25, 0.0  ;;  %1910 = vrot.lane.b32.xlu1 %v10593_v60, %s8783_s16  ;;  %v10687_v5 = vpop.permute.xlu0 %3241  ;;  %v10693_v28 = vpop.permute.xlu1 %3243 }
 0x247   :  { %v10605_v22 = vpop.f32.mrf.mxu1  ;;  %15145 = vst [vmem:[#allocation7_spill] sm:$0xff] %v10687_v5  ;;  %15146 = vst [vmem:[#allocation8_spill] sm:$0xff] %v10693_v28 }
 0x248   :  { %1762 = vst [vmem:[#allocation2 + $0x88] sm:$0xf] %v1741_v7  ;;  %1912 = vrot.lane.b32.xlu0 %v10600_v8, %s8783_s16 }
 0x249   :  { %v1665_v53 = vpop.f32.mrf.mxu1  ;;  %v1800_v20 = vld [vmem:[#allocation2 + $0x70] sm:$0xf] }
 0x24a   :  { %v1681_v10 = vadd.f32 %v1665_v53, %v1278_v39  ;;  %1914 = vrot.lane.b32.xlu1 %v10610_v38, %s8783_s16  ;;  %v1820_v6 = vmax.f32 %v1780_v4, %v1800_v20  ;;  %v1880_v7 = vld [vmem:[#allocation2 + $0x70] sm:$0xf]  ;;  %v10701_v13 = vpop.permute.xlu0 %3245  ;;  %v10704_v39 = vpop.permute.xlu1 %3247  ;;  %v2057_v4 = vld [vmem:[#allocation2 + $0x60] sm:$0xf]  ;;  %v2058_v53 = vld [vmem:[#allocation2 + $0x68] sm:$0xf]  ;;  %v1678_v20 = vadd.f32 %v10549_v14, %v10459_v58 }
 0x24b   :  { %v1667_v16 = vpop.f32.mrf.mxu1  ;;  %v1801_v31 = vld [vmem:[#allocation2 + $0x78] sm:$0xf]  ;;  %15147 = vst [vmem:[#allocation4_spill] sm:$0xff] %v10701_v13  ;;  %15148 = vst [vmem:[#allocation9_spill] sm:$0xff] %v10704_v39  ;;  %v2059_v54 = vld [vmem:[#allocation2 + $0x70] sm:$0xf] }
 0x24c   :  { %v1713_v23 = vadd.f32 %v15129_v0, %v1681_v10  ;;  %v1690_v43 = vadd.f32 %v1667_v16, %v1287_v3  ;;  %1916 = vrot.lane.b32.xlu0 %v10620_v2, %s8783_s16  ;;  %1840 = vst [vmem:[%s15010_s3 + $0x70] sm:$0xf] %v1820_v6  ;;  %v1821_v51 = vmax.f32 %v1781_v61, %v1801_v31  ;;  %v1881_v47 = vld [vmem:[#allocation2 + $0x78] sm:$0xf]  ;;  %v2236_v61 = vld [vmem:[#allocation2 + $0x60] sm:$0xf] }
 0x24d   :  { %v1669_v9 = vpop.f32.mrf.mxu1  ;;  %v1802_v46 = vld [vmem:[#allocation2 + $0x80] sm:$0xf]  ;;  %v2060_v10 = vld [vmem:[#allocation2 + $0x78] sm:$0xf]  ;;  %v1679_v16 = vadd.f32 %v10564_v12, %v10465_v42  ;;  %v2238_v58 = vld [vmem:[#allocation2 + $0x70] sm:$0xf] }
 0x24e   :  { %v1733_v49 = vmax.f32 %v1713_v23, 0.0  ;;  %v1722_v48 = vadd.f32 %v15132_v26, %v1690_v43  ;;  %v1691_v37 = vadd.f32 %v1669_v9, %v1288_v27  ;;  %2089 = vrot.lane.b32.xlu1 %v10593_v60, %s8785_s14  ;;  %1841 = vst [vmem:[%s15010_s3 + $0x78] sm:$0xf] %v1821_v51  ;;  %v1822_v63 = vmax.f32 %v1782_v35, %v1802_v46  ;;  %v10708_v55 = vpop.permute.xlu0 %3249  ;;  %v10711_v3 = vpop.permute.xlu1 %3251  ;;  %v2237_v27 = vld [vmem:[#allocation2 + $0x68] sm:$0xf] }
 0x24f   :  { %v1803_v11 = vld [vmem:[#allocation2 + $0x88] sm:$0xf]  ;;  %15149 = vst [vmem:[#allocation11_spill] sm:$0xff] %v10708_v55  ;;  %15150 = vst [vmem:[#allocation5_spill] sm:$0xff] %v10711_v3  ;;  %v1710_v23 = vadd.f32 %v15129_v0, %v1678_v20  ;;  %v1680_v43 = vadd.f32 %v10605_v22, %v10485_v33  ;;  %v1711_v14 = vadd.f32 %v15129_v0, %v1679_v16  ;;  %v2239_v42 = vld [vmem:[#allocation2 + $0x78] sm:$0xf] }
 0x250   :  { %1754 = vst.msk [vmem:[#allocation2 + $0x48] sm:$0xff] %vm1753_vm6, %v1733_v49  ;;  %v1742_v34 = vmax.f32 %v1722_v48, 0.0  ;;  %v1723_v44 = vadd.f32 %v15132_v26, %v1691_v37  ;;  %2091 = vrot.lane.b32.xlu0 %v10600_v8, %s8785_s14  ;;  %1842 = vst [vmem:[%s15010_s3 + $0x80] sm:$0xf] %v1822_v63  ;;  %v1823_v15 = vmax.f32 %v1783_v36, %v1803_v11  ;;  %v1775_v26 = vld [vmem:[%s15010_s3 + $0x48] sm:$0xff] }
 0x251   :  { %v10729_v12 = vmax.f32 %v1710_v23, 0.0  ;;  %v1712_v35 = vadd.f32 %v15129_v0, %v1680_v43  ;;  %v10735_v51 = vmax.f32 %v1711_v14, 0.0  ;;  %v10785_v11 = vld [vmem:[%s15008_s1 + $0x20] sm:$0x3f]   ;;  %v10870_v16 = vld [vmem:[%s15007_s0 + $0x70] ss:$44 sps:$4 sm:$0xff]  }
 0x252   :  { %1763 = vst [vmem:[#allocation2 + $0x90] sm:$0xf] %v1742_v34  ;;  %v1743_v21 = vmax.f32 %v1723_v44, 0.0  ;;  %2093 = vrot.lane.b32.xlu1 %v10610_v38, %s8785_s14  ;;  %1843 = vst [vmem:[%s15010_s3 + $0x88] sm:$0xf] %v1823_v15  ;;  %v10719_v6 = vpop.permute.xlu0 %3253  ;;  %v10725_v31 = vpop.permute.xlu1 %3255  ;;  %8276 = vmatmul.mubr.msk.bf16.vlgmr.msra.gmra.mxu1 %vm404_vm1, %v10785_v11 }
 0x253   :  { %15151 = vst [vmem:[#allocation6_spill] sm:$0xff] %v10719_v6  ;;  %15152 = vst [vmem:[#allocation13_spill] sm:$0xff] %v10725_v31  ;;  %v10741_v22 = vmax.f32 %v1712_v35, 0.0  ;;  %v1882_v34 = vld [vmem:[#allocation2 + $0x80] sm:$0xf]  ;;  %8277 = vmatmul.mubr.msk.bf16.vlgmr.msra.gmra.mxu0 %vm404_vm1, %v10785_v11  ;;  %3134 = vmatprep.mubr.bf16.mxu1 %v15097_v41 }
 0x254   :  { %1765 = vst.msk [vmem:[#allocation2 + $0x98] sm:$0xf] %vm1764_vm7, %v1743_v21  ;;  %2095 = vrot.lane.b32.xlu0 %v10620_v2, %s8785_s14  ;;  %v1883_v15 = vld [vmem:[#allocation2 + $0x88] sm:$0xf]  ;;  %3177 = vmatprep.mubr.bf16.mxu0 %v15097_v41  ;;  %v10864_v20 = vld [vmem:[%s15007_s0 + $0x14] ss:$44 sps:$4 sm:$0xff]  }
 0x255   :  { %v2240_v23 = vld [vmem:[#allocation2 + $0x80] sm:$0xf]  ;;  %v10883_v43 = vld [vmem:[%s15007_s0 + $0x10] ss:$44 sps:$4 sm:$0xff]   ;;  %v10892_v14 = vld [vmem:[%s15007_s0 + $0x12c] ss:$44 sps:$4 sm:$0xff]  }
 0x256   :  { %2268 = vrot.lane.b32.xlu1 %v10593_v60, %s8786_s15  ;;  %v10733_v9 = vpop.permute.xlu0 %3257  ;;  %v10739_v33 = vpop.permute.xlu1 %3259  ;;  %v10898_v35 = vld [vmem:[%s15007_s0 + $0x18] ss:$44 sps:$4 sm:$0xff]   ;;  %v11021_v3 = vld [vmem:[%s15007_s0 + $0x114] ss:$44 sps:$4 sm:$0xff]  }
 0x257   :  { %v10666_v1 = vld [vmem:[#allocation2 + $0x48] sm:$0xff]  ;;  %15153 = vst [vmem:[#allocation3_spill] sm:$0xff] %v10733_v9  ;;  %15154 = vst [vmem:[#allocation14_spill] sm:$0xff] %v10739_v33  ;;  %v1807_v33 = vmax.f32 %v10513_v19, 0.0 }
 0x258   :  { %2270 = vrot.lane.b32.xlu0 %v10600_v8, %s8786_s15  ;;  %v1815_v59 = vmax.f32 %v1775_v26, %v10666_v1  ;;  %v10793_v26 = vld [vmem:[%s15007_s0 + $0x118] ss:$44 sps:$4 sm:$0xff]  }
 0x259   :  { %v1804_v40 = vld [vmem:[#allocation2 + $0x90] sm:$0xf]  ;;  %3111 = vmatpush1.bf16.msra.mxu1 %v10793_v26 }
 0x25a   :  { %2272 = vrot.lane.b32.xlu1 %v10610_v38, %s8786_s15  ;;  %1835 = vst.msk [vmem:[%s15010_s3 + $0x48] sm:$0xff] %vm24_vm4, %v1815_v59  ;;  %v1824_v30 = vmax.f32 %v1784_v52, %v1804_v40  ;;  %v10747_v0 = vpop.permute.xlu0 %3261  ;;  %v10751_v49 = vpop.permute.xlu1 %3263  ;;  %v1884_v21 = vld [vmem:[#allocation2 + $0x90] sm:$0xf] }
 0x25b   :  { %v1805_v32 = vld [vmem:[#allocation2 + $0x98] sm:$0xf]  ;;  %15155 = vst [vmem:[#allocation10_spill] sm:$0xff] %v10747_v0  ;;  %15156 = vst [vmem:[#allocation15_spill] sm:$0xff] %v10751_v49  ;;  %v10804_v59 = vld [vmem:[%s15007_s0 + $0xc4] ss:$44 sps:$4 sm:$0xff]  }
 0x25c   :  { %2274 = vrot.lane.b32.xlu0 %v10620_v2, %s8786_s15  ;;  %v1825_v25 = vmax.f32 %v1785_v29, %v1805_v32  ;;  %1844 = vst [vmem:[%s15010_s3 + $0x90] sm:$0xf] %v1824_v30  ;;  %3112 = vmatprep.subr.bf16.mxu1 %v10804_v59  ;;  %v1885_v52 = vld [vmem:[#allocation2 + $0x98] sm:$0xf]  ;;  %v10810_v29 = vld [vmem:[%s15007_s0 + $0x120] ss:$44 sps:$4 sm:$0xff]  }
 0x25d   :  { %3154 = vmatpush1.bf16.msra.mxu0 %v10810_v29  ;;  %v10820_v32 = vld [vmem:[%s15007_s0 + $0xcc] ss:$44 sps:$4 sm:$0xff]   ;;  %v2061_v30 = vld [vmem:[#allocation2 + $0x80] sm:$0xf] }
 0x25e   :  { %1930 = vrot.lane.b32.xlu1 %v1878_v45, %s8783_s16  ;;  %1845 = vst.msk [vmem:[%s15010_s3 + $0x98] sm:$0xf] %vm35_vm5, %v1825_v25  ;;  %v10757_v48 = vpop.permute.xlu0 %3265  ;;  %v10761_v37 = vpop.permute.xlu1 %3267  ;;  %3155 = vmatprep.subr.bf16.mxu0 %v10820_v32  ;;  %v10826_v25 = vld [vmem:[%s15007_s0 + $0xc0] ss:$44 sps:$4 sm:$0xff]  }
 0x25f   :  { %15157 = vst [vmem:[#allocation12_spill] sm:$0xff] %v10757_v48  ;;  %15158 = vst [vmem:[#allocation16_spill] sm:$0xff] %v10761_v37  ;;  %3113 = vmatpush1.bf16.msra.mxu1 %v10826_v25  ;;  %v10834_v45 = vld [vmem:[%s15007_s0 + $0x6c] ss:$44 sps:$4 sm:$0xff]  }
 0x260   :  { %1932 = vrot.lane.b32.xlu0 %v1879_v24, %s8783_s16  ;;  %3114 = vmatprep.subr.bf16.mxu1 %v10834_v45  ;;  %v2062_v24 = vld [vmem:[#allocation2 + $0x88] sm:$0xf] }
 0x262   :  { %1934 = vrot.lane.b32.xlu1 %v1880_v7, %s8783_s16  ;;  %v10767_v46 = vpop.permute.xlu0 %3269  ;;  %v10771_v36 = vpop.permute.xlu1 %3271  ;;  %v10840_v7 = vld [vmem:[%s15007_s0 + $0xc8] ss:$44 sps:$4 sm:$0xff]  }
 0x263   :  { %15159 = vst [vmem:[#allocation17_spill] sm:$0xff] %v10767_v46  ;;  %15160 = vst [vmem:[#allocation18_spill] sm:$0xff] %v10771_v36  ;;  %3156 = vmatpush1.bf16.msra.mxu0 %v10840_v7 }
 0x264   :  { %1936 = vrot.lane.b32.xlu0 %v1881_v47, %s8783_s16 }
 0x266   :  { %2109 = vrot.lane.b32.xlu1 %v2057_v4, %s8785_s14  ;;  %v10777_v63 = vpop.permute.xlu0 %3273  ;;  %v10780_v44 = vpop.permute.xlu1 %3275  ;;  %v10849_v4 = vld [vmem:[%s15007_s0 + $0x74] ss:$44 sps:$4 sm:$0xff]  }
 0x267   :  { %15161 = vst [vmem:[#allocation20_spill] sm:$0xff] %v10777_v63  ;;  %15162 = vst [vmem:[#allocation21_spill] sm:$0xff] %v10780_v44  ;;  %3157 = vmatprep.subr.bf16.mxu0 %v10849_v4 }
 0x268   :  { %2111 = vrot.lane.b32.xlu0 %v2058_v53, %s8785_s14  ;;  %v2063_v53 = vld [vmem:[#allocation2 + $0x90] sm:$0xf]  ;;  %3158 = vmatpush1.bf16.msra.mxu0 %v10870_v16 }
 0x26a   :  { %2113 = vrot.lane.b32.xlu1 %v2059_v54, %s8785_s14  ;;  %v10815_v40 = vpop.permute.xlu1 %3279  ;;  %v10855_v54 = vld [vmem:[%s15007_s0 + $0x68] ss:$44 sps:$4 sm:$0xff]  }
 0x26b   :  { %15164 = vst [vmem:[#allocation23_spill] sm:$0xff] %v10815_v40  ;;  %3115 = vmatpush1.bf16.msra.mxu1 %v10855_v54  ;;  %v1808_v40 = vmax.f32 %v10593_v60, 0.0 }
 0x26c   :  { %2115 = vrot.lane.b32.xlu0 %v2060_v10, %s8785_s14  ;;  %3116 = vmatprep.subr.bf16.mxu1 %v10864_v20 }
 0x26e   :  { %2288 = vrot.lane.b32.xlu1 %v2236_v61, %s8786_s15  ;;  %v10859_v10 = vpop.permute.xlu1 %3283  ;;  %v2064_v61 = vld [vmem:[#allocation2 + $0x98] sm:$0xf] }
 0x26f   :  { %3117 = vmatpush1.bf16.msra.mxu1 %v10883_v43 }
 0x270   :  { %2290 = vrot.lane.b32.xlu0 %v2237_v27, %s8786_s15  ;;  %v10877_v27 = vld [vmem:[%s15007_s0 + $0x1c] ss:$44 sps:$4 sm:$0xff]   ;;  %3196 = vmatprep.subr.bf16.mxu1 %v10892_v14 }
 0x271   :  { %3159 = vmatprep.subr.bf16.mxu0 %v10877_v27 }
 0x272   :  { %2292 = vrot.lane.b32.xlu1 %v2238_v58, %s8786_s15  ;;  %3160 = vmatpush1.bf16.msra.mxu0 %v10898_v35 }
 0x273   :  { %8278 = vmatmul.mubr.msk.bf16.vlgmr.msra.gmra.mxu1 %vm404_vm1, %v10785_v11 }
 0x274   :  { %2294 = vrot.lane.b32.xlu0 %v2239_v42, %s8786_s15  ;;  %v2241_v42 = vld [vmem:[#allocation2 + $0x88] sm:$0xf]  ;;  %3220 = vmatprep.mubr.bf16.mxu1 %v15097_v41 }
 0x275   :  { %8279 = vmatmul.mubr.msk.bf16.vlgmr.msra.gmra.mxu0 %vm404_vm1, %v10785_v11 }
 0x276   :  { %1918 = vrot.lane.b32.xlu1 %v10729_v12, %s8783_s16  ;;  %3430 = vmatprep.mubr.bf16.mxu0 %v15097_v41 }
 0x278   :  { %1920 = vrot.lane.b32.xlu0 %v10735_v51, %s8783_s16 }
 0x27a   :  { %1922 = vrot.lane.b32.xlu1 %v10741_v22, %s8783_s16 }
 0x27c   :  { %1924 = vrot.lane.b32.xlu0 %v10666_v1, %s8783_s16 }
 0x27e   :  { %2097 = vrot.lane.b32.xlu1 %v10729_v12, %s8785_s14 }
 0x280   :  { %2099 = vrot.lane.b32.xlu0 %v10735_v51, %s8785_s14 }
 0x282   :  { %2101 = vrot.lane.b32.xlu1 %v10741_v22, %s8785_s14 }
 0x284   :  { %2103 = vrot.lane.b32.xlu0 %v10666_v1, %s8785_s14 }
 0x286   :  { %2276 = vrot.lane.b32.xlu1 %v10729_v12, %s8786_s15 }
 0x288   :  { %2278 = vrot.lane.b32.xlu0 %v10735_v51, %s8786_s15 }
 0x28a   :  { %2280 = vrot.lane.b32.xlu1 %v10741_v22, %s8786_s15 }
 0x28c   :  { %2282 = vrot.lane.b32.xlu0 %v10666_v1, %s8786_s15  ;;  %v10799_v1 = vpop.permute.xlu0 %3277 }
 0x28d   :  { %15163 = vst [vmem:[#allocation22_spill] sm:$0xff] %v10799_v1 }
 0x28e   :  { %1938 = vrot.lane.b32.xlu1 %v1882_v34, %s8783_s16 }
 0x290   :  { %1940 = vrot.lane.b32.xlu0 %v1883_v15, %s8783_s16  ;;  %v10844_v47 = vpop.permute.xlu0 %3281  ;;  %v2242_v15 = vld [vmem:[#allocation2 + $0x90] sm:$0xf] }
 0x291   :  { %15165 = vst [vmem:[#allocation24_spill] sm:$0xff] %v10844_v47 }
 0x292   :  { %1942 = vrot.lane.b32.xlu1 %v1884_v21, %s8783_s16  ;;  %v10907_v21 = vld [vmem:[%s15007_s0 + $0x128] ss:$44 sps:$4 sm:$0xff]  }
 0x293   :  { %3197 = vmatpush1.bf16.msra.mxu1 %v10907_v21 }
 0x294   :  { %1944 = vrot.lane.b32.xlu0 %v1885_v52, %s8783_s16  ;;  %v10886_v58 = vpop.permute.xlu0 %3285 }
 0x295   :  { %15166 = vst [vmem:[#allocation25_spill] sm:$0xff] %v10886_v58 }
 0x296   :  { %2117 = vrot.lane.b32.xlu1 %v2061_v30, %s8785_s14  ;;  %v10917_v30 = vld [vmem:[%s15007_s0 + $0xd4] ss:$44 sps:$4 sm:$0xff]  }
 0x297   :  { %3198 = vmatprep.subr.bf16.mxu1 %v10917_v30 }
 0x298   :  { %2119 = vrot.lane.b32.xlu0 %v2062_v24, %s8785_s14  ;;  %v2243_v24 = vld [vmem:[#allocation2 + $0x98] sm:$0xf] }
 0x29a   :  { %2121 = vrot.lane.b32.xlu1 %v2063_v53, %s8785_s14 }
 0x29c   :  { %2123 = vrot.lane.b32.xlu0 %v2064_v61, %s8785_s14 }
 0x29e   :  { %2296 = vrot.lane.b32.xlu1 %v2240_v23, %s8786_s15  ;;  %v10929_v23 = vld [vmem:[%s15007_s0 + $0xd0] ss:$44 sps:$4 sm:$0xff]  }
 0x29f   :  { %3199 = vmatpush1.bf16.msra.mxu1 %v10929_v23 }
 0x2a0   :  { %v1907_v34 = vpop.permute.xlu1 %1906  ;;  %2298 = vrot.lane.b32.xlu0 %v2241_v42, %s8786_s15  ;;  %v1806_v42 = vmax.f32 %v10508_v56, 0.0  ;;  %v10950_v56 = vld [vmem:[%s15007_s0 + $0x78] ss:$44 sps:$4 sm:$0xff]  }
 0x2a2   :  { %2300 = vrot.lane.b32.xlu1 %v2242_v15, %s8786_s15  ;;  %v10912_v52 = vpop.permute.xlu0 %1908 }
 0x2a3   :  { %v1947_v61 = vsel %vm327_vm0, %v1907_v34, %v10912_v52 }
 0x2a4   :  { %v2086_v53 = vpop.permute.xlu1 %2085  ;;  %2302 = vrot.lane.b32.xlu0 %v2243_v24, %s8786_s15  ;;  %v10940_v24 = vld [vmem:[%s15007_s0 + $0x7c] ss:$44 sps:$4 sm:$0xff]   ;;  %v1985_v9 = vmax.f32 %v1806_v42, %v1947_v61 }
 0x2a5   :  { %3200 = vmatprep.subr.bf16.mxu1 %v10940_v24 }
 0x2a6   :  { %3287 = vrot.lane.b32.xlu1 %v10826_v25, %s8785_s14  ;;  %v10935_v15 = vpop.permute.xlu0 %2087  ;;  %3201 = vmatpush1.bf16.msra.mxu1 %v10950_v56 }
 0x2a7   :  { %v2126_v34 = vsel %vm974_vm2, %v2086_v53, %v10935_v15  ;;  %v10960_v53 = vld [vmem:[%s15007_s0 + $0x24] ss:$44 sps:$4 sm:$0xff]  }
 0x2a8   :  { %v2265_v1 = vpop.permute.xlu1 %2264  ;;  %3289 = vrot.lane.b32.xlu0 %v10804_v59, %s8785_s14  ;;  %v2164_v6 = vmax.f32 %v1985_v9, %v2126_v34  ;;  %3202 = vmatprep.subr.bf16.mxu1 %v10960_v53  ;;  %v10970_v9 = vld [vmem:[%s15007_s0 + $0x20] ss:$44 sps:$4 sm:$0xff]  }
 0x2aa   :  { %3291 = vrot.lane.b32.xlu1 %v10840_v7, %s8785_s14  ;;  %v10955_v31 = vpop.permute.xlu0 %2266  ;;  %3203 = vmatpush1.bf16.msra.mxu1 %v10970_v9 }
 0x2ab   :  { %v2305_v61 = vsel %vm1377_vm3, %v2265_v1, %v10955_v31 }
 0x2ac   :  { %v2343_v42 = vmax.f32 %v2164_v6, %v2305_v61  ;;  %v1927_v63 = vpop.permute.xlu1 %1926  ;;  %3293 = vrot.lane.b32.xlu0 %v10820_v32, %s8785_s14  ;;  %v1856_v6 = vld [vmem:[%s15010_s3 + $0x50] sm:$0xf] }
 0x2ad   :  { %8280 = vmatmul.mubr.msk.bf16.vlgmr.msra.gmra.mxu1 %vm404_vm1, %v10785_v11  ;;  %v11005_v11 = vld [vmem:[%s15007_s0 + $0x10c] ss:$44 sps:$4 sm:$0xff]  }
 0x2ae   :  { %2363 = vst [vmem:[%s15010_s3] sm:$0xff] %v2343_v42  ;;  %3295 = vrot.lane.b32.xlu1 %v10929_v23, %s8785_s14  ;;  %v10978_v1 = vpop.permute.xlu0 %1928  ;;  %3473 = vmatprep.mubr.bf16.mxu1 %v15097_v41  ;;  %v10996_v42 = vld [vmem:[%s15007_s0 + $0x108] ss:$44 sps:$4 sm:$0xff]  }
 0x2af   :  { %v1956_v34 = vsel %vm327_vm0, %v1927_v63, %v10978_v1 }
 0x2b0   :  { %v1995_v61 = vmax.f32 %v1856_v6, %v1956_v34  ;;  %v2106_v44 = vpop.permute.xlu1 %2105  ;;  %3297 = vrot.lane.b32.xlu0 %v10917_v30, %s8785_s14  ;;  %v11012_v34 = vld [vmem:[%s15007_s0 + $0x110] ss:$44 sps:$4 sm:$0xff]  }
 0x2b2   :  { %2015 = vst [vmem:[%s15010_s3 + $0x50] sm:$0xf] %v1995_v61  ;;  %3299 = vrot.lane.b32.xlu1 %v10996_v42, %s8785_s14  ;;  %v11000_v63 = vpop.permute.xlu0 %2107 }
 0x2b3   :  { %v2135_v36 = vsel %vm974_vm2, %v2106_v44, %v11000_v63  ;;  %v11049_v44 = vld [vmem:[%s15007_s0 + $0x124] ss:$44 sps:$4 sm:$0xff]  }
 0x2b4   :  { %v2285_v6 = vpop.permute.xlu1 %2284  ;;  %3301 = vrot.lane.b32.xlu0 %v11005_v11, %s8785_s14 }
 0x2b6   :  { %3303 = vrot.lane.b32.xlu1 %v11012_v34, %s8785_s14  ;;  %v11016_v61 = vpop.permute.xlu0 %2286 }
 0x2b7   :  { %v2314_v37 = vsel %vm1377_vm3, %v2285_v6, %v11016_v61 }
 0x2b8   :  { %v1911_v55 = vpop.permute.xlu1 %1910  ;;  %3305 = vrot.lane.b32.xlu0 %v11021_v3, %s8785_s14 }
 0x2b9   :  { %v2035_v46 = vld [vmem:[%s15010_s3 + $0x50] sm:$0xf]  ;;  %v1948_v5 = vsel %vm327_vm0, %v10912_v52, %v1911_v55  ;;  %v1809_v52 = vmax.f32 %v10600_v8, 0.0 }
 0x2ba   :  { %v2174_v41 = vmax.f32 %v2035_v46, %v2135_v36  ;;  %3307 = vrot.lane.b32.xlu1 %v10793_v26, %s8785_s14  ;;  %v1913_v13 = vpop.permute.xlu0 %1912  ;;  %v1986_v6 = vmax.f32 %v1807_v33, %v1948_v5 }
 0x2bb   :  { %v1949_v0 = vsel %vm327_vm0, %v1911_v55, %v1913_v13 }
 0x2bc   :  { %2194 = vst [vmem:[%s15010_s3 + $0x50] sm:$0xf] %v2174_v41  ;;  %v1915_v39 = vpop.permute.xlu1 %1914  ;;  %3309 = vrot.lane.b32.xlu0 %v11038_v50, %s8785_s14  ;;  %v1987_v55 = vmax.f32 %v1808_v40, %v1949_v0 }
 0x2be   :  { %3311 = vrot.lane.b32.xlu1 %v10810_v29, %s8785_s14  ;;  %v11044_v46 = vpop.permute.xlu0 %1916 }
 0x2bf   :  { %v1951_v60 = vsel %vm327_vm0, %v1915_v39, %v11044_v46 }
 0x2c0   :  { %v2090_v36 = vpop.permute.xlu1 %2089  ;;  %3313 = vrot.lane.b32.xlu0 %v11049_v44, %s8785_s14 }
 0x2c1   :  { %v2127_v49 = vsel %vm974_vm2, %v10935_v15, %v2090_v36 }
 0x2c2   :  { %3315 = vrot.lane.b32.xlu1 %v10907_v21, %s8785_s14  ;;  %v2092_v41 = vpop.permute.xlu0 %2091  ;;  %v2165_v15 = vmax.f32 %v1986_v6, %v2127_v49 }
 0x2c3   :  { %v2214_v48 = vld [vmem:[%s15010_s3 + $0x50] sm:$0xf] }
 0x2c4   :  { %v2353_v28 = vmax.f32 %v2214_v48, %v2314_v37  ;;  %v2094_v58 = vpop.permute.xlu1 %2093  ;;  %3317 = vrot.lane.b32.xlu0 %v10892_v14, %s8785_s14  ;;  %v1950_v48 = vsel %vm327_vm0, %v1913_v13, %v1915_v39  ;;  %v2128_v37 = vsel %vm974_vm2, %v2090_v36, %v2092_v41  ;;  %v1810_v13 = vmax.f32 %v10610_v38, 0.0 }
 0x2c5   :  { %v2129_v5 = vsel %vm974_vm2, %v2092_v41, %v2094_v58  ;;  %v2166_v33 = vmax.f32 %v1987_v55, %v2128_v37 }
 0x2c6   :  { %2373 = vst [vmem:[%s15010_s3 + $0x50] sm:$0xf] %v2353_v28  ;;  %3641 = vrot.lane.b32.xlu1 %v10447_v18, %s8786_s15  ;;  %v11074_v19 = vpop.permute.xlu0 %2095  ;;  %v1988_v28 = vmax.f32 %v1809_v52, %v1950_v48  ;;  %v1989_v39 = vmax.f32 %v1810_v13, %v1951_v60  ;;  %v1857_v48 = vld [vmem:[%s15010_s3 + $0x58] sm:$0xf] }
 0x2c8   :  { %v2269_v47 = vpop.permute.xlu1 %2268  ;;  %3643 = vrot.lane.b32.xlu0 %v10438_v57, %s8786_s15  ;;  %v2130_v57 = vsel %vm974_vm2, %v2094_v58, %v11074_v19  ;;  %v2167_v40 = vmax.f32 %v1988_v28, %v2129_v5 }
 0x2c9   :  { %v2306_v18 = vsel %vm1377_vm3, %v10955_v31, %v2269_v47 }
 0x2ca   :  { %v2344_v0 = vmax.f32 %v2165_v15, %v2306_v18  ;;  %3645 = vrot.lane.b32.xlu1 %v10478_v62, %s8786_s15  ;;  %v2271_v8 = vpop.permute.xlu0 %2270  ;;  %v2168_v62 = vmax.f32 %v1989_v39, %v2130_v57 }
 0x2cb   :  { %v2307_v49 = vsel %vm1377_vm3, %v2269_v47, %v2271_v8 }
 0x2cc   :  { %2364 = vst [vmem:[%s15010_s3 + $0x8] sm:$0xff] %v2344_v0  ;;  %v2345_v31 = vmax.f32 %v2166_v33, %v2307_v49  ;;  %v2273_v36 = vpop.permute.xlu1 %2272  ;;  %3647 = vrot.lane.b32.xlu0 %v10470_v17, %s8786_s15 }
 0x2cd   :  { %v2308_v38 = vsel %vm1377_vm3, %v2271_v8, %v2273_v36 }
 0x2ce   :  { %2365 = vst [vmem:[%s15010_s3 + $0x10] sm:$0xff] %v2345_v31  ;;  %v2346_v58 = vmax.f32 %v2167_v40, %v2308_v38  ;;  %3649 = vrot.lane.b32.xlu1 %v10883_v43, %s8786_s15  ;;  %v11103_v47 = vpop.permute.xlu0 %2274 }
 0x2cf   :  { %v2309_v41 = vsel %vm1377_vm3, %v2273_v36, %v11103_v47 }
 0x2d0   :  { %2366 = vst [vmem:[%s15010_s3 + $0x18] sm:$0xff] %v2346_v58  ;;  %v2347_v17 = vmax.f32 %v2168_v62, %v2309_v41  ;;  %v1931_v6 = vpop.permute.xlu1 %1930  ;;  %3651 = vrot.lane.b32.xlu0 %v10864_v20, %s8786_s15  ;;  %v1858_v20 = vld [vmem:[%s15010_s3 + $0x60] sm:$0xf] }
 0x2d1   :  { %v1957_v43 = vsel %vm327_vm0, %v10978_v1, %v1931_v6 }
 0x2d2   :  { %2367 = vst [vmem:[%s15010_s3 + $0x20] sm:$0xff] %v2347_v17  ;;  %v1996_v37 = vmax.f32 %v1857_v48, %v1957_v43  ;;  %3653 = vrot.lane.b32.xlu1 %v10898_v35, %s8786_s15  ;;  %v1933_v55 = vpop.permute.xlu0 %1932  ;;  %v1859_v35 = vld [vmem:[%s15010_s3 + $0x68] sm:$0xf]  ;;  %v8744_v17 = vld [vmem:[%s15007_s0 + $0xb4] ss:$44 sps:$4 sm:$0xff]  }
 0x2d3   :  { %v1958_v52 = vsel %vm327_vm0, %v1931_v6, %v1933_v55  ;;  %v8745_v48 = vld [vmem:[%s15007_s0 + $0xb8] ss:$44 sps:$4 sm:$0xff]  }
 0x2d4   :  { %2016 = vst [vmem:[%s15010_s3 + $0x58] sm:$0xf] %v1996_v37  ;;  %v1997_v1 = vmax.f32 %v1858_v20, %v1958_v52  ;;  %v1935_v15 = vpop.permute.xlu1 %1934  ;;  %3655 = vrot.lane.b32.xlu0 %v10877_v27, %s8786_s15  ;;  %v1860_v27 = vld [vmem:[%s15010_s3 + $0x70] sm:$0xf] }
 0x2d5   :  { %v1959_v60 = vsel %vm327_vm0, %v1933_v55, %v1935_v15  ;;  %v8746_v20 = vld [vmem:[%s15007_s0 + $0xb0] ss:$44 sps:$4 sm:$0xff]  }
 0x2d6   :  { %2017 = vst [vmem:[%s15010_s3 + $0x60] sm:$0xf] %v1997_v1  ;;  %v1998_v5 = vmax.f32 %v1859_v35, %v1959_v60  ;;  %3657 = vrot.lane.b32.xlu1 %v10970_v9, %s8786_s15  ;;  %v11140_v18 = vpop.permute.xlu0 %1936  ;;  %v8743_v9 = vld [vmem:[%s15007_s0 + $0x58] ss:$44 sps:$4 sm:$0xff]   ;;  %v8747_v60 = vld [vmem:[%s15007_s0 + $0x5c] ss:$44 sps:$4 sm:$0xff]  }
 0x2d7   :  { %v1960_v28 = vsel %vm327_vm0, %v1935_v15, %v11140_v18 }
 0x2d8   :  { %2018 = vst [vmem:[%s15010_s3 + $0x68] sm:$0xf] %v1998_v5  ;;  %v1999_v13 = vmax.f32 %v1860_v27, %v1960_v28  ;;  %v2110_v33 = vpop.permute.xlu1 %2109  ;;  %3659 = vrot.lane.b32.xlu0 %v10960_v53, %s8786_s15 }
 0x2d9   :  { %v2136_v57 = vsel %vm974_vm2, %v11000_v63, %v2110_v33 }
 0x2da   :  { %2019 = vst [vmem:[%s15010_s3 + $0x70] sm:$0xf] %v1999_v13  ;;  %3661 = vrot.lane.b32.xlu1 %v8743_v9, %s8786_s15  ;;  %v2112_v0 = vpop.permute.xlu0 %2111  ;;  %v8748_v13 = vld [vmem:[%s15007_s0 + $0x60] ss:$44 sps:$4 sm:$0xff]  }
 0x2db   :  { %v2036_v8 = vld [vmem:[%s15010_s3 + $0x58] sm:$0xf]  ;;  %v2137_v40 = vsel %vm974_vm2, %v2110_v33, %v2112_v0 }
 0x2dc   :  { %v2175_v49 = vmax.f32 %v2036_v8, %v2136_v57  ;;  %v2114_v53 = vpop.permute.xlu1 %2113  ;;  %3703 = vrot.lane.b32.xlu0 %v11005_v11, %s8786_s15 }
 0x2dd   :  { %v2037_v39 = vld [vmem:[%s15010_s3 + $0x60] sm:$0xf]  ;;  %v2138_v36 = vsel %vm974_vm2, %v2112_v0, %v2114_v53 }
 0x2de   :  { %2195 = vst [vmem:[%s15010_s3 + $0x58] sm:$0xf] %v2175_v49  ;;  %v2176_v31 = vmax.f32 %v2037_v39, %v2137_v40  ;;  %3705 = vrot.lane.b32.xlu1 %v11012_v34, %s8786_s15  ;;  %v11175_v63 = vpop.permute.xlu0 %2115  ;;  %v1855_v49 = vld [vmem:[%s15010_s3 + $0x48] sm:$0xff] }
 0x2df   :  { %v2038_v11 = vld [vmem:[%s15010_s3 + $0x68] sm:$0xf]  ;;  %v2139_v58 = vsel %vm974_vm2, %v2114_v53, %v11175_v63 }
 0x2e0   :  { %2196 = vst [vmem:[%s15010_s3 + $0x60] sm:$0xf] %v2176_v31  ;;  %v2177_v38 = vmax.f32 %v2038_v11, %v2138_v36  ;;  %v2289_v62 = vpop.permute.xlu1 %2288  ;;  %3701 = vrot.lane.b32.xlu0 %v10996_v42, %s8786_s15  ;;  %v1811_v31 = vmax.f32 %v10620_v2, 0.0  ;;  %v8749_v36 = vld [vmem:[%s15007_s0 + $0xbc] ss:$44 sps:$4 sm:$0xff]  }
 0x2e1   :  { %v2039_v34 = vld [vmem:[%s15010_s3 + $0x70] sm:$0xf]  ;;  %v2315_v37 = vsel %vm1377_vm3, %v11016_v61, %v2289_v62 }
 0x2e2   :  { %2197 = vst [vmem:[%s15010_s3 + $0x68] sm:$0xf] %v2177_v38  ;;  %v2178_v41 = vmax.f32 %v2039_v34, %v2139_v58  ;;  %3683 = vrot.lane.b32.xlu1 %v8744_v17, %s8786_s15  ;;  %v2291_v6 = vpop.permute.xlu0 %2290 }
 0x2e3   :  { %v2316_v15 = vsel %vm1377_vm3, %v2289_v62, %v2291_v6 }
 0x2e4   :  { %2198 = vst [vmem:[%s15010_s3 + $0x70] sm:$0xf] %v2178_v41  ;;  %v2293_v42 = vpop.permute.xlu1 %2292  ;;  %3685 = vrot.lane.b32.xlu0 %v8745_v48, %s8786_s15  ;;  %v1813_v41 = vmax.f32 %v10735_v51, 0.0  ;;  %v1814_v51 = vmax.f32 %v10741_v22, 0.0 }
 0x2e5   :  { %v2215_v43 = vld [vmem:[%s15010_s3 + $0x58] sm:$0xf]  ;;  %v2317_v27 = vsel %vm1377_vm3, %v2291_v6, %v2293_v42 }
 0x2e6   :  { %v2354_v55 = vmax.f32 %v2215_v43, %v2315_v37  ;;  %3681 = vrot.lane.b32.xlu1 %v8746_v20, %s8786_s15  ;;  %v11214_v52 = vpop.permute.xlu0 %2294 }
 0x2e7   :  { %v2216_v1 = vld [vmem:[%s15010_s3 + $0x60] sm:$0xf]  ;;  %v2318_v0 = vsel %vm1377_vm3, %v2293_v42, %v11214_v52 }
 0x2e8   :  { %2374 = vst [vmem:[%s15010_s3 + $0x58] sm:$0xf] %v2354_v55  ;;  %v2355_v61 = vmax.f32 %v2216_v1, %v2316_v15  ;;  %v1919_v35 = vpop.permute.xlu1 %1918  ;;  %3663 = vrot.lane.b32.xlu0 %v8747_v60, %s8786_s15 }
 0x2e9   :  { %v2217_v5 = vld [vmem:[%s15010_s3 + $0x68] sm:$0xf] }
 0x2ea   :  { %2375 = vst [vmem:[%s15010_s3 + $0x60] sm:$0xf] %v2355_v61  ;;  %v2356_v28 = vmax.f32 %v2217_v5, %v2317_v27  ;;  %3665 = vrot.lane.b32.xlu1 %v8748_v13, %s8786_s15  ;;  %v1921_v33 = vpop.permute.xlu0 %1920 }
 0x2eb   :  { %v2218_v9 = vld [vmem:[%s15010_s3 + $0x70] sm:$0xf] }
 0x2ec   :  { %2376 = vst [vmem:[%s15010_s3 + $0x68] sm:$0xf] %v2356_v28  ;;  %v2357_v8 = vmax.f32 %v2218_v9, %v2318_v0  ;;  %v1923_v57 = vpop.permute.xlu1 %1922  ;;  %3707 = vrot.lane.b32.xlu0 %v11021_v3, %s8786_s15  ;;  %v1861_v9 = vld [vmem:[%s15010_s3 + $0x78] sm:$0xf] }
 0x2ed   :  { %v1954_v2 = vsel %vm327_vm0, %v1921_v33, %v1923_v57 }
 0x2ee   :  { %2377 = vst [vmem:[%s15010_s3 + $0x70] sm:$0xf] %v2357_v8  ;;  %3709 = vrot.lane.b32.xlu1 %v10793_v26, %s8786_s15  ;;  %v1925_v53 = vpop.permute.xlu0 %1924  ;;  %v1952_v26 = vsel %vm327_vm0, %v11044_v46, %v1919_v35  ;;  %v1992_v43 = vmax.f32 %v1813_v41, %v1954_v2 }
 0x2ef   :  { %v1994_v39 = vmax.f32 %v1855_v49, %v1925_v53  ;;  %v1990_v62 = vmax.f32 %v1811_v31, %v1952_v26  ;;  %v1862_v49 = vld [vmem:[%s15010_s3 + $0x80] sm:$0xf]  ;;  %v1864_v31 = vld [vmem:[%s15010_s3 + $0x90] sm:$0xf] }
 0x2f0   :  { %v2098_v40 = vpop.permute.xlu1 %2097  ;;  %3711 = vrot.lane.b32.xlu0 %v11038_v50, %s8786_s15  ;;  %v1953_v50 = vsel %vm327_vm0, %v1919_v35, %v1921_v33 }
 0x2f1   :  { %2014 = vst.msk [vmem:[%s15010_s3 + $0x48] sm:$0xff] %vm24_vm4, %v1994_v39  ;;  %v2131_v38 = vsel %vm974_vm2, %v11074_v19, %v2098_v40 }
 0x2f2   :  { %3713 = vrot.lane.b32.xlu1 %v10810_v29, %s8786_s15  ;;  %v2100_v3 = vpop.permute.xlu0 %2099  ;;  %v1812_v29 = vmax.f32 %v10729_v12, 0.0  ;;  %v2169_v17 = vmax.f32 %v1990_v62, %v2131_v38  ;;  %v1955_v12 = vsel %vm327_vm0, %v1923_v57, %v1925_v53 }
 0x2f3   :  { %v2132_v34 = vsel %vm974_vm2, %v2098_v40, %v2100_v3  ;;  %v1993_v15 = vmax.f32 %v1814_v51, %v1955_v12 }
 0x2f4   :  { %v2102_v11 = vpop.permute.xlu1 %2101  ;;  %3687 = vrot.lane.b32.xlu0 %v8749_v36, %s8786_s15  ;;  %v1991_v58 = vmax.f32 %v1812_v29, %v1953_v50 }
 0x2f6   :  { %3689 = vrot.lane.b32.xlu1 %v10826_v25, %s8786_s15  ;;  %v2104_v46 = vpop.permute.xlu0 %2103  ;;  %v2133_v25 = vsel %vm974_vm2, %v2100_v3, %v2102_v11  ;;  %v2170_v37 = vmax.f32 %v1991_v58, %v2132_v34 }
 0x2f7   :  { %v2134_v1 = vsel %vm974_vm2, %v2102_v11, %v2104_v46 }
 0x2f8   :  { %v2034_v6 = vld [vmem:[%s15010_s3 + $0x48] sm:$0xff]  ;;  %v2277_v19 = vpop.permute.xlu1 %2276  ;;  %3691 = vrot.lane.b32.xlu0 %v10804_v59, %s8786_s15  ;;  %v2172_v60 = vmax.f32 %v1993_v15, %v2134_v1 }
 0x2f9   :  { %v2173_v42 = vmax.f32 %v2034_v6, %v2104_v46  ;;  %v2310_v48 = vsel %vm1377_vm3, %v11103_v47, %v2277_v19  ;;  %v2171_v47 = vmax.f32 %v1992_v43, %v2133_v25 }
 0x2fa   :  { %v2348_v55 = vmax.f32 %v2169_v17, %v2310_v48  ;;  %3693 = vrot.lane.b32.xlu1 %v10840_v7, %s8786_s15  ;;  %v2279_v20 = vpop.permute.xlu0 %2278  ;;  %v8750_v7 = vld [vmem:[%s15007_s0 + $0x64] ss:$44 sps:$4 sm:$0xff]  }
 0x2fb   :  { %2193 = vst.msk [vmem:[%s15010_s3 + $0x48] sm:$0xff] %vm24_vm4, %v2173_v42  ;;  %v2311_v59 = vsel %vm1377_vm3, %v2277_v19, %v2279_v20 }
 0x2fc   :  { %2368 = vst [vmem:[%s15010_s3 + $0x28] sm:$0xff] %v2348_v55  ;;  %v2349_v22 = vmax.f32 %v2170_v37, %v2311_v59  ;;  %v2281_v61 = vpop.permute.xlu1 %2280  ;;  %3667 = vrot.lane.b32.xlu0 %v8750_v7, %s8786_s15  ;;  %v4403_v59 = vld [vmem:[%s15007_s0 + $0x134] sm:$0xff] }
 0x2fd   :  { %v2312_v35 = vsel %vm1377_vm3, %v2279_v20, %v2281_v61 }
 0x2fe   :  { %2369 = vst [vmem:[%s15010_s3 + $0x30] sm:$0xff] %v2349_v22  ;;  %v2350_v5 = vmax.f32 %v2171_v47, %v2312_v35  ;;  %3669 = vrot.lane.b32.xlu1 %v10855_v54, %s8786_s15  ;;  %v2283_v27 = vpop.permute.xlu0 %2282  ;;  %v11461_v22 = vld [vmem:[%s15007_s0 + $0x118] ss:$44 sps:$4 sm:$0xff]  }
 0x2ff   :  { %v2313_v28 = vsel %vm1377_vm3, %v2281_v61, %v2283_v27 }
 0x300   :  { %2370 = vst [vmem:[%s15010_s3 + $0x38] sm:$0xff] %v2350_v5  ;;  %v2351_v13 = vmax.f32 %v2172_v60, %v2313_v28  ;;  %v1939_v33 = vpop.permute.xlu1 %1938  ;;  %3671 = vrot.lane.b32.xlu0 %v10834_v45, %s8786_s15 }
 0x301   :  { %v1961_v0 = vsel %vm327_vm0, %v11140_v18, %v1939_v33 }
 0x302   :  { %v2213_v54 = vld [vmem:[%s15010_s3 + $0x48] sm:$0xff]  ;;  %2371 = vst [vmem:[%s15010_s3 + $0x40] sm:$0xff] %v2351_v13  ;;  %v2000_v8 = vmax.f32 %v1861_v9, %v1961_v0  ;;  %3673 = vrot.lane.b32.xlu1 %v10870_v16, %s8786_s15  ;;  %v1941_v45 = vpop.permute.xlu0 %1940 }
 0x303   :  { %v2352_v57 = vmax.f32 %v2213_v54, %v2283_v27  ;;  %v1962_v18 = vsel %vm327_vm0, %v1939_v33, %v1941_v45  ;;  %v1863_v16 = vld [vmem:[%s15010_s3 + $0x88] sm:$0xf]  ;;  %v11493_v54 = vld [vmem:[%s15007_s0 + $0xb4] ss:$44 sps:$4 sm:$0xff]  }
 0x304   :  { %2020 = vst [vmem:[%s15010_s3 + $0x78] sm:$0xf] %v2000_v8  ;;  %v2001_v53 = vmax.f32 %v1862_v49, %v1962_v18  ;;  %v1943_v39 = vpop.permute.xlu1 %1942  ;;  %3715 = vrot.lane.b32.xlu0 %v11049_v44, %s8786_s15  ;;  %v1865_v44 = vld [vmem:[%s15010_s3 + $0x98] sm:$0xf]  ;;  %v11518_v49 = vld [vmem:[%s15007_s0 + $0xbc] ss:$44 sps:$4 sm:$0xff]  }
 0x305   :  { %2372 = vst.msk [vmem:[%s15010_s3 + $0x48] sm:$0xff] %vm24_vm4, %v2352_v57  ;;  %v1963_v40 = vsel %vm327_vm0, %v1941_v45, %v1943_v39  ;;  %v11509_v45 = vld [vmem:[%s15007_s0 + $0xb8] ss:$44 sps:$4 sm:$0xff]  }
 0x306   :  { %2021 = vst [vmem:[%s15010_s3 + $0x80] sm:$0xf] %v2001_v53  ;;  %v2002_v3 = vmax.f32 %v1863_v16, %v1963_v40  ;;  %3717 = vrot.lane.b32.xlu1 %v10907_v21, %s8786_s15  ;;  %v1945_v26 = vpop.permute.xlu0 %1944  ;;  %v11527_v53 = vld [vmem:[%s15007_s0 + $0xc0] ss:$44 sps:$4 sm:$0xff]   ;;  %v11534_v16 = vld [vmem:[%s15007_s0 + $0xb0] ss:$44 sps:$4 sm:$0xff]  }
 0x307   :  { %v1964_v11 = vsel %vm327_vm0, %v1943_v39, %v1945_v26  ;;  %v2004_v36 = vmax.f32 %v1865_v44, %v1945_v26  ;;  %v11548_v26 = vld [vmem:[%s15007_s0 + $0x60] ss:$44 sps:$4 sm:$0xff]  }
 0x308   :  { %2022 = vst [vmem:[%s15010_s3 + $0x88] sm:$0xf] %v2002_v3  ;;  %v2003_v50 = vmax.f32 %v1864_v31, %v1964_v11  ;;  %v2118_v38 = vpop.permute.xlu1 %2117  ;;  %3719 = vrot.lane.b32.xlu0 %v10892_v14, %s8786_s15  ;;  %v11541_v3 = vld [vmem:[%s15007_s0 + $0x5c] ss:$44 sps:$4 sm:$0xff]  }
 0x309   :  { %2024 = vst.msk [vmem:[%s15010_s3 + $0x98] sm:$0xf] %vm35_vm5, %v2004_v36  ;;  %v2140_v14 = vsel %vm974_vm2, %v11175_v63, %v2118_v38 }
 0x30a   :  { %2023 = vst [vmem:[%s15010_s3 + $0x90] sm:$0xf] %v2003_v50  ;;  %3695 = vrot.lane.b32.xlu1 %v10820_v32, %s8786_s15  ;;  %v2120_v21 = vpop.permute.xlu0 %2119  ;;  %v11557_v50 = vld [vmem:[%s15007_s0 + $0x64] ss:$44 sps:$4 sm:$0xff]  }
 0x30b   :  { %v2040_v62 = vld [vmem:[%s15010_s3 + $0x78] sm:$0xf]  ;;  %v2141_v34 = vsel %vm974_vm2, %v2118_v38, %v2120_v21  ;;  %v15167_v38 = vld [vmem:[#allocation24_spill] sm:$0xff] }
 0x30c   :  { %v2179_v29 = vmax.f32 %v2040_v62, %v2140_v14  ;;  %v2122_v46 = vpop.permute.xlu1 %2121  ;;  %3697 = vrot.lane.b32.xlu0 %v10929_v23, %s8786_s15  ;;  %v11567_v14 = vld [vmem:[%s15007_s0 + $0x68] ss:$44 sps:$4 sm:$0xff]  }
 0x30d   :  { %v2041_v2 = vld [vmem:[%s15010_s3 + $0x80] sm:$0xf]  ;;  %v2142_v23 = vsel %vm974_vm2, %v2120_v21, %v2122_v46  ;;  %v3338_v21 = vsel %vm974_vm2, %v15167_v38, %v10859_v10 }
 0x30e   :  { %2199 = vst [vmem:[%s15010_s3 + $0x78] sm:$0xf] %v2179_v29  ;;  %v2180_v32 = vmax.f32 %v2041_v2, %v2141_v34  ;;  %3699 = vrot.lane.b32.xlu1 %v10917_v30, %s8786_s15  ;;  %v2124_v63 = vpop.permute.xlu0 %2123  ;;  %v15168_v2 = vld [vmem:[#allocation23_spill] sm:$0xff] }
 0x30f   :  { %v2042_v58 = vld [vmem:[%s15010_s3 + $0x88] sm:$0xf]  ;;  %v2143_v19 = vsel %vm974_vm2, %v2122_v46, %v2124_v63  ;;  %v3337_v34 = vsel %vm974_vm2, %v15168_v2, %v15167_v38  ;;  %v15180_v2 = vmov 0  }
 0x310   :  { %2200 = vst [vmem:[%s15010_s3 + $0x80] sm:$0xf] %v2180_v32  ;;  %v2181_v41 = vmax.f32 %v2042_v58, %v2142_v23  ;;  %v2044_v17 = vld [vmem:[%s15010_s3 + $0x98] sm:$0xf]  ;;  %v2297_v6 = vpop.permute.xlu1 %2296  ;;  %3675 = vrot.lane.b32.xlu0 %v10849_v4, %s8786_s15  ;;  %v15169_v58 = vld [vmem:[#allocation15_spill] sm:$0xff] }
 0x311   :  { %v2043_v30 = vld [vmem:[%s15010_s3 + $0x90] sm:$0xf]  ;;  %v2183_v12 = vmax.f32 %v2044_v17, %v2124_v63  ;;  %v11413_v4 = vld [vmem:[%s15007_s0 + $0x10c] ss:$44 sps:$4 sm:$0xff]   ;;  %v2319_v51 = vsel %vm1377_vm3, %v11214_v52, %v2297_v6  ;;  %v11668_v38 = vld [vmem:[%s15007_s0 + $0x11c] ss:$44 sps:$4 sm:$0xff]  }
 0x312   :  { %2201 = vst [vmem:[%s15010_s3 + $0x88] sm:$0xf] %v2181_v41  ;;  %v2182_v25 = vmax.f32 %v2043_v30, %v2143_v19  ;;  %3677 = vrot.lane.b32.xlu1 %v10950_v56, %s8786_s15  ;;  %v2299_v42 = vpop.permute.xlu0 %2298  ;;  %v11427_v56 = vld [vmem:[%s15007_s0 + $0x110] ss:$44 sps:$4 sm:$0xff]   ;;  %v4398_v52 = vld [vmem:[%s15007_s0 + $0x108] sm:$0xff] }
 0x313   :  { %2203 = vst.msk [vmem:[%s15010_s3 + $0x98] sm:$0xf] %vm35_vm5, %v2183_v12  ;;  %v2320_v1 = vsel %vm1377_vm3, %v2297_v6, %v2299_v42  ;;  %v11477_v27 = vcombine.low %v4398_v52, %v4403_v59  ;;  %v11579_v63 = vld [vmem:[%s15007_s0 + $0x58] ss:$44 sps:$4 sm:$0xff]   ;;  %v15171_v6 = vld [vmem:[#allocation25_spill] sm:$0xff]  ;;  %v15176_v52 = vld [vmem:[#allocation12_spill] sm:$0xff] }
 0x314   :  { %2202 = vst [vmem:[%s15010_s3 + $0x90] sm:$0xf] %v2182_v25  ;;  %v2301_v48 = vpop.permute.xlu1 %2300  ;;  %3679 = vrot.lane.b32.xlu0 %v10940_v24, %s8786_s15  ;;  %v11439_v24 = vld [vmem:[%s15007_s0 + $0x114] ss:$44 sps:$4 sm:$0xff]   ;;  %v15170_v23 = vld [vmem:[#allocation10_spill] sm:$0xff] }
 0x315   :  { %v2219_v43 = vld [vmem:[%s15010_s3 + $0x78] sm:$0xf]  ;;  %v2321_v7 = vsel %vm1377_vm3, %v2299_v42, %v2301_v48  ;;  %v3329_v41 = vsel %vm974_vm2, %v15170_v23, %v15169_v58  ;;  %v11592_v19 = vld [vmem:[%s15007_s0 + $0x4] ss:$44 sps:$4 sm:$0xff]  }
 0x316   :  { %v2358_v37 = vmax.f32 %v2219_v43, %v2319_v51  ;;  %4638 = vrot.lane.b32.xlu1 %v11413_v4, %s8783_s16  ;;  %v2303_v55 = vpop.permute.xlu0 %2302  ;;  %v15172_v25 = vld [vmem:[#allocation14_spill] sm:$0xff]  ;;  %v11605_v43 = vld [vmem:[%s15007_s0 + $0x8] ss:$44 sps:$4 sm:$0xff]  }
 0x317   :  { %v2220_v20 = vld [vmem:[%s15010_s3 + $0x80] sm:$0xf]  ;;  %v2322_v13 = vsel %vm1377_vm3, %v2301_v48, %v2303_v55  ;;  %v3328_v42 = vsel %vm974_vm2, %v15172_v25, %v15170_v23  ;;  %v3339_v48 = vsel %vm974_vm2, %v10859_v10, %v15171_v6  ;;  %v15173_v51 = vld [vmem:[#allocation8_spill] sm:$0xff]  ;;  %v11698_v23 = vld [vmem:[%s15007_s0 + $0x124] ss:$44 sps:$4 sm:$0xff]  }
 0x318   :  { %2378 = vst [vmem:[%s15010_s3 + $0x78] sm:$0xf] %v2358_v37  ;;  %v2359_v15 = vmax.f32 %v2220_v20, %v2320_v1  ;;  %v11454_v47 = vpop.permute.xlu1 %3287  ;;  %4640 = vrot.lane.b32.xlu0 %v11427_v56, %s8783_s16  ;;  %v15174_v37 = vld [vmem:[#allocation7_spill] sm:$0xff]  ;;  %v15175_v1 = vld [vmem:[#allocation16_spill] sm:$0xff] }
 0x319   :  { %v2221_v61 = vld [vmem:[%s15010_s3 + $0x88] sm:$0xf]  ;;  %v3340_v30 = vsel %vm974_vm2, %v15171_v6, %v11454_v47  ;;  %v3331_v10 = vsel %vm974_vm2, %v15176_v52, %v15175_v1  ;;  %v11620_v59 = vld [vmem:[%s15007_s0 + $0xc] ss:$44 sps:$4 sm:$0xff]   ;;  %v15182_v6 = vld [vmem:[#allocation17_spill] sm:$0xff] }
 0x31a   :  { %2379 = vst [vmem:[%s15010_s3 + $0x80] sm:$0xf] %v2359_v15  ;;  %v2360_v35 = vmax.f32 %v2221_v61, %v2321_v7  ;;  %v2223_v60 = vld [vmem:[%s15010_s3 + $0x98] sm:$0xf]  ;;  %4642 = vrot.lane.b32.xlu1 %v11439_v24, %s8783_s16  ;;  %v11475_v5 = vpop.permute.xlu0 %3289  ;;  %v15177_v61 = vld [vmem:[#allocation19_spill] sm:$0xff] }
 0x31b   :  { %v2222_v28 = vld [vmem:[%s15010_s3 + $0x90] sm:$0xf]  ;;  %v2362_v33 = vmax.f32 %v2223_v60, %v2303_v55  ;;  %v3320_v55 = vsel %vm974_vm2, %v15174_v37, %v15173_v51  ;;  %v3319_v7 = vsel %vm974_vm2, %v15177_v61, %v15174_v37  ;;  %v15184_v37 = vld [vmem:[#allocation11_spill] sm:$0xff] }
 0x31c   :  { %2380 = vst [vmem:[%s15010_s3 + $0x88] sm:$0xf] %v2360_v35  ;;  %v2361_v9 = vmax.f32 %v2222_v28, %v2322_v13  ;;  %v11486_v0 = vpop.permute.xlu1 %3291  ;;  %4644 = vrot.lane.b32.xlu0 %v11461_v22, %s8783_s16  ;;  %v3330_v35 = vsel %vm974_vm2, %v15169_v58, %v15176_v52  ;;  %v11635_v60 = vld [vmem:[%s15007_s0 + $0x10] ss:$44 sps:$4 sm:$0xff]  }
 0x31d   :  { %2382 = vst.msk [vmem:[%s15010_s3 + $0x98] sm:$0xf] %vm35_vm5, %v2362_v33  ;;  %v11640_v28 = vld [vmem:[%s15008_s1 + $0x30] sm:$0x3f]   ;;  %v15179_v33 = vld [vmem:[#allocation4_spill] sm:$0xff] }
 0x31e   :  { %2381 = vst [vmem:[%s15010_s3 + $0x90] sm:$0xf] %v2361_v9  ;;  %4636 = vrot.lane.b32.xlu1 %v11477_v27, %s8783_s16  ;;  %v11504_v8 = vpop.permute.xlu0 %3293  ;;  %v15178_v13 = vld [vmem:[#allocation9_spill] sm:$0xff] }
 0x31f   :  { %v3322_v9 = vsel %vm974_vm2, %v15179_v33, %v15178_v13 }
 0x320   :  { %v11511_v57 = vpop.permute.xlu1 %3295  ;;  %4618 = vrot.lane.b32.xlu0 %v11493_v54, %s8783_s16 }
 0x322   :  { %4620 = vrot.lane.b32.xlu1 %v11509_v45, %s8783_s16  ;;  %v11522_v18 = vpop.permute.xlu0 %3297 }
 0x324   :  { %v3300_v39 = vpop.permute.xlu1 %3299  ;;  %4622 = vrot.lane.b32.xlu0 %v11518_v49, %s8783_s16 }
 0x326   :  { %4624 = vrot.lane.b32.xlu1 %v11527_v53, %s8783_s16  ;;  %v3302_v40 = vpop.permute.xlu0 %3301 }
 0x327   :  { %v3346_v36 = vsel %vm974_vm2, %v3300_v39, %v3302_v40 }
 0x328   :  { %v3304_v44 = vpop.permute.xlu1 %3303  ;;  %4616 = vrot.lane.b32.xlu0 %v11534_v16, %s8783_s16 }
 0x329   :  { %v3347_v31 = vsel %vm974_vm2, %v3302_v40, %v3304_v44 }
 0x32a   :  { %4598 = vrot.lane.b32.xlu1 %v11541_v3, %s8783_s16  ;;  %3406 = vmatprep.subr.bf16.mxu0 %v3347_v31  ;;  %v3306_v11 = vpop.permute.xlu0 %3305 }
 0x32b   :  { %3407 = vmatpush1.bf16.msra.mxu0 %v3346_v36  ;;  %v3348_v32 = vsel %vm974_vm2, %v3304_v44, %v3306_v11  ;;  %v11653_v44 = vld [vmem:[%s15007_s0] ss:$44 sps:$4 sm:$0xff]  }
 0x32c   :  { %v3308_v62 = vpop.permute.xlu1 %3307  ;;  %4600 = vrot.lane.b32.xlu0 %v11548_v26, %s8783_s16  ;;  %3408 = vmatprep.subr.bf16.mxu0 %v3338_v21  ;;  %v3342_v21 = vsel %vm974_vm2, %v11475_v5, %v11486_v0 }
 0x32d   :  { %v3349_v29 = vsel %vm974_vm2, %v3306_v11, %v3308_v62  ;;  %v3321_v11 = vsel %vm974_vm2, %v15173_v51, %v15179_v33  ;;  %v15183_v51 = vld [vmem:[#allocation5_spill] sm:$0xff]  ;;  %v11759_v33 = vld [vmem:[%s15007_s0 + $0xcc] ss:$44 sps:$4 sm:$0xff]  }
 0x32e   :  { %4602 = vrot.lane.b32.xlu1 %v11557_v50, %s8783_s16  ;;  %3449 = vmatprep.subr.bf16.mxu1 %v3349_v29  ;;  %v3310_v46 = vpop.permute.xlu0 %3309 }
 0x32f   :  { %3409 = vmatpush1.bf16.msra.mxu0 %v3337_v34  ;;  %3450 = vmatpush1.bf16.msra.mxu1 %v3348_v32  ;;  %v3350_v36 = vsel %vm974_vm2, %v3308_v62, %v3310_v46  ;;  %v3341_v32 = vsel %vm974_vm2, %v11454_v47, %v11475_v5  ;;  %v3344_v47 = vsel %vm974_vm2, %v11504_v8, %v11511_v57  ;;  %v11713_v5 = vld [vmem:[%s15007_s0 + $0x128] ss:$44 sps:$4 sm:$0xff]  }
 0x330   :  { %v3312_v17 = vpop.permute.xlu1 %3311  ;;  %4604 = vrot.lane.b32.xlu0 %v11567_v14, %s8783_s16  ;;  %3410 = vmatprep.subr.bf16.mxu0 %v3329_v41  ;;  %v15181_v41 = vld [vmem:[#allocation18_spill] sm:$0xff] }
 0x331   :  { %3451 = vmatprep.subr.bf16.mxu1 %v3340_v30  ;;  %v3351_v40 = vsel %vm974_vm2, %v3310_v46, %v3312_v17  ;;  %v11682_v46 = vld [vmem:[%s15007_s0 + $0x120] ss:$44 sps:$4 sm:$0xff]   ;;  %v3333_v30 = vsel %vm974_vm2, %v15182_v6, %v15181_v41 }
 0x332   :  { %4596 = vrot.lane.b32.xlu1 %v11579_v63, %s8783_s16  ;;  %v3314_v12 = vpop.permute.xlu0 %3313 }
 0x333   :  { %3411 = vmatpush1.bf16.msra.mxu0 %v3328_v42  ;;  %3452 = vmatpush1.bf16.msra.mxu1 %v3339_v48  ;;  %v3352_v58 = vsel %vm974_vm2, %v3312_v17, %v3314_v12  ;;  %v3343_v42 = vsel %vm974_vm2, %v11486_v0, %v11504_v8  ;;  %v11729_v48 = vld [vmem:[%s15007_s0 + $0xc4] ss:$44 sps:$4 sm:$0xff]   ;;  %v11744_v8 = vld [vmem:[%s15007_s0 + $0xc8] ss:$44 sps:$4 sm:$0xff]  }
 0x334   :  { %v11610_v20 = vpop.permute.xlu1 %3315  ;;  %4578 = vrot.lane.b32.xlu0 %v11592_v19, %s8783_s16  ;;  %3412 = vmatprep.subr.bf16.mxu0 %v3320_v55  ;;  %v3324_v55 = vsel %vm974_vm2, %v15184_v37, %v15183_v51 }
 0x335   :  { %3453 = vmatprep.subr.bf16.mxu1 %v3331_v10  ;;  %v3353_v62 = vsel %vm974_vm2, %v3314_v12, %v11610_v20  ;;  %v3332_v12 = vsel %vm974_vm2, %v15175_v1, %v15182_v6  ;;  %v15185_v1 = vld [vmem:[#allocation21_spill] sm:$0xff]  ;;  %v15186_v10 = vld [vmem:[#allocation20_spill] sm:$0xff] }
 0x336   :  { %4580 = vrot.lane.b32.xlu1 %v11605_v43, %s8783_s16  ;;  %v11624_v15 = vpop.permute.xlu0 %3317  ;;  %v3335_v0 = vsel %vm974_vm2, %v15186_v10, %v15185_v1  ;;  %v11797_v6 = vld [vmem:[%s15007_s0 + $0x70] ss:$44 sps:$4 sm:$0xff]  }
 0x337   :  { %3413 = vmatpush1.bf16.msra.mxu0 %v3319_v7  ;;  %3454 = vmatpush1.bf16.msra.mxu1 %v3330_v35  ;;  %v3323_v7 = vsel %vm974_vm2, %v15178_v13, %v15184_v37  ;;  %v3334_v35 = vsel %vm974_vm2, %v15181_v41, %v15186_v10  ;;  %v11771_v13 = vld [vmem:[%s15007_s0 + $0xd0] ss:$44 sps:$4 sm:$0xff]   ;;  %v11830_v37 = vld [vmem:[%s15007_s0 + $0x14] ss:$44 sps:$4 sm:$0xff]  }
 0x338   :  { %v11645_v39 = vpop.permute.xlu1 %3641  ;;  %4582 = vrot.lane.b32.xlu0 %v11620_v59, %s8783_s16  ;;  %3455 = vmatprep.subr.bf16.mxu1 %v3322_v9  ;;  %v15187_v9 = vld [vmem:[#allocation13_spill] sm:$0xff] }
 0x339   :  { %3492 = vmatprep.subr.bf16.mxu0 %v3351_v40  ;;  %v15188_v40 = vld [vmem:[#allocation6_spill] sm:$0xff] }
 0x33a   :  { %4584 = vrot.lane.b32.xlu1 %v11635_v60, %s8783_s16  ;;  %v11657_v31 = vpop.permute.xlu0 %3643  ;;  %8284 = vmatmul.mubr.msk.bf16.vlgmr.msra.gmra.mxu0 %vm404_vm1, %v11640_v28 }
 0x33b   :  { %3456 = vmatpush1.bf16.msra.mxu1 %v3321_v11  ;;  %3493 = vmatpush1.bf16.msra.mxu0 %v3350_v36  ;;  %v3326_v11 = vsel %vm974_vm2, %v15188_v40, %v15187_v9 }
 0x33c   :  { %v11673_v29 = vpop.permute.xlu1 %3645  ;;  %4576 = vrot.lane.b32.xlu0 %v11653_v44, %s8783_s16  ;;  %3494 = vmatprep.subr.bf16.mxu0 %v3342_v21 }
 0x33d   :  { %3535 = vmatprep.subr.bf16.mxu1 %v3353_v62  ;;  %3516 = vmatprep.mubr.bf16.mxu0 %v15180_v2  ;;  %v3325_v62 = vsel %vm974_vm2, %v15183_v51, %v15188_v40  ;;  %v11849_v40 = vld [vmem:[%s15007_s0 + $0x1c] ss:$44 sps:$4 sm:$0xff]  }
 0x33e   :  { %4646 = vrot.lane.b32.xlu1 %v11668_v38, %s8783_s16  ;;  %v11687_v34 = vpop.permute.xlu0 %3647  ;;  %8285 = vmatmul.mubr.msk.bf16.vlgmr.msra.gmra.mxu1 %vm404_vm1, %v11640_v28 }
 0x33f   :  { %3495 = vmatpush1.bf16.msra.mxu0 %v3341_v32  ;;  %3536 = vmatpush1.bf16.msra.mxu1 %v3352_v58  ;;  %v3354_v32 = vsel %vm974_vm2, %v11610_v20, %v11624_v15  ;;  %v11789_v58 = vld [vmem:[%s15007_s0 + $0x6c] ss:$44 sps:$4 sm:$0xff]  }
 0x340   :  { %v11703_v25 = vpop.permute.xlu1 %3649  ;;  %4648 = vrot.lane.b32.xlu0 %v11682_v46, %s8783_s16  ;;  %3496 = vmatprep.subr.bf16.mxu0 %v3333_v30  ;;  %v11808_v30 = vld [vmem:[%s15007_s0 + $0x74] ss:$44 sps:$4 sm:$0xff]  }
 0x341   :  { %3537 = vmatprep.subr.bf16.mxu1 %v3344_v47  ;;  %3559 = vmatprep.mubr.bf16.mxu1 %v15180_v2 }
 0x342   :  { %4650 = vrot.lane.b32.xlu1 %v11698_v23, %s8783_s16  ;;  %v11718_v17 = vpop.permute.xlu0 %3651 }
 0x343   :  { %3497 = vmatpush1.bf16.msra.mxu0 %v3332_v12  ;;  %3538 = vmatpush1.bf16.msra.mxu1 %v3343_v42  ;;  %v15189_v12 = vld [vmem:[#allocation22_spill] sm:$0xff] }
 0x344   :  { %v11734_v52 = vpop.permute.xlu1 %3653  ;;  %4652 = vrot.lane.b32.xlu0 %v11713_v5, %s8783_s16  ;;  %3498 = vmatprep.subr.bf16.mxu0 %v3324_v55  ;;  %v3336_v51 = vsel %vm974_vm2, %v15185_v1, %v15189_v12 }
 0x345   :  { %3539 = vmatprep.subr.bf16.mxu1 %v3335_v0  ;;  %v15190_v0 = vld [vmem:[#allocation3_spill] sm:$0xff] }
 0x346   :  { %4626 = vrot.lane.b32.xlu1 %v11729_v48, %s8783_s16  ;;  %v11748_v61 = vpop.permute.xlu0 %3655 }
 0x347   :  { %3499 = vmatpush1.bf16.msra.mxu0 %v3323_v7  ;;  %3540 = vmatpush1.bf16.msra.mxu1 %v3334_v35  ;;  %v11839_v7 = vld [vmem:[%s15007_s0 + $0x18] ss:$44 sps:$4 sm:$0xff]   ;;  %v3327_v35 = vsel %vm974_vm2, %v15187_v9, %v15190_v0 }
 0x348   :  { %v11764_v36 = vpop.permute.xlu1 %3657  ;;  %4628 = vrot.lane.b32.xlu0 %v11744_v8, %s8783_s16  ;;  %3541 = vmatprep.subr.bf16.mxu1 %v3326_v11 }
 0x349   :  { %3578 = vmatprep.subr.bf16.mxu0 %v11624_v15  ;;  %v3345_v15 = vsel %vm974_vm2, %v11511_v57, %v11522_v18  ;;  %v11819_v57 = vld [vmem:[%s15007_s0 + $0x78] ss:$44 sps:$4 sm:$0xff]  }
 0x34a   :  { %4630 = vrot.lane.b32.xlu1 %v11759_v33, %s8783_s16  ;;  %v11776_v21 = vpop.permute.xlu0 %3659  ;;  %8286 = vmatmul.mubr.msk.bf16.vlgmr.msra.gmra.mxu0 %vm404_vm1, %v11640_v28 }
 0x34b   :  { %3542 = vmatpush1.bf16.msra.mxu1 %v3325_v62  ;;  %3579 = vmatpush1.bf16.msra.mxu0 %v3354_v32  ;;  %v11857_v32 = vld [vmem:[%s15007_s0 + $0x20] ss:$44 sps:$4 sm:$0xff]  }
 0x34c   :  { %v3662_v41 = vpop.permute.xlu1 %3661  ;;  %4632 = vrot.lane.b32.xlu0 %v11771_v13, %s8783_s16  ;;  %3580 = vmatprep.subr.bf16.mxu0 %v11522_v18  ;;  %15191 = vst [vmem:[#allocation24_spill] sm:$0xff] %v11857_v32 }
 0x34d   :  { %3602 = vmatprep.mubr.bf16.mxu0 %v15180_v2 }
 0x34e   :  { %4606 = vrot.lane.b32.xlu1 %v11789_v58, %s8783_s16  ;;  %v3704_v20 = vpop.permute.xlu0 %3703  ;;  %8287 = vmatmul.mubr.msk.bf16.vlgmr.msra.gmra.mxu1 %vm404_vm1, %v11640_v28 }
 0x34f   :  { %3581 = vmatpush1.bf16.msra.mxu0 %v3345_v15  ;;  %3832 = vmatprep.mubr.bf16.mxu1 %v15180_v2  ;;  %v11865_v15 = vld [vmem:[%s15007_s0 + $0x12c] ss:$44 sps:$4 sm:$0xff]  }
 0x350   :  { %v3706_v47 = vpop.permute.xlu1 %3705  ;;  %4608 = vrot.lane.b32.xlu0 %v11797_v6, %s8783_s16  ;;  %3582 = vmatprep.subr.bf16.mxu0 %v15189_v12 }
 0x351   :  { %v3749_v18 = vsel %vm1377_vm3, %v3704_v20, %v3706_v47 }
 0x352   :  { %4610 = vrot.lane.b32.xlu1 %v11808_v30, %s8783_s16  ;;  %3808 = vmatprep.subr.bf16.mxu1 %v3749_v18  ;;  %v3702_v42 = vpop.permute.xlu0 %3701  ;;  %v11874_v18 = vld [vmem:[%s15007_s0 + $0xd4] ss:$44 sps:$4 sm:$0xff]  }
 0x353   :  { %v3748_v55 = vsel %vm1377_vm3, %v3702_v42, %v3704_v20  ;;  %3583 = vmatpush1.bf16.msra.mxu0 %v3336_v51 }
 0x354   :  { %v3684_v10 = vpop.permute.xlu1 %3683  ;;  %4612 = vrot.lane.b32.xlu0 %v11819_v57, %s8783_s16  ;;  %3584 = vmatprep.subr.bf16.mxu0 %v15190_v0 }
 0x355   :  { %3809 = vmatpush1.bf16.msra.mxu1 %v3748_v55  ;;  %v11884_v55 = vld [vmem:[%s15007_s0 + $0x7c] ss:$44 sps:$4 sm:$0xff]  }
 0x356   :  { %4586 = vrot.lane.b32.xlu1 %v11830_v37, %s8783_s16  ;;  %v3686_v1 = vpop.permute.xlu0 %3685 }
 0x357   :  { %3585 = vmatpush1.bf16.msra.mxu0 %v3327_v35  ;;  %v3740_v11 = vsel %vm1377_vm3, %v3684_v10, %v3686_v1  ;;  %v11894_v35 = vld [vmem:[%s15007_s0 + $0x24] ss:$44 sps:$4 sm:$0xff]  }
 0x358   :  { %v3682_v62 = vpop.permute.xlu1 %3681  ;;  %4588 = vrot.lane.b32.xlu0 %v11839_v7, %s8783_s16  ;;  %3810 = vmatprep.subr.bf16.mxu1 %v3740_v11 }
 0x359   :  { %v3739_v9 = vsel %vm1377_vm3, %v3682_v62, %v3684_v10  ;;  %v3722_v10 = vsel %vm1377_vm3, %v11657_v31, %v11673_v29  ;;  %v3721_v62 = vsel %vm1377_vm3, %v11645_v39, %v11657_v31 }
 0x35a   :  { %4590 = vrot.lane.b32.xlu1 %v11849_v40, %s8783_s16  ;;  %3811 = vmatpush1.bf16.msra.mxu1 %v3739_v9  ;;  %v3664_v20 = vpop.permute.xlu0 %3663 }
 0x35b   :  { %8288 = vmatmul.mubr.msk.bf16.vlgmr.msra.gmra.mxu0 %vm404_vm1, %v11640_v28  ;;  %v3730_v28 = vsel %vm1377_vm3, %v3662_v41, %v3664_v20 }
 0x35c   :  { %v3666_v12 = vpop.permute.xlu1 %3665  ;;  %4592 = vrot.lane.b32.xlu0 %v11857_v32, %s8783_s16  ;;  %3875 = vmatprep.mubr.bf16.mxu0 %v15180_v2 }
 0x35d   :  { %v3731_v42 = vsel %vm1377_vm3, %v3664_v20, %v3666_v12  ;;  %v11906_v20 = vld [vmem:[%s15008_s1 + $0x38] sm:$0x3f]  }
 0x35e   :  { %4654 = vrot.lane.b32.xlu1 %v11865_v15, %s8783_s16  ;;  %3812 = vmatprep.subr.bf16.mxu1 %v3731_v42  ;;  %v3708_v51 = vpop.permute.xlu0 %3707 }
 0x35f   :  { %3813 = vmatpush1.bf16.msra.mxu1 %v3730_v28  ;;  %v3750_v9 = vsel %vm1377_vm3, %v3706_v47, %v3708_v51 }
 0x360   :  { %v3710_v0 = vpop.permute.xlu1 %3709  ;;  %4634 = vrot.lane.b32.xlu0 %v11874_v18, %s8783_s16  ;;  %3814 = vmatprep.subr.bf16.mxu1 %v3722_v10 }
 0x361   :  { %v3751_v41 = vsel %vm1377_vm3, %v3708_v51, %v3710_v0 }
 0x362   :  { %4614 = vrot.lane.b32.xlu1 %v11884_v55, %s8783_s16  ;;  %3851 = vmatprep.subr.bf16.mxu0 %v3751_v41  ;;  %v3712_v11 = vpop.permute.xlu0 %3711 }
 0x363   :  { %3815 = vmatpush1.bf16.msra.mxu1 %v3721_v62  ;;  %3852 = vmatpush1.bf16.msra.mxu0 %v3750_v9  ;;  %v3752_v31 = vsel %vm1377_vm3, %v3710_v0, %v3712_v11 }
 0x364   :  { %v3714_v42 = vpop.permute.xlu1 %3713  ;;  %4594 = vrot.lane.b32.xlu0 %v11894_v35, %s8783_s16 }
 0x365   :  { %v3753_v28 = vsel %vm1377_vm3, %v3712_v11, %v3714_v42 }
 0x366   :  { %5283 = vrot.lane.b32.xlu1 %v11413_v4, %s8785_s14  ;;  %3894 = vmatprep.subr.bf16.mxu1 %v3753_v28  ;;  %v3688_v39 = vpop.permute.xlu0 %3687 }
 0x367   :  { %8292 = vmatmul.mubr.msk.bf16.vlgmr.msra.gmra.mxu1 %vm404_vm1, %v11906_v20  ;;  %v3741_v41 = vsel %vm1377_vm3, %v3686_v1, %v3688_v39 }
 0x368   :  { %3895 = vmatpush1.bf16.msra.mxu1 %v3752_v31  ;;  %v3690_v47 = vpop.permute.xlu1 %3689  ;;  %5285 = vrot.lane.b32.xlu0 %v11427_v56, %s8785_s14 }
 0x369   :  { %v3742_v51 = vsel %vm1377_vm3, %v3688_v39, %v3690_v47  ;;  %3918 = vmatprep.mubr.bf16.mxu1 %v15180_v2  ;;  %v3724_v39 = vsel %vm1377_vm3, %v11687_v34, %v11703_v25 }
 0x36a   :  { %5287 = vrot.lane.b32.xlu1 %v11439_v24, %s8785_s14  ;;  %3853 = vmatprep.subr.bf16.mxu0 %v3742_v51  ;;  %v3692_v10 = vpop.permute.xlu0 %3691 }
 0x36b   :  { %3854 = vmatpush1.bf16.msra.mxu0 %v3741_v41  ;;  %v3743_v9 = vsel %vm1377_vm3, %v3690_v47, %v3692_v10 }
 0x36c   :  { %v3694_v62 = vpop.permute.xlu1 %3693  ;;  %5289 = vrot.lane.b32.xlu0 %v11461_v22, %s8785_s14 }
 0x36d   :  { %v3744_v0 = vsel %vm1377_vm3, %v3692_v10, %v3694_v62 }
 0x36e   :  { %5281 = vrot.lane.b32.xlu1 %v11477_v27, %s8785_s14  ;;  %3896 = vmatprep.subr.bf16.mxu1 %v3744_v0  ;;  %v3668_v11 = vpop.permute.xlu0 %3667 }
 0x36f   :  { %3897 = vmatpush1.bf16.msra.mxu1 %v3743_v9  ;;  %v3732_v28 = vsel %vm1377_vm3, %v3666_v12, %v3668_v11  ;;  %v3723_v12 = vsel %vm1377_vm3, %v11673_v29, %v11687_v34  ;;  %v3725_v34 = vsel %vm1377_vm3, %v11703_v25, %v11718_v17 }
 0x370   :  { %v3670_v24 = vpop.permute.xlu1 %3669  ;;  %5263 = vrot.lane.b32.xlu0 %v11493_v54, %s8785_s14 }
 0x371   :  { %v3733_v1 = vsel %vm1377_vm3, %v3668_v11, %v3670_v24 }
 0x372   :  { %5265 = vrot.lane.b32.xlu1 %v11509_v45, %s8785_s14  ;;  %3855 = vmatprep.subr.bf16.mxu0 %v3733_v1  ;;  %v3672_v22 = vpop.permute.xlu0 %3671 }
 0x373   :  { %3856 = vmatpush1.bf16.msra.mxu0 %v3732_v28  ;;  %v3734_v10 = vsel %vm1377_vm3, %v3670_v24, %v3672_v22 }
 0x374   :  { %v3674_v31 = vpop.permute.xlu1 %3673  ;;  %5267 = vrot.lane.b32.xlu0 %v11518_v49, %s8785_s14  ;;  %3857 = vmatprep.subr.bf16.mxu0 %v3724_v39  ;;  %v3726_v49 = vsel %vm1377_vm3, %v11718_v17, %v11734_v52  ;;  %v3728_v39 = vsel %vm1377_vm3, %v11748_v61, %v11764_v36 }
 0x375   :  { %v3735_v47 = vsel %vm1377_vm3, %v3672_v22, %v3674_v31 }
 0x376   :  { %5269 = vrot.lane.b32.xlu1 %v11527_v53, %s8785_s14  ;;  %3898 = vmatprep.subr.bf16.mxu1 %v3735_v47  ;;  %v3716_v51 = vpop.permute.xlu0 %3715 }
 0x377   :  { %3858 = vmatpush1.bf16.msra.mxu0 %v3723_v12  ;;  %3899 = vmatpush1.bf16.msra.mxu1 %v3734_v10  ;;  %v3754_v0 = vsel %vm1377_vm3, %v3714_v42, %v3716_v51  ;;  %v3727_v12 = vsel %vm1377_vm3, %v11734_v52, %v11748_v61 }
 0x378   :  { %v3718_v41 = vpop.permute.xlu1 %3717  ;;  %5261 = vrot.lane.b32.xlu0 %v11534_v16, %s8785_s14  ;;  %3900 = vmatprep.subr.bf16.mxu1 %v3726_v49 }
 0x379   :  { %v3755_v53 = vsel %vm1377_vm3, %v3716_v51, %v3718_v41 }
 0x37a   :  { %5243 = vrot.lane.b32.xlu1 %v11541_v3, %s8785_s14  ;;  %3937 = vmatprep.subr.bf16.mxu0 %v3755_v53  ;;  %v3720_v29 = vpop.permute.xlu0 %3719 }
 0x37b   :  { %8293 = vmatmul.mubr.msk.bf16.vlgmr.msra.gmra.mxu0 %vm404_vm1, %v11906_v20  ;;  %3901 = vmatpush1.bf16.msra.mxu1 %v3725_v34  ;;  %v3756_v25 = vsel %vm1377_vm3, %v3718_v41, %v3720_v29  ;;  %v3729_v41 = vsel %vm1377_vm3, %v11764_v36, %v11776_v21 }
 0x37c   :  { %3938 = vmatpush1.bf16.msra.mxu0 %v3754_v0  ;;  %v3696_v11 = vpop.permute.xlu1 %3695  ;;  %5245 = vrot.lane.b32.xlu0 %v11548_v26, %s8785_s14 }
 0x37d   :  { %3980 = vmatprep.subr.bf16.mxu1 %v3720_v29  ;;  %3961 = vmatprep.mubr.bf16.mxu0 %v15180_v2  ;;  %v3745_v24 = vsel %vm1377_vm3, %v3694_v62, %v3696_v11 }
 0x37e   :  { %5247 = vrot.lane.b32.xlu1 %v11557_v50, %s8785_s14  ;;  %v3698_v9 = vpop.permute.xlu0 %3697  ;;  %8294 = vmatmul.mubr.msk.bf16.vlgmr.msra.gmra.mxu1 %vm404_vm1, %v11906_v20 }
 0x37f   :  { %3981 = vmatpush1.bf16.msra.mxu1 %v3756_v25  ;;  %v3746_v17 = vsel %vm1377_vm3, %v3696_v11, %v3698_v9  ;;  %4004 = vmatprep.mubr.bf16.mxu1 %v15180_v2 }
 0x380   :  { %v3700_v42 = vpop.permute.xlu1 %3699  ;;  %5249 = vrot.lane.b32.xlu0 %v11567_v14, %s8785_s14  ;;  %3939 = vmatprep.subr.bf16.mxu0 %v3746_v17 }
 0x381   :  { %3940 = vmatpush1.bf16.msra.mxu0 %v3745_v24  ;;  %3982 = vmatprep.subr.bf16.mxu1 %v3700_v42  ;;  %v3747_v50 = vsel %vm1377_vm3, %v3698_v9, %v3700_v42 }
 0x382   :  { %5241 = vrot.lane.b32.xlu1 %v11579_v63, %s8785_s14  ;;  %v3676_v1 = vpop.permute.xlu0 %3675 }
 0x383   :  { %3983 = vmatpush1.bf16.msra.mxu1 %v3747_v50  ;;  %v3736_v62 = vsel %vm1377_vm3, %v3674_v31, %v3676_v1 }
 0x384   :  { %v3678_v22 = vpop.permute.xlu1 %3677  ;;  %5223 = vrot.lane.b32.xlu0 %v11592_v19, %s8785_s14 }
 0x385   :  { %v3737_v28 = vsel %vm1377_vm3, %v3676_v1, %v3678_v22 }
 0x386   :  { %5225 = vrot.lane.b32.xlu1 %v11605_v43, %s8785_s14  ;;  %3941 = vmatprep.subr.bf16.mxu0 %v3737_v28  ;;  %v3680_v14 = vpop.permute.xlu0 %3679 }
 0x387   :  { %3942 = vmatpush1.bf16.msra.mxu0 %v3736_v62  ;;  %3984 = vmatprep.subr.bf16.mxu1 %v3680_v14  ;;  %v3738_v47 = vsel %vm1377_vm3, %v3678_v22, %v3680_v14 }
 0x388   :  { %v4639_v51 = vpop.permute.xlu1 %4638  ;;  %5227 = vrot.lane.b32.xlu0 %v11620_v59, %s8785_s14  ;;  %3943 = vmatprep.subr.bf16.mxu0 %v3728_v39 }
 0x389   :  { %3985 = vmatpush1.bf16.msra.mxu1 %v3738_v47 }
 0x38a   :  { %3986 = vmatprep.subr.bf16.mxu1 %v11776_v21  ;;  %5229 = vrot.lane.b32.xlu1 %v11635_v60, %s8785_s14  ;;  %v4641_v31 = vpop.permute.xlu0 %4640 }
 0x38b   :  { %3944 = vmatpush1.bf16.msra.mxu0 %v3727_v12  ;;  %v4684_v10 = vsel %vm327_vm0, %v4639_v51, %v4641_v31 }
 0x38c   :  { %v4643_v49 = vpop.permute.xlu1 %4642  ;;  %5221 = vrot.lane.b32.xlu0 %v11653_v44, %s8785_s14  ;;  %4743 = vmatprep.subr.bf16.mxu0 %v4684_v10  ;;  %v12056_v10 = vpop.f32.mrf.mxu0 }
 0x38d   :  { %3987 = vmatpush1.bf16.msra.mxu1 %v3729_v41  ;;  %v4685_v21 = vsel %vm327_vm0, %v4641_v31, %v4643_v49 }
 0x38e   :  { %5291 = vrot.lane.b32.xlu1 %v11668_v38, %s8785_s14  ;;  %v12003_v53 = vpop.permute.xlu0 %4644  ;;  %8295 = vmatmul.mubr.msk.bf16.vlgmr.msra.gmra.mxu0 %vm404_vm1, %v11906_v20  ;;  %v12060_v41 = vpop.f32.mrf.mxu0 }
 0x38f   :  { %v4686_v52 = vsel %vm327_vm0, %v4643_v49, %v12003_v53  ;;  %4767 = vmatprep.mubr.bf16.mxu0 %v15180_v2 }
 0x390   :  { %v4637_v61 = vpop.permute.xlu1 %4636  ;;  %5293 = vrot.lane.b32.xlu0 %v11682_v46, %s8785_s14  ;;  %4786 = vmatprep.subr.bf16.mxu1 %v4686_v52 }
 0x391   :  { %v4683_v36 = vsel %vm327_vm0, %v4637_v61, %v4639_v51  ;;  %8296 = vmatmul.mubr.msk.bf16.vlgmr.msra.gmra.mxu1 %vm404_vm1, %v11906_v20 }
 0x392   :  { %4787 = vmatpush1.bf16.msra.mxu1 %v4685_v21  ;;  %5295 = vrot.lane.b32.xlu1 %v11698_v23, %s8785_s14  ;;  %v4619_v29 = vpop.permute.xlu0 %4618 }
 0x393   :  { %4744 = vmatpush1.bf16.msra.mxu0 %v4683_v36  ;;  %4810 = vmatprep.mubr.bf16.mxu1 %v15180_v2  ;;  %v12068_v36 = vpop.f32.mrf.mxu0 }
 0x394   :  { %v4621_v34 = vpop.permute.xlu1 %4620  ;;  %5297 = vrot.lane.b32.xlu0 %v11713_v5, %s8785_s14 }
 0x395   :  { %v4675_v0 = vsel %vm327_vm0, %v4619_v29, %v4621_v34 }
 0x396   :  { %5271 = vrot.lane.b32.xlu1 %v11729_v48, %s8785_s14  ;;  %4745 = vmatprep.subr.bf16.mxu0 %v4675_v0  ;;  %v4623_v20 = vpop.permute.xlu0 %4622  ;;  %v12077_v0 = vld [vmem:[%s15008_s1 + $0x48] sm:$0x3f]  }
 0x397   :  { %v4676_v17 = vsel %vm327_vm0, %v4621_v34, %v4623_v20 }
 0x398   :  { %v12024_v11 = vpop.permute.xlu1 %4624  ;;  %5273 = vrot.lane.b32.xlu0 %v11744_v8, %s8785_s14 }
 0x399   :  { %v4677_v9 = vsel %vm327_vm0, %v4623_v20, %v12024_v11  ;;  %v12079_v20 = vpop.f32.mrf.mxu0 }
 0x39a   :  { %5275 = vrot.lane.b32.xlu1 %v11759_v33, %s8785_s14  ;;  %4788 = vmatprep.subr.bf16.mxu1 %v4677_v9  ;;  %v4617_v25 = vpop.permute.xlu0 %4616 }
 0x39b   :  { %v4674_v42 = vsel %vm327_vm0, %v4617_v25, %v4619_v29  ;;  %4789 = vmatpush1.bf16.msra.mxu1 %v4676_v17  ;;  %v12085_v25 = vpop.f32.mrf.mxu0 }
 0x39c   :  { %v4599_v24 = vpop.permute.xlu1 %4598  ;;  %5277 = vrot.lane.b32.xlu0 %v11771_v13, %s8785_s14  ;;  %4746 = vmatpush1.bf16.msra.mxu0 %v4674_v42 }
 0x39e   :  { %5251 = vrot.lane.b32.xlu1 %v11789_v58, %s8785_s14  ;;  %v4601_v50 = vpop.permute.xlu0 %4600 }
 0x39f   :  { %v4666_v1 = vsel %vm327_vm0, %v4599_v24, %v4601_v50 }
 0x3a0   :  { %v4603_v22 = vpop.permute.xlu1 %4602  ;;  %5253 = vrot.lane.b32.xlu0 %v11797_v6, %s8785_s14  ;;  %4747 = vmatprep.subr.bf16.mxu0 %v4666_v1 }
 0x3a1   :  { %v4667_v39 = vsel %vm327_vm0, %v4601_v50, %v4603_v22 }
 0x3a2   :  { %5255 = vrot.lane.b32.xlu1 %v11808_v30, %s8785_s14  ;;  %v12043_v28 = vpop.permute.xlu0 %4604 }
 0x3a3   :  { %v4668_v14 = vsel %vm327_vm0, %v4603_v22, %v12043_v28 }
 0x3a4   :  { %v4597_v62 = vpop.permute.xlu1 %4596  ;;  %5257 = vrot.lane.b32.xlu0 %v11819_v57, %s8785_s14  ;;  %4790 = vmatprep.subr.bf16.mxu1 %v4668_v14 }
 0x3a5   :  { %v4665_v47 = vsel %vm327_vm0, %v4597_v62, %v4599_v24  ;;  %4791 = vmatpush1.bf16.msra.mxu1 %v4667_v39  ;;  %v12097_v24 = vpop.f32.mrf.mxu0 }
 0x3a6   :  { %5231 = vrot.lane.b32.xlu1 %v11830_v37, %s8785_s14  ;;  %4748 = vmatpush1.bf16.msra.mxu0 %v4665_v47  ;;  %v4579_v51 = vpop.permute.xlu0 %4578 }
 0x3a7   :  { %v12106_v14 = vpop.f32.mrf.mxu0 }
 0x3a8   :  { %v4581_v31 = vpop.permute.xlu1 %4580  ;;  %5233 = vrot.lane.b32.xlu0 %v11839_v7, %s8785_s14 }
 0x3a9   :  { %v4657_v12 = vsel %vm327_vm0, %v4579_v51, %v4581_v31 }
 0x3aa   :  { %5235 = vrot.lane.b32.xlu1 %v11849_v40, %s8785_s14  ;;  %4749 = vmatprep.subr.bf16.mxu0 %v4657_v12  ;;  %v4583_v49 = vpop.permute.xlu0 %4582 }
 0x3ab   :  { %v4658_v29 = vsel %vm327_vm0, %v4581_v31, %v4583_v49 }
 0x3ac   :  { %v12062_v52 = vpop.permute.xlu1 %4584  ;;  %5237 = vrot.lane.b32.xlu0 %v11857_v32, %s8785_s14 }
 0x3ad   :  { %v4659_v61 = vsel %vm327_vm0, %v4583_v49, %v12062_v52 }
 0x3ae   :  { %5685 = vrot.lane.b32.xlu1 %v11413_v4, %s8786_s15  ;;  %4792 = vmatprep.subr.bf16.mxu1 %v4659_v61  ;;  %v4577_v21 = vpop.permute.xlu0 %4576  ;;  %v12083_v4 = vpop.f32.mrf.mxu1 }
 0x3af   :  { %v4656_v34 = vsel %vm327_vm0, %v4577_v21, %v4579_v51  ;;  %4793 = vmatpush1.bf16.msra.mxu1 %v4658_v29  ;;  %v12116_v51 = vpop.f32.mrf.mxu0 }
 0x3b0   :  { %v4647_v9 = vpop.permute.xlu1 %4646  ;;  %5687 = vrot.lane.b32.xlu0 %v11427_v56, %s8786_s15  ;;  %4750 = vmatpush1.bf16.msra.mxu0 %v4656_v34  ;;  %v12095_v56 = vpop.f32.mrf.mxu1  ;;  %15193 = vst [vmem:[#allocation15_spill] sm:$0xff] %v12116_v51 }
 0x3b1   :  { %v4687_v1 = vsel %vm327_vm0, %v12003_v53, %v4647_v9 }
 0x3b2   :  { %5299 = vrot.lane.b32.xlu1 %v11865_v15, %s8785_s14  ;;  %v4649_v17 = vpop.permute.xlu0 %4648  ;;  %8343 = vmatmul.mubr.msk.bf16.vlgmr.msra.gmra.mxu1 %vm404_vm1, %v12077_v0  ;;  %v12104_v22 = vpop.f32.mrf.mxu1 }
 0x3b3   :  { %v4688_v42 = vsel %vm327_vm0, %v4647_v9, %v4649_v17  ;;  %8342 = vmatmul.mubr.msk.bf16.vlgmr.msra.gmra.mxu0 %vm404_vm1, %v12077_v0  ;;  %4896 = vmatprep.mubr.bf16.mxu1 %v15180_v2 }
 0x3b4   :  { %v4651_v50 = vpop.permute.xlu1 %4650  ;;  %5683 = vrot.lane.b32.xlu0 %v11477_v27, %s8786_s15  ;;  %4829 = vmatprep.subr.bf16.mxu0 %v4688_v42  ;;  %v12114_v47 = vpop.f32.mrf.mxu1 }
 0x3b5   :  { %4830 = vmatpush1.bf16.msra.mxu0 %v4687_v1  ;;  %4853 = vmatprep.mubr.bf16.mxu0 %v15180_v2  ;;  %15192 = vst [vmem:[#allocation23_spill] sm:$0xff] %v12114_v47  ;;  %v4689_v31 = vsel %vm327_vm0, %v4649_v17, %v4651_v50 }
 0x3b6   :  { %5665 = vrot.lane.b32.xlu1 %v11493_v54, %s8786_s15  ;;  %v12110_v62 = vpop.permute.xlu0 %4652  ;;  %v12121_v12 = vpop.f32.mrf.mxu1 }
 0x3b7   :  { %v4690_v39 = vsel %vm327_vm0, %v4651_v50, %v12110_v62  ;;  %v12123_v54 = vpop.f32.mrf.mxu0 }
 0x3b8   :  { %v4627_v53 = vpop.permute.xlu1 %4626  ;;  %5667 = vrot.lane.b32.xlu0 %v11509_v45, %s8786_s15  ;;  %4872 = vmatprep.subr.bf16.mxu1 %v4690_v39  ;;  %v12128_v21 = vpop.f32.mrf.mxu1 }
 0x3b9   :  { %4873 = vmatpush1.bf16.msra.mxu1 %v4689_v31  ;;  %v12130_v29 = vpop.f32.mrf.mxu0  ;;  %v4678_v45 = vsel %vm327_vm0, %v12024_v11, %v4627_v53 }
 0x3ba   :  { %5279 = vrot.lane.b32.xlu1 %v11874_v18, %s8785_s14  ;;  %v4629_v49 = vpop.permute.xlu0 %4628  ;;  %v12136_v9 = vpop.f32.mrf.mxu1 }
 0x3bb   :  { %v4679_v61 = vsel %vm327_vm0, %v4627_v53, %v4629_v49  ;;  %v12138_v17 = vpop.f32.mrf.mxu0 }
 0x3bc   :  { %v4631_v34 = vpop.permute.xlu1 %4630  ;;  %5663 = vrot.lane.b32.xlu0 %v11534_v16, %s8786_s15  ;;  %4831 = vmatprep.subr.bf16.mxu0 %v4679_v61  ;;  %v12146_v1 = vpop.f32.mrf.mxu1 }
 0x3bd   :  { %4832 = vmatpush1.bf16.msra.mxu0 %v4678_v45  ;;  %15194 = vst [vmem:[#allocation10_spill] sm:$0xff] %v12146_v1  ;;  %v12148_v16 = vpop.f32.mrf.mxu0  ;;  %v4680_v11 = vsel %vm327_vm0, %v4629_v49, %v4631_v34 }
 0x3be   :  { %5645 = vrot.lane.b32.xlu1 %v11541_v3, %s8786_s15  ;;  %v12142_v42 = vpop.permute.xlu0 %4632  ;;  %v3050_v53 = vpop.f32.mrf.mxu1 }
 0x3bf   :  { %v4681_v50 = vsel %vm327_vm0, %v4631_v34, %v12142_v42  ;;  %v3093_v31 = vpop.f32.mrf.mxu0 }
 0x3c0   :  { %v4607_v39 = vpop.permute.xlu1 %4606  ;;  %5647 = vrot.lane.b32.xlu0 %v11548_v26, %s8786_s15  ;;  %4874 = vmatprep.subr.bf16.mxu1 %v4681_v50  ;;  %v3052_v45 = vpop.f32.mrf.mxu1  ;;  %v12168_v47 = vadd.f32 %v3093_v31, %v12083_v4 }
 0x3c1   :  { %4875 = vmatpush1.bf16.msra.mxu1 %v4680_v11  ;;  %v3095_v1 = vpop.f32.mrf.mxu0  ;;  %v4669_v26 = vsel %vm327_vm0, %v12043_v28, %v4607_v39  ;;  %v12165_v11 = vadd.f32 %v3050_v53, %v12056_v10  ;;  %v12180_v10 = vadd.f32 %v3052_v45, %v12060_v41 }
 0x3c2   :  { %5259 = vrot.lane.b32.xlu1 %v11884_v55, %s8785_s14  ;;  %v4609_v3 = vpop.permute.xlu0 %4608  ;;  %v3054_v49 = vpop.f32.mrf.mxu1  ;;  %15195 = vst [vmem:[#allocation25_spill] sm:$0xff] %v12168_v47  ;;  %v12183_v4 = vadd.f32 %v3095_v1, %v12095_v56 }
 0x3c3   :  { %v4670_v61 = vsel %vm327_vm0, %v4607_v39, %v4609_v3  ;;  %v3097_v34 = vpop.f32.mrf.mxu0  ;;  %v12188_v47 = vadd.f32 %v3054_v49, %v12068_v36  ;;  %v12201_v36 = vld [vmem:[%s15007_s0 + $0x114] ss:$44 sps:$4 sm:$0xff]  }
 0x3c4   :  { %v4611_v51 = vpop.permute.xlu1 %4610  ;;  %5643 = vrot.lane.b32.xlu0 %v11579_v63, %s8786_s15  ;;  %4833 = vmatprep.subr.bf16.mxu0 %v4670_v61  ;;  %v12172_v32 = vpop.f32.mrf.mxu1 }
 0x3c5   :  { %4834 = vmatpush1.bf16.msra.mxu0 %v4669_v26  ;;  %v12174_v28 = vpop.f32.mrf.mxu0  ;;  %v4671_v26 = vsel %vm327_vm0, %v4609_v3, %v4611_v51 }
 0x3c6   :  { %5625 = vrot.lane.b32.xlu1 %v11592_v19, %s8786_s15  ;;  %v12162_v50 = vpop.permute.xlu0 %4612  ;;  %15196 = vst [vmem:[#allocation14_spill] sm:$0xff] %v12174_v28  ;;  %v3136_v53 = vpop.f32.mrf.mxu1 }
 0x3c7   :  { %v4672_v61 = vsel %vm327_vm0, %v4611_v51, %v12162_v50  ;;  %v3179_v31 = vpop.f32.mrf.mxu0  ;;  %v12208_v49 = vadd.f32 %v3136_v53, %v12085_v25 }
 0x3c8   :  { %v4587_v39 = vpop.permute.xlu1 %4586  ;;  %5627 = vrot.lane.b32.xlu0 %v11605_v43, %s8786_s15  ;;  %4876 = vmatprep.subr.bf16.mxu1 %v4672_v61  ;;  %v12191_v43 = vadd.f32 %v3097_v34, %v12104_v22  ;;  %v3138_v41 = vpop.f32.mrf.mxu1  ;;  %v12211_v34 = vadd.f32 %v3179_v31, %v12121_v12 }
 0x3c9   :  { %4877 = vmatpush1.bf16.msra.mxu1 %v4671_v26  ;;  %v4660_v56 = vsel %vm327_vm0, %v12062_v52, %v4587_v39  ;;  %v3181_v1 = vpop.f32.mrf.mxu0  ;;  %v12220_v26 = vld [vmem:[%s15007_s0 + $0x118] ss:$44 sps:$4 sm:$0xff]   ;;  %v12226_v12 = vadd.f32 %v3138_v41, %v12097_v24 }
 0x3ca   :  { %5239 = vrot.lane.b32.xlu1 %v11894_v35, %s8785_s14  ;;  %v4589_v28 = vpop.permute.xlu0 %4588  ;;  %v3140_v45 = vpop.f32.mrf.mxu1  ;;  %v12229_v53 = vadd.f32 %v3181_v1, %v12128_v21 }
 0x3cb   :  { %v4661_v51 = vsel %vm327_vm0, %v4587_v39, %v4589_v28  ;;  %v12238_v24 = vadd.f32 %v3140_v45, %v12106_v14  ;;  %v8754_v14 = vld [vmem:[%s15007_s0 + $0xbc] ss:$44 sps:$4 sm:$0xff]   ;;  %v8755_v45 = vld [vmem:[%s15007_s0 + $0xb4] ss:$44 sps:$4 sm:$0xff]  }
 0x3cc   :  { %v4591_v3 = vpop.permute.xlu1 %4590  ;;  %5623 = vrot.lane.b32.xlu0 %v11653_v44, %s8786_s15  ;;  %4835 = vmatprep.subr.bf16.mxu0 %v4661_v51  ;;  %v12215_v61 = vpop.f32.mrf.mxu1 }
 0x3cd   :  { %4836 = vmatpush1.bf16.msra.mxu0 %v4660_v56  ;;  %v4662_v25 = vsel %vm327_vm0, %v4589_v28, %v4591_v3  ;;  %v3183_v51 = vpop.f32.mrf.mxu0 }
 0x3ce   :  { %5689 = vrot.lane.b32.xlu1 %v12201_v36, %s8786_s15  ;;  %v12205_v22 = vpop.permute.xlu0 %4592  ;;  %v3222_v56 = vpop.f32.mrf.mxu1  ;;  %v12241_v21 = vadd.f32 %v3183_v51, %v12136_v9 }
 0x3cf   :  { %v4663_v52 = vsel %vm327_vm0, %v4591_v3, %v12205_v22 }
 0x3d0   :  { %v4655_v39 = vpop.permute.xlu1 %4654  ;;  %5691 = vrot.lane.b32.xlu0 %v12220_v26, %s8786_s15  ;;  %4878 = vmatprep.subr.bf16.mxu1 %v4663_v52  ;;  %v3224_v41 = vpop.f32.mrf.mxu1  ;;  %v12261_v52 = vadd.f32 %v3222_v56, %v12123_v54  ;;  %v8757_v54 = vld [vmem:[%s15007_s0 + $0xb0] ss:$44 sps:$4 sm:$0xff]  }
 0x3d1   :  { %4879 = vmatpush1.bf16.msra.mxu1 %v4662_v25  ;;  %4915 = vmatprep.subr.bf16.mxu0 %v4655_v39  ;;  %v4691_v31 = vsel %vm327_vm0, %v12110_v62, %v4655_v39  ;;  %v8753_v62 = vld [vmem:[%s15007_s0 + $0x10c] ss:$44 sps:$4 sm:$0xff]   ;;  %v12271_v25 = vadd.f32 %v3224_v41, %v12130_v29  ;;  %v8758_v29 = vld [vmem:[%s15007_s0 + $0x5c] ss:$44 sps:$4 sm:$0xff]   ;;  %v8759_v41 = vld [vmem:[%s15007_s0 + $0x64] ss:$44 sps:$4 sm:$0xff]  }
 0x3d2   :  { %5693 = vrot.lane.b32.xlu1 %v11668_v38, %s8786_s15  ;;  %8344 = vmatmul.mubr.msk.bf16.vlgmr.msra.gmra.mxu0 %vm404_vm1, %v12077_v0  ;;  %v4635_v28 = vpop.permute.xlu0 %4634 }
 0x3d3   :  { %4916 = vmatpush1.bf16.msra.mxu0 %v4691_v31  ;;  %5006 = vmatprep.subr.bf16.mxu1 %v8753_v62  ;;  %v4682_v9 = vsel %vm327_vm0, %v12142_v42, %v4635_v28  ;;  %v8756_v42 = vld [vmem:[%s15007_s0 + $0xc0] ss:$44 sps:$4 sm:$0xff]  }
 0x3d4   :  { %v4615_v3 = vpop.permute.xlu1 %4614  ;;  %5695 = vrot.lane.b32.xlu0 %v11682_v46, %s8786_s15  ;;  %8345 = vmatmul.mubr.msk.bf16.vlgmr.msra.gmra.mxu1 %vm404_vm1, %v12077_v0 }
 0x3d5   :  { %4917 = vmatprep.subr.bf16.mxu0 %v4635_v28  ;;  %5007 = vmatpush1.bf16.msra.mxu1 %v11477_v27  ;;  %v3226_v27 = vpop.f32.mrf.mxu1  ;;  %v4673_v31 = vsel %vm327_vm0, %v12162_v50, %v4615_v3 }
 0x3d6   :  { %5669 = vrot.lane.b32.xlu1 %v8754_v14, %s8786_s15  ;;  %v4595_v1 = vpop.permute.xlu0 %4594  ;;  %5008 = vmatprep.subr.bf16.mxu1 %v8755_v45  ;;  %v12287_v56 = vadd.f32 %v3226_v27, %v12138_v17  ;;  %v8766_v45 = vld [vmem:[%s15007_s0 + $0x10] ss:$44 sps:$4 sm:$0xff]  }
 0x3d7   :  { %4918 = vmatpush1.bf16.msra.mxu0 %v4682_v9  ;;  %4939 = vmatprep.mubr.bf16.mxu0 %v15180_v2  ;;  %v3228_v28 = vpop.f32.mrf.mxu1  ;;  %v4664_v17 = vsel %vm327_vm0, %v12205_v22, %v4595_v1  ;;  %v8761_v22 = vld [vmem:[%s15007_s0 + $0x110] ss:$44 sps:$4 sm:$0xff]  }
 0x3d8   :  { %4919 = vmatprep.subr.bf16.mxu0 %v4615_v3  ;;  %v12264_v39 = vpop.permute.xlu1 %5283  ;;  %5671 = vrot.lane.b32.xlu0 %v8756_v42, %s8786_s15  ;;  %v12294_v50 = vadd.f32 %v3228_v28, %v12148_v16  ;;  %v12316_v16 = vld [vmem:[%s15008_s1 + $0x40] sm:$0x3f]   ;;  %v15200_v28 = vld [vmem:[#allocation14_spill] sm:$0xff] }
 0x3d9   :  { %5009 = vmatpush1.bf16.msra.mxu1 %v8757_v54  ;;  %5030 = vmatprep.mubr.bf16.mxu1 %v15180_v2 }
 0x3da   :  { %5673 = vrot.lane.b32.xlu1 %v11729_v48, %s8786_s15  ;;  %v12281_v51 = vpop.permute.xlu0 %5285  ;;  %5010 = vmatprep.subr.bf16.mxu1 %v8758_v29  ;;  %v15198_v29 = vld [vmem:[#allocation24_spill] sm:$0xff] }
 0x3db   :  { %4920 = vmatpush1.bf16.msra.mxu0 %v4673_v31 }
 0x3dc   :  { %v12289_v62 = vpop.permute.xlu1 %5287  ;;  %5675 = vrot.lane.b32.xlu0 %v11744_v8, %s8786_s15  ;;  %4921 = vmatprep.subr.bf16.mxu0 %v4595_v1 }
 0x3dd   :  { %5011 = vmatpush1.bf16.msra.mxu1 %v11579_v63  ;;  %v8760_v63 = vld [vmem:[%s15007_s0 + $0x68] ss:$44 sps:$4 sm:$0xff]  }
 0x3de   :  { %5649 = vrot.lane.b32.xlu1 %v8759_v41, %s8786_s15  ;;  %v12303_v3 = vpop.permute.xlu0 %5289  ;;  %5012 = vmatprep.subr.bf16.mxu1 %v11592_v19 }
 0x3df   :  { %4922 = vmatpush1.bf16.msra.mxu0 %v4664_v17 }
 0x3e0   :  { %v12306_v9 = vpop.permute.xlu1 %5281  ;;  %5651 = vrot.lane.b32.xlu0 %v8760_v63, %s8786_s15  ;;  %5049 = vmatprep.subr.bf16.mxu0 %v12201_v36 }
 0x3e1   :  { %5013 = vmatpush1.bf16.msra.mxu1 %v11653_v44 }
 0x3e2   :  { %5653 = vrot.lane.b32.xlu1 %v11789_v58, %s8786_s15  ;;  %8346 = vmatmul.mubr.msk.bf16.vlgmr.msra.gmra.mxu0 %vm404_vm1, %v12077_v0  ;;  %v12323_v19 = vpop.permute.xlu0 %5263 }
 0x3e3   :  { %5050 = vmatpush1.bf16.msra.mxu0 %v8761_v22  ;;  %5092 = vmatprep.subr.bf16.mxu1 %v11668_v38  ;;  %v8762_v38 = vld [vmem:[%s15007_s0 + $0xb8] ss:$44 sps:$4 sm:$0xff]  }
 0x3e4   :  { %v12329_v36 = vpop.permute.xlu1 %5265  ;;  %5655 = vrot.lane.b32.xlu0 %v11797_v6, %s8786_s15  ;;  %8348 = vmatmul.mubr.msk.bf16.vlgmr.msra.gmra.mxu1 %vm404_vm1, %v12316_v16 }
 0x3e5   :  { %5051 = vmatprep.subr.bf16.mxu0 %v8754_v14  ;;  %5093 = vmatpush1.bf16.msra.mxu1 %v12220_v26  ;;  %v8765_v14 = vld [vmem:[%s15007_s0 + $0x8] ss:$44 sps:$4 sm:$0xff]  }
 0x3e6   :  { %5629 = vrot.lane.b32.xlu1 %v11620_v59, %s8786_s15  ;;  %v12338_v44 = vpop.permute.xlu0 %5267  ;;  %5094 = vmatprep.subr.bf16.mxu1 %v11729_v48  ;;  %v8763_v48 = vld [vmem:[%s15007_s0 + $0x60] ss:$44 sps:$4 sm:$0xff]  }
 0x3e7   :  { %5052 = vmatpush1.bf16.msra.mxu0 %v8762_v38  ;;  %5073 = vmatprep.mubr.bf16.mxu0 %v15180_v2  ;;  %v12472_v38 = vld [vmem:[%s15007_s0 + $0x10c] ss:$44 sps:$4 sm:$0xff]  }
 0x3e8   :  { %v12345_v0 = vpop.permute.xlu1 %5269  ;;  %5631 = vrot.lane.b32.xlu0 %v11635_v60, %s8786_s15  ;;  %5053 = vmatprep.subr.bf16.mxu0 %v8759_v41  ;;  %v8764_v60 = vld [vmem:[%s15007_s0 + $0xc] ss:$44 sps:$4 sm:$0xff]  }
 0x3e9   :  { %5095 = vmatpush1.bf16.msra.mxu1 %v8756_v42  ;;  %5116 = vmatprep.mubr.bf16.mxu1 %v15180_v2 }
 0x3ea   :  { %5633 = vrot.lane.b32.xlu1 %v11830_v37, %s8786_s15  ;;  %v12352_v59 = vpop.permute.xlu0 %5261  ;;  %5096 = vmatprep.subr.bf16.mxu1 %v11789_v58 }
 0x3eb   :  { %5054 = vmatpush1.bf16.msra.mxu0 %v8763_v48 }
 0x3ec   :  { %v12358_v26 = vpop.permute.xlu1 %5243  ;;  %5635 = vrot.lane.b32.xlu0 %v11839_v7, %s8786_s15  ;;  %5055 = vmatprep.subr.bf16.mxu0 %v8764_v60 }
 0x3ed   :  { %5097 = vmatpush1.bf16.msra.mxu1 %v8760_v63  ;;  %v5328_v63 = vsel %vm974_vm2, %v12306_v9, %v12264_v39 }
 0x3ee   :  { %5697 = vrot.lane.b32.xlu1 %v11698_v23, %s8786_s15  ;;  %v12367_v58 = vpop.permute.xlu0 %5245  ;;  %5098 = vmatprep.subr.bf16.mxu1 %v11830_v37 }
 0x3ef   :  { %5056 = vmatpush1.bf16.msra.mxu0 %v8765_v14  ;;  %v12487_v14 = vld [vmem:[%s15007_s0 + $0x110] ss:$44 sps:$4 sm:$0xff]  }
 0x3f0   :  { %v12373_v1 = vpop.permute.xlu1 %5247  ;;  %5699 = vrot.lane.b32.xlu0 %v11713_v5, %s8786_s15  ;;  %5135 = vmatprep.subr.bf16.mxu0 %v11698_v23 }
 0x3f1   :  { %5099 = vmatpush1.bf16.msra.mxu1 %v8766_v45  ;;  %v5330_v45 = vsel %vm974_vm2, %v12281_v51, %v12289_v62 }
 0x3f2   :  { %5701 = vrot.lane.b32.xlu1 %v11865_v15, %s8786_s15  ;;  %8349 = vmatmul.mubr.msk.bf16.vlgmr.msra.gmra.mxu0 %vm404_vm1, %v12316_v16  ;;  %v12385_v37 = vpop.permute.xlu0 %5249 }
 0x3f3   :  { %5136 = vmatpush1.bf16.msra.mxu0 %v11682_v46  ;;  %5178 = vmatprep.subr.bf16.mxu1 %v11865_v15  ;;  %v12402_v46 = vpop.f32.mrf.mxu0 }
 0x3f4   :  { %v12389_v27 = vpop.permute.xlu1 %5241  ;;  %5677 = vrot.lane.b32.xlu0 %v11759_v33, %s8786_s15  ;;  %8350 = vmatmul.mubr.msk.bf16.vlgmr.msra.gmra.mxu1 %vm404_vm1, %v12316_v16 }
 0x3f5   :  { %5137 = vmatprep.subr.bf16.mxu0 %v11759_v33  ;;  %5179 = vmatpush1.bf16.msra.mxu1 %v11713_v5 }
 0x3f6   :  { %5679 = vrot.lane.b32.xlu1 %v11771_v13, %s8786_s15  ;;  %v12399_v23 = vpop.permute.xlu0 %5223  ;;  %5180 = vmatprep.subr.bf16.mxu1 %v11874_v18 }
 0x3f7   :  { %5138 = vmatpush1.bf16.msra.mxu0 %v11744_v8  ;;  %5159 = vmatprep.mubr.bf16.mxu0 %v15180_v2 }
 0x3f8   :  { %v12406_v15 = vpop.permute.xlu1 %5225  ;;  %5681 = vrot.lane.b32.xlu0 %v11874_v18, %s8786_s15  ;;  %5139 = vmatprep.subr.bf16.mxu0 %v11808_v30 }
 0x3f9   :  { %5181 = vmatpush1.bf16.msra.mxu1 %v11771_v13  ;;  %5202 = vmatprep.mubr.bf16.mxu1 %v15180_v2 }
 0x3fa   :  { %5657 = vrot.lane.b32.xlu1 %v11808_v30, %s8786_s15  ;;  %v12415_v5 = vpop.permute.xlu0 %5227  ;;  %5182 = vmatprep.subr.bf16.mxu1 %v11884_v55  ;;  %v3432_v8 = vpop.f32.mrf.mxu0  ;;  %v3057_v30 = vadd.f32 %v12172_v32, %v12079_v20 }
 0x3fb   :  { %5140 = vmatpush1.bf16.msra.mxu0 %v11797_v6  ;;  %v12420_v33 = vadd.f32 %v3432_v8, %v12165_v11 }
 0x3fc   :  { %v12422_v18 = vpop.permute.xlu1 %5229  ;;  %5659 = vrot.lane.b32.xlu0 %v11819_v57, %s8786_s15  ;;  %5141 = vmatprep.subr.bf16.mxu0 %v11849_v40  ;;  %v3434_v13 = vpop.f32.mrf.mxu0 }
 0x3fd   :  { %5183 = vmatpush1.bf16.msra.mxu1 %v11819_v57  ;;  %v12431_v42 = vadd.f32 %v3434_v13, %v12180_v10  ;;  %v5329_v57 = vsel %vm974_vm2, %v12264_v39, %v12281_v51  ;;  %v15197_v10 = vld [vmem:[#allocation25_spill] sm:$0xff]  ;;  %v5320_v39 = vsel %vm974_vm2, %v12323_v19, %v12329_v36  ;;  %v12525_v13 = vld [vmem:[%s15007_s0 + $0x118] ss:$44 sps:$4 sm:$0xff]  }
 0x3fe   :  { %5661 = vrot.lane.b32.xlu1 %v11884_v55, %s8786_s15  ;;  %v12435_v6 = vpop.permute.xlu0 %5221  ;;  %5184 = vmatprep.subr.bf16.mxu1 %v11894_v35  ;;  %v3436_v11 = vpop.f32.mrf.mxu0  ;;  %v12511_v51 = vld [vmem:[%s15007_s0 + $0x114] ss:$44 sps:$4 sm:$0xff]  }
 0x3ff   :  { %5142 = vmatpush1.bf16.msra.mxu0 %v11839_v7  ;;  %v12443_v54 = vadd.f32 %v3436_v11, %v12188_v47  ;;  %v3475_v32 = vpop.f32.mrf.mxu1  ;;  %v15199_v7 = vld [vmem:[#allocation23_spill] sm:$0xff]  ;;  %v5310_v11 = vsel %vm974_vm2, %v12389_v27, %v12358_v26 }
 0x400   :  { %5388 = vmatprep.subr.bf16.mxu0 %v5329_v57  ;;  %v12445_v20 = vpop.permute.xlu1 %5291  ;;  %5637 = vrot.lane.b32.xlu0 %v11849_v40, %s8786_s15  ;;  %v3438_v55 = vpop.f32.mrf.mxu0  ;;  %v12450_v31 = vadd.f32 %v3475_v32, %v15197_v10  ;;  %v3100_v41 = vadd.f32 %v15200_v28, %v15199_v7  ;;  %v5331_v40 = vsel %vm974_vm2, %v12289_v62, %v12303_v3  ;;  %v12559_v10 = vld [vmem:[%s15007_s0 + $0xb4] ss:$44 sps:$4 sm:$0xff]  }
 0x401   :  { %5185 = vmatpush1.bf16.msra.mxu1 %v15198_v29  ;;  %v12455_v17 = vadd.f32 %v3438_v55, %v3057_v30  ;;  %v3477_v47 = vpop.f32.mrf.mxu1  ;;  %v5321_v30 = vsel %vm974_vm2, %v12329_v36, %v12338_v44  ;;  %v5313_v57 = vsel %vm974_vm2, %v12373_v1, %v12385_v37  ;;  %v12544_v36 = vld [vmem:[%s15007_s0 + $0x108] ss:$44 sps:$4 sm:$0xff]   ;;  %v5312_v7 = vsel %vm974_vm2, %v12367_v58, %v12373_v1  ;;  %v15201_v28 = vld [vmem:[#allocation15_spill] sm:$0xff] }
 0x402   :  { %5639 = vrot.lane.b32.xlu1 %v15198_v29, %s8786_s15  ;;  %8351 = vmatmul.mubr.msk.bf16.vlgmr.msra.gmra.mxu0 %vm404_vm1, %v12316_v16  ;;  %v12467_v22 = vpop.permute.xlu0 %5293  ;;  %v12475_v48 = vadd.f32 %v3477_v47, %v12183_v4  ;;  %v5301_v47 = vsel %vm974_vm2, %v12435_v6, %v12399_v23  ;;  %v12590_v1 = vld [vmem:[%s15008_s1 + $0x50] sm:$0x3f]  }
 0x403   :  { %5389 = vmatpush1.bf16.msra.mxu0 %v5328_v63  ;;  %5431 = vmatprep.subr.bf16.mxu1 %v5331_v40  ;;  %v3479_v9 = vpop.f32.mrf.mxu1  ;;  %v5304_v63 = vsel %vm974_vm2, %v12415_v5, %v12422_v18 }
 0x404   :  { %5390 = vmatprep.subr.bf16.mxu0 %v5320_v39  ;;  %v12480_v60 = vpop.permute.xlu1 %5295  ;;  %5641 = vrot.lane.b32.xlu0 %v11894_v35, %s8786_s15  ;;  %v12490_v4 = vadd.f32 %v3479_v9, %v12191_v43  ;;  %v5319_v35 = vsel %vm974_vm2, %v12352_v59, %v12323_v19  ;;  %v5322_v43 = vsel %vm974_vm2, %v12338_v44, %v12345_v0  ;;  %v12600_v9 = vld [vmem:[%s15007_s0 + $0xbc] ss:$44 sps:$4 sm:$0xff]  }
 0x405   :  { %8352 = vmatmul.mubr.msk.bf16.vlgmr.msra.gmra.mxu1 %vm404_vm1, %v12316_v16  ;;  %5412 = vmatprep.mubr.bf16.mxu0 %v15180_v2  ;;  %v3481_v8 = vpop.f32.mrf.mxu1  ;;  %v5311_v19 = vsel %vm974_vm2, %v12358_v26, %v12367_v58  ;;  %v5302_v26 = vsel %vm974_vm2, %v12399_v23, %v12406_v15  ;;  %v5333_v58 = vsel %vm974_vm2, %v12445_v20, %v12467_v22 }
 0x406   :  { %5432 = vmatpush1.bf16.msra.mxu1 %v5330_v45  ;;  %6620 = vrot.lane.b32.xlu1 %v12472_v38, %s8783_s16  ;;  %v12506_v16 = vpop.permute.xlu0 %5297  ;;  %v12513_v62 = vadd.f32 %v3481_v8, %v3100_v41 }
 0x407   :  { %5391 = vmatpush1.bf16.msra.mxu0 %v5319_v35  ;;  %5433 = vmatprep.subr.bf16.mxu1 %v5322_v43 }
 0x408   :  { %5392 = vmatprep.subr.bf16.mxu0 %v5311_v19  ;;  %v12518_v59 = vpop.permute.xlu1 %5271  ;;  %6622 = vrot.lane.b32.xlu0 %v12487_v14, %s8783_s16  ;;  %v5335_v19 = vsel %vm974_vm2, %v12480_v60, %v12506_v16 }
 0x409   :  { %5455 = vmatprep.mubr.bf16.mxu1 %v15180_v2 }
 0x40a   :  { %5434 = vmatpush1.bf16.msra.mxu1 %v5321_v30  ;;  %6624 = vrot.lane.b32.xlu1 %v12511_v51, %s8783_s16  ;;  %v12539_v32 = vpop.permute.xlu0 %5273  ;;  %v3518_v44 = vpop.f32.mrf.mxu0 }
 0x40b   :  { %5393 = vmatpush1.bf16.msra.mxu0 %v5310_v11  ;;  %5435 = vmatprep.subr.bf16.mxu1 %v5313_v57  ;;  %v12550_v27 = vadd.f32 %v3518_v44, %v12208_v49  ;;  %v3143_v49 = vadd.f32 %v12215_v61, %v15201_v28  ;;  %v12582_v61 = vld [vmem:[%s15007_s0 + $0xb8] ss:$44 sps:$4 sm:$0xff]   ;;  %v5332_v57 = vsel %vm974_vm2, %v12303_v3, %v12445_v20 }
 0x40c   :  { %5394 = vmatprep.subr.bf16.mxu0 %v5302_v26  ;;  %v12552_v55 = vpop.permute.xlu1 %5275  ;;  %6626 = vrot.lane.b32.xlu0 %v12525_v13, %s8783_s16  ;;  %v3520_v29 = vpop.f32.mrf.mxu0  ;;  %v15202_v11 = vld [vmem:[#allocation10_spill] sm:$0xff]  ;;  %v5324_v26 = vsel %vm974_vm2, %v12518_v59, %v12539_v32  ;;  %v5334_v3 = vsel %vm974_vm2, %v12467_v22, %v12480_v60  ;;  %v5323_v22 = vsel %vm974_vm2, %v12345_v0, %v12518_v59 }
 0x40d   :  { %v12567_v41 = vadd.f32 %v3520_v29, %v12226_v12  ;;  %v5325_v0 = vsel %vm974_vm2, %v12539_v32, %v12552_v55 }
 0x40e   :  { %5436 = vmatpush1.bf16.msra.mxu1 %v5312_v7  ;;  %6618 = vrot.lane.b32.xlu1 %v12544_v36, %s8783_s16  ;;  %v12577_v40 = vpop.permute.xlu0 %5277  ;;  %v3522_v12 = vpop.f32.mrf.mxu0 }
 0x40f   :  { %5395 = vmatpush1.bf16.msra.mxu0 %v5301_v47  ;;  %5437 = vmatprep.subr.bf16.mxu1 %v5304_v63  ;;  %v12593_v23 = vadd.f32 %v3522_v12, %v12238_v24  ;;  %v3561_v6 = vpop.f32.mrf.mxu1  ;;  %v5303_v24 = vsel %vm974_vm2, %v12406_v15, %v12415_v5  ;;  %v3186_v15 = vadd.f32 %v12402_v46, %v15202_v11  ;;  %v12672_v63 = vld [vmem:[%s15007_s0 + $0x60] ss:$44 sps:$4 sm:$0xff]   ;;  %v12708_v11 = vld [vmem:[%s15007_s0 + $0x58] ss:$44 sps:$4 sm:$0xff]  }
 0x410   :  { %5474 = vmatprep.subr.bf16.mxu0 %v5333_v58  ;;  %v5252_v39 = vpop.permute.xlu1 %5251  ;;  %6600 = vrot.lane.b32.xlu0 %v12559_v10, %s8783_s16  ;;  %v3524_v45 = vpop.f32.mrf.mxu0  ;;  %v12603_v8 = vadd.f32 %v3561_v6, %v12211_v34  ;;  %v12618_v34 = vld [vmem:[%s15007_s0 + $0xc0] ss:$44 sps:$4 sm:$0xff]   ;;  %v5326_v7 = vsel %vm974_vm2, %v12552_v55, %v12577_v40  ;;  %v12685_v58 = vld [vmem:[%s15007_s0 + $0x64] ss:$44 sps:$4 sm:$0xff]  }
 0x411   :  { %v12608_v35 = vadd.f32 %v3524_v45, %v3143_v49  ;;  %v3563_v43 = vpop.f32.mrf.mxu1  ;;  %v5314_v6 = vsel %vm974_vm2, %v12385_v37, %v5252_v39 }
 0x412   :  { %5438 = vmatpush1.bf16.msra.mxu1 %v5303_v24  ;;  %6602 = vrot.lane.b32.xlu1 %v12582_v61, %s8783_s16  ;;  %v5254_v30 = vpop.permute.xlu0 %5253  ;;  %v12623_v5 = vadd.f32 %v3563_v43, %v12229_v53  ;;  %v12638_v53 = vld [vmem:[%s15007_s0 + $0xb0] ss:$44 sps:$4 sm:$0xff]   ;;  %v12695_v24 = vld [vmem:[%s15007_s0 + $0x68] ss:$44 sps:$4 sm:$0xff]  }
 0x413   :  { %8356 = vmatmul.mubr.msk.bf16.vlgmr.msra.gmra.mxu0 %vm404_vm1, %v12590_v1  ;;  %5517 = vmatprep.subr.bf16.mxu1 %v5335_v19  ;;  %v3565_v44 = vpop.f32.mrf.mxu1  ;;  %v5315_v60 = vsel %vm974_vm2, %v5252_v39, %v5254_v30 }
 0x414   :  { %5475 = vmatpush1.bf16.msra.mxu0 %v5332_v57  ;;  %v5256_v29 = vpop.permute.xlu1 %5255  ;;  %6604 = vrot.lane.b32.xlu0 %v12600_v9, %s8783_s16  ;;  %v12641_v46 = vadd.f32 %v3565_v44, %v12241_v21  ;;  %v12658_v21 = vld [vmem:[%s15007_s0 + $0x5c] ss:$44 sps:$4 sm:$0xff]  }
 0x415   :  { %5476 = vmatprep.subr.bf16.mxu0 %v5324_v26  ;;  %8357 = vmatmul.mubr.msk.bf16.vlgmr.msra.gmra.mxu1 %vm404_vm1, %v12590_v1  ;;  %v3567_v20 = vpop.f32.mrf.mxu1  ;;  %v5316_v37 = vsel %vm974_vm2, %v5254_v30, %v5256_v29  ;;  %v12722_v26 = vld [vmem:[%s15007_s0 + $0x4] ss:$44 sps:$4 sm:$0xff]  }
 0x416   :  { %5518 = vmatpush1.bf16.msra.mxu1 %v5334_v3  ;;  %6606 = vrot.lane.b32.xlu1 %v12618_v34, %s8783_s16  ;;  %v12653_v28 = vpop.permute.xlu0 %5257  ;;  %v12660_v49 = vadd.f32 %v3567_v20, %v3186_v15  ;;  %v12735_v20 = vld [vmem:[%s15007_s0 + $0x8] ss:$44 sps:$4 sm:$0xff]  }
 0x417   :  { %5519 = vmatprep.subr.bf16.mxu1 %v5326_v7  ;;  %5498 = vmatprep.mubr.bf16.mxu0 %v15180_v2  ;;  %v5317_v59 = vsel %vm974_vm2, %v5256_v29, %v12653_v28 }
 0x418   :  { %5477 = vmatpush1.bf16.msra.mxu0 %v5323_v22  ;;  %v5232_v47 = vpop.permute.xlu1 %5231  ;;  %6598 = vrot.lane.b32.xlu0 %v12638_v53, %s8783_s16 }
 0x419   :  { %5478 = vmatprep.subr.bf16.mxu0 %v5315_v60  ;;  %5541 = vmatprep.mubr.bf16.mxu1 %v15180_v2  ;;  %v12749_v60 = vld [vmem:[%s15007_s0 + $0xc] ss:$44 sps:$4 sm:$0xff]  }
 0x41a   :  { %5520 = vmatpush1.bf16.msra.mxu1 %v5325_v0  ;;  %6580 = vrot.lane.b32.xlu1 %v12658_v21, %s8783_s16  ;;  %v5234_v12 = vpop.permute.xlu0 %5233  ;;  %v12760_v0 = vld [vmem:[%s15007_s0 + $0x10] ss:$44 sps:$4 sm:$0xff]  }
 0x41b   :  { %5521 = vmatprep.subr.bf16.mxu1 %v5317_v59  ;;  %v5306_v32 = vsel %vm974_vm2, %v5232_v47, %v5234_v12  ;;  %v3604_v55 = vpop.f32.mrf.mxu0 }
 0x41c   :  { %5479 = vmatpush1.bf16.msra.mxu0 %v5314_v6  ;;  %v5236_v45 = vpop.permute.xlu1 %5235  ;;  %6582 = vrot.lane.b32.xlu0 %v12672_v63, %s8783_s16  ;;  %v12698_v43 = vadd.f32 %v3604_v55, %v12261_v52  ;;  %v5305_v52 = vsel %vm974_vm2, %v12422_v18, %v5232_v47  ;;  %v12770_v6 = vld [vmem:[%s15007_s0] ss:$44 sps:$4 sm:$0xff]  }
 0x41d   :  { %5480 = vmatprep.subr.bf16.mxu0 %v5306_v32  ;;  %v3606_v39 = vpop.f32.mrf.mxu0  ;;  %v5307_v18 = vsel %vm974_vm2, %v5234_v12, %v5236_v45 }
 0x41e   :  { %5522 = vmatpush1.bf16.msra.mxu1 %v5316_v37  ;;  %6584 = vrot.lane.b32.xlu1 %v12685_v58, %s8783_s16  ;;  %v12703_v19 = vpop.permute.xlu0 %5237  ;;  %v12711_v15 = vadd.f32 %v3606_v39, %v12271_v25  ;;  %v12782_v37 = vld [vmem:[%s15007_s0 + $0x11c] ss:$44 sps:$4 sm:$0xff]  }
 0x41f   :  { %v5308_v30 = vsel %vm974_vm2, %v5236_v45, %v12703_v19  ;;  %v3608_v57 = vpop.f32.mrf.mxu0 }
 0x420   :  { %5481 = vmatpush1.bf16.msra.mxu0 %v5305_v52  ;;  %v5686_v44 = vpop.permute.xlu1 %5685  ;;  %6586 = vrot.lane.b32.xlu0 %v12695_v24, %s8783_s16  ;;  %v12725_v25 = vadd.f32 %v3608_v57, %v12287_v56  ;;  %v12794_v57 = vld [vmem:[%s15007_s0 + $0x120] ss:$44 sps:$4 sm:$0xff]  }
 0x421   :  { %5523 = vmatprep.subr.bf16.mxu1 %v5308_v30  ;;  %v3610_v29 = vpop.f32.mrf.mxu0 }
 0x422   :  { %5524 = vmatpush1.bf16.msra.mxu1 %v5307_v18  ;;  %6578 = vrot.lane.b32.xlu1 %v12708_v11, %s8783_s16  ;;  %v12730_v3 = vpop.permute.xlu0 %5687  ;;  %v12738_v7 = vadd.f32 %v3610_v29, %v12294_v50 }
 0x423   :  { %v5731_v56 = vsel %vm1377_vm3, %v5686_v44, %v12730_v3  ;;  %8358 = vmatmul.mubr.msk.bf16.vlgmr.msra.gmra.mxu0 %vm404_vm1, %v12590_v1 }
 0x424   :  { %v5300_v22 = vpop.permute.xlu1 %5299  ;;  %6560 = vrot.lane.b32.xlu0 %v12722_v26, %s8783_s16  ;;  %5790 = vmatprep.subr.bf16.mxu1 %v5731_v56  ;;  %v12806_v56 = vld [vmem:[%s15007_s0 + $0x124] ss:$44 sps:$4 sm:$0xff]  }
 0x425   :  { %5560 = vmatprep.subr.bf16.mxu0 %v5300_v22  ;;  %v5336_v50 = vsel %vm974_vm2, %v12506_v16, %v5300_v22  ;;  %8359 = vmatmul.mubr.msk.bf16.vlgmr.msra.gmra.mxu1 %vm404_vm1, %v12590_v1 }
 0x426   :  { %6562 = vrot.lane.b32.xlu1 %v12735_v20, %s8783_s16  ;;  %5561 = vmatpush1.bf16.msra.mxu0 %v5336_v50  ;;  %v5684_v47 = vpop.permute.xlu0 %5683 }
 0x427   :  { %v5730_v59 = vsel %vm1377_vm3, %v5684_v47, %v5686_v44  ;;  %5584 = vmatprep.mubr.bf16.mxu0 %v15180_v2  ;;  %5814 = vmatprep.mubr.bf16.mxu1 %v15180_v2  ;;  %v3834_v16 = vpop.f32.mrf.mxu1 }
 0x428   :  { %v5666_v12 = vpop.permute.xlu1 %5665  ;;  %6564 = vrot.lane.b32.xlu0 %v12749_v60, %s8783_s16  ;;  %5791 = vmatpush1.bf16.msra.mxu1 %v5730_v59  ;;  %v12773_v32 = vadd.f32 %v3834_v16, %v12420_v33 }
 0x429   :  { %v3836_v55 = vpop.f32.mrf.mxu1 }
 0x42a   :  { %15203 = vst [vmem:[#allocation8_spill] sm:$0xff] %v12773_v32  ;;  %6566 = vrot.lane.b32.xlu1 %v12760_v0, %s8783_s16  ;;  %v12777_v45 = vpop.permute.xlu0 %5667  ;;  %v12785_v39 = vadd.f32 %v3836_v55, %v12431_v42 }
 0x42b   :  { %v5722_v52 = vsel %vm1377_vm3, %v5666_v12, %v12777_v45  ;;  %v3838_v30 = vpop.f32.mrf.mxu1 }
 0x42c   :  { %15204 = vst [vmem:[#allocation7_spill] sm:$0xff] %v12785_v39  ;;  %v5280_v33 = vpop.permute.xlu1 %5279  ;;  %6558 = vrot.lane.b32.xlu0 %v12770_v6, %s8783_s16  ;;  %5792 = vmatprep.subr.bf16.mxu1 %v5722_v52  ;;  %v12797_v44 = vadd.f32 %v3838_v30, %v12443_v54  ;;  %v12844_v30 = vld [vmem:[%s15007_s0 + $0xcc] ss:$44 sps:$4 sm:$0xff]  }
 0x42d   :  { %5562 = vmatprep.subr.bf16.mxu0 %v5280_v33  ;;  %v5327_v42 = vsel %vm974_vm2, %v12577_v40, %v5280_v33  ;;  %v3840_v18 = vpop.f32.mrf.mxu1  ;;  %v12817_v40 = vld [vmem:[%s15007_s0 + $0x128] ss:$44 sps:$4 sm:$0xff]  }
 0x42e   :  { %15205 = vst [vmem:[#allocation16_spill] sm:$0xff] %v12797_v44  ;;  %6628 = vrot.lane.b32.xlu1 %v12782_v37, %s8783_s16  ;;  %5563 = vmatpush1.bf16.msra.mxu0 %v5327_v42  ;;  %v5664_v29 = vpop.permute.xlu0 %5663  ;;  %v12809_v22 = vadd.f32 %v3840_v18, %v12455_v17  ;;  %v12826_v17 = vld [vmem:[%s15007_s0 + $0xc4] ss:$44 sps:$4 sm:$0xff]  }
 0x42f   :  { %v5721_v54 = vsel %vm1377_vm3, %v5664_v29, %v5666_v12  ;;  %v12835_v12 = vld [vmem:[%s15007_s0 + $0xc8] ss:$44 sps:$4 sm:$0xff]   ;;  %v12861_v29 = vld [vmem:[%s15007_s0 + $0x6c] ss:$44 sps:$4 sm:$0xff]  }
 0x430   :  { %15206 = vst [vmem:[#allocation12_spill] sm:$0xff] %v12809_v22  ;;  %v5646_v50 = vpop.permute.xlu1 %5645  ;;  %6630 = vrot.lane.b32.xlu0 %v12794_v57, %s8783_s16  ;;  %5793 = vmatpush1.bf16.msra.mxu1 %v5721_v54 }
 0x432   :  { %6632 = vrot.lane.b32.xlu1 %v12806_v56, %s8783_s16  ;;  %v12821_v47 = vpop.permute.xlu0 %5647 }
 0x433   :  { %v5713_v59 = vsel %vm1377_vm3, %v5646_v50, %v12821_v47 }
 0x434   :  { %v5260_v16 = vpop.permute.xlu1 %5259  ;;  %6634 = vrot.lane.b32.xlu0 %v12817_v40, %s8783_s16  ;;  %5794 = vmatprep.subr.bf16.mxu1 %v5713_v59 }
 0x435   :  { %5564 = vmatprep.subr.bf16.mxu0 %v5260_v16  ;;  %v5318_v55 = vsel %vm974_vm2, %v12653_v28, %v5260_v16  ;;  %v12852_v28 = vld [vmem:[%s15007_s0 + $0xd0] ss:$44 sps:$4 sm:$0xff]  }
 0x436   :  { %6608 = vrot.lane.b32.xlu1 %v12826_v17, %s8783_s16  ;;  %5565 = vmatpush1.bf16.msra.mxu0 %v5318_v55  ;;  %v5644_v52 = vpop.permute.xlu0 %5643  ;;  %v12870_v16 = vld [vmem:[%s15007_s0 + $0x70] ss:$44 sps:$4 sm:$0xff]  }
 0x437   :  { %v5712_v33 = vsel %vm1377_vm3, %v5644_v52, %v5646_v50 }
 0x438   :  { %v5626_v42 = vpop.permute.xlu1 %5625  ;;  %6610 = vrot.lane.b32.xlu0 %v12835_v12, %s8783_s16  ;;  %5795 = vmatpush1.bf16.msra.mxu1 %v5712_v33 }
 0x43a   :  { %6612 = vrot.lane.b32.xlu1 %v12844_v30, %s8783_s16  ;;  %v12856_v18 = vpop.permute.xlu0 %5627 }
 0x43b   :  { %v5704_v54 = vsel %vm1377_vm3, %v5626_v42, %v12856_v18  ;;  %v3877_v50 = vpop.f32.mrf.mxu0 }
 0x43c   :  { %v5240_v59 = vpop.permute.xlu1 %5239  ;;  %6614 = vrot.lane.b32.xlu0 %v12852_v28, %s8783_s16  ;;  %5796 = vmatprep.subr.bf16.mxu1 %v5704_v54  ;;  %v12873_v55 = vadd.f32 %v3877_v50, %v12450_v31  ;;  %v12882_v54 = vld [vmem:[%s15007_s0 + $0x74] ss:$44 sps:$4 sm:$0xff]  }
 0x43d   :  { %5566 = vmatprep.subr.bf16.mxu0 %v5240_v59  ;;  %v5309_v52 = vsel %vm974_vm2, %v12703_v19, %v5240_v59  ;;  %v3879_v33 = vpop.f32.mrf.mxu0  ;;  %v12891_v19 = vld [vmem:[%s15008_s1 + $0x58] sm:$0x3f]  }
 0x43e   :  { %15207 = vst [vmem:[#allocation19_spill] sm:$0xff] %v12873_v55  ;;  %6588 = vrot.lane.b32.xlu1 %v12861_v29, %s8783_s16  ;;  %5567 = vmatpush1.bf16.msra.mxu0 %v5309_v52  ;;  %v5624_v39 = vpop.permute.xlu0 %5623  ;;  %v12885_v32 = vadd.f32 %v3879_v33, %v12475_v48  ;;  %v3920_v31 = vpop.f32.mrf.mxu1  ;;  %v12901_v48 = vld [vmem:[%s15007_s0 + $0x78] ss:$44 sps:$4 sm:$0xff]  }
 0x43f   :  { %v5703_v50 = vsel %vm1377_vm3, %v5624_v39, %v5626_v42  ;;  %v3881_v59 = vpop.f32.mrf.mxu0  ;;  %v12894_v52 = vadd.f32 %v3920_v31, %v12550_v27 }
 0x440   :  { %15208 = vst [vmem:[#allocation9_spill] sm:$0xff] %v12885_v32  ;;  %v5690_v55 = vpop.permute.xlu1 %5689  ;;  %6590 = vrot.lane.b32.xlu0 %v12870_v16, %s8783_s16  ;;  %5797 = vmatpush1.bf16.msra.mxu1 %v5703_v50  ;;  %v12904_v39 = vadd.f32 %v3881_v59, %v12490_v4  ;;  %v3922_v42 = vpop.f32.mrf.mxu1  ;;  %v12916_v50 = vld [vmem:[%s15007_s0 + $0x14] ss:$44 sps:$4 sm:$0xff]  }
 0x441   :  { %15209 = vst [vmem:[#allocation4_spill] sm:$0xff] %v12894_v52  ;;  %8360 = vmatmul.mubr.msk.bf16.vlgmr.msra.gmra.mxu0 %vm404_vm1, %v12590_v1  ;;  %v3883_v33 = vpop.f32.mrf.mxu0  ;;  %v12909_v27 = vadd.f32 %v3922_v42, %v12567_v41  ;;  %v12965_v52 = vld [vmem:[%s15007_s0 + $0x12c] ss:$44 sps:$4 sm:$0xff]  }
 0x442   :  { %15210 = vst [vmem:[#allocation18_spill] sm:$0xff] %v12904_v39  ;;  %6592 = vrot.lane.b32.xlu1 %v12882_v54, %s8783_s16  ;;  %v5692_v31 = vpop.permute.xlu0 %5691  ;;  %5857 = vmatprep.mubr.bf16.mxu0 %v15180_v2  ;;  %v12920_v4 = vadd.f32 %v3883_v33, %v12513_v62  ;;  %v3924_v59 = vpop.f32.mrf.mxu1  ;;  %v12935_v62 = vld [vmem:[%s15007_s0 + $0x18] ss:$44 sps:$4 sm:$0xff]  }
 0x443   :  { %15211 = vst [vmem:[#allocation17_spill] sm:$0xff] %v12909_v27  ;;  %v5733_v1 = vsel %vm1377_vm3, %v5690_v55, %v5692_v31  ;;  %8364 = vmatmul.mubr.msk.bf16.vlgmr.msra.gmra.mxu1 %vm404_vm1, %v12891_v19  ;;  %v12926_v41 = vadd.f32 %v3924_v59, %v12593_v23  ;;  %v5732_v27 = vsel %vm1377_vm3, %v12730_v3, %v5690_v55  ;;  %v12948_v3 = vld [vmem:[%s15007_s0 + $0x1c] ss:$44 sps:$4 sm:$0xff]  }
 0x444   :  { %15212 = vst [vmem:[#allocation5_spill] sm:$0xff] %v12920_v4  ;;  %v5694_v42 = vpop.permute.xlu1 %5693  ;;  %6594 = vrot.lane.b32.xlu0 %v12901_v48, %s8783_s16  ;;  %5833 = vmatprep.subr.bf16.mxu0 %v5733_v1  ;;  %v3926_v33 = vpop.f32.mrf.mxu1  ;;  %v12997_v4 = vld [vmem:[%s15007_s0 + $0x24] ss:$44 sps:$4 sm:$0xff]  }
 0x445   :  { %15213 = vst [vmem:[#allocation11_spill] sm:$0xff] %v12926_v41  ;;  %5834 = vmatpush1.bf16.msra.mxu0 %v5732_v27  ;;  %5900 = vmatprep.mubr.bf16.mxu1 %v15180_v2  ;;  %v12939_v23 = vadd.f32 %v3926_v33, %v12608_v35  ;;  %v5734_v35 = vsel %vm1377_vm3, %v5692_v31, %v5694_v42  ;;  %v12958_v27 = vld [vmem:[%s15007_s0 + $0x20] ss:$44 sps:$4 sm:$0xff]  }
 0x446   :  { %6568 = vrot.lane.b32.xlu1 %v12916_v50, %s8783_s16  ;;  %v12943_v59 = vpop.permute.xlu0 %5695 }
 0x447   :  { %15214 = vst [vmem:[#allocation21_spill] sm:$0xff] %v12939_v23  ;;  %v5735_v55 = vsel %vm1377_vm3, %v5694_v42, %v12943_v59  ;;  %v12975_v42 = vld [vmem:[%s15007_s0 + $0xd4] ss:$44 sps:$4 sm:$0xff]   ;;  %v12984_v23 = vld [vmem:[%s15007_s0 + $0x7c] ss:$44 sps:$4 sm:$0xff]  }
 0x448   :  { %v5670_v1 = vpop.permute.xlu1 %5669  ;;  %6570 = vrot.lane.b32.xlu0 %v12935_v62, %s8783_s16  ;;  %5876 = vmatprep.subr.bf16.mxu1 %v5735_v55  ;;  %15215 = vst [vmem:[#allocation20_spill] sm:$0xff] %v12975_v42 }
 0x449   :  { %5877 = vmatpush1.bf16.msra.mxu1 %v5734_v35  ;;  %v5723_v31 = vsel %vm1377_vm3, %v12777_v45, %v5670_v1 }
 0x44a   :  { %6572 = vrot.lane.b32.xlu1 %v12948_v3, %s8783_s16  ;;  %v5672_v33 = vpop.permute.xlu0 %5671 }
 0x44b   :  { %v5724_v32 = vsel %vm1377_vm3, %v5670_v1, %v5672_v33 }
 0x44c   :  { %v5674_v55 = vpop.permute.xlu1 %5673  ;;  %6574 = vrot.lane.b32.xlu0 %v12958_v27, %s8783_s16  ;;  %5835 = vmatprep.subr.bf16.mxu0 %v5724_v32 }
 0x44d   :  { %5836 = vmatpush1.bf16.msra.mxu0 %v5723_v31  ;;  %v5725_v31 = vsel %vm1377_vm3, %v5672_v33, %v5674_v55 }
 0x44e   :  { %6636 = vrot.lane.b32.xlu1 %v12965_v52, %s8783_s16  ;;  %v12979_v35 = vpop.permute.xlu0 %5675  ;;  %v3963_v32 = vpop.f32.mrf.mxu0 }
 0x44f   :  { %v5726_v45 = vsel %vm1377_vm3, %v5674_v55, %v12979_v35  ;;  %v12989_v1 = vadd.f32 %v3963_v32, %v12603_v8 }
 0x450   :  { %v5650_v41 = vpop.permute.xlu1 %5649  ;;  %6616 = vrot.lane.b32.xlu0 %v12975_v42, %s8783_s16  ;;  %5878 = vmatprep.subr.bf16.mxu1 %v5726_v45  ;;  %v3965_v39 = vpop.f32.mrf.mxu0 }
 0x451   :  { %15216 = vst [vmem:[#allocation13_spill] sm:$0xff] %v12989_v1  ;;  %5879 = vmatpush1.bf16.msra.mxu1 %v5725_v31  ;;  %v13000_v22 = vadd.f32 %v3965_v39, %v12623_v5  ;;  %v4006_v44 = vpop.f32.mrf.mxu1  ;;  %v5714_v5 = vsel %vm1377_vm3, %v12821_v47, %v5650_v41 }
 0x452   :  { %6596 = vrot.lane.b32.xlu1 %v12984_v23, %s8783_s16  ;;  %v5652_v8 = vpop.permute.xlu0 %5651  ;;  %v3967_v32 = vpop.f32.mrf.mxu0  ;;  %v13005_v45 = vadd.f32 %v4006_v44, %v12698_v43 }
 0x453   :  { %15217 = vst [vmem:[#allocation6_spill] sm:$0xff] %v13000_v22  ;;  %v5715_v33 = vsel %vm1377_vm3, %v5650_v41, %v5652_v8  ;;  %v13009_v55 = vadd.f32 %v3967_v32, %v12641_v46  ;;  %v4008_v1 = vpop.f32.mrf.mxu1 }
 0x454   :  { %15218 = vst [vmem:[#allocation22_spill] sm:$0xff] %v13005_v45  ;;  %v5654_v42 = vpop.permute.xlu1 %5653  ;;  %6576 = vrot.lane.b32.xlu0 %v12997_v4, %s8783_s16  ;;  %5837 = vmatprep.subr.bf16.mxu0 %v5715_v33  ;;  %v3969_v39 = vpop.f32.mrf.mxu0  ;;  %v13016_v31 = vadd.f32 %v4008_v1, %v12711_v15 }
 0x455   :  { %15219 = vst [vmem:[#allocation3_spill] sm:$0xff] %v13009_v55  ;;  %5838 = vmatpush1.bf16.msra.mxu0 %v5714_v5  ;;  %v13019_v43 = vadd.f32 %v3969_v39, %v12660_v49  ;;  %v4010_v44 = vpop.f32.mrf.mxu1  ;;  %v5716_v49 = vsel %vm1377_vm3, %v5652_v8, %v5654_v42  ;;  %v13199_v55 = vld [vmem:[%s15008_s1 + $0x68] sm:$0x3f]  }
 0x456   :  { %15220 = vst [vmem:[#allocation25_spill] sm:$0xff] %v13016_v31  ;;  %7265 = vrot.lane.b32.xlu1 %v12472_v38, %s8785_s14  ;;  %v13023_v46 = vpop.permute.xlu0 %5655  ;;  %v13026_v32 = vadd.f32 %v4010_v44, %v12725_v25 }
 0x457   :  { %15221 = vst [vmem:[#allocation24_spill] sm:$0xff] %v13019_v43  ;;  %v5717_v47 = vsel %vm1377_vm3, %v5654_v42, %v13023_v46  ;;  %v4012_v41 = vpop.f32.mrf.mxu1 }
 0x458   :  { %15222 = vst [vmem:[#allocation23_spill] sm:$0xff] %v13026_v32  ;;  %v5630_v33 = vpop.permute.xlu1 %5629  ;;  %7267 = vrot.lane.b32.xlu0 %v12487_v14, %s8785_s14  ;;  %5880 = vmatprep.subr.bf16.mxu1 %v5717_v47  ;;  %v13034_v15 = vadd.f32 %v4012_v41, %v12738_v7 }
 0x459   :  { %5881 = vmatpush1.bf16.msra.mxu1 %v5716_v49  ;;  %v5705_v39 = vsel %vm1377_vm3, %v12856_v18, %v5630_v33 }
 0x45a   :  { %15223 = vst [vmem:[#allocation14_spill] sm:$0xff] %v13034_v15  ;;  %7269 = vrot.lane.b32.xlu1 %v12511_v51, %s8785_s14  ;;  %v5632_v25 = vpop.permute.xlu0 %5631 }
 0x45b   :  { %v5706_v1 = vsel %vm1377_vm3, %v5630_v33, %v5632_v25 }
 0x45c   :  { %v5634_v5 = vpop.permute.xlu1 %5633  ;;  %7271 = vrot.lane.b32.xlu0 %v12525_v13, %s8785_s14  ;;  %5839 = vmatprep.subr.bf16.mxu0 %v5706_v1 }
 0x45d   :  { %5840 = vmatpush1.bf16.msra.mxu0 %v5705_v39  ;;  %v5707_v51 = vsel %vm1377_vm3, %v5632_v25, %v5634_v5 }
 0x45e   :  { %7263 = vrot.lane.b32.xlu1 %v12544_v36, %s8785_s14  ;;  %v5636_v7 = vpop.permute.xlu0 %5635 }
 0x45f   :  { %v5708_v42 = vsel %vm1377_vm3, %v5634_v5, %v5636_v7 }
 0x460   :  { %v5698_v8 = vpop.permute.xlu1 %5697  ;;  %7245 = vrot.lane.b32.xlu0 %v12559_v10, %s8785_s14  ;;  %8365 = vmatmul.mubr.msk.bf16.vlgmr.msra.gmra.mxu0 %vm404_vm1, %v12891_v19 }
 0x461   :  { %5882 = vmatprep.subr.bf16.mxu1 %v5708_v42  ;;  %5943 = vmatprep.mubr.bf16.mxu0 %v15180_v2  ;;  %v5736_v47 = vsel %vm1377_vm3, %v12943_v59, %v5698_v8 }
 0x462   :  { %5883 = vmatpush1.bf16.msra.mxu1 %v5707_v51  ;;  %7247 = vrot.lane.b32.xlu1 %v12582_v61, %s8785_s14  ;;  %v5700_v13 = vpop.permute.xlu0 %5699 }
 0x463   :  { %v5737_v18 = vsel %vm1377_vm3, %v5698_v8, %v5700_v13 }
 0x464   :  { %v5702_v44 = vpop.permute.xlu1 %5701  ;;  %7249 = vrot.lane.b32.xlu0 %v12600_v9, %s8785_s14  ;;  %5919 = vmatprep.subr.bf16.mxu0 %v5737_v18 }
 0x465   :  { %8366 = vmatmul.mubr.msk.bf16.vlgmr.msra.gmra.mxu1 %vm404_vm1, %v12891_v19  ;;  %5920 = vmatpush1.bf16.msra.mxu0 %v5736_v47  ;;  %v5738_v41 = vsel %vm1377_vm3, %v5700_v13, %v5702_v44 }
 0x466   :  { %5962 = vmatprep.subr.bf16.mxu1 %v5702_v44  ;;  %7251 = vrot.lane.b32.xlu1 %v12618_v34, %s8785_s14  ;;  %v5678_v33 = vpop.permute.xlu0 %5677 }
 0x467   :  { %5963 = vmatpush1.bf16.msra.mxu1 %v5738_v41  ;;  %5986 = vmatprep.mubr.bf16.mxu1 %v15180_v2  ;;  %v5727_v25 = vsel %vm1377_vm3, %v12979_v35, %v5678_v33 }
 0x468   :  { %v5680_v49 = vpop.permute.xlu1 %5679  ;;  %7243 = vrot.lane.b32.xlu0 %v12638_v53, %s8785_s14 }
 0x469   :  { %v5728_v9 = vsel %vm1377_vm3, %v5678_v33, %v5680_v49 }
 0x46a   :  { %7225 = vrot.lane.b32.xlu1 %v12658_v21, %s8785_s14  ;;  %5921 = vmatprep.subr.bf16.mxu0 %v5728_v9  ;;  %v5682_v59 = vpop.permute.xlu0 %5681 }
 0x46b   :  { %5922 = vmatpush1.bf16.msra.mxu0 %v5727_v25  ;;  %5964 = vmatprep.subr.bf16.mxu1 %v5682_v59  ;;  %v5729_v34 = vsel %vm1377_vm3, %v5680_v49, %v5682_v59 }
 0x46c   :  { %v5658_v1 = vpop.permute.xlu1 %5657  ;;  %7227 = vrot.lane.b32.xlu0 %v12672_v63, %s8785_s14  ;;  %5965 = vmatpush1.bf16.msra.mxu1 %v5729_v34 }
 0x46d   :  { %v5718_v35 = vsel %vm1377_vm3, %v13023_v46, %v5658_v1 }
 0x46e   :  { %7229 = vrot.lane.b32.xlu1 %v12685_v58, %s8785_s14  ;;  %v5660_v5 = vpop.permute.xlu0 %5659 }
 0x46f   :  { %v5719_v39 = vsel %vm1377_vm3, %v5658_v1, %v5660_v5 }
 0x470   :  { %v5662_v42 = vpop.permute.xlu1 %5661  ;;  %7231 = vrot.lane.b32.xlu0 %v12695_v24, %s8785_s14  ;;  %5923 = vmatprep.subr.bf16.mxu0 %v5719_v39 }
 0x471   :  { %5924 = vmatpush1.bf16.msra.mxu0 %v5718_v35  ;;  %5966 = vmatprep.subr.bf16.mxu1 %v5662_v42  ;;  %v5720_v8 = vsel %vm1377_vm3, %v5660_v5, %v5662_v42 }
 0x472   :  { %7223 = vrot.lane.b32.xlu1 %v12708_v11, %s8785_s14  ;;  %5967 = vmatpush1.bf16.msra.mxu1 %v5720_v8  ;;  %v5638_v51 = vpop.permute.xlu0 %5637  ;;  %v13121_v42 = vpop.f32.mrf.mxu1 }
 0x473   :  { %v5709_v44 = vsel %vm1377_vm3, %v5636_v7, %v5638_v51  ;;  %v13117_v5 = vpop.f32.mrf.mxu0 }
 0x474   :  { %v5640_v13 = vpop.permute.xlu1 %5639  ;;  %7205 = vrot.lane.b32.xlu0 %v12722_v26, %s8785_s14 }
 0x475   :  { %v5710_v18 = vsel %vm1377_vm3, %v5638_v51, %v5640_v13  ;;  %v13126_v51 = vpop.f32.mrf.mxu0 }
 0x476   :  { %7207 = vrot.lane.b32.xlu1 %v12735_v20, %s8785_s14  ;;  %5925 = vmatprep.subr.bf16.mxu0 %v5710_v18  ;;  %v5642_v46 = vpop.permute.xlu0 %5641  ;;  %v13132_v18 = vpop.f32.mrf.mxu1 }
 0x477   :  { %5926 = vmatpush1.bf16.msra.mxu0 %v5709_v44  ;;  %5968 = vmatprep.subr.bf16.mxu1 %v5642_v46  ;;  %v5711_v47 = vsel %vm1377_vm3, %v5640_v13, %v5642_v46 }
 0x478   :  { %v6621_v41 = vpop.permute.xlu1 %6620  ;;  %7209 = vrot.lane.b32.xlu0 %v12749_v60, %s8785_s14  ;;  %5969 = vmatpush1.bf16.msra.mxu1 %v5711_v47 }
 0x47a   :  { %7211 = vrot.lane.b32.xlu1 %v12760_v0, %s8785_s14  ;;  %8367 = vmatmul.mubr.msk.bf16.vlgmr.msra.gmra.mxu0 %vm404_vm1, %v12891_v19  ;;  %v6623_v33 = vpop.permute.xlu0 %6622 }
 0x47b   :  { %8368 = vmatmul.mubr.msk.bf16.vlgmr.msra.gmra.mxu1 %vm404_vm1, %v12891_v19  ;;  %v6666_v7 = vsel %vm327_vm0, %v6621_v41, %v6623_v33  ;;  %6749 = vmatprep.mubr.bf16.mxu0 %v15180_v2 }
 0x47c   :  { %v6625_v49 = vpop.permute.xlu1 %6624  ;;  %7203 = vrot.lane.b32.xlu0 %v12770_v6, %s8785_s14  ;;  %6725 = vmatprep.subr.bf16.mxu0 %v6666_v7 }
 0x47d   :  { %6792 = vmatprep.mubr.bf16.mxu1 %v15180_v2  ;;  %v6667_v25 = vsel %vm327_vm0, %v6623_v33, %v6625_v49 }
 0x47e   :  { %7273 = vrot.lane.b32.xlu1 %v12782_v37, %s8785_s14  ;;  %v13107_v9 = vpop.permute.xlu0 %6626 }
 0x47f   :  { %v6668_v59 = vsel %vm327_vm0, %v6625_v49, %v13107_v9  ;;  %v13144_v49 = vpop.f32.mrf.mxu1 }
 0x480   :  { %v6619_v19 = vpop.permute.xlu1 %6618  ;;  %7275 = vrot.lane.b32.xlu0 %v12794_v57, %s8785_s14  ;;  %6768 = vmatprep.subr.bf16.mxu1 %v6668_v59 }
 0x481   :  { %v6665_v34 = vsel %vm327_vm0, %v6619_v19, %v6621_v41  ;;  %6769 = vmatpush1.bf16.msra.mxu1 %v6667_v25  ;;  %v13139_v41 = vpop.f32.mrf.mxu0 }
 0x482   :  { %7277 = vrot.lane.b32.xlu1 %v12806_v56, %s8785_s14  ;;  %6726 = vmatpush1.bf16.msra.mxu0 %v6665_v34  ;;  %v6601_v1 = vpop.permute.xlu0 %6600 }
 0x483   :  { %v13148_v19 = vpop.f32.mrf.mxu0 }
 0x484   :  { %v6603_v39 = vpop.permute.xlu1 %6602  ;;  %7279 = vrot.lane.b32.xlu0 %v12817_v40, %s8785_s14 }
 0x485   :  { %v6657_v35 = vsel %vm327_vm0, %v6601_v1, %v6603_v39 }
 0x486   :  { %7253 = vrot.lane.b32.xlu1 %v12826_v17, %s8785_s14  ;;  %6727 = vmatprep.subr.bf16.mxu0 %v6657_v35  ;;  %v6605_v8 = vpop.permute.xlu0 %6604 }
 0x487   :  { %v6658_v47 = vsel %vm327_vm0, %v6603_v39, %v6605_v8 }
 0x488   :  { %v13128_v13 = vpop.permute.xlu1 %6606  ;;  %7255 = vrot.lane.b32.xlu0 %v12835_v12, %s8785_s14 }
 0x489   :  { %v6659_v46 = vsel %vm327_vm0, %v6605_v8, %v13128_v13 }
 0x48a   :  { %7257 = vrot.lane.b32.xlu1 %v12844_v30, %s8785_s14  ;;  %6770 = vmatprep.subr.bf16.mxu1 %v6659_v46  ;;  %v6599_v44 = vpop.permute.xlu0 %6598 }
 0x48b   :  { %v6656_v33 = vsel %vm327_vm0, %v6599_v44, %v6601_v1  ;;  %6771 = vmatpush1.bf16.msra.mxu1 %v6658_v47  ;;  %v13153_v1 = vpop.f32.mrf.mxu1 }
 0x48c   :  { %v6581_v7 = vpop.permute.xlu1 %6580  ;;  %7259 = vrot.lane.b32.xlu0 %v12852_v28, %s8785_s14  ;;  %6728 = vmatpush1.bf16.msra.mxu0 %v6656_v33  ;;  %15224 = vst [vmem:[#allocation15_spill] sm:$0xff] %v13153_v1 }
 0x48e   :  { %7233 = vrot.lane.b32.xlu1 %v12861_v29, %s8785_s14  ;;  %v6583_v59 = vpop.permute.xlu0 %6582 }
 0x48f   :  { %v6648_v25 = vsel %vm327_vm0, %v6581_v7, %v6583_v59 }
 0x490   :  { %v6585_v34 = vpop.permute.xlu1 %6584  ;;  %7235 = vrot.lane.b32.xlu0 %v12870_v16, %s8785_s14  ;;  %6729 = vmatprep.subr.bf16.mxu0 %v6648_v25 }
 0x491   :  { %v6649_v44 = vsel %vm327_vm0, %v6583_v59, %v6585_v34 }
 0x492   :  { %7237 = vrot.lane.b32.xlu1 %v12882_v54, %s8785_s14  ;;  %v13157_v39 = vpop.permute.xlu0 %6586  ;;  %v13159_v35 = vpop.f32.mrf.mxu0 }
 0x493   :  { %v6650_v8 = vsel %vm327_vm0, %v6585_v34, %v13157_v39 }
 0x494   :  { %v6579_v46 = vpop.permute.xlu1 %6578  ;;  %7239 = vrot.lane.b32.xlu0 %v12901_v48, %s8785_s14  ;;  %6772 = vmatprep.subr.bf16.mxu1 %v6650_v8  ;;  %v13166_v47 = vpop.f32.mrf.mxu1 }
 0x495   :  { %v6647_v33 = vsel %vm327_vm0, %v6579_v46, %v6581_v7  ;;  %6773 = vmatpush1.bf16.msra.mxu1 %v6649_v44  ;;  %v13171_v45 = vpop.f32.mrf.mxu0 }
 0x496   :  { %7213 = vrot.lane.b32.xlu1 %v12916_v50, %s8785_s14  ;;  %6730 = vmatpush1.bf16.msra.mxu0 %v6647_v33  ;;  %v6561_v25 = vpop.permute.xlu0 %6560  ;;  %v13175_v15 = vpop.f32.mrf.mxu1 }
 0x497   :  { %v13180_v34 = vpop.f32.mrf.mxu0 }
 0x498   :  { %v6563_v22 = vpop.permute.xlu1 %6562  ;;  %7215 = vrot.lane.b32.xlu0 %v12935_v62, %s8785_s14  ;;  %v13186_v46 = vpop.f32.mrf.mxu1 }
 0x499   :  { %v6639_v59 = vsel %vm327_vm0, %v6561_v25, %v6563_v22  ;;  %15225 = vst [vmem:[#allocation10_spill] sm:$0xff] %v13186_v46  ;;  %v13193_v32 = vpop.f32.mrf.mxu0 }
 0x49a   :  { %7217 = vrot.lane.b32.xlu1 %v12948_v3, %s8785_s14  ;;  %6731 = vmatprep.subr.bf16.mxu0 %v6639_v59  ;;  %v6565_v7 = vpop.permute.xlu0 %6564  ;;  %15226 = vst [vmem:[#allocation26_spill] sm:$0xff] %v13193_v32 }
 0x49b   :  { %v6640_v59 = vsel %vm327_vm0, %v6563_v22, %v6565_v7 }
 0x49c   :  { %v13182_v8 = vpop.permute.xlu1 %6566  ;;  %7219 = vrot.lane.b32.xlu0 %v12958_v27, %s8785_s14 }
 0x49d   :  { %v6641_v44 = vsel %vm327_vm0, %v6565_v7, %v13182_v8 }
 0x49e   :  { %7667 = vrot.lane.b32.xlu1 %v12472_v38, %s8786_s15  ;;  %6774 = vmatprep.subr.bf16.mxu1 %v6641_v44  ;;  %v6559_v33 = vpop.permute.xlu0 %6558  ;;  %v13203_v38 = vpop.f32.mrf.mxu1 }
 0x49f   :  { %v6638_v43 = vsel %vm327_vm0, %v6559_v33, %v6561_v25  ;;  %6775 = vmatpush1.bf16.msra.mxu1 %v6640_v59  ;;  %15227 = vst [vmem:[#allocation27_spill] sm:$0xff] %v13203_v38 }
 0x4a0   :  { %v6629_v31 = vpop.permute.xlu1 %6628  ;;  %7669 = vrot.lane.b32.xlu0 %v12487_v14, %s8786_s15  ;;  %6732 = vmatpush1.bf16.msra.mxu0 %v6638_v43 }
 0x4a1   :  { %v6669_v43 = vsel %vm327_vm0, %v13107_v9, %v6629_v31 }
 0x4a2   :  { %7281 = vrot.lane.b32.xlu1 %v12965_v52, %s8785_s14  ;;  %v6631_v22 = vpop.permute.xlu0 %6630  ;;  %8415 = vmatmul.mubr.msk.bf16.vlgmr.msra.gmra.mxu1 %vm404_vm1, %v13199_v55  ;;  %v13209_v25 = vpop.f32.mrf.mxu0 }
 0x4a3   :  { %v6670_v7 = vsel %vm327_vm0, %v6629_v31, %v6631_v22  ;;  %8414 = vmatmul.mubr.msk.bf16.vlgmr.msra.gmra.mxu0 %vm404_vm1, %v13199_v55  ;;  %6878 = vmatprep.mubr.bf16.mxu1 %v15180_v2 }
 0x4a4   :  { %v6633_v14 = vpop.permute.xlu1 %6632  ;;  %7665 = vrot.lane.b32.xlu0 %v12544_v36, %s8786_s15  ;;  %6811 = vmatprep.subr.bf16.mxu0 %v6670_v7  ;;  %v5032_v44 = vpop.f32.mrf.mxu1  ;;  %v15229_v7 = vld [vmem:[#allocation20_spill] sm:$0xff] }
 0x4a5   :  { %6812 = vmatpush1.bf16.msra.mxu0 %v6669_v43  ;;  %6835 = vmatprep.mubr.bf16.mxu0 %v15180_v2  ;;  %v13221_v33 = vadd.f32 %v5032_v44, %v13117_v5  ;;  %v13223_v59 = vpop.f32.mrf.mxu0  ;;  %v6671_v5 = vsel %vm327_vm0, %v6631_v22, %v6633_v14 }
 0x4a6   :  { %15228 = vst [vmem:[#allocation28_spill] sm:$0xff] %v13223_v59  ;;  %7647 = vrot.lane.b32.xlu1 %v12559_v10, %s8786_s15  ;;  %v13227_v38 = vpop.permute.xlu0 %6634  ;;  %v5034_v46 = vpop.f32.mrf.mxu1 }
 0x4a7   :  { %v6672_v36 = vsel %vm327_vm0, %v6633_v14, %v13227_v38  ;;  %v13232_v31 = vadd.f32 %v5034_v46, %v13126_v51  ;;  %v13239_v43 = vpop.f32.mrf.mxu0 }
 0x4a8   :  { %v6609_v9 = vpop.permute.xlu1 %6608  ;;  %7649 = vrot.lane.b32.xlu0 %v12582_v61, %s8786_s15  ;;  %6854 = vmatprep.subr.bf16.mxu1 %v6672_v36  ;;  %15230 = vst [vmem:[#allocation20_spill] sm:$0xff] %v13239_v43  ;;  %v13246_v51 = vpop.f32.mrf.mxu1 }
 0x4a9   :  { %6855 = vmatpush1.bf16.msra.mxu1 %v6671_v5  ;;  %v6660_v61 = vsel %vm327_vm0, %v13128_v13, %v6609_v9  ;;  %v13252_v22 = vpop.f32.mrf.mxu0 }
 0x4aa   :  { %7261 = vrot.lane.b32.xlu1 %v15229_v7, %s8785_s14  ;;  %v6611_v10 = vpop.permute.xlu0 %6610  ;;  %15231 = vst [vmem:[#allocation29_spill] sm:$0xff] %v13252_v22  ;;  %v13259_v13 = vpop.f32.mrf.mxu1 }
 0x4ab   :  { %v6661_v44 = vsel %vm327_vm0, %v6609_v9, %v6611_v10 }
 0x4ac   :  { %v6613_v59 = vpop.permute.xlu1 %6612  ;;  %7645 = vrot.lane.b32.xlu0 %v12638_v53, %s8786_s15  ;;  %6813 = vmatprep.subr.bf16.mxu0 %v6661_v44 }
 0x4ad   :  { %6814 = vmatpush1.bf16.msra.mxu0 %v6660_v61  ;;  %v6662_v53 = vsel %vm327_vm0, %v6611_v10, %v6613_v59 }
 0x4ae   :  { %7627 = vrot.lane.b32.xlu1 %v12658_v21, %s8786_s15  ;;  %v13250_v46 = vpop.permute.xlu0 %6614 }
 0x4af   :  { %v6663_v14 = vsel %vm327_vm0, %v6613_v59, %v13250_v46 }
 0x4b0   :  { %v6589_v36 = vpop.permute.xlu1 %6588  ;;  %7629 = vrot.lane.b32.xlu0 %v12672_v63, %s8786_s15  ;;  %6856 = vmatprep.subr.bf16.mxu1 %v6663_v14 }
 0x4b1   :  { %6857 = vmatpush1.bf16.msra.mxu1 %v6662_v53  ;;  %v6651_v63 = vsel %vm327_vm0, %v13157_v39, %v6589_v36 }
 0x4b2   :  { %7241 = vrot.lane.b32.xlu1 %v12984_v23, %s8785_s14  ;;  %v6591_v21 = vpop.permute.xlu0 %6590  ;;  %v5075_v9 = vpop.f32.mrf.mxu0 }
 0x4b3   :  { %v6652_v5 = vsel %vm327_vm0, %v6589_v36, %v6591_v21  ;;  %v13265_v44 = vadd.f32 %v5075_v9, %v13121_v42 }
 0x4b4   :  { %v6593_v61 = vpop.permute.xlu1 %6592  ;;  %7625 = vrot.lane.b32.xlu0 %v12708_v11, %s8786_s15  ;;  %6815 = vmatprep.subr.bf16.mxu0 %v6652_v5  ;;  %v13271_v59 = vpop.f32.mrf.mxu1 }
 0x4b5   :  { %6816 = vmatpush1.bf16.msra.mxu0 %v6651_v63  ;;  %v13277_v14 = vpop.f32.mrf.mxu0  ;;  %v6653_v39 = vsel %vm327_vm0, %v6591_v21, %v6593_v61 }
 0x4b6   :  { %7607 = vrot.lane.b32.xlu1 %v12722_v26, %s8786_s15  ;;  %v13275_v10 = vpop.permute.xlu0 %6594  ;;  %v13284_v36 = vpop.f32.mrf.mxu1 }
 0x4b7   :  { %v6654_v42 = vsel %vm327_vm0, %v6593_v61, %v13275_v10  ;;  %v13288_v5 = vpop.f32.mrf.mxu0  ;;  %v13300_v61 = vld [vmem:[%s15007_s0 + $0x114] ss:$44 sps:$4 sm:$0xff]  }
 0x4b8   :  { %v6569_v53 = vpop.permute.xlu1 %6568  ;;  %7609 = vrot.lane.b32.xlu0 %v12735_v20, %s8786_s15  ;;  %6858 = vmatprep.subr.bf16.mxu1 %v6654_v42  ;;  %v13295_v21 = vpop.f32.mrf.mxu1 }
 0x4b9   :  { %6859 = vmatpush1.bf16.msra.mxu1 %v6653_v39  ;;  %v6642_v20 = vsel %vm327_vm0, %v13182_v8, %v6569_v53  ;;  %v13304_v39 = vpop.f32.mrf.mxu0  ;;  %v13310_v8 = vld [vmem:[%s15007_s0 + $0x118] ss:$44 sps:$4 sm:$0xff]  }
 0x4ba   :  { %7221 = vrot.lane.b32.xlu1 %v12997_v4, %s8785_s14  ;;  %v6571_v9 = vpop.permute.xlu0 %6570  ;;  %15232 = vst [vmem:[#allocation30_spill] sm:$0xff] %v13304_v39  ;;  %v13317_v32 = vpop.f32.mrf.mxu1 }
 0x4bb   :  { %v6643_v63 = vsel %vm327_vm0, %v6569_v53, %v6571_v9  ;;  %15233 = vst [vmem:[#allocation31_spill] sm:$0xff] %v13317_v32  ;;  %v8772_v32 = vld [vmem:[%s15007_s0 + $0xb4] ss:$44 sps:$4 sm:$0xff]  }
 0x4bc   :  { %v6573_v22 = vpop.permute.xlu1 %6572  ;;  %7605 = vrot.lane.b32.xlu0 %v12770_v6, %s8786_s15  ;;  %6817 = vmatprep.subr.bf16.mxu0 %v6643_v63 }
 0x4bd   :  { %6818 = vmatpush1.bf16.msra.mxu0 %v6642_v20  ;;  %v6644_v53 = vsel %vm327_vm0, %v6571_v9, %v6573_v22 }
 0x4be   :  { %7671 = vrot.lane.b32.xlu1 %v13300_v61, %s8786_s15  ;;  %v6575_v42 = vpop.permute.xlu0 %6574 }
 0x4bf   :  { %v6645_v43 = vsel %vm327_vm0, %v6573_v22, %v6575_v42 }
 0x4c0   :  { %v6637_v63 = vpop.permute.xlu1 %6636  ;;  %7673 = vrot.lane.b32.xlu0 %v13310_v8, %s8786_s15  ;;  %6860 = vmatprep.subr.bf16.mxu1 %v6645_v43  ;;  %v8769_v43 = vld [vmem:[%s15007_s0 + $0x10c] ss:$44 sps:$4 sm:$0xff]  }
 0x4c1   :  { %6861 = vmatpush1.bf16.msra.mxu1 %v6644_v53  ;;  %6897 = vmatprep.subr.bf16.mxu0 %v6637_v63  ;;  %v6673_v20 = vsel %vm327_vm0, %v13227_v38, %v6637_v63  ;;  %v8770_v63 = vld [vmem:[%s15007_s0 + $0x108] ss:$44 sps:$4 sm:$0xff]  }
 0x4c2   :  { %7675 = vrot.lane.b32.xlu1 %v12782_v37, %s8786_s15  ;;  %8416 = vmatmul.mubr.msk.bf16.vlgmr.msra.gmra.mxu0 %vm404_vm1, %v13199_v55  ;;  %v6617_v39 = vpop.permute.xlu0 %6616  ;;  %v5161_v1 = vpop.f32.mrf.mxu0 }
 0x4c3   :  { %6898 = vmatpush1.bf16.msra.mxu0 %v6673_v20  ;;  %6988 = vmatprep.subr.bf16.mxu1 %v8769_v43  ;;  %v13327_v22 = vadd.f32 %v5161_v1, %v13166_v47  ;;  %v8771_v1 = vld [vmem:[%s15007_s0 + $0xbc] ss:$44 sps:$4 sm:$0xff]   ;;  %v6664_v47 = vsel %vm327_vm0, %v13250_v46, %v6617_v39 }
 0x4c4   :  { %v6597_v38 = vpop.permute.xlu1 %6596  ;;  %7677 = vrot.lane.b32.xlu0 %v12794_v57, %s8786_s15  ;;  %8417 = vmatmul.mubr.msk.bf16.vlgmr.msra.gmra.mxu1 %vm404_vm1, %v13199_v55  ;;  %v5163_v9 = vpop.f32.mrf.mxu0  ;;  %v8774_v46 = vld [vmem:[%s15007_s0 + $0xb0] ss:$44 sps:$4 sm:$0xff]  }
 0x4c5   :  { %6899 = vmatprep.subr.bf16.mxu0 %v6617_v39  ;;  %6989 = vmatpush1.bf16.msra.mxu1 %v8770_v63  ;;  %v5204_v53 = vpop.f32.mrf.mxu1  ;;  %v13337_v20 = vadd.f32 %v5163_v9, %v13175_v15  ;;  %v8773_v9 = vld [vmem:[%s15007_s0 + $0xc0] ss:$44 sps:$4 sm:$0xff]  }
 0x4c6   :  { %7651 = vrot.lane.b32.xlu1 %v8771_v1, %s8786_s15  ;;  %v6577_v43 = vpop.permute.xlu0 %6576  ;;  %6990 = vmatprep.subr.bf16.mxu1 %v8772_v32  ;;  %v13349_v63 = vadd.f32 %v5204_v53, %v13209_v25  ;;  %v6655_v25 = vsel %vm327_vm0, %v13275_v10, %v6597_v38  ;;  %v8775_v53 = vld [vmem:[%s15007_s0 + $0x5c] ss:$44 sps:$4 sm:$0xff]  }
 0x4c7   :  { %6900 = vmatpush1.bf16.msra.mxu0 %v6664_v47  ;;  %6921 = vmatprep.mubr.bf16.mxu0 %v15180_v2  ;;  %v13362_v32 = vpop.f32.mrf.mxu1  ;;  %v13373_v47 = vpop.f32.mrf.mxu0  ;;  %v6646_v10 = vsel %vm327_vm0, %v6575_v42, %v6577_v43 }
 0x4c8   :  { %6901 = vmatprep.subr.bf16.mxu0 %v6597_v38  ;;  %v13352_v15 = vpop.permute.xlu1 %7265  ;;  %7653 = vrot.lane.b32.xlu0 %v8773_v9, %s8786_s15  ;;  %15234 = vst [vmem:[#allocation32_spill] sm:$0xff] %v13362_v32 }
 0x4c9   :  { %6991 = vmatpush1.bf16.msra.mxu1 %v8774_v46  ;;  %7012 = vmatprep.mubr.bf16.mxu1 %v15180_v2  ;;  %v13380_v32 = vpop.f32.mrf.mxu1 }
 0x4ca   :  { %7655 = vrot.lane.b32.xlu1 %v12826_v17, %s8786_s15  ;;  %v13368_v39 = vpop.permute.xlu0 %7267  ;;  %6992 = vmatprep.subr.bf16.mxu1 %v8775_v53 }
 0x4cb   :  { %6902 = vmatpush1.bf16.msra.mxu0 %v6655_v25  ;;  %v13388_v25 = vpop.f32.mrf.mxu0 }
 0x4cc   :  { %v13375_v46 = vpop.permute.xlu1 %7269  ;;  %7657 = vrot.lane.b32.xlu0 %v12835_v12, %s8786_s15  ;;  %6903 = vmatprep.subr.bf16.mxu0 %v6577_v43 }
 0x4cd   :  { %6993 = vmatpush1.bf16.msra.mxu1 %v12708_v11  ;;  %v13401_v11 = vpop.f32.mrf.mxu1 }
 0x4ce   :  { %7631 = vrot.lane.b32.xlu1 %v12685_v58, %s8786_s15  ;;  %v13385_v38 = vpop.permute.xlu0 %7271  ;;  %6994 = vmatprep.subr.bf16.mxu1 %v12722_v26  ;;  %v13398_v58 = vld [vmem:[%s15008_s1 + $0x60] sm:$0x3f]  }
 0x4cf   :  { %6904 = vmatpush1.bf16.msra.mxu0 %v6646_v10 }
 0x4d0   :  { %v13390_v53 = vpop.permute.xlu1 %7263  ;;  %7633 = vrot.lane.b32.xlu0 %v12695_v24, %s8786_s15  ;;  %7031 = vmatprep.subr.bf16.mxu0 %v13300_v61  ;;  %v8776_v24 = vld [vmem:[%s15007_s0 + $0x110] ss:$44 sps:$4 sm:$0xff]  }
 0x4d1   :  { %6995 = vmatpush1.bf16.msra.mxu1 %v12770_v6 }
 0x4d2   :  { %7635 = vrot.lane.b32.xlu1 %v12861_v29, %s8786_s15  ;;  %8418 = vmatmul.mubr.msk.bf16.vlgmr.msra.gmra.mxu0 %vm404_vm1, %v13199_v55  ;;  %v13407_v26 = vpop.permute.xlu0 %7245 }
 0x4d3   :  { %7032 = vmatpush1.bf16.msra.mxu0 %v8776_v24  ;;  %7074 = vmatprep.subr.bf16.mxu1 %v12782_v37  ;;  %v5414_v61 = vpop.f32.mrf.mxu0 }
 0x4d4   :  { %v13413_v42 = vpop.permute.xlu1 %7247  ;;  %7637 = vrot.lane.b32.xlu0 %v12870_v16, %s8786_s15  ;;  %8420 = vmatmul.mubr.msk.bf16.vlgmr.msra.gmra.mxu1 %vm404_vm1, %v13398_v58  ;;  %v13420_v6 = vadd.f32 %v5414_v61, %v13221_v33  ;;  %v8777_v33 = vld [vmem:[%s15007_s0 + $0xb8] ss:$44 sps:$4 sm:$0xff]  }
 0x4d5   :  { %7033 = vmatprep.subr.bf16.mxu0 %v8771_v1  ;;  %7075 = vmatpush1.bf16.msra.mxu1 %v13310_v8  ;;  %v5457_v55 = vpop.f32.mrf.mxu1  ;;  %v5416_v43 = vpop.f32.mrf.mxu0 }
 0x4d6   :  { %7611 = vrot.lane.b32.xlu1 %v12749_v60, %s8786_s15  ;;  %v13425_v37 = vpop.permute.xlu0 %7249  ;;  %7076 = vmatprep.subr.bf16.mxu1 %v12826_v17  ;;  %v13429_v10 = vadd.f32 %v5457_v55, %v13265_v44  ;;  %v13432_v24 = vadd.f32 %v5416_v43, %v13232_v31  ;;  %v8778_v17 = vld [vmem:[%s15007_s0 + $0x64] ss:$44 sps:$4 sm:$0xff]   ;;  %v8781_v55 = vld [vmem:[%s15007_s0 + $0x8] ss:$44 sps:$4 sm:$0xff]  }
 0x4d7   :  { %7034 = vmatpush1.bf16.msra.mxu0 %v8777_v33  ;;  %7055 = vmatprep.mubr.bf16.mxu0 %v15180_v2  ;;  %v13446_v31 = vpop.f32.mrf.mxu1  ;;  %v8782_v43 = vld [vmem:[%s15007_s0 + $0x10] ss:$44 sps:$4 sm:$0xff]  }
 0x4d8   :  { %v13438_v8 = vpop.permute.xlu1 %7251  ;;  %7613 = vrot.lane.b32.xlu0 %v12760_v0, %s8786_s15  ;;  %7035 = vmatprep.subr.bf16.mxu0 %v8778_v17  ;;  %v8779_v0 = vld [vmem:[%s15007_s0 + $0x60] ss:$44 sps:$4 sm:$0xff]  }
 0x4d9   :  { %7077 = vmatpush1.bf16.msra.mxu1 %v8773_v9  ;;  %7098 = vmatprep.mubr.bf16.mxu1 %v15180_v2  ;;  %v8780_v9 = vld [vmem:[%s15007_s0 + $0x68] ss:$44 sps:$4 sm:$0xff]   ;;  %v13464_v61 = vpop.f32.mrf.mxu1 }
 0x4da   :  { %7615 = vrot.lane.b32.xlu1 %v12916_v50, %s8786_s15  ;;  %v13450_v44 = vpop.permute.xlu0 %7243  ;;  %7078 = vmatprep.subr.bf16.mxu1 %v12861_v29 }
 0x4db   :  { %7036 = vmatpush1.bf16.msra.mxu0 %v8779_v0  ;;  %v13482_v33 = vpop.f32.mrf.mxu1 }
 0x4dc   :  { %v13456_v1 = vpop.permute.xlu1 %7225  ;;  %7617 = vrot.lane.b32.xlu0 %v12935_v62, %s8786_s15  ;;  %7037 = vmatprep.subr.bf16.mxu0 %v12749_v60 }
 0x4dd   :  { %7079 = vmatpush1.bf16.msra.mxu1 %v8780_v9 }
 0x4de   :  { %7679 = vrot.lane.b32.xlu1 %v12806_v56, %s8786_s15  ;;  %v13468_v29 = vpop.permute.xlu0 %7227  ;;  %7080 = vmatprep.subr.bf16.mxu1 %v12916_v50 }
 0x4df   :  { %7038 = vmatpush1.bf16.msra.mxu0 %v8781_v55  ;;  %v4036_v55 = vld [vmem:[%s15009_s2 + $0x8] sm:$0xf] }
 0x4e0   :  { %v13474_v60 = vpop.permute.xlu1 %7229  ;;  %7681 = vrot.lane.b32.xlu0 %v12817_v40, %s8786_s15  ;;  %7117 = vmatprep.subr.bf16.mxu0 %v12806_v56 }
 0x4e1   :  { %7081 = vmatpush1.bf16.msra.mxu1 %v8782_v43 }
 0x4e2   :  { %7683 = vrot.lane.b32.xlu1 %v12965_v52, %s8786_s15  ;;  %8421 = vmatmul.mubr.msk.bf16.vlgmr.msra.gmra.mxu0 %vm404_vm1, %v13398_v58  ;;  %v13488_v50 = vpop.permute.xlu0 %7231 }
 0x4e3   :  { %7118 = vmatpush1.bf16.msra.mxu0 %v12794_v57  ;;  %7160 = vmatprep.subr.bf16.mxu1 %v12965_v52 }
 0x4e4   :  { %v13492_v56 = vpop.permute.xlu1 %7223  ;;  %7659 = vrot.lane.b32.xlu0 %v12844_v30, %s8786_s15  ;;  %8422 = vmatmul.mubr.msk.bf16.vlgmr.msra.gmra.mxu1 %vm404_vm1, %v13398_v58 }
 0x4e5   :  { %7119 = vmatprep.subr.bf16.mxu0 %v12844_v30  ;;  %7161 = vmatpush1.bf16.msra.mxu1 %v12817_v40  ;;  %v5543_v17 = vpop.f32.mrf.mxu1  ;;  %v13526_v30 = vpop.f32.mrf.mxu0 }
 0x4e6   :  { %7661 = vrot.lane.b32.xlu1 %v12852_v28, %s8786_s15  ;;  %v13502_v0 = vpop.permute.xlu0 %7205  ;;  %7162 = vmatprep.subr.bf16.mxu1 %v15229_v7  ;;  %v13506_v57 = vadd.f32 %v5543_v17, %v13327_v22  ;;  %v7301_v17 = vsel %vm974_vm2, %v13450_v44, %v13407_v26  ;;  %v6018_v44 = vld [vmem:[%s15009_s2 + $0x8] sm:$0xf] }
 0x4e7   :  { %7120 = vmatpush1.bf16.msra.mxu0 %v12835_v12  ;;  %7141 = vmatprep.mubr.bf16.mxu0 %v15180_v2  ;;  %v5545_v52 = vpop.f32.mrf.mxu1 }
 0x4e8   :  { %v13510_v9 = vpop.permute.xlu1 %7207  ;;  %7663 = vrot.lane.b32.xlu0 %v15229_v7, %s8786_s15  ;;  %7121 = vmatprep.subr.bf16.mxu0 %v12882_v54  ;;  %v13516_v40 = vadd.f32 %v5545_v52, %v13337_v20 }
 0x4e9   :  { %7163 = vmatpush1.bf16.msra.mxu1 %v12852_v28  ;;  %7184 = vmatprep.mubr.bf16.mxu1 %v15180_v2 }
 0x4ea   :  { %7639 = vrot.lane.b32.xlu1 %v12882_v54, %s8786_s15  ;;  %v13522_v12 = vpop.permute.xlu0 %7209  ;;  %7164 = vmatprep.subr.bf16.mxu1 %v12984_v23  ;;  %v13541_v54 = vpop.f32.mrf.mxu0 }
 0x4eb   :  { %7122 = vmatpush1.bf16.msra.mxu0 %v12870_v16  ;;  %v7311_v16 = vsel %vm974_vm2, %v13352_v15, %v13368_v39 }
 0x4ec   :  { %v13528_v7 = vpop.permute.xlu1 %7211  ;;  %7641 = vrot.lane.b32.xlu0 %v12901_v48, %s8786_s15  ;;  %7123 = vmatprep.subr.bf16.mxu0 %v12948_v3 }
 0x4ed   :  { %7165 = vmatpush1.bf16.msra.mxu1 %v12901_v48  ;;  %v13548_v48 = vpop.f32.mrf.mxu0 }
 0x4ee   :  { %7643 = vrot.lane.b32.xlu1 %v12984_v23, %s8786_s15  ;;  %v7204_v28 = vpop.permute.xlu0 %7203  ;;  %7166 = vmatprep.subr.bf16.mxu1 %v12997_v4  ;;  %v7313_v23 = vsel %vm974_vm2, %v13375_v46, %v13385_v38 }
 0x4ef   :  { %7124 = vmatpush1.bf16.msra.mxu0 %v12935_v62  ;;  %v7310_v62 = vsel %vm974_vm2, %v13390_v53, %v13352_v15  ;;  %v4035_v15 = vld [vmem:[%s15009_s2] sm:$0xff]  ;;  %v7312_v53 = vsel %vm974_vm2, %v13368_v39, %v13375_v46  ;;  %v13579_v43 = vpop.f32.mrf.mxu0  ;;  %v7293_v39 = vsel %vm974_vm2, %v13456_v1, %v13468_v29 }
 0x4f0   :  { %7370 = vmatprep.subr.bf16.mxu0 %v7311_v16  ;;  %v13543_v22 = vpop.permute.xlu1 %7273  ;;  %7619 = vrot.lane.b32.xlu0 %v12948_v3, %s8786_s15  ;;  %v7302_v3 = vsel %vm974_vm2, %v13407_v26, %v13413_v42  ;;  %v7303_v26 = vsel %vm974_vm2, %v13413_v42, %v13425_v37  ;;  %v7292_v16 = vsel %vm974_vm2, %v13492_v56, %v13456_v1 }
 0x4f1   :  { %7167 = vmatpush1.bf16.msra.mxu1 %v12958_v27  ;;  %v13599_v52 = vpop.f32.mrf.mxu0  ;;  %v7284_v42 = vsel %vm974_vm2, %v13502_v0, %v13510_v9  ;;  %v7294_v1 = vsel %vm974_vm2, %v13468_v29, %v13474_v60 }
 0x4f2   :  { %7621 = vrot.lane.b32.xlu1 %v12958_v27, %s8786_s15  ;;  %8423 = vmatmul.mubr.msk.bf16.vlgmr.msra.gmra.mxu0 %vm404_vm1, %v13398_v58  ;;  %v13560_v20 = vpop.permute.xlu0 %7275 }
 0x4f3   :  { %7371 = vmatpush1.bf16.msra.mxu0 %v7310_v62  ;;  %7413 = vmatprep.subr.bf16.mxu1 %v7313_v23  ;;  %v7295_v62 = vsel %vm974_vm2, %v13474_v60, %v13488_v50  ;;  %v13613_v56 = vpop.f32.mrf.mxu0  ;;  %v7315_v29 = vsel %vm974_vm2, %v13543_v22, %v13560_v20 }
 0x4f4   :  { %7372 = vmatprep.subr.bf16.mxu0 %v7302_v3  ;;  %v7278_v27 = vpop.permute.xlu1 %7277  ;;  %7623 = vrot.lane.b32.xlu0 %v12997_v4, %s8786_s15  ;;  %v7304_v4 = vsel %vm974_vm2, %v13425_v37, %v13438_v8  ;;  %v7283_v3 = vsel %vm974_vm2, %v7204_v28, %v13502_v0  ;;  %v7285_v0 = vsel %vm974_vm2, %v13510_v9, %v13522_v12 }
 0x4f5   :  { %8424 = vmatmul.mubr.msk.bf16.vlgmr.msra.gmra.mxu1 %vm404_vm1, %v13398_v58  ;;  %7394 = vmatprep.mubr.bf16.mxu0 %v15180_v2 }
 0x4f6   :  { %7414 = vmatpush1.bf16.msra.mxu1 %v7312_v53  ;;  %4039 = vperm.xlu1 %8447, %v4035_v15   ;;  %v13587_v58 = vpop.permute.xlu0 %7279 }
 0x4f7   :  { %7373 = vmatpush1.bf16.msra.mxu0 %v7301_v17  ;;  %7415 = vmatprep.subr.bf16.mxu1 %v7304_v4  ;;  %v7314_v17 = vsel %vm974_vm2, %v13385_v38, %v13543_v22  ;;  %v7317_v4 = vsel %vm974_vm2, %v7278_v27, %v13587_v58  ;;  %v7316_v38 = vsel %vm974_vm2, %v13560_v20, %v7278_v27 }
 0x4f8   :  { %7374 = vmatprep.subr.bf16.mxu0 %v7293_v39  ;;  %v7254_v46 = vpop.permute.xlu1 %7253  ;;  %4044 = vperm.xlu0 %8446, %v4036_v55   ;;  %v13625_v55 = vld [vmem:[%s15008_s1 + $0x70] sm:$0x3f]  }
 0x4f9   :  { %7437 = vmatprep.mubr.bf16.mxu1 %v15180_v2  ;;  %v7305_v22 = vsel %vm974_vm2, %v13438_v8, %v7254_v46 }
 0x4fa   :  { %7416 = vmatpush1.bf16.msra.mxu1 %v7303_v26  ;;  %6021 = vperm.xlu1 %8447, %v4035_v15   ;;  %v7256_v23 = vpop.permute.xlu0 %7255  ;;  %v7286_v15 = vsel %vm974_vm2, %v13522_v12, %v13528_v7 }
 0x4fb   :  { %7375 = vmatpush1.bf16.msra.mxu0 %v7292_v16  ;;  %7417 = vmatprep.subr.bf16.mxu1 %v7295_v62  ;;  %v7306_v9 = vsel %vm974_vm2, %v7254_v46, %v7256_v23 }
 0x4fc   :  { %7376 = vmatprep.subr.bf16.mxu0 %v7284_v42  ;;  %v7258_v37 = vpop.permute.xlu1 %7257  ;;  %6026 = vperm.xlu0 %8446, %v6018_v44  }
 0x4fd   :  { %v7307_v42 = vsel %vm974_vm2, %v7256_v23, %v7258_v37 }
 0x4fe   :  { %7418 = vmatpush1.bf16.msra.mxu1 %v7294_v1  ;;  %v13620_v53 = vpop.permute.xlu0 %7259 }
 0x4ff   :  { %7377 = vmatpush1.bf16.msra.mxu0 %v7283_v3  ;;  %7419 = vmatprep.subr.bf16.mxu1 %v7286_v15 }
 0x500   :  { %7456 = vmatprep.subr.bf16.mxu0 %v7315_v29  ;;  %v7234_v60 = vpop.permute.xlu1 %7233 }
 0x501   :  { %v5586_v28 = vpop.f32.mrf.mxu0  ;;  %v7296_v20 = vsel %vm974_vm2, %v13488_v50, %v7234_v60 }
 0x502   :  { %8428 = vmatmul.mubr.msk.bf16.vlgmr.msra.gmra.mxu0 %vm404_vm1, %v13625_v55  ;;  %7420 = vmatpush1.bf16.msra.mxu1 %v7285_v0  ;;  %v7236_v39 = vpop.permute.xlu0 %7235  ;;  %v13641_v26 = vadd.f32 %v5586_v28, %v13349_v63  ;;  %v7308_v63 = vsel %vm974_vm2, %v7258_v37, %v13620_v53 }
 0x503   :  { %7457 = vmatpush1.bf16.msra.mxu0 %v7314_v17  ;;  %7499 = vmatprep.subr.bf16.mxu1 %v7317_v4  ;;  %v7297_v16 = vsel %vm974_vm2, %v7234_v60, %v7236_v39 }
 0x504   :  { %15235 = vst [vmem:[#allocation33_spill] sm:$0xff] %v13641_v26  ;;  %7458 = vmatprep.subr.bf16.mxu0 %v7306_v9  ;;  %v7238_v12 = vpop.permute.xlu1 %7237  ;;  %7480 = vmatprep.mubr.bf16.mxu0 %v15180_v2 }
 0x505   :  { %8429 = vmatmul.mubr.msk.bf16.vlgmr.msra.gmra.mxu1 %vm404_vm1, %v13625_v55  ;;  %v7298_v3 = vsel %vm974_vm2, %v7236_v39, %v7238_v12 }
 0x506   :  { %7500 = vmatpush1.bf16.msra.mxu1 %v7316_v38  ;;  %v7240_v44 = vpop.permute.xlu0 %7239  ;;  %7523 = vmatprep.mubr.bf16.mxu1 %v15180_v2 }
 0x507   :  { %7459 = vmatpush1.bf16.msra.mxu0 %v7305_v22  ;;  %7501 = vmatprep.subr.bf16.mxu1 %v7308_v63  ;;  %v7299_v8 = vsel %vm974_vm2, %v7238_v12, %v7240_v44 }
 0x508   :  { %7460 = vmatprep.subr.bf16.mxu0 %v7297_v16  ;;  %v7214_v62 = vpop.permute.xlu1 %7213 }
 0x509   :  { %v7287_v15 = vsel %vm974_vm2, %v13528_v7, %v7214_v62 }
 0x50a   :  { %7502 = vmatpush1.bf16.msra.mxu1 %v7307_v42  ;;  %v7216_v27 = vpop.permute.xlu0 %7215 }
 0x50b   :  { %7461 = vmatpush1.bf16.msra.mxu0 %v7296_v20  ;;  %7503 = vmatprep.subr.bf16.mxu1 %v7299_v8  ;;  %v7288_v46 = vsel %vm974_vm2, %v7214_v62, %v7216_v27 }
 0x50c   :  { %v7218_v1 = vpop.permute.xlu1 %7217  ;;  %7462 = vmatprep.subr.bf16.mxu0 %v7288_v46 }
 0x50d   :  { %v7289_v29 = vsel %vm974_vm2, %v7216_v27, %v7218_v1 }
 0x50e   :  { %7504 = vmatpush1.bf16.msra.mxu1 %v7298_v3  ;;  %v7220_v23 = vpop.permute.xlu0 %7219 }
 0x50f   :  { %7463 = vmatpush1.bf16.msra.mxu0 %v7287_v15  ;;  %v7290_v50 = vsel %vm974_vm2, %v7218_v1, %v7220_v23 }
 0x510   :  { %v7668_v37 = vpop.permute.xlu1 %7667  ;;  %7505 = vmatprep.subr.bf16.mxu1 %v7290_v50 }
 0x512   :  { %8430 = vmatmul.mubr.msk.bf16.vlgmr.msra.gmra.mxu0 %vm404_vm1, %v13625_v55  ;;  %7506 = vmatpush1.bf16.msra.mxu1 %v7289_v29  ;;  %v7670_v60 = vpop.permute.xlu0 %7669 }
 0x513   :  { %v7713_v0 = vsel %vm1377_vm3, %v7668_v37, %v7670_v60  ;;  %7566 = vmatprep.mubr.bf16.mxu0 %v15180_v2 }
 0x514   :  { %v7282_v28 = vpop.permute.xlu1 %7281  ;;  %7772 = vmatprep.subr.bf16.mxu1 %v7713_v0 }
 0x515   :  { %v7318_v7 = vsel %vm974_vm2, %v13587_v58, %v7282_v28  ;;  %8431 = vmatmul.mubr.msk.bf16.vlgmr.msra.gmra.mxu1 %vm404_vm1, %v13625_v55  ;;  %7542 = vmatprep.subr.bf16.mxu0 %v7282_v28 }
 0x516   :  { %7543 = vmatpush1.bf16.msra.mxu0 %v7318_v7  ;;  %v7666_v17 = vpop.permute.xlu0 %7665  ;;  %7796 = vmatprep.mubr.bf16.mxu1 %v15180_v2 }
 0x517   :  { %v7712_v4 = vsel %vm1377_vm3, %v7666_v17, %v7668_v37 }
 0x518   :  { %v7648_v39 = vpop.permute.xlu1 %7647  ;;  %7773 = vmatpush1.bf16.msra.mxu1 %v7712_v4 }
 0x51a   :  { %v7650_v9 = vpop.permute.xlu0 %7649 }
 0x51b   :  { %v7704_v12 = vsel %vm1377_vm3, %v7648_v39, %v7650_v9 }
 0x51c   :  { %v7262_v38 = vpop.permute.xlu1 %7261  ;;  %7774 = vmatprep.subr.bf16.mxu1 %v7704_v12 }
 0x51d   :  { %v7309_v58 = vsel %vm974_vm2, %v13620_v53, %v7262_v38  ;;  %7544 = vmatprep.subr.bf16.mxu0 %v7262_v38 }
 0x51e   :  { %7545 = vmatpush1.bf16.msra.mxu0 %v7309_v58  ;;  %v7646_v22 = vpop.permute.xlu0 %7645 }
 0x51f   :  { %v7703_v63 = vsel %vm1377_vm3, %v7646_v22, %v7648_v39 }
 0x520   :  { %v7628_v16 = vpop.permute.xlu1 %7627  ;;  %7775 = vmatpush1.bf16.msra.mxu1 %v7703_v63 }
 0x522   :  { %v7630_v62 = vpop.permute.xlu0 %7629 }
 0x523   :  { %v7695_v42 = vsel %vm1377_vm3, %v7628_v16, %v7630_v62 }
 0x524   :  { %v7242_v20 = vpop.permute.xlu1 %7241  ;;  %7776 = vmatprep.subr.bf16.mxu1 %v7695_v42 }
 0x525   :  { %v7300_v8 = vsel %vm974_vm2, %v7240_v44, %v7242_v20  ;;  %7546 = vmatprep.subr.bf16.mxu0 %v7242_v20  ;;  %v13688_v44 = vld [vmem:[%s15008_s1 + $0x78] sm:$0x3f]  }
 0x526   :  { %7547 = vmatpush1.bf16.msra.mxu0 %v7300_v8  ;;  %v7626_v27 = vpop.permute.xlu0 %7625 }
 0x527   :  { %v7694_v46 = vsel %vm1377_vm3, %v7626_v27, %v7628_v16 }
 0x528   :  { %v7608_v53 = vpop.permute.xlu1 %7607  ;;  %7777 = vmatpush1.bf16.msra.mxu1 %v7694_v46 }
 0x52a   :  { %v7610_v1 = vpop.permute.xlu0 %7609 }
 0x52b   :  { %v7686_v3 = vsel %vm1377_vm3, %v7608_v53, %v7610_v1 }
 0x52c   :  { %v7222_v15 = vpop.permute.xlu1 %7221  ;;  %7778 = vmatprep.subr.bf16.mxu1 %v7686_v3 }
 0x52d   :  { %v7291_v50 = vsel %vm974_vm2, %v7220_v23, %v7222_v15  ;;  %7548 = vmatprep.subr.bf16.mxu0 %v7222_v15 }
 0x52e   :  { %7549 = vmatpush1.bf16.msra.mxu0 %v7291_v50  ;;  %v7606_v37 = vpop.permute.xlu0 %7605 }
 0x52f   :  { %v7685_v29 = vsel %vm1377_vm3, %v7606_v37, %v7608_v53 }
 0x530   :  { %v7672_v0 = vpop.permute.xlu1 %7671  ;;  %7779 = vmatpush1.bf16.msra.mxu1 %v7685_v29 }
 0x531   :  { %8432 = vmatmul.mubr.msk.bf16.vlgmr.msra.gmra.mxu0 %vm404_vm1, %v13625_v55  ;;  %v7714_v7 = vsel %vm1377_vm3, %v7670_v60, %v7672_v0 }
 0x532   :  { %v7674_v28 = vpop.permute.xlu0 %7673  ;;  %7839 = vmatprep.mubr.bf16.mxu0 %v15180_v2 }
 0x533   :  { %8436 = vmatmul.mubr.msk.bf16.vlgmr.msra.gmra.mxu1 %vm404_vm1, %v13688_v44  ;;  %v7715_v23 = vsel %vm1377_vm3, %v7672_v0, %v7674_v28 }
 0x534   :  { %v7676_v17 = vpop.permute.xlu1 %7675  ;;  %7815 = vmatprep.subr.bf16.mxu0 %v7715_v23  ;;  %7882 = vmatprep.mubr.bf16.mxu1 %v15180_v2  ;;  %v13710_v23 = vpop.f32.mrf.mxu1 }
 0x535   :  { %7816 = vmatpush1.bf16.msra.mxu0 %v7714_v7  ;;  %v7716_v55 = vsel %vm1377_vm3, %v7674_v28, %v7676_v17 }
 0x536   :  { %v7678_v4 = vpop.permute.xlu0 %7677 }
 0x537   :  { %v7717_v39 = vsel %vm1377_vm3, %v7676_v17, %v7678_v4 }
 0x538   :  { %v7652_v12 = vpop.permute.xlu1 %7651  ;;  %7858 = vmatprep.subr.bf16.mxu1 %v7717_v39 }
 0x539   :  { %7859 = vmatpush1.bf16.msra.mxu1 %v7716_v55  ;;  %v7705_v22 = vsel %vm1377_vm3, %v7650_v9, %v7652_v12  ;;  %v13716_v55 = vpop.f32.mrf.mxu1 }
 0x53a   :  { %v7654_v38 = vpop.permute.xlu0 %7653 }
 0x53b   :  { %v7706_v58 = vsel %vm1377_vm3, %v7652_v12, %v7654_v38 }
 0x53c   :  { %v7656_v63 = vpop.permute.xlu1 %7655  ;;  %7817 = vmatprep.subr.bf16.mxu0 %v7706_v58 }
 0x53d   :  { %7818 = vmatpush1.bf16.msra.mxu0 %v7705_v22  ;;  %v7707_v42 = vsel %vm1377_vm3, %v7654_v38, %v7656_v63  ;;  %v13720_v38 = vpop.f32.mrf.mxu0 }
 0x53e   :  { %v7658_v60 = vpop.permute.xlu0 %7657 }
 0x53f   :  { %v7708_v16 = vsel %vm1377_vm3, %v7656_v63, %v7658_v60  ;;  %v13725_v63 = vpop.f32.mrf.mxu1 }
 0x540   :  { %v7632_v20 = vpop.permute.xlu1 %7631  ;;  %7860 = vmatprep.subr.bf16.mxu1 %v7708_v16 }
 0x541   :  { %7861 = vmatpush1.bf16.msra.mxu1 %v7707_v42  ;;  %v7696_v46 = vsel %vm1377_vm3, %v7630_v62, %v7632_v20 }
 0x542   :  { %v7634_v8 = vpop.permute.xlu0 %7633 }
 0x543   :  { %v7697_v27 = vsel %vm1377_vm3, %v7632_v20, %v7634_v8  ;;  %v13729_v20 = vpop.f32.mrf.mxu0 }
 0x544   :  { %v7636_v53 = vpop.permute.xlu1 %7635  ;;  %7819 = vmatprep.subr.bf16.mxu0 %v7697_v27  ;;  %v13731_v27 = vpop.f32.mrf.mxu1 }
 0x545   :  { %7820 = vmatpush1.bf16.msra.mxu0 %v7696_v46  ;;  %v7698_v15 = vsel %vm1377_vm3, %v7634_v8, %v7636_v53 }
 0x546   :  { %v7638_v9 = vpop.permute.xlu0 %7637 }
 0x547   :  { %v7699_v3 = vsel %vm1377_vm3, %v7636_v53, %v7638_v9 }
 0x548   :  { %v7612_v50 = vpop.permute.xlu1 %7611  ;;  %7862 = vmatprep.subr.bf16.mxu1 %v7699_v3 }
 0x549   :  { %7863 = vmatpush1.bf16.msra.mxu1 %v7698_v15  ;;  %v7687_v0 = vsel %vm1377_vm3, %v7610_v1, %v7612_v50  ;;  %v13736_v15 = vpop.f32.mrf.mxu0 }
 0x54a   :  { %v7614_v37 = vpop.permute.xlu0 %7613 }
 0x54b   :  { %v7688_v29 = vsel %vm1377_vm3, %v7612_v50, %v7614_v37 }
 0x54c   :  { %v7616_v28 = vpop.permute.xlu1 %7615  ;;  %7821 = vmatprep.subr.bf16.mxu0 %v7688_v29 }
 0x54d   :  { %7822 = vmatpush1.bf16.msra.mxu0 %v7687_v0  ;;  %v7689_v17 = vsel %vm1377_vm3, %v7614_v37, %v7616_v28  ;;  %v13741_v0 = vpop.f32.mrf.mxu0 }
 0x54e   :  { %v7618_v62 = vpop.permute.xlu0 %7617 }
 0x54f   :  { %v7690_v7 = vsel %vm1377_vm3, %v7616_v28, %v7618_v62 }
 0x550   :  { %v7680_v39 = vpop.permute.xlu1 %7679  ;;  %8437 = vmatmul.mubr.msk.bf16.vlgmr.msra.gmra.mxu0 %vm404_vm1, %v13688_v44  ;;  %7864 = vmatprep.subr.bf16.mxu1 %v7690_v7 }
 0x551   :  { %7865 = vmatpush1.bf16.msra.mxu1 %v7689_v17  ;;  %7925 = vmatprep.mubr.bf16.mxu0 %v15180_v2  ;;  %v7718_v58 = vsel %vm1377_vm3, %v7678_v4, %v7680_v39 }
 0x552   :  { %v7682_v1 = vpop.permute.xlu0 %7681 }
 0x553   :  { %v7719_v12 = vsel %vm1377_vm3, %v7680_v39, %v7682_v1 }
 0x554   :  { %v7684_v22 = vpop.permute.xlu1 %7683  ;;  %8438 = vmatmul.mubr.msk.bf16.vlgmr.msra.gmra.mxu1 %vm404_vm1, %v13688_v44  ;;  %7901 = vmatprep.subr.bf16.mxu0 %v7719_v12  ;;  %v13749_v12 = vpop.f32.mrf.mxu0 }
 0x555   :  { %v7720_v16 = vsel %vm1377_vm3, %v7682_v1, %v7684_v22  ;;  %7902 = vmatpush1.bf16.msra.mxu0 %v7718_v58  ;;  %7944 = vmatprep.subr.bf16.mxu1 %v7684_v22 }
 0x556   :  { %7945 = vmatpush1.bf16.msra.mxu1 %v7720_v16  ;;  %v7660_v42 = vpop.permute.xlu0 %7659  ;;  %7968 = vmatprep.mubr.bf16.mxu1 %v15180_v2  ;;  %v13738_v2 = vpop.f32.mrf.mxu1 }
 0x557   :  { %v7709_v46 = vsel %vm1377_vm3, %v7658_v60, %v7660_v42 }
 0x558   :  { %v7662_v8 = vpop.permute.xlu1 %7661  ;;  %v13744_v7 = vpop.f32.mrf.mxu1 }
 0x559   :  { %v7710_v4 = vsel %vm1377_vm3, %v7660_v42, %v7662_v8 }
 0x55a   :  { %7903 = vmatprep.subr.bf16.mxu0 %v7710_v4  ;;  %v7664_v53 = vpop.permute.xlu0 %7663  ;;  %v13747_v1 = vpop.f32.mrf.mxu1 }
 0x55b   :  { %v7711_v3 = vsel %vm1377_vm3, %v7662_v8, %v7664_v53  ;;  %7904 = vmatpush1.bf16.msra.mxu0 %v7709_v46  ;;  %7946 = vmatprep.subr.bf16.mxu1 %v7664_v53  ;;  %v13756_v4 = vpop.f32.mrf.mxu0  ;;  %v5037_v53 = vadd.f32 %v13246_v51, %v13139_v41  ;;  %v15237_v41 = vld [vmem:[#allocation30_spill] sm:$0xff] }
 0x55c   :  { %v7640_v50 = vpop.permute.xlu1 %7639  ;;  %7947 = vmatpush1.bf16.msra.mxu1 %v7711_v3  ;;  %v13753_v42 = vpop.f32.mrf.mxu1  ;;  %v5039_v3 = vadd.f32 %v13259_v13, %v13148_v19  ;;  %v15238_v19 = vld [vmem:[#allocation26_spill] sm:$0xff]  ;;  %v15239_v13 = vld [vmem:[#allocation31_spill] sm:$0xff] }
 0x55d   :  { %v7700_v28 = vsel %vm1377_vm3, %v7638_v9, %v7640_v50 }
 0x55e   :  { %v7642_v37 = vpop.permute.xlu0 %7641  ;;  %v13760_v46 = vpop.f32.mrf.mxu1 }
 0x55f   :  { %v7701_v29 = vsel %vm1377_vm3, %v7640_v50, %v7642_v37  ;;  %v5078_v50 = vadd.f32 %v13277_v14, %v13132_v18  ;;  %v5125_v18 = vadd.f32 %v15239_v13, %v15238_v19  ;;  %v15240_v14 = vld [vmem:[#allocation28_spill] sm:$0xff] }
 0x560   :  { %v7644_v60 = vpop.permute.xlu1 %7643  ;;  %7905 = vmatprep.subr.bf16.mxu0 %v7701_v29  ;;  %v5119_v29 = vadd.f32 %v13271_v59, %v13159_v35  ;;  %v15243_v59 = vld [vmem:[#allocation27_spill] sm:$0xff] }
 0x561   :  { %v7702_v17 = vsel %vm1377_vm3, %v7642_v37, %v7644_v60  ;;  %7906 = vmatpush1.bf16.msra.mxu0 %v7700_v28  ;;  %7948 = vmatprep.subr.bf16.mxu1 %v7644_v60  ;;  %v5080_v37 = vadd.f32 %v13288_v5, %v13144_v49  ;;  %v5123_v28 = vadd.f32 %v13295_v21, %v13180_v34  ;;  %v15236_v60 = vld [vmem:[#allocation15_spill] sm:$0xff]  ;;  %v15242_v5 = vld [vmem:[#allocation10_spill] sm:$0xff]  ;;  %v15244_v34 = vld [vmem:[#allocation20_spill] sm:$0xff] }
 0x562   :  { %7949 = vmatpush1.bf16.msra.mxu1 %v7702_v17  ;;  %v7620_v39 = vpop.permute.xlu0 %7619  ;;  %v5082_v51 = vadd.f32 %v15237_v41, %v15236_v60  ;;  %v5166_v35 = vadd.f32 %v13373_v47, %v15242_v5  ;;  %v5209_v21 = vadd.f32 %v13380_v32, %v15244_v34  ;;  %v5606_v60 = vadd.f32 %v13541_v54, %v5039_v3  ;;  %v15247_v3 = vld [vmem:[#allocation25_spill] sm:$0xff]  ;;  %v15255_v5 = vld [vmem:[#allocation24_spill] sm:$0xff]  ;;  %v15257_v34 = vld [vmem:[#allocation14_spill] sm:$0xff] }
 0x563   :  { %v7691_v16 = vsel %vm1377_vm3, %v7618_v62, %v7620_v39  ;;  %v13764_v62 = vpop.f32.mrf.mxu0  ;;  %v5599_v19 = vadd.f32 %v13548_v48, %v5119_v29 }
 0x564   :  { %v7622_v58 = vpop.permute.xlu1 %7621 }
 0x565   :  { %v7692_v22 = vsel %vm1377_vm3, %v7620_v39, %v7622_v58  ;;  %v13782_v17 = vpop.f32.mrf.mxu0  ;;  %v15241_v39 = vld [vmem:[#allocation32_spill] sm:$0xff] }
 0x566   :  { %7907 = vmatprep.subr.bf16.mxu0 %v7692_v22  ;;  %v7624_v9 = vpop.permute.xlu0 %7623  ;;  %v5207_v49 = vadd.f32 %v15241_v39, %v15240_v14 }
 0x567   :  { %v7693_v8 = vsel %vm1377_vm3, %v7622_v58, %v7624_v9  ;;  %7908 = vmatpush1.bf16.msra.mxu0 %v7691_v16  ;;  %7950 = vmatprep.subr.bf16.mxu1 %v7624_v9  ;;  %v15245_v58 = vld [vmem:[#allocation29_spill] sm:$0xff]  ;;  %v5598_v16 = vadd.f32 %v13446_v31, %v5078_v50  ;;  %v5607_v9 = vadd.f32 %v13464_v61, %v5080_v37  ;;  %v13810_v13 = vpop.f32.mrf.mxu0 }
 0x568   :  { %7951 = vmatpush1.bf16.msra.mxu1 %v7693_v8  ;;  %v5211_v22 = vadd.f32 %v13401_v11, %v15245_v58  ;;  %v5605_v8 = vadd.f32 %v13526_v30, %v5037_v53  ;;  %v5609_v11 = vadd.f32 %v13599_v52, %v5123_v28  ;;  %v5611_v31 = vadd.f32 %v13710_v23, %v5166_v35  ;;  %v15249_v52 = vld [vmem:[#allocation12_spill] sm:$0xff]  ;;  %v15250_v23 = vld [vmem:[#allocation18_spill] sm:$0xff] }
 0x569   :  { %v5610_v30 = vadd.f32 %v13613_v56, %v5125_v18  ;;  %v13816_v54 = vadd.f32 %v13720_v38, %v5207_v49  ;;  %v15252_v56 = vld [vmem:[#allocation11_spill] sm:$0xff]  ;;  %v15253_v38 = vld [vmem:[#allocation21_spill] sm:$0xff]  ;;  %v5949_v14 = vpop.f32.mrf.mxu0 }
 0x56a   :  { %8439 = vmatmul.mubr.msk.bf16.vlgmr.msra.gmra.mxu0 %vm404_vm1, %v13688_v44 }
 0x56b   :  { %8440 = vmatmul.mubr.msk.bf16.vlgmr.msra.gmra.mxu1 %vm404_vm1, %v13688_v44  ;;  %v5121_v44 = vadd.f32 %v13284_v36, %v13171_v45  ;;  %v5168_v45 = vadd.f32 %v13388_v25, %v15243_v59  ;;  %v13792_v36 = vpop.f32.mrf.mxu1  ;;  %v5608_v25 = vadd.f32 %v13482_v33, %v5082_v51  ;;  %v5613_v33 = vadd.f32 %v13729_v20, %v5209_v21  ;;  %v15254_v20 = vld [vmem:[#allocation3_spill] sm:$0xff] }
 0x56c   :  { %v15256_v59 = vld [vmem:[#allocation23_spill] sm:$0xff] }
 0x56d   :  { %v13802_v47 = vpop.f32.mrf.mxu1  ;;  %v5600_v32 = vadd.f32 %v13579_v43, %v5121_v44  ;;  %v5612_v61 = vadd.f32 %v13716_v55, %v5168_v45  ;;  %v15248_v43 = vld [vmem:[#allocation16_spill] sm:$0xff]  ;;  %v15251_v55 = vld [vmem:[#allocation5_spill] sm:$0xff] }
 0x56e   :  { %15246 = vst [vmem:[#allocation15_spill] sm:$0xff] %v13802_v47 }
 0x56f   :  { %v13823_v29 = vpop.f32.mrf.mxu1 }
 0x571   :  { %v13804_v41 = vpop.permute.xlu1 %4039 }
 0x572   :  { %v4056_v48 = vadd.f32 %v13804_v41, %v15247_v3 }
 0x573   :  { %v4045_v53 = vpop.permute.xlu0 %4044 }
 0x574   :  { %v4057_v50 = vadd.f32 %v4045_v53, %v15248_v43  ;;  %v4058_v37 = vadd.f32 %v4045_v53, %v15249_v52  ;;  %v4059_v44 = vadd.f32 %v4045_v53, %v15250_v23  ;;  %v4060_v28 = vadd.f32 %v4045_v53, %v15251_v55 }
 0x575   :  { %v4061_v51 = vadd.f32 %v4045_v53, %v15252_v56  ;;  %v4062_v18 = vadd.f32 %v4045_v53, %v15253_v38  ;;  %v4076_v39 = vmax.f32 %v4056_v48, 0.0  ;;  %v4063_v49 = vadd.f32 %v4045_v53, %v15254_v20  ;;  %v5992_v20 = vpop.f32.mrf.mxu1 }
 0x576   :  { %v4064_v35 = vadd.f32 %v4045_v53, %v15255_v5  ;;  %v4065_v45 = vadd.f32 %v4045_v53, %v15256_v59  ;;  %v4066_v21 = vadd.f32 %v4045_v53, %v15257_v34  ;;  %v4077_v58 = vmax.f32 %v4057_v50, 0.0 }
 0x577   :  { %v4078_v3 = vmax.f32 %v4058_v37, 0.0  ;;  %v4079_v43 = vmax.f32 %v4059_v44, 0.0  ;;  %4096 = vst.msk [vmem:[#allocation2 + $0x48] sm:$0xff] %vm1753_vm6, %v4076_v39  ;;  %v4080_v52 = vmax.f32 %v4060_v28, 0.0  ;;  %v4081_v23 = vmax.f32 %v4061_v51, 0.0  ;;  %v13834_v38 = vpop.permute.xlu0 %6026  ;;  %v5951_v44 = vpop.f32.mrf.mxu0  ;;  %v15258_v28 = vld [vmem:[#allocation8_spill] sm:$0xff] }
 0x578   :  { %v4082_v55 = vmax.f32 %v4062_v18, 0.0  ;;  %v4083_v56 = vmax.f32 %v4063_v49, 0.0  ;;  %v6008_v48 = vadd.f32 %v13744_v7, %v5606_v60  ;;  %v4084_v47 = vmax.f32 %v4064_v35, 0.0  ;;  %4097 = vst [vmem:[#allocation2 + $0x50] sm:$0xf] %v4077_v58  ;;  %v15259_v18 = vld [vmem:[#allocation7_spill] sm:$0xff]  ;;  %v5994_v39 = vpop.f32.mrf.mxu1 }
 0x579   :  { %v4085_v5 = vmax.f32 %v4065_v45, 0.0  ;;  %v4086_v26 = vmax.f32 %v4066_v21, 0.0  ;;  %4098 = vst [vmem:[#allocation2 + $0x58] sm:$0xf] %v4078_v3  ;;  %4099 = vst [vmem:[#allocation2 + $0x60] sm:$0xf] %v4079_v43  ;;  %v6007_v53 = vadd.f32 %v13738_v2, %v5605_v8  ;;  %v5614_v50 = vadd.f32 %v13736_v15, %v5211_v22 }
 0x57a   :  { %v6000_v37 = vadd.f32 %v13749_v12, %v5598_v16  ;;  %v13842_v51 = vadd.f32 %v13804_v41, %v15258_v28  ;;  %4100 = vst [vmem:[#allocation2 + $0x68] sm:$0xf] %v4080_v52  ;;  %4101 = vst [vmem:[#allocation2 + $0x70] sm:$0xf] %v4081_v23  ;;  %v6009_v7 = vadd.f32 %v13756_v4, %v5607_v9  ;;  %v15260_v49 = vld [vmem:[#allocation19_spill] sm:$0xff]  ;;  %v15262_v45 = vld [vmem:[#allocation4_spill] sm:$0xff] }
 0x57b   :  { %4102 = vst [vmem:[#allocation2 + $0x78] sm:$0xf] %v4082_v55  ;;  %4103 = vst [vmem:[#allocation2 + $0x80] sm:$0xf] %v4083_v56  ;;  %v6001_v60 = vadd.f32 %v13747_v1, %v5599_v19  ;;  %v13848_v2 = vadd.f32 %v13804_v41, %v15259_v18  ;;  %v6040_v15 = vadd.f32 %v13834_v38, %v6008_v48  ;;  %v15263_v21 = vld [vmem:[#allocation17_spill] sm:$0xff] }
 0x57c   :  { %4104 = vst [vmem:[#allocation2 + $0x88] sm:$0xf] %v4084_v47  ;;  %4105 = vst [vmem:[#allocation2 + $0x90] sm:$0xf] %v4085_v5  ;;  %v6010_v12 = vadd.f32 %v13764_v62, %v5608_v25  ;;  %v6002_v22 = vadd.f32 %v13753_v42, %v5600_v32  ;;  %v6011_v16 = vadd.f32 %v13760_v46, %v5609_v11  ;;  %v13857_v47 = vpop.permute.xlu1 %6021  ;;  %v15060_v46 = vmax.f32 %v13842_v51, 0.0  ;;  %v15261_v25 = vld [vmem:[#allocation9_spill] sm:$0xff] }
 0x57d   :  { %4106 = vst.msk [vmem:[#allocation2 + $0x98] sm:$0xf] %vm1764_vm7, %v4086_v26  ;;  %v6039_v4 = vadd.f32 %v13834_v38, %v6007_v53  ;;  %v6012_v1 = vadd.f32 %v13792_v36, %v5610_v30  ;;  %v6013_v9 = vadd.f32 %v5949_v14, %v5611_v31  ;;  %v6015_v8 = vadd.f32 %v5992_v20, %v5613_v33 }
 0x57e   :  { %v6014_v19 = vadd.f32 %v5951_v44, %v5612_v61  ;;  %v13861_v26 = vadd.f32 %v13804_v41, %v15260_v49  ;;  %v6041_v62 = vadd.f32 %v13834_v38, %v6009_v7  ;;  %v6042_v42 = vadd.f32 %v13834_v38, %v6010_v12  ;;  %4247 = vrot.lane.b32.xlu1 %v15060_v46, %s8785_s14 }
 0x57f   :  { %v13868_v32 = vadd.f32 %v13804_v41, %v15261_v25  ;;  %v13871_v36 = vadd.f32 %v13834_v38, %v6011_v16  ;;  %v6060_v11 = vmax.f32 %v6040_v15, 0.0  ;;  %v15059_v31 = vmax.f32 %v13848_v2, 0.0  ;;  %v13902_v52 = vld [vmem:[#allocation2 + $0x50] sm:$0xf]  ;;  %v4120_v25 = vld [vmem:[%s15010_s3 + $0x68] sm:$0xf] }
 0x580   :  { %v6016_v61 = vadd.f32 %v5994_v39, %v5614_v50  ;;  %v6044_v30 = vadd.f32 %v13834_v38, %v6012_v1  ;;  %v6059_v33 = vmax.f32 %v6039_v4, 0.0  ;;  %v13879_v14 = vadd.f32 %v13857_v47, %v6000_v37  ;;  %v13881_v35 = vld [vmem:[#allocation2 + $0x58] sm:$0xf]  ;;  %v13904_v23 = vld [vmem:[#allocation2 + $0x50] sm:$0xf] }
 0x581   :  { %v13883_v59 = vld [vmem:[#allocation2 + $0x58] sm:$0xf]  ;;  %v13887_v34 = vadd.f32 %v13804_v41, %v15262_v45  ;;  %v13891_v58 = vadd.f32 %v13804_v41, %v15263_v21  ;;  %v13894_v3 = vadd.f32 %v13834_v38, %v6013_v9  ;;  %v13897_v43 = vadd.f32 %v13834_v38, %v6014_v19  ;;  %4249 = vrot.lane.b32.xlu0 %v15059_v31, %s8785_s14  ;;  %v13908_v5 = vld [vmem:[#allocation2 + $0x68] sm:$0xf]  ;;  %v13920_v7 = vld [vmem:[#allocation2 + $0x60] sm:$0xf] }
 0x582   :  { %6080 = vst [vmem:[#allocation2 + $0x58] sm:$0xf] %v6060_v11  ;;  %v6061_v55 = vmax.f32 %v6041_v62, 0.0  ;;  %v6062_v56 = vmax.f32 %v6042_v42, 0.0  ;;  %v15058_v48 = vmax.f32 %v13861_v26, 0.0  ;;  %v6052_v20 = vmax.f32 %v13879_v14, 0.0 }
 0x583   :  { %6079 = vst [vmem:[#allocation2 + $0x50] sm:$0xf] %v6059_v33  ;;  %v6063_v53 = vmax.f32 %v13871_v36, 0.0  ;;  %v15057_v50 = vmax.f32 %v13868_v32, 0.0  ;;  %v13913_v37 = vadd.f32 %v13857_v47, %v6001_v60  ;;  %v13916_v44 = vadd.f32 %v13857_v47, %v6002_v22  ;;  %v13918_v28 = vld [vmem:[#allocation2 + $0x68] sm:$0xf] }
 0x584   :  { %v6006_v18 = vadd.f32 %v13823_v29, %v13816_v54  ;;  %v15264_v15 = vld [vmem:[#allocation13_spill] sm:$0xff]  ;;  %v13929_v16 = vadd.f32 %v13834_v38, %v6016_v61  ;;  %v6064_v4 = vmax.f32 %v6044_v30, 0.0  ;;  %4251 = vrot.lane.b32.xlu1 %v15058_v48, %s8785_s14  ;;  %6072 = vst [vmem:[#allocation2 + $0x18] sm:$0xff] %v6052_v20  ;;  %v4116_v60 = vld [vmem:[%s15010_s3 + $0x48] sm:$0xff]  ;;  %v4118_v29 = vld [vmem:[%s15010_s3 + $0x58] sm:$0xf]  ;;  %v13953_v39 = vadd.f32 %v13834_v38, %v6015_v8 }
 0x585   :  { %v13926_v12 = vadd.f32 %v13804_v41, %v15264_v15  ;;  %v13939_v54 = vld [vmem:[#allocation2 + $0x48] sm:$0xff]  ;;  %6082 = vst [vmem:[#allocation2 + $0x68] sm:$0xf] %v6062_v56  ;;  %v13944_v22 = vld [vmem:[#allocation2 + $0x60] sm:$0xf]  ;;  %v15265_v9 = vld [vmem:[#allocation6_spill] sm:$0xff]  ;;  %4253 = vrot.lane.b32.xlu0 %v15057_v50, %s8785_s14 }
 0x586   :  { %v13946_v1 = vld [vmem:[#allocation2 + $0x78] sm:$0xf]  ;;  %v13950_v19 = vadd.f32 %v13804_v41, %v15265_v9  ;;  %v6053_v49 = vmax.f32 %v13913_v37, 0.0  ;;  %v15061_v62 = vmax.f32 %v13916_v44, 0.0  ;;  %v4117_v42 = vld [vmem:[%s15010_s3 + $0x50] sm:$0xf] }
 0x587   :  { %v4119_v38 = vld [vmem:[%s15010_s3 + $0x60] sm:$0xf]  ;;  %6081 = vst [vmem:[#allocation2 + $0x60] sm:$0xf] %v6061_v55  ;;  %v13969_v8 = vld [vmem:[#allocation2 + $0x78] sm:$0xf] }
 0x588   :  { %v4141_v36 = vld [vmem:[#allocation2 + $0x70] sm:$0xf]  ;;  %v6065_v11 = vmax.f32 %v13894_v3, 0.0  ;;  %v6066_v61 = vmax.f32 %v13897_v43, 0.0  ;;  %v15072_v30 = vmax.f32 %v13887_v34, 0.0  ;;  %v15071_v33 = vmax.f32 %v13891_v58, 0.0 }
 0x589   :  { %v4122_v45 = vld [vmem:[%s15010_s3 + $0x78] sm:$0xf]  ;;  %6084 = vst [vmem:[#allocation2 + $0x78] sm:$0xf] %v6064_v4  ;;  %v4121_v21 = vld [vmem:[%s15010_s3 + $0x70] sm:$0xf]  ;;  %v4156_v3 = vmax.f32 %v4116_v60, %v13939_v54  ;;  %v6038_v43 = vadd.f32 %v13857_v47, %v6006_v18  ;;  %v4158_v4 = vmax.f32 %v4118_v29, %v13883_v59  ;;  %v4157_v59 = vmax.f32 %v4117_v42, %v13904_v23 }
 0x58a   :  { %v4221_v55 = vld [vmem:[#allocation2 + $0x70] sm:$0xf]  ;;  %v15266_v56 = vld [vmem:[#allocation22_spill] sm:$0xff]  ;;  %6073 = vst [vmem:[#allocation2 + $0x20] sm:$0xff] %v6053_v49  ;;  %6074 = vst [vmem:[#allocation2 + $0x28] sm:$0xff] %v15061_v62  ;;  %v6068_v18 = vmax.f32 %v13929_v16, 0.0  ;;  %4255 = vrot.lane.b32.xlu1 %v15072_v30, %s8785_s14  ;;  %v4159_v29 = vmax.f32 %v4119_v38, %v13920_v7  ;;  %4257 = vrot.lane.b32.xlu0 %v15071_v33, %s8785_s14  ;;  %v4162_v23 = vmax.f32 %v4122_v45, %v13946_v1 }
 0x58b   :  { %v13983_v15 = vadd.f32 %v13804_v41, %v15266_v56  ;;  %6083 = vst [vmem:[#allocation2 + $0x70] sm:$0xf] %v6063_v53  ;;  %v4124_v9 = vld [vmem:[%s15010_s3 + $0x88] sm:$0xf]  ;;  %v4123_v56 = vld [vmem:[%s15010_s3 + $0x80] sm:$0xf]  ;;  %v4160_v53 = vmax.f32 %v4120_v25, %v13908_v5  ;;  %v4161_v5 = vmax.f32 %v4121_v21, %v4141_v36 }
 0x58c   :  { %v4144_v50 = vld [vmem:[#allocation2 + $0x88] sm:$0xf]  ;;  %v4143_v48 = vld [vmem:[#allocation2 + $0x80] sm:$0xf]  ;;  %v4126_v60 = vld [vmem:[%s15010_s3 + $0x98] sm:$0xf] }
 0x58d   :  { %v4224_v41 = vld [vmem:[#allocation2 + $0x88] sm:$0xf]  ;;  %v4223_v31 = vld [vmem:[#allocation2 + $0x80] sm:$0xf]  ;;  %v4146_v46 = vld [vmem:[#allocation2 + $0x98] sm:$0xf]  ;;  %v4164_v1 = vmax.f32 %v4124_v9, %v4144_v50  ;;  %v4163_v25 = vmax.f32 %v4123_v56, %v4143_v48  ;;  %v14075_v48 = vpop.f32.mrf.mxu1  ;;  %v14077_v50 = vpop.f32.mrf.mxu0 }
 0x58e   :  { %6086 = vst [vmem:[#allocation2 + $0x88] sm:$0xf] %v6066_v61  ;;  %v6067_v62 = vmax.f32 %v13953_v39, 0.0  ;;  %v6058_v16 = vmax.f32 %v6038_v43, 0.0  ;;  %4176 = vst.msk [vmem:[%s15010_s3 + $0x48] sm:$0xff] %vm24_vm4, %v4156_v3  ;;  %v15070_v42 = vmax.f32 %v13926_v12, 0.0  ;;  %v4166_v38 = vmax.f32 %v4126_v60, %v4146_v46 }
 0x58f   :  { %4178 = vst [vmem:[%s15010_s3 + $0x58] sm:$0xf] %v4158_v4  ;;  %6085 = vst [vmem:[#allocation2 + $0x80] sm:$0xf] %v6065_v11  ;;  %v4226_v7 = vld [vmem:[#allocation2 + $0x98] sm:$0xf]  ;;  %v6004_v60 = vadd.f32 %v13810_v13, %v13516_v40 }
 0x590   :  { %v4125_v39 = vld [vmem:[%s15010_s3 + $0x90] sm:$0xf]  ;;  %4177 = vst [vmem:[%s15010_s3 + $0x50] sm:$0xf] %v4157_v59  ;;  %4180 = vst [vmem:[%s15010_s3 + $0x68] sm:$0xf] %v4160_v53  ;;  %4259 = vrot.lane.b32.xlu1 %v15070_v42, %s8785_s14 }
 0x591   :  { %4179 = vst [vmem:[%s15010_s3 + $0x60] sm:$0xf] %v4159_v29  ;;  %6088 = vst.msk [vmem:[#allocation2 + $0x98] sm:$0xf] %vm1764_vm7, %v6068_v18  ;;  %v4145_v36 = vld [vmem:[#allocation2 + $0x90] sm:$0xf]  ;;  %v14150_v59 = vadd.f32 %v13857_v47, %v6004_v60 }
 0x592   :  { %v4225_v11 = vld [vmem:[#allocation2 + $0x90] sm:$0xf]  ;;  %v15069_v61 = vmax.f32 %v13950_v19, 0.0  ;;  %6078 = vst.msk [vmem:[#allocation2 + $0x48] sm:$0xff] %vm1753_vm6, %v6058_v16  ;;  %4182 = vst [vmem:[%s15010_s3 + $0x78] sm:$0xf] %v4162_v23  ;;  %v4165_v45 = vmax.f32 %v4125_v39, %v4145_v36 }
 0x593   :  { %4181 = vst [vmem:[%s15010_s3 + $0x70] sm:$0xf] %v4161_v5  ;;  %6087 = vst [vmem:[#allocation2 + $0x90] sm:$0xf] %v6067_v62  ;;  %v15068_v46 = vmax.f32 %v13983_v15, 0.0  ;;  %v5998_v62 = vadd.f32 %v13731_v27, %v13432_v24  ;;  %v5999_v24 = vadd.f32 %v13741_v0, %v13429_v10  ;;  %v15273_v53 = vld [vmem:[#allocation15_spill] sm:$0xff] }
 0x594   :  { %4184 = vst [vmem:[%s15010_s3 + $0x88] sm:$0xf] %v4164_v1  ;;  %4183 = vst [vmem:[%s15010_s3 + $0x80] sm:$0xf] %v4163_v25  ;;  %4261 = vrot.lane.b32.xlu0 %v15069_v61, %s8785_s14  ;;  %v15274_v40 = vmax.f32 %v13916_v44, 0.0 }
 0x595   :  { %4186 = vst.msk [vmem:[%s15010_s3 + $0x98] sm:$0xf] %vm35_vm5, %v4166_v38  ;;  %4185 = vst [vmem:[%s15010_s3 + $0x90] sm:$0xf] %v4165_v45  ;;  %4263 = vrot.lane.b32.xlu1 %v15068_v46, %s8785_s14  ;;  %v14118_v3 = vadd.f32 %v13857_v47, %v5999_v24  ;;  %v6199_v39 = vld [vmem:[#allocation2 + $0x50] sm:$0xf] }
 0x596   :  { %15271 = vst [vmem:[#allocation32_spill] sm:$0xff] %v14150_v59  ;;  %v6200_v25 = vld [vmem:[#allocation2 + $0x58] sm:$0xf]  ;;  %v6201_v36 = vld [vmem:[#allocation2 + $0x60] sm:$0xf] }
 0x597   :  { %15269 = vst [vmem:[#allocation31_spill] sm:$0xff] %v14118_v3  ;;  %v15065_v10 = vmax.f32 %v14118_v3, 0.0  ;;  %v6202_v45 = vld [vmem:[#allocation2 + $0x68] sm:$0xf] }
 0x598   :  { %4265 = vrot.lane.b32.xlu0 %v13939_v54, %s8785_s14  ;;  %v14082_v54 = vpop.f32.mrf.mxu1 }
 0x599   :  { %4267 = vrot.lane.b32.xlu1 %v13902_v52, %s8785_s14  ;;  %v14084_v52 = vpop.f32.mrf.mxu0 }
 0x59c   :  { %4269 = vrot.lane.b32.xlu0 %v13881_v35, %s8785_s14  ;;  %v14088_v35 = vpop.f32.mrf.mxu1 }
 0x59d   :  { %4271 = vrot.lane.b32.xlu1 %v13944_v22, %s8785_s14  ;;  %v14092_v22 = vpop.f32.mrf.mxu0 }
 0x59e   :  { %v14110_v21 = vpop.f32.mrf.mxu1 }
 0x59f   :  { %v14114_v27 = vpop.f32.mrf.mxu0 }
 0x5a0   :  { %4273 = vrot.lane.b32.xlu0 %v13918_v28, %s8785_s14  ;;  %v5997_v28 = vadd.f32 %v13725_v63, %v13420_v6  ;;  %v8000_v6 = vld [vmem:[%s15009_s2 + $0x8] sm:$0xf]  ;;  %v14108_v63 = vadd.f32 %v13857_v47, %v5998_v62  ;;  %v14121_v4 = vpop.f32.mrf.mxu1  ;;  %v6203_v62 = vld [vmem:[#allocation2 + $0x70] sm:$0xf] }
 0x5a1   :  { %4275 = vrot.lane.b32.xlu1 %v4221_v55, %s8785_s14  ;;  %v14123_v9 = vpop.f32.mrf.mxu0 }
 0x5a2   :  { %15268 = vst [vmem:[#allocation26_spill] sm:$0xff] %v14108_v63  ;;  %v15066_v43 = vmax.f32 %v14108_v63, 0.0  ;;  %v14132_v0 = vpop.f32.mrf.mxu1 }
 0x5a3   :  { %v14136_v56 = vpop.f32.mrf.mxu0 }
 0x5a4   :  { %4277 = vrot.lane.b32.xlu0 %v13969_v8, %s8785_s14  ;;  %v14102_v8 = vadd.f32 %v13857_v47, %v5997_v28 }
 0x5a5   :  { %4279 = vrot.lane.b32.xlu1 %v4223_v31, %s8785_s14  ;;  %v7999_v31 = vld [vmem:[%s15009_s2] sm:$0xff]  ;;  %v14156_v16 = vpop.f32.mrf.mxu0 }
 0x5a6   :  { %15267 = vst [vmem:[#allocation30_spill] sm:$0xff] %v14102_v8  ;;  %v15067_v55 = vmax.f32 %v14102_v8, 0.0 }
 0x5a7   :  { %v14171_v5 = vpop.f32.mrf.mxu0 }
 0x5a8   :  { %4281 = vrot.lane.b32.xlu0 %v4224_v41, %s8785_s14  ;;  %v6003_v41 = vadd.f32 %v13782_v17, %v13506_v57  ;;  %v14152_v57 = vpop.f32.mrf.mxu1  ;;  %v15272_v17 = vld [vmem:[#allocation33_spill] sm:$0xff] }
 0x5a9   :  { %4283 = vrot.lane.b32.xlu1 %v4225_v11, %s8785_s14  ;;  %v6005_v29 = vadd.f32 %v15273_v53, %v15272_v17  ;;  %v6206_v17 = vld [vmem:[#allocation2 + $0x88] sm:$0xf] }
 0x5aa   :  { %v14147_v18 = vadd.f32 %v13857_v47, %v6003_v41  ;;  %v14169_v23 = vpop.f32.mrf.mxu1  ;;  %v6205_v41 = vld [vmem:[#allocation2 + $0x80] sm:$0xf] }
 0x5ab   :  { %v14166_v14 = vadd.f32 %v13857_v47, %v6005_v29  ;;  %v14182_v47 = vpop.f32.mrf.mxu0  ;;  %v6207_v29 = vld [vmem:[#allocation2 + $0x90] sm:$0xf] }
 0x5ac   :  { %4285 = vrot.lane.b32.xlu0 %v4226_v7, %s8785_s14  ;;  %15270 = vst [vmem:[#allocation28_spill] sm:$0xff] %v14147_v18  ;;  %v15064_v13 = vmax.f32 %v14147_v18, 0.0  ;;  %v14180_v44 = vpop.f32.mrf.mxu1 }
 0x5ad   :  { %8003 = vperm.xlu1 %8447, %v7999_v31   ;;  %15275 = vst [vmem:[#allocation10_spill] sm:$0xff] %v14166_v14  ;;  %v15062_v37 = vmax.f32 %v14166_v14, 0.0  ;;  %v14193_v1 = vpop.f32.mrf.mxu0 }
 0x5ae   :  { %v14191_v7 = vpop.f32.mrf.mxu1 }
 0x5af   :  { %v14199_v11 = vpop.f32.mrf.mxu0 }
 0x5b0   :  { %8008 = vperm.xlu0 %8446, %v8000_v6   ;;  %v14197_v38 = vpop.f32.mrf.mxu1  ;;  %v6204_v6 = vld [vmem:[#allocation2 + $0x78] sm:$0xf] }
 0x5b1   :  { %6229 = vrot.lane.b32.xlu1 %v15067_v55, %s8783_s16  ;;  %v14205_v31 = vpop.f32.mrf.mxu0 }
 0x5b2   :  { %v14203_v28 = vpop.f32.mrf.mxu1 }
 0x5b3   :  { %v14211_v60 = vpop.f32.mrf.mxu0 }
 0x5b4   :  { %6231 = vrot.lane.b32.xlu0 %v15066_v43, %s8783_s16  ;;  %v14208_v24 = vpop.f32.mrf.mxu1 }
 0x5b5   :  { %6233 = vrot.lane.b32.xlu1 %v15065_v10, %s8783_s16 }
 0x5b6   :  { %v14214_v53 = vpop.f32.mrf.mxu1 }
 0x5b8   :  { %6235 = vrot.lane.b32.xlu0 %v6052_v20, %s8783_s16  ;;  %v15063_v20 = vmax.f32 %v14150_v59, 0.0 }
 0x5b9   :  { %6237 = vrot.lane.b32.xlu1 %v6053_v49, %s8783_s16  ;;  %v14184_v49 = vld [vmem:[#allocation2 + $0x48] sm:$0xff] }
 0x5bc   :  { %6239 = vrot.lane.b32.xlu0 %v15274_v40, %s8783_s16  ;;  %v14217_v40 = vpop.f32.mrf.mxu0 }
 0x5bd   :  { %6241 = vrot.lane.b32.xlu1 %v15064_v13, %s8783_s16 }
 0x5c0   :  { %6243 = vrot.lane.b32.xlu0 %v15063_v20, %s8783_s16 }
 0x5c1   :  { %6245 = vrot.lane.b32.xlu1 %v15062_v37, %s8783_s16 }
 0x5c4   :  { %6247 = vrot.lane.b32.xlu0 %v14184_v49, %s8783_s16 }
 0x5c5   :  { %6249 = vrot.lane.b32.xlu1 %v6199_v39, %s8783_s16  ;;  %v6208_v39 = vld [vmem:[#allocation2 + $0x98] sm:$0xf] }
 0x5c8   :  { %6251 = vrot.lane.b32.xlu0 %v6200_v25, %s8783_s16  ;;  %v14220_v25 = vpop.f32.mrf.mxu1 }
 0x5c9   :  { %6253 = vrot.lane.b32.xlu1 %v6201_v36, %s8783_s16  ;;  %v14223_v36 = vpop.f32.mrf.mxu0 }
 0x5cc   :  { %6255 = vrot.lane.b32.xlu0 %v6202_v45, %s8783_s16  ;;  %v14225_v45 = vpop.f32.mrf.mxu1 }
 0x5cd   :  { %6257 = vrot.lane.b32.xlu1 %v6203_v62, %s8783_s16  ;;  %v14227_v62 = vpop.f32.mrf.mxu0 }
 0x5d0   :  { %6259 = vrot.lane.b32.xlu0 %v6204_v6, %s8783_s16  ;;  %v14229_v6 = vpop.f32.mrf.mxu1 }
 0x5d1   :  { %6261 = vrot.lane.b32.xlu1 %v6205_v41, %s8783_s16  ;;  %v14231_v41 = vpop.f32.mrf.mxu0 }
 0x5d3   :  { %v14235_v37 = vpop.f32.mrf.mxu0 }
 0x5d4   :  { %6263 = vrot.lane.b32.xlu0 %v6206_v17, %s8783_s16  ;;  %v14233_v17 = vpop.f32.mrf.mxu1 }
 0x5d5   :  { %6265 = vrot.lane.b32.xlu1 %v6207_v29, %s8783_s16  ;;  %v14239_v29 = vpop.f32.mrf.mxu0 }
 0x5d6   :  { %v14237_v20 = vpop.f32.mrf.mxu1 }
 0x5d8   :  { %6267 = vrot.lane.b32.xlu0 %v6208_v39, %s8783_s16  ;;  %v14241_v13 = vpop.f32.mrf.mxu1  ;;  %v14243_v39 = vpop.f32.mrf.mxu0 }
 0x5d9   :  { %15276 = vst [vmem:[#allocation27_spill] sm:$0xff] %v14241_v13 }
 0x5da   :  { %v14245_v10 = vpop.f32.mrf.mxu0  ;;  %v14247_v43 = vpop.f32.mrf.mxu1 }
 0x5db   :  { %15277 = vst [vmem:[#allocation20_spill] sm:$0xff] %v14245_v10  ;;  %15278 = vst [vmem:[#allocation29_spill] sm:$0xff] %v14247_v43 }
 0x5dc   :  { %v14249_v55 = vpop.f32.mrf.mxu0  ;;  %v14251_v46 = vpop.f32.mrf.mxu1 }
 0x5dd   :  { %15279 = vst [vmem:[#allocation25_spill] sm:$0xff] %v14249_v55  ;;  %15280 = vst [vmem:[#allocation16_spill] sm:$0xff] %v14251_v46  ;;  %v4110_v55 = vld [vmem:[%s15010_s3 + $0x18] sm:$0xff] }
 0x5de   :  { %v14253_v61 = vpop.f32.mrf.mxu0  ;;  %v14255_v42 = vpop.f32.mrf.mxu1 }
 0x5df   :  { %15281 = vst [vmem:[#allocation12_spill] sm:$0xff] %v14253_v61  ;;  %15282 = vst [vmem:[#allocation18_spill] sm:$0xff] %v14255_v42 }
 0x5e0   :  { %v14261_v14 = vpop.f32.mrf.mxu0  ;;  %v14263_v59 = vpop.f32.mrf.mxu1 }
 0x5e1   :  { %15285 = vst [vmem:[#allocation21_spill] sm:$0xff] %v14261_v14  ;;  %15286 = vst [vmem:[#allocation3_spill] sm:$0xff] %v14263_v59 }
 0x5e2   :  { %v14265_v18 = vpop.f32.mrf.mxu0  ;;  %v14269_v63 = vpop.f32.mrf.mxu1 }
 0x5e3   :  { %15287 = vst [vmem:[#allocation24_spill] sm:$0xff] %v14265_v18  ;;  %15289 = vst [vmem:[#allocation14_spill] sm:$0xff] %v14269_v63 }
 0x5e4   :  { %v14273_v46 = vpop.f32.mrf.mxu0  ;;  %v14277_v42 = vpop.f32.mrf.mxu1 }
 0x5e5   :  { %15291 = vst [vmem:[#allocation7_spill] sm:$0xff] %v14273_v46  ;;  %15293 = vst [vmem:[#allocation9_spill] sm:$0xff] %v14277_v42  ;;  %v15308_v46 = vmax.f32 %v13848_v2, 0.0 }
 0x5e6   :  { %v14285_v59 = vpop.f32.mrf.mxu1 }
 0x5e7   :  { %15297 = vst [vmem:[#allocation6_spill] sm:$0xff] %v14285_v59  ;;  %v4108_v59 = vld [vmem:[%s15010_s3 + $0x8] sm:$0xff] }
 0x5e8   :  { %v14330_v43 = vmax.f32 %v4108_v59, %v15308_v46  ;;  %v15311_v46 = vmax.f32 %v13868_v32, 0.0  ;;  %v15312_v59 = vmax.f32 %v13887_v34, 0.0  ;;  %v4115_v32 = vld [vmem:[%s15010_s3 + $0x40] sm:$0xff]  ;;  %v15314_v34 = vmax.f32 %v13926_v12, 0.0 }
 0x5ea   :  { %15309 = vst [vmem:[#allocation40_spill] sm:$0xff] %v14330_v43 }
 0x5f0   :  { %v14257_v33 = vpop.permute.xlu1 %4247 }
 0x5f1   :  { %15283 = vst [vmem:[#allocation5_spill] sm:$0xff] %v14257_v33 }
 0x5f3   :  { %v14259_v30 = vpop.permute.xlu0 %4249 }
 0x5f4   :  { %15284 = vst [vmem:[#allocation11_spill] sm:$0xff] %v14259_v30  ;;  %v14281_v30 = vpop.f32.mrf.mxu0 }
 0x5f5   :  { %15295 = vst [vmem:[#allocation17_spill] sm:$0xff] %v14281_v30 }
 0x5f6   :  { %v14267_v3 = vpop.permute.xlu1 %4251 }
 0x5f7   :  { %15288 = vst [vmem:[#allocation23_spill] sm:$0xff] %v14267_v3  ;;  %v14271_v8 = vpop.permute.xlu0 %4253  ;;  %v14289_v3 = vpop.f32.mrf.mxu0 }
 0x5f8   :  { %15290 = vst [vmem:[#allocation8_spill] sm:$0xff] %v14271_v8  ;;  %15299 = vst [vmem:[#allocation33_spill] sm:$0xff] %v14289_v3  ;;  %v14293_v8 = vpop.f32.mrf.mxu1 }
 0x5f9   :  { %15301 = vst [vmem:[#allocation34_spill] sm:$0xff] %v14293_v8 }
 0x5fa   :  { %v14303_v30 = vpop.f32.mrf.mxu1 }
 0x5fb   :  { %15304 = vst [vmem:[#allocation37_spill] sm:$0xff] %v14303_v30 }
 0x5fc   :  { %v14275_v61 = vpop.permute.xlu1 %4255  ;;  %v14279_v33 = vpop.permute.xlu0 %4257 }
 0x5fd   :  { %15292 = vst [vmem:[#allocation19_spill] sm:$0xff] %v14275_v61  ;;  %15294 = vst [vmem:[#allocation4_spill] sm:$0xff] %v14279_v33  ;;  %v4196_v61 = vld [vmem:[%s15010_s3 + $0x48] sm:$0xff]  ;;  %v14300_v33 = vpop.f32.mrf.mxu0  ;;  %v14341_v10 = vpop.f32.mrf.mxu1 }
 0x5fe   :  { %15303 = vst [vmem:[#allocation36_spill] sm:$0xff] %v14300_v33  ;;  %v15306_v33 = vmax.f32 %v13842_v51, 0.0 }
 0x602   :  { %v14283_v14 = vpop.permute.xlu1 %4259 }
 0x603   :  { %15296 = vst [vmem:[#allocation13_spill] sm:$0xff] %v14283_v14 }
 0x606   :  { %v14287_v18 = vpop.permute.xlu0 %4261 }
 0x607   :  { %15298 = vst [vmem:[#allocation22_spill] sm:$0xff] %v14287_v18  ;;  %v14291_v63 = vpop.permute.xlu1 %4263  ;;  %v4107_v18 = vld [vmem:[%s15010_s3] sm:$0xff] }
 0x608   :  { %15300 = vst [vmem:[#allocation15_spill] sm:$0xff] %v14291_v63  ;;  %v14326_v3 = vmax.f32 %v4107_v18, %v15306_v33  ;;  %v15310_v33 = vmax.f32 %v13861_v26, 0.0  ;;  %v14349_v18 = vmax.f32 %v4110_v55, %v15311_v46  ;;  %v4114_v26 = vld [vmem:[%s15010_s3 + $0x38] sm:$0xff]  ;;  %v7017_v46 = vadd.f32 %v14191_v7, %v14084_v52 }
 0x60a   :  { %v14298_v42 = vpop.permute.xlu0 %4265  ;;  %15307 = vst [vmem:[#allocation39_spill] sm:$0xff] %v14326_v3  ;;  %v15313_v3 = vmax.f32 %v13891_v58, 0.0  ;;  %v15315_v58 = vmax.f32 %v13950_v19, 0.0  ;;  %v7015_v19 = vadd.f32 %v14180_v44, %v14077_v50  ;;  %v7021_v50 = vadd.f32 %v14203_v28, %v14114_v27  ;;  %v14403_v44 = vpop.f32.mrf.mxu1 }
 0x60b   :  { %15302 = vst [vmem:[#allocation35_spill] sm:$0xff] %v14298_v42  ;;  %v4334_v14 = vmax.f32 %v4196_v61, %v14298_v42  ;;  %v4268_v63 = vpop.permute.xlu1 %4267  ;;  %v4109_v61 = vld [vmem:[%s15010_s3 + $0x10] sm:$0xff]  ;;  %v14318_v42 = vpop.f32.mrf.mxu0  ;;  %v7103_v28 = vadd.f32 %v14214_v53, %v14136_v56  ;;  %v14437_v56 = vadd.f32 %v14225_v45, %v14171_v5  ;;  %v14453_v5 = vadd.f32 %v14229_v6, %v14182_v47 }
 0x60c   :  { %15305 = vst [vmem:[#allocation38_spill] sm:$0xff] %v14318_v42  ;;  %v4111_v42 = vld [vmem:[%s15010_s3 + $0x20] sm:$0xff]  ;;  %v14345_v2 = vmax.f32 %v4109_v61, %v15310_v33  ;;  %v15316_v61 = vmax.f32 %v13983_v15, 0.0  ;;  %v6119_v45 = vld [vmem:[#allocation2 + $0x50] sm:$0xf] }
 0x60d   :  { %4354 = vst.msk [vmem:[%s15010_s3 + $0x48] sm:$0xff] %vm24_vm4, %v4334_v14  ;;  %v4197_v14 = vld [vmem:[%s15010_s3 + $0x50] sm:$0xf]  ;;  %v14353_v43 = vmax.f32 %v4111_v42, %v15312_v59  ;;  %v14391_v15 = vpop.f32.mrf.mxu0 }
 0x60e   :  { %v4270_v8 = vpop.permute.xlu0 %4269 }
 0x60f   :  { %v4296_v30 = vsel %vm974_vm2, %v4268_v63, %v4270_v8  ;;  %v4112_v63 = vld [vmem:[%s15010_s3 + $0x28] sm:$0xff]  ;;  %v4272_v55 = vpop.permute.xlu1 %4271 }
 0x610   :  { %v4335_v51 = vmax.f32 %v4197_v14, %v4296_v30  ;;  %v14357_v13 = vmax.f32 %v4112_v63, %v15313_v3  ;;  %v4113_v30 = vld [vmem:[%s15010_s3 + $0x30] sm:$0xff]  ;;  %v14374_v3 = vmax.f32 %v4114_v26, %v15315_v58  ;;  %v14378_v14 = vmax.f32 %v4115_v32, %v15316_v61  ;;  %v4198_v63 = vld [vmem:[%s15010_s3 + $0x58] sm:$0xf] }
 0x611   :  { %v14370_v42 = vmax.f32 %v4113_v30, %v15314_v34  ;;  %v4297_v12 = vsel %vm974_vm2, %v4270_v8, %v4272_v55  ;;  %v7058_v26 = vadd.f32 %v14211_v60, %v14075_v48  ;;  %v7019_v8 = vadd.f32 %v14197_v38, %v14092_v22  ;;  %v4201_v60 = vld [vmem:[%s15010_s3 + $0x70] sm:$0xf] }
 0x612   :  { %4355 = vst [vmem:[%s15010_s3 + $0x50] sm:$0xf] %v4335_v51  ;;  %v4274_v33 = vpop.permute.xlu0 %4273  ;;  %v4336_v59 = vmax.f32 %v4198_v63, %v4297_v12  ;;  %v4199_v51 = vld [vmem:[%s15010_s3 + $0x60] sm:$0xf]  ;;  %v7060_v32 = vadd.f32 %v14217_v40, %v14082_v54  ;;  %v7101_v48 = vadd.f32 %v14208_v24, %v14123_v9  ;;  %v7064_v38 = vadd.f32 %v14227_v62, %v14110_v21  ;;  %v15320_v58 = vld [vmem:[#allocation29_spill] sm:$0xff]  ;;  %v15321_v63 = vld [vmem:[#allocation12_spill] sm:$0xff] }
 0x613   :  { %v4298_v30 = vsel %vm974_vm2, %v4272_v55, %v4274_v33  ;;  %v7062_v55 = vadd.f32 %v14223_v36, %v14088_v35  ;;  %v4276_v22 = vpop.permute.xlu1 %4275  ;;  %v14424_v54 = vadd.f32 %v14220_v25, %v14156_v16  ;;  %v4200_v35 = vld [vmem:[%s15010_s3 + $0x68] sm:$0xf]  ;;  %v7144_v21 = vadd.f32 %v14231_v41, %v14121_v4  ;;  %v14439_v16 = vpop.f32.mrf.mxu0 }
 0x614   :  { %v4337_v52 = vmax.f32 %v4199_v51, %v4298_v30  ;;  %v6098_v7 = vld [vmem:[%s15010_s3 + $0x48] sm:$0xff]  ;;  %4356 = vst [vmem:[%s15010_s3 + $0x58] sm:$0xf] %v4336_v59  ;;  %v4299_v9 = vsel %vm974_vm2, %v4274_v33, %v4276_v22  ;;  %v7146_v4 = vadd.f32 %v14235_v37, %v14132_v0  ;;  %v14457_v40 = vadd.f32 %v14239_v29, %v14152_v57  ;;  %v14459_v25 = vpop.f32.mrf.mxu1  ;;  %v15317_v37 = vld [vmem:[#allocation27_spill] sm:$0xff]  ;;  %v6120_v51 = vld [vmem:[#allocation2 + $0x58] sm:$0xf] }
 0x615   :  { %v6138_v27 = vmax.f32 %v6098_v7, %v14184_v49  ;;  %v4338_v24 = vmax.f32 %v4200_v35, %v4299_v9  ;;  %v14463_v62 = vadd.f32 %v14233_v17, %v14193_v1  ;;  %v7150_v41 = vadd.f32 %v14243_v39, %v14169_v23  ;;  %v14481_v1 = vpop.f32.mrf.mxu0  ;;  %v15318_v23 = vld [vmem:[#allocation20_spill] sm:$0xff]  ;;  %v15323_v7 = vld [vmem:[#allocation21_spill] sm:$0xff]  ;;  %v6121_v9 = vld [vmem:[#allocation2 + $0x60] sm:$0xf] }
 0x616   :  { %4357 = vst [vmem:[%s15010_s3 + $0x60] sm:$0xf] %v4337_v52  ;;  %v4278_v49 = vpop.permute.xlu0 %4277  ;;  %v14469_v0 = vadd.f32 %v14237_v20, %v14199_v11  ;;  %v14473_v47 = vadd.f32 %v15317_v37, %v14205_v31  ;;  %v14484_v17 = vadd.f32 %v15318_v23, %v7015_v19  ;;  %v15319_v20 = vld [vmem:[#allocation25_spill] sm:$0xff]  ;;  %v4202_v31 = vld [vmem:[%s15010_s3 + $0x78] sm:$0xf]  ;;  %v14497_v61 = vadd.f32 %v15320_v58, %v7058_v26  ;;  %v14506_v59 = vpop.f32.mrf.mxu1  ;;  %v15322_v30 = vld [vmem:[#allocation16_spill] sm:$0xff] }
 0x617   :  { %v4300_v53 = vsel %vm974_vm2, %v4276_v22, %v4278_v49  ;;  %6158 = vst.msk [vmem:[%s15010_s3 + $0x48] sm:$0xff] %vm24_vm4, %v6138_v27  ;;  %4358 = vst [vmem:[%s15010_s3 + $0x68] sm:$0xf] %v4338_v24  ;;  %v4280_v6 = vpop.permute.xlu1 %4279  ;;  %v14487_v11 = vadd.f32 %v15319_v20, %v7017_v46  ;;  %v14500_v12 = vadd.f32 %v15321_v63, %v7019_v8  ;;  %v4203_v19 = vld [vmem:[%s15010_s3 + $0x80] sm:$0xf]  ;;  %v15324_v26 = vld [vmem:[#allocation18_spill] sm:$0xff] }
 0x618   :  { %v4339_v36 = vmax.f32 %v4201_v60, %v4300_v53  ;;  %v4301_v39 = vsel %vm974_vm2, %v4278_v49, %v4280_v6  ;;  %v14509_v52 = vadd.f32 %v15322_v30, %v7060_v32  ;;  %v14512_v22 = vadd.f32 %v15323_v7, %v7021_v50  ;;  %v15325_v49 = vld [vmem:[#allocation3_spill] sm:$0xff]  ;;  %v15326_v32 = vld [vmem:[#allocation24_spill] sm:$0xff]  ;;  %v15332_v30 = vld [vmem:[#allocation17_spill] sm:$0xff] }
 0x619   :  { %v6099_v57 = vld [vmem:[%s15010_s3 + $0x50] sm:$0xf]  ;;  %v4340_v33 = vmax.f32 %v4202_v31, %v4301_v39  ;;  %v14515_v27 = vadd.f32 %v15324_v26, %v7062_v55  ;;  %v14524_v24 = vadd.f32 %v15325_v49, %v7064_v38  ;;  %v14527_v60 = vadd.f32 %v15326_v32, %v7101_v48  ;;  %v15327_v50 = vld [vmem:[#allocation7_spill] sm:$0xff]  ;;  %v15328_v38 = vld [vmem:[#allocation14_spill] sm:$0xff]  ;;  %v14556_v39 = vpop.f32.mrf.mxu1 }
 0x61a   :  { %v6139_v29 = vmax.f32 %v6099_v57, %v6119_v45  ;;  %4359 = vst [vmem:[%s15010_s3 + $0x70] sm:$0xf] %v4339_v36  ;;  %v4282_v34 = vpop.permute.xlu0 %4281  ;;  %v14530_v53 = vadd.f32 %v15327_v50, %v7103_v28  ;;  %v14538_v45 = vpop.f32.mrf.mxu0  ;;  %v14541_v57 = vadd.f32 %v15328_v38, %v7144_v21  ;;  %v15329_v48 = vld [vmem:[#allocation11_spill] sm:$0xff]  ;;  %v4204_v20 = vld [vmem:[%s15010_s3 + $0x88] sm:$0xf]  ;;  %v7591_v7 = vadd.f32 %v15332_v30, %v14424_v54  ;;  %v15333_v26 = vld [vmem:[#allocation9_spill] sm:$0xff] }
 0x61b   :  { %v4302_v46 = vsel %vm974_vm2, %v4280_v6, %v4282_v34  ;;  %v6100_v8 = vld [vmem:[%s15010_s3 + $0x58] sm:$0xf]  ;;  %4360 = vst [vmem:[%s15010_s3 + $0x78] sm:$0xf] %v4340_v33  ;;  %v4284_v37 = vpop.permute.xlu1 %4283  ;;  %v15330_v6 = vld [vmem:[#allocation5_spill] sm:$0xff]  ;;  %v15331_v58 = vld [vmem:[#allocation23_spill] sm:$0xff] }
 0x61c   :  { %6159 = vst [vmem:[%s15010_s3 + $0x50] sm:$0xf] %v6139_v29  ;;  %v4341_v35 = vmax.f32 %v4203_v19, %v4302_v46  ;;  %v6140_v55 = vmax.f32 %v6100_v8, %v6120_v51  ;;  %v4287_v28 = vsel %vm974_vm2, %v15330_v6, %v15329_v48  ;;  %v4303_v29 = vsel %vm974_vm2, %v4282_v34, %v4284_v37  ;;  %v4206_v21 = vld [vmem:[%s15010_s3 + $0x98] sm:$0xf]  ;;  %v4205_v34 = vld [vmem:[%s15010_s3 + $0x90] sm:$0xf]  ;;  %v7845_v6 = vpop.f32.mrf.mxu0 }
 0x61d   :  { %v6101_v36 = vld [vmem:[%s15010_s3 + $0x60] sm:$0xf]  ;;  %v4288_v63 = vsel %vm974_vm2, %v15329_v48, %v15331_v58  ;;  %v4342_v33 = vmax.f32 %v4204_v20, %v4303_v29  ;;  %v6122_v51 = vld [vmem:[#allocation2 + $0x68] sm:$0xf]  ;;  %v14571_v8 = vadd.f32 %v15333_v26, %v7146_v4  ;;  %v6123_v50 = vld [vmem:[#allocation2 + $0x70] sm:$0xf] }
 0x61e   :  { %v6141_v23 = vmax.f32 %v6101_v36, %v6121_v9  ;;  %4361 = vst [vmem:[%s15010_s3 + $0x80] sm:$0xf] %v4341_v35  ;;  %v4286_v31 = vpop.permute.xlu0 %4285  ;;  %6160 = vst [vmem:[%s15010_s3 + $0x58] sm:$0xf] %v6140_v55  ;;  %v15334_v35 = vld [vmem:[#allocation33_spill] sm:$0xff]  ;;  %v15335_v55 = vld [vmem:[#allocation6_spill] sm:$0xff] }
 0x61f   :  { %v4304_v19 = vsel %vm974_vm2, %v4284_v37, %v4286_v31  ;;  %v4344_v46 = vmax.f32 %v4206_v21, %v4286_v31  ;;  %v7592_v9 = vadd.f32 %v15334_v35, %v14437_v56  ;;  %v6102_v49 = vld [vmem:[%s15010_s3 + $0x68] sm:$0xf]  ;;  %v14583_v36 = vadd.f32 %v15335_v55, %v14457_v40  ;;  %v15336_v54 = vld [vmem:[#allocation34_spill] sm:$0xff]  ;;  %v15337_v37 = vld [vmem:[#allocation39_spill] sm:$0xff]  ;;  %4362 = vst [vmem:[%s15010_s3 + $0x88] sm:$0xf] %v4342_v33  ;;  %v7888_v31 = vpop.f32.mrf.mxu1 }
 0x620   :  { %6161 = vst [vmem:[%s15010_s3 + $0x60] sm:$0xf] %v6141_v23  ;;  %v4343_v32 = vmax.f32 %v4205_v34, %v4304_v19  ;;  %v14586_v4 = vadd.f32 %v15336_v54, %v7150_v41  ;;  %v4325_v38 = vmax.f32 %v15337_v37, %v4287_v28  ;;  %v6142_v56 = vmax.f32 %v6102_v49, %v6122_v51  ;;  %v15338_v40 = vld [vmem:[#allocation36_spill] sm:$0xff]  ;;  %v15341_v33 = vld [vmem:[#allocation38_spill] sm:$0xff]  ;;  %v15343_v51 = vld [vmem:[#allocation19_spill] sm:$0xff]  ;;  %v7847_v54 = vpop.f32.mrf.mxu0 }
 0x621   :  { %v6103_v48 = vld [vmem:[%s15010_s3 + $0x70] sm:$0xf]  ;;  %4364 = vst.msk [vmem:[%s15010_s3 + $0x98] sm:$0xf] %vm35_vm5, %v4344_v46  ;;  %v14601_v41 = vadd.f32 %v15338_v40, %v14453_v5  ;;  %v15339_v28 = vld [vmem:[#allocation40_spill] sm:$0xff]  ;;  %v14614_v34 = vadd.f32 %v15341_v33, %v14463_v62  ;;  %v15347_v37 = vld [vmem:[#allocation30_spill] sm:$0xff]  ;;  %v7989_v40 = vadd.f32 %v14403_v44, %v14500_v12  ;;  %v7981_v12 = vadd.f32 %v14481_v1, %v14497_v61 }
 0x622   :  { %v4326_v23 = vmax.f32 %v15339_v28, %v4288_v63  ;;  %v15340_v20 = vld [vmem:[#allocation8_spill] sm:$0xff]  ;;  %v6143_v21 = vmax.f32 %v6103_v48, %v6123_v50  ;;  %4363 = vst [vmem:[%s15010_s3 + $0x90] sm:$0xf] %v4343_v32  ;;  %v15342_v5 = vld [vmem:[#allocation37_spill] sm:$0xff]  ;;  %v14620_v63 = vadd.f32 %v14391_v15, %v14469_v0  ;;  %6162 = vst [vmem:[%s15010_s3 + $0x68] sm:$0xf] %v6142_v56 }
 0x623   :  { %v14607_v29 = vsel %vm974_vm2, %v15331_v58, %v15340_v20  ;;  %v7979_v19 = vadd.f32 %v15342_v5, %v14484_v17  ;;  %v7980_v58 = vadd.f32 %v14341_v10, %v14487_v11  ;;  %v6124_v46 = vld [vmem:[#allocation2 + $0x78] sm:$0xf]  ;;  %v14630_v62 = vsel %vm974_vm2, %v15340_v20, %v15343_v51  ;;  %v15344_v30 = vld [vmem:[#allocation4_spill] sm:$0xff]  ;;  %v15345_v15 = vld [vmem:[#allocation13_spill] sm:$0xff] }
 0x624   :  { %v14635_v17 = vsel %vm974_vm2, %v15343_v51, %v15344_v30  ;;  %v14640_v0 = vsel %vm974_vm2, %v15344_v30, %v15345_v15  ;;  %v15346_v10 = vld [vmem:[#allocation22_spill] sm:$0xff]  ;;  %6163 = vst [vmem:[%s15010_s3 + $0x70] sm:$0xf] %v6143_v21  ;;  %v6125_v35 = vld [vmem:[#allocation2 + $0x80] sm:$0xf]  ;;  %v4327_v49 = vmax.f32 %v14345_v2, %v14607_v29  ;;  %v14657_v32 = vadd.f32 %v14439_v16, %v14473_v47  ;;  %v7890_v21 = vpop.f32.mrf.mxu1  ;;  %v15354_v29 = vld [vmem:[#allocation28_spill] sm:$0xff] }
 0x625   :  { %v14645_v11 = vsel %vm974_vm2, %v15345_v15, %v15346_v10  ;;  %v6104_v26 = vld [vmem:[%s15010_s3 + $0x78] sm:$0xf]  ;;  %v6105_v55 = vld [vmem:[%s15010_s3 + $0x80] sm:$0xf]  ;;  %v15348_v56 = vmax.f32 %v15347_v37, 0.0  ;;  %v7990_v28 = vadd.f32 %v14459_v25, %v14512_v22  ;;  %v4330_v51 = vmax.f32 %v14357_v13, %v14640_v0 }
 0x626   :  { %v6144_v50 = vmax.f32 %v6104_v26, %v6124_v46  ;;  %v6145_v20 = vmax.f32 %v6105_v55, %v6125_v35  ;;  %v15349_v16 = vld [vmem:[#allocation26_spill] sm:$0xff]  ;;  %v6126_v5 = vld [vmem:[#allocation2 + $0x88] sm:$0xf]  ;;  %v4328_v46 = vmax.f32 %v14349_v18, %v14630_v62  ;;  %v4331_v44 = vmax.f32 %v14370_v42, %v14645_v11  ;;  %v6127_v61 = vld [vmem:[#allocation2 + $0x90] sm:$0xf] }
 0x627   :  { %v14664_v48 = vmax.f32 %v4325_v38, %v15348_v56  ;;  %v15350_v47 = vmax.f32 %v15349_v16, 0.0  ;;  %v4329_v38 = vmax.f32 %v14353_v43, %v14635_v17  ;;  %v6128_v25 = vld [vmem:[#allocation2 + $0x98] sm:$0xf]  ;;  %v7982_v22 = vadd.f32 %v14538_v45, %v14509_v52  ;;  %v15351_v55 = vld [vmem:[#allocation15_spill] sm:$0xff] }
 0x628   :  { %6164 = vst [vmem:[%s15010_s3 + $0x78] sm:$0xf] %v6144_v50  ;;  %6165 = vst [vmem:[%s15010_s3 + $0x80] sm:$0xf] %v6145_v20  ;;  %v7992_v30 = vadd.f32 %v7847_v54, %v14524_v24  ;;  %v7984_v15 = vadd.f32 %v14556_v39, %v14530_v53  ;;  %v6108_v1 = vld [vmem:[%s15010_s3 + $0x98] sm:$0xf]  ;;  %v7993_v52 = vadd.f32 %v7888_v31, %v7591_v7  ;;  %v14712_v37 = vpop.permute.xlu1 %8003 }
 0x629   :  { %v14672_v33 = vmax.f32 %v4326_v23, %v15350_v47  ;;  %v6106_v23 = vld [vmem:[%s15010_s3 + $0x88] sm:$0xf]  ;;  %v6107_v35 = vld [vmem:[%s15010_s3 + $0x90] sm:$0xf]  ;;  %v7994_v45 = vadd.f32 %v7890_v21, %v7592_v9  ;;  %v6148_v50 = vmax.f32 %v6108_v1, %v6128_v25  ;;  %v14707_v24 = vsel %vm974_vm2, %v15346_v10, %v15351_v55 }
 0x62a   :  { %v6146_v26 = vmax.f32 %v6106_v23, %v6126_v5  ;;  %v7991_v53 = vadd.f32 %v7845_v6, %v14515_v27  ;;  %v7983_v39 = vadd.f32 %v14506_v59, %v14527_v60  ;;  %v6147_v54 = vmax.f32 %v6107_v35, %v6127_v61  ;;  %v6112_v61 = vld [vmem:[#allocation2 + $0x18] sm:$0xff] }
 0x62b   :  { %v8011_v7 = vadd.f32 %v14712_v37, %v7979_v19  ;;  %v14719_v9 = vadd.f32 %v14712_v37, %v7980_v58  ;;  %v14722_v31 = vadd.f32 %v14712_v37, %v7981_v12  ;;  %v14725_v27 = vadd.f32 %v14712_v37, %v7982_v22  ;;  %v14727_v6 = vpop.permute.xlu0 %8008  ;;  %6168 = vst.msk [vmem:[%s15010_s3 + $0x98] sm:$0xf] %vm35_vm5, %v6148_v50 }
 0x62c   :  { %6166 = vst [vmem:[%s15010_s3 + $0x88] sm:$0xf] %v6146_v26  ;;  %6167 = vst [vmem:[%s15010_s3 + $0x90] sm:$0xf] %v6147_v54  ;;  %v14737_v59 = vadd.f32 %v14712_v37, %v7983_v39  ;;  %v14740_v60 = vadd.f32 %v14712_v37, %v7984_v15  ;;  %v8021_v19 = vadd.f32 %v14727_v6, %v7989_v40  ;;  %v6230_v5 = vpop.permute.xlu1 %6229  ;;  %v7927_v39 = vpop.f32.mrf.mxu0  ;;  %v15355_v62 = vmax.f32 %v15354_v29, 0.0 }
 0x62d   :  { %v8022_v58 = vadd.f32 %v14727_v6, %v7990_v28  ;;  %v8023_v10 = vadd.f32 %v14727_v6, %v7991_v53  ;;  %v8024_v56 = vadd.f32 %v14727_v6, %v7992_v30  ;;  %v8025_v20 = vadd.f32 %v14727_v6, %v7993_v52 }
 0x62e   :  { %v8026_v21 = vadd.f32 %v14727_v6, %v7994_v45  ;;  %v8041_v16 = vmax.f32 %v8021_v19, 0.0  ;;  %v8031_v25 = vmax.f32 %v8011_v7, 0.0  ;;  %v8032_v12 = vmax.f32 %v14719_v9, 0.0  ;;  %v15352_v45 = vld [vmem:[#allocation31_spill] sm:$0xff]  ;;  %v6114_v9 = vld [vmem:[#allocation2 + $0x28] sm:$0xff] }
 0x62f   :  { %v8042_v47 = vmax.f32 %v8022_v58, 0.0  ;;  %v8043_v22 = vmax.f32 %v8023_v10, 0.0  ;;  %v8044_v23 = vmax.f32 %v8024_v56, 0.0  ;;  %v8045_v15 = vmax.f32 %v8025_v20, 0.0  ;;  %v6232_v1 = vpop.permute.xlu0 %6231  ;;  %v6113_v7 = vld [vmem:[#allocation2 + $0x20] sm:$0xff]  ;;  %v7970_v10 = vpop.f32.mrf.mxu1 }
 0x630   :  { %v8046_v40 = vmax.f32 %v8026_v21, 0.0  ;;  %8061 = vst [vmem:[#allocation2 + $0x50] sm:$0xf] %v8041_v16  ;;  %v6269_v28 = vsel %vm327_vm0, %v6230_v5, %v6232_v1  ;;  %v8033_v30 = vmax.f32 %v14722_v31, 0.0  ;;  %v8034_v26 = vmax.f32 %v14725_v27, 0.0  ;;  %v6234_v19 = vpop.permute.xlu1 %6233 }
 0x631   :  { %8062 = vst [vmem:[#allocation2 + $0x58] sm:$0xf] %v8042_v47  ;;  %v8035_v35 = vmax.f32 %v14737_v59, 0.0  ;;  %8063 = vst [vmem:[#allocation2 + $0x60] sm:$0xf] %v8043_v22  ;;  %v6307_v52 = vmax.f32 %v14664_v48, %v6269_v28  ;;  %v15353_v50 = vmax.f32 %v15352_v45, 0.0  ;;  %v6132_v54 = vmax.f32 %v4328_v46, %v6112_v61 }
 0x632   :  { %8064 = vst [vmem:[#allocation2 + $0x68] sm:$0xf] %v8044_v23  ;;  %8065 = vst [vmem:[#allocation2 + $0x70] sm:$0xf] %v8045_v15  ;;  %v8036_v31 = vmax.f32 %v14740_v60, 0.0  ;;  %v7985_v58 = vadd.f32 %v7927_v39, %v14541_v57  ;;  %v6133_v2 = vmax.f32 %v4329_v38, %v6113_v7  ;;  %v14774_v18 = vmax.f32 %v4330_v51, %v6114_v9  ;;  %v7929_v38 = vpop.f32.mrf.mxu0  ;;  %v7972_v51 = vpop.f32.mrf.mxu1  ;;  %v6178_v60 = vld [vmem:[%s15010_s3 + $0x48] sm:$0xff] }
 0x633   :  { %8066 = vst [vmem:[#allocation2 + $0x78] sm:$0xf] %v8046_v40  ;;  %v6131_v53 = vmax.f32 %v4327_v49, %v15353_v50  ;;  %8054 = vst [vmem:[#allocation2 + $0x18] sm:$0xff] %v8034_v26  ;;  %v14781_v57 = vmax.f32 %v4331_v44, %v15355_v62  ;;  %v4332_v49 = vmax.f32 %v14374_v3, %v14707_v24  ;;  %v6236_v48 = vpop.permute.xlu0 %6235  ;;  %v15356_v44 = vld [vmem:[#allocation35_spill] sm:$0xff] }
 0x634   :  { %8055 = vst [vmem:[#allocation2 + $0x20] sm:$0xff] %v8035_v35  ;;  %v8111_v43 = vmax.f32 %v6307_v52, %v8031_v25  ;;  %v6270_v17 = vsel %vm327_vm0, %v6232_v1, %v6234_v19  ;;  %v7987_v46 = vadd.f32 %v7970_v10, %v14601_v41  ;;  %8056 = vst [vmem:[#allocation2 + $0x28] sm:$0xff] %v8036_v31  ;;  %v7931_v21 = vpop.f32.mrf.mxu0  ;;  %v6238_v5 = vpop.permute.xlu1 %6237 }
 0x635   :  { %v6308_v13 = vmax.f32 %v14672_v33, %v6270_v17  ;;  %v6271_v0 = vsel %vm327_vm0, %v6234_v19, %v6236_v48  ;;  %v8017_v42 = vadd.f32 %v14712_v37, %v7985_v58  ;;  %v7986_v11 = vadd.f32 %v7929_v38, %v14571_v8  ;;  %v7974_v22 = vpop.f32.mrf.mxu1 }
 0x636   :  { %v4295_v56 = vsel %vm974_vm2, %v15351_v55, %v15356_v44  ;;  %8131 = vst [vmem:[%s15010_s3] sm:$0xff] %v8111_v43  ;;  %v6309_v41 = vmax.f32 %v6131_v53, %v6271_v0  ;;  %v14800_v20 = vadd.f32 %v14712_v37, %v7987_v46  ;;  %v7988_v33 = vadd.f32 %v7972_v51, %v14614_v34  ;;  %v7933_v28 = vpop.f32.mrf.mxu0  ;;  %v15357_v43 = vld [vmem:[#allocation32_spill] sm:$0xff]  ;;  %v15359_v46 = vld [vmem:[#allocation10_spill] sm:$0xff]  ;;  %v6179_v44 = vld [vmem:[%s15010_s3 + $0x50] sm:$0xf] }
 0x637   :  { %v8112_v16 = vmax.f32 %v6308_v13, %v8032_v12  ;;  %v8037_v47 = vmax.f32 %v8017_v42, 0.0  ;;  %v8018_v8 = vadd.f32 %v14712_v37, %v7986_v11  ;;  %v7995_v25 = vadd.f32 %v7931_v21, %v14583_v36  ;;  %v6240_v1 = vpop.permute.xlu0 %6239  ;;  %v7976_v52 = vpop.f32.mrf.mxu1  ;;  %v6180_v21 = vld [vmem:[%s15010_s3 + $0x58] sm:$0xf] }
 0x638   :  { %v8113_v55 = vmax.f32 %v6309_v41, %v8033_v30  ;;  %v8039_v23 = vmax.f32 %v14800_v20, 0.0  ;;  %v8020_v15 = vadd.f32 %v14712_v37, %v7988_v33  ;;  %v6272_v40 = vsel %vm327_vm0, %v6236_v48, %v6238_v5  ;;  %v6242_v9 = vpop.permute.xlu1 %6241 }
 0x639   :  { %8132 = vst [vmem:[%s15010_s3 + $0x8] sm:$0xff] %v8112_v16  ;;  %v8038_v34 = vmax.f32 %v8018_v8, 0.0  ;;  %v6310_v12 = vmax.f32 %v6132_v54, %v6272_v40  ;;  %v6273_v61 = vsel %vm327_vm0, %v6238_v5, %v6240_v1  ;;  %v8027_v36 = vadd.f32 %v14727_v6, %v7995_v25  ;;  %v6181_v5 = vld [vmem:[%s15010_s3 + $0x60] sm:$0xf]  ;;  %v6182_v40 = vld [vmem:[%s15010_s3 + $0x68] sm:$0xf] }
 0x63a   :  { %8133 = vst [vmem:[%s15010_s3 + $0x10] sm:$0xff] %v8113_v55  ;;  %v8040_v37 = vmax.f32 %v8020_v15, 0.0  ;;  %v6311_v30 = vmax.f32 %v6133_v2, %v6273_v61  ;;  %v7997_v45 = vadd.f32 %v7974_v22, %v14620_v63  ;;  %v7996_v50 = vadd.f32 %v7933_v28, %v14586_v4 }
 0x63b   :  { %v4333_v53 = vmax.f32 %v14378_v14, %v4295_v56  ;;  %v8114_v39 = vmax.f32 %v6310_v12, %v8034_v26  ;;  %v8047_v54 = vmax.f32 %v8027_v36, 0.0  ;;  %v7998_v7 = vadd.f32 %v7976_v52, %v14657_v32  ;;  %v6244_v10 = vpop.permute.xlu0 %6243  ;;  %v6183_v12 = vld [vmem:[%s15010_s3 + $0x70] sm:$0xf] }
 0x63c   :  { %8060 = vst.msk [vmem:[#allocation2 + $0x48] sm:$0xff] %vm1753_vm6, %v8040_v37  ;;  %v8115_v19 = vmax.f32 %v6311_v30, %v8035_v35  ;;  %v8029_v58 = vadd.f32 %v14727_v6, %v7997_v45  ;;  %v8028_v63 = vadd.f32 %v14727_v6, %v7996_v50  ;;  %v6274_v4 = vsel %vm327_vm0, %v6240_v1, %v6242_v9  ;;  %v6246_v62 = vpop.permute.xlu1 %6245  ;;  %v8101_v52 = vld [vmem:[#allocation2 + $0x50] sm:$0xf]  ;;  %v6184_v50 = vld [vmem:[%s15010_s3 + $0x78] sm:$0xf] }
 0x63d   :  { %8134 = vst [vmem:[%s15010_s3 + $0x18] sm:$0xff] %v8114_v39  ;;  %8067 = vst [vmem:[#allocation2 + $0x80] sm:$0xf] %v8047_v54  ;;  %v8030_v14 = vadd.f32 %v14727_v6, %v7998_v7  ;;  %v6312_v32 = vmax.f32 %v14774_v18, %v6274_v4  ;;  %v6275_v27 = vsel %vm327_vm0, %v6242_v9, %v6244_v10  ;;  %v15358_v17 = vmax.f32 %v15357_v43, 0.0  ;;  %v6185_v7 = vld [vmem:[%s15010_s3 + $0x80] sm:$0xf] }
 0x63e   :  { %8135 = vst [vmem:[%s15010_s3 + $0x20] sm:$0xff] %v8115_v19  ;;  %v8049_v59 = vmax.f32 %v8029_v58, 0.0  ;;  %v8048_v26 = vmax.f32 %v8028_v63, 0.0  ;;  %v6313_v35 = vmax.f32 %v14781_v57, %v6275_v27  ;;  %v6276_v48 = vsel %vm327_vm0, %v6244_v10, %v6246_v62  ;;  %v8102_v58 = vld [vmem:[#allocation2 + $0x58] sm:$0xf] }
 0x63f   :  { %v8050_v2 = vmax.f32 %v8030_v14, 0.0  ;;  %v8116_v29 = vmax.f32 %v6312_v32, %v8036_v31  ;;  %v6136_v6 = vmax.f32 %v4332_v49, %v15358_v17  ;;  %v15360_v38 = vmax.f32 %v15359_v46, 0.0  ;;  %v6248_v31 = vpop.permute.xlu0 %6247  ;;  %v8103_v10 = vld [vmem:[#allocation2 + $0x60] sm:$0xf] }
 0x640   :  { %8069 = vst [vmem:[#allocation2 + $0x90] sm:$0xf] %v8049_v59  ;;  %8068 = vst [vmem:[#allocation2 + $0x88] sm:$0xf] %v8048_v26  ;;  %v8117_v18 = vmax.f32 %v6313_v35, %v8037_v47  ;;  %v6277_v24 = vsel %vm327_vm0, %v6246_v62, %v6248_v31  ;;  %v6316_v57 = vmax.f32 %v6178_v60, %v6248_v31  ;;  %v6250_v42 = vpop.permute.xlu1 %6249  ;;  %v6186_v59 = vld [vmem:[%s15010_s3 + $0x88] sm:$0xf] }
 0x641   :  { %v6137_v13 = vmax.f32 %v4333_v53, %v15360_v38  ;;  %8070 = vst.msk [vmem:[#allocation2 + $0x98] sm:$0xf] %vm1764_vm7, %v8050_v2  ;;  %8136 = vst [vmem:[%s15010_s3 + $0x28] sm:$0xff] %v8116_v29  ;;  %v6314_v3 = vmax.f32 %v6136_v6, %v6276_v48  ;;  %v6188_v35 = vld [vmem:[%s15010_s3 + $0x98] sm:$0xf] }
 0x642   :  { %8137 = vst [vmem:[%s15010_s3 + $0x30] sm:$0xff] %v8117_v18  ;;  %6336 = vst.msk [vmem:[%s15010_s3 + $0x48] sm:$0xff] %vm24_vm4, %v6316_v57  ;;  %v6187_v62 = vld [vmem:[%s15010_s3 + $0x90] sm:$0xf]  ;;  %v8104_v18 = vld [vmem:[#allocation2 + $0x68] sm:$0xf] }
 0x643   :  { %v6315_v49 = vmax.f32 %v6137_v13, %v6277_v24  ;;  %v8118_v0 = vmax.f32 %v6314_v3, %v8038_v34  ;;  %v6252_v51 = vpop.permute.xlu0 %6251  ;;  %v8100_v33 = vld [vmem:[#allocation2 + $0x48] sm:$0xff]  ;;  %v8105_v38 = vld [vmem:[#allocation2 + $0x70] sm:$0xf]  ;;  %v8106_v3 = vld [vmem:[#allocation2 + $0x78] sm:$0xf] }
 0x644   :  { %v6278_v56 = vsel %vm327_vm0, %v6250_v42, %v6252_v51  ;;  %v6254_v20 = vpop.permute.xlu1 %6253  ;;  %v8107_v57 = vld [vmem:[#allocation2 + $0x80] sm:$0xf] }
 0x645   :  { %v8119_v11 = vmax.f32 %v6315_v49, %v8039_v23  ;;  %8138 = vst [vmem:[%s15010_s3 + $0x38] sm:$0xff] %v8118_v0  ;;  %v6317_v41 = vmax.f32 %v6179_v44, %v6278_v56  ;;  %v6279_v16 = vsel %vm327_vm0, %v6252_v51, %v6254_v20 }
 0x646   :  { %v6318_v8 = vmax.f32 %v6180_v21, %v6279_v16 }
 0x647   :  { %8139 = vst [vmem:[%s15010_s3 + $0x40] sm:$0xff] %v8119_v11  ;;  %6337 = vst [vmem:[%s15010_s3 + $0x50] sm:$0xf] %v6317_v41  ;;  %v6256_v47 = vpop.permute.xlu0 %6255  ;;  %v8108_v42 = vld [vmem:[#allocation2 + $0x88] sm:$0xf] }
 0x648   :  { %v6280_v25 = vsel %vm327_vm0, %v6254_v20, %v6256_v47  ;;  %6338 = vst [vmem:[%s15010_s3 + $0x58] sm:$0xf] %v6318_v8  ;;  %v6258_v15 = vpop.permute.xlu1 %6257  ;;  %v8110_v51 = vld [vmem:[#allocation2 + $0x98] sm:$0xf]  ;;  %v8109_v41 = vld [vmem:[#allocation2 + $0x90] sm:$0xf] }
 0x649   :  { %v8080_v22 = vld [vmem:[%s15010_s3 + $0x48] sm:$0xff]  ;;  %v6319_v55 = vmax.f32 %v6181_v5, %v6280_v25  ;;  %v6281_v1 = vsel %vm327_vm0, %v6256_v47, %v6258_v15 }
 0x64a   :  { %v8120_v23 = vmax.f32 %v8080_v22, %v8100_v33  ;;  %v6320_v34 = vmax.f32 %v6182_v40, %v6281_v1 }
 0x64b   :  { %6339 = vst [vmem:[%s15010_s3 + $0x60] sm:$0xf] %v6319_v55  ;;  %v6260_v28 = vpop.permute.xlu0 %6259 }
 0x64c   :  { %8140 = vst.msk [vmem:[%s15010_s3 + $0x48] sm:$0xff] %vm24_vm4, %v8120_v23  ;;  %v6282_v61 = vsel %vm327_vm0, %v6258_v15, %v6260_v28  ;;  %6340 = vst [vmem:[%s15010_s3 + $0x68] sm:$0xf] %v6320_v34  ;;  %v6262_v30 = vpop.permute.xlu1 %6261 }
 0x64d   :  { %v6321_v36 = vmax.f32 %v6183_v12, %v6282_v61  ;;  %v6283_v53 = vsel %vm327_vm0, %v6260_v28, %v6262_v30 }
 0x64e   :  { %v8081_v37 = vld [vmem:[%s15010_s3 + $0x50] sm:$0xf]  ;;  %v6322_v54 = vmax.f32 %v6184_v50, %v6283_v53 }
 0x64f   :  { %v8121_v45 = vmax.f32 %v8081_v37, %v8101_v52  ;;  %6341 = vst [vmem:[%s15010_s3 + $0x70] sm:$0xf] %v6321_v36  ;;  %v6264_v39 = vpop.permute.xlu0 %6263  ;;  %v8082_v19 = vld [vmem:[%s15010_s3 + $0x58] sm:$0xf] }
 0x650   :  { %v6284_v9 = vsel %vm327_vm0, %v6262_v30, %v6264_v39  ;;  %v8122_v4 = vmax.f32 %v8082_v19, %v8102_v58  ;;  %6342 = vst [vmem:[%s15010_s3 + $0x78] sm:$0xf] %v6322_v54  ;;  %v6266_v32 = vpop.permute.xlu1 %6265 }
 0x651   :  { %8141 = vst [vmem:[%s15010_s3 + $0x50] sm:$0xf] %v8121_v45  ;;  %v6323_v63 = vmax.f32 %v6185_v7, %v6284_v9  ;;  %v6285_v26 = vsel %vm327_vm0, %v6264_v39, %v6266_v32 }
 0x652   :  { %v8083_v14 = vld [vmem:[%s15010_s3 + $0x60] sm:$0xf]  ;;  %8142 = vst [vmem:[%s15010_s3 + $0x58] sm:$0xf] %v8122_v4  ;;  %v6324_v29 = vmax.f32 %v6186_v59, %v6285_v26 }
 0x653   :  { %v8123_v27 = vmax.f32 %v8083_v14, %v8103_v10  ;;  %6343 = vst [vmem:[%s15010_s3 + $0x80] sm:$0xf] %v6323_v63  ;;  %v6268_v2 = vpop.permute.xlu0 %6267  ;;  %v8084_v6 = vld [vmem:[%s15010_s3 + $0x68] sm:$0xf] }
 0x654   :  { %v6286_v43 = vsel %vm327_vm0, %v6266_v32, %v6268_v2  ;;  %v6326_v17 = vmax.f32 %v6188_v35, %v6268_v2  ;;  %v8124_v46 = vmax.f32 %v8084_v6, %v8104_v18  ;;  %6344 = vst [vmem:[%s15010_s3 + $0x88] sm:$0xf] %v6324_v29 }
 0x655   :  { %8143 = vst [vmem:[%s15010_s3 + $0x60] sm:$0xf] %v8123_v27  ;;  %v6325_v48 = vmax.f32 %v6187_v62, %v6286_v43 }
 0x656   :  { %v8085_v13 = vld [vmem:[%s15010_s3 + $0x70] sm:$0xf]  ;;  %6346 = vst.msk [vmem:[%s15010_s3 + $0x98] sm:$0xf] %vm35_vm5, %v6326_v17  ;;  %8144 = vst [vmem:[%s15010_s3 + $0x68] sm:$0xf] %v8124_v46 }
 0x657   :  { %v8125_v60 = vmax.f32 %v8085_v13, %v8105_v38  ;;  %6345 = vst [vmem:[%s15010_s3 + $0x90] sm:$0xf] %v6325_v48  ;;  %v8086_v31 = vld [vmem:[%s15010_s3 + $0x78] sm:$0xf] }
 0x658   :  { %v8126_v24 = vmax.f32 %v8086_v31, %v8106_v3 }
 0x659   :  { %8145 = vst [vmem:[%s15010_s3 + $0x70] sm:$0xf] %v8125_v60 }
 0x65a   :  { %v8087_v49 = vld [vmem:[%s15010_s3 + $0x80] sm:$0xf]  ;;  %8146 = vst [vmem:[%s15010_s3 + $0x78] sm:$0xf] %v8126_v24 }
 0x65b   :  { %v8127_v0 = vmax.f32 %v8087_v49, %v8107_v57  ;;  %v8088_v11 = vld [vmem:[%s15010_s3 + $0x88] sm:$0xf] }
 0x65c   :  { %v8128_v56 = vmax.f32 %v8088_v11, %v8108_v42 }
 0x65d   :  { %8147 = vst [vmem:[%s15010_s3 + $0x80] sm:$0xf] %v8127_v0  ;;  %v8090_v44 = vld [vmem:[%s15010_s3 + $0x98] sm:$0xf] }
 0x65e   :  { %v8089_v20 = vld [vmem:[%s15010_s3 + $0x90] sm:$0xf]  ;;  %v8130_v33 = vmax.f32 %v8090_v44, %v8110_v51  ;;  %8148 = vst [vmem:[%s15010_s3 + $0x88] sm:$0xf] %v8128_v56 }
 0x65f   :  { %v8129_v21 = vmax.f32 %v8089_v20, %v8109_v41 }
 0x660   :  { %8150 = vst.msk [vmem:[%s15010_s3 + $0x98] sm:$0xf] %vm35_vm5, %v8130_v33 }
 0x661   :  { %8149 = vst [vmem:[%s15010_s3 + $0x90] sm:$0xf] %v8129_v21 }

// kernel: lstm_singleshot_forward.3
= control target key start
LH: loop header
LB: loop body
LE: loop exit
PB: predicated region body
PF: predicated region fallthrough
CT: control target
= control target key end

     0   :  { %s5990_s29 = smov 127   ;;  %v5991_v6 = vmov 0   ;;  %s5992_s23 = smov 126   ;;  %vm121_vm0 = vcmask 392192   ;;  %vm111_vm1 = vcmask 1039360   ;;  %vm274_vm2 = vcmask 1031168   ;;  %s7964_s0 = inlined_call_operand.vmem [shape: bf16[48,289], index: 0, kind: input, shape index: {}]   ;;  %s7965_s1 = inlined_call_operand.vmem [shape: bf16[9,24,48], index: 1, kind: input, shape index: {}]   ;;  %s7966_s2 = inlined_call_operand.vmem [shape: f32[24,1], index: 2, kind: input, shape index: {}]   ;;  %s7967_s3 = inlined_call_operand.vmem [shape: f32[217,49], index: 3, kind: input, shape index: {}]   ;;  %s7968_s4 = inlined_call_operand.vmem [shape: bf16[9,24,24], index: 4, kind: input, shape index: {}]   ;;  %s7969_s5 = inlined_call_operand.vmem [shape: f32[24,1], index: 5, kind: input, shape index: {}]   ;;  %s7970_s6 = inlined_call_operand.vmem [shape: bf16[9,24,24], index: 6, kind: input, shape index: {}]   ;;  %s7971_s7 = inlined_call_operand.vmem [shape: f32[24,1], index: 7, kind: input, shape index: {}]   ;;  %s7972_s11 = inlined_call_operand.vmem [shape: f32[128,1], index: 11, kind: input, shape index: {}]   ;;  %s7973_s9 = inlined_call_operand.vmem [shape: bf16[512,128], index: 9, kind: input, shape index: {}]   ;;  %s7974_s8 = inlined_call_operand.vmem [shape: bf16[512,24], index: 8, kind: input, shape index: {}]   ;;  %s7975_s10 = inlined_call_operand.vmem [shape: f32[512,1], index: 10, kind: input, shape index: {}]   ;;  %s7976_s12 = inlined_call_operand.vmem [shape: f32[128,1], index: 12, kind: input, shape index: {}]   ;;  %s7977_s17 = inlined_call_operand.vmem [shape: f32[128,1], index: 17, kind: output, shape index: {2}]   ;;  %s7978_s16 = inlined_call_operand.vmem [shape: f32[128,1], index: 16, kind: output, shape index: {1}]   ;;  %s7979_s13 = inlined_call_operand.vmem [shape: bf16[5,128], index: 13, kind: input, shape index: {}]   ;;  %s7980_s14 = inlined_call_operand.vmem [shape: f32[5,1], index: 14, kind: input, shape index: {}]   ;;  %s7981_s15 = inlined_call_operand.vmem [shape: f32[5,1], index: 15, kind: output, shape index: {0}]  }
   0x1   :  { %7984 = sst [smem:[#allocation5_spill]] %s7964_s0  ;;  %160 = vmatprep.mubr.bf16.mxu0 %v5991_v6  ;;  %231 = vmatprep.mubr.bf16.mxu1 %v5991_v6  ;;  %s5993_s30 = smov 111   ;;  %v1034_v25 = vld [vmem:[%s7966_s2] sm:$0xff]  ;;  %v1035_v28 = vld [vmem:[%s7966_s2 + $0x8] sm:$0xff]  ;;  %v1036_v33 = vld [vmem:[%s7966_s2 + $0x10] sm:$0xff]  ;;  %vm428_vm3 = vcmask 908288  }
   0x2   :  { %7985 = sst [smem:[#allocation6_spill]] %s7965_s1  ;;  %5558 = vset.pattern.permute.xlu0 %v5991_v6  ;;  %5559 = vset.pattern.permute.xlu1 %v5991_v6  ;;  %s5994_s18 = smov 110   ;;  %vm534_vm4 = vcmask 900096   ;;  %vm640_vm5 = vcmask 891904   ;;  %vm746_vm6 = vcmask 769024   ;;  %vm852_vm7 = vcmask 760832  }
   0x3   :  { %s7986_s26 = sld [smem:[#allocation5_spill]]  ;;  %s5996_s25 = smov 94   ;;  %vm958_vm8 = vcmask 752640   ;;  %vm1065_vm9 = vcmask 1022976   ;;  %vm1345_vm10 = vcmask 1040384   ;;  %vm1335_vm11 = vcmask 728064  }
   0x4   :  { %s7987_s27 = sld [smem:[#allocation6_spill]]  ;;  %s5997_s28 = smov 93   ;;  %vm1429_vm12 = vcmask 400384   ;;  %vm1460_vm13 = vcmask 195584   ;;  %vm1467_vm14 = vcmask 1043456   ;;  %vm2144_vm15 = vcmask 269312  }
   0x5   :  { %s5998_s0 = smov 92   ;;  %s6002_s24 = smov 114  }
   0x6   :  { %s6003_s19 = smov 112   ;;  %s6004_s1 = smov 119  }
   0x9   :  { %v6100_v0 = vld [vmem:[%s7986_s26 + $0x30] ss:$12 sps:$4 sm:$0xff]   ;;  %v6105_v1 = vld [vmem:[%s7986_s26 + $0x18] ss:$12 sps:$4 sm:$0xff]   ;;  %v6112_v2 = vld [vmem:[%s7986_s26 + $0x34] ss:$12 sps:$4 sm:$0xff]  }
   0xa   :  { %107 = vrot.lane.b32.xlu0 %v6100_v0, %s5990_s29  ;;  %103 = vrot.lane.b32.xlu1 %v6105_v1, %s5990_s29  ;;  %v6119_v3 = vld [vmem:[%s7986_s26 + $0x1c] ss:$12 sps:$4 sm:$0xff]   ;;  %v6125_v4 = vld [vmem:[%s7986_s26 + $0x4] ss:$12 sps:$4 sm:$0xff]  }
   0xb   :  { %209 = vmatprep.subr.bf16.mxu1 %v6112_v2  ;;  %v6133_v5 = vld [vmem:[%s7986_s26] ss:$12 sps:$4 sm:$0xff]   ;;  %v5609_v8 = vld [vmem:[%s7986_s26 + $0x38] ss:$12 sps:$4 sm:$0xff]   ;;  %v5616_v10 = vld [vmem:[%s7987_s27 + $0x8] ss:$0 sps:$4 sm:$0xff]  }
   0xc   :  { %210 = vmatpush1.bf16.msra.mxu1 %v6100_v0  ;;  %v5614_v7 = vld [vmem:[%s7987_s27] sm:$0xff]   ;;  %v6198_v11 = vld [vmem:[%s7986_s26 + $0x8] ss:$12 sps:$4 sm:$0xff]   ;;  %v5612_v23 = vld [vmem:[%s7987_s27 + $0xc] sm:$0xff]  }
   0xd   :  { %211 = vmatprep.subr.bf16.mxu1 %v6119_v3  ;;  %v5610_v9 = vld [vmem:[%s7986_s26 + $0x20] ss:$12 sps:$4 sm:$0xff]   ;;  %s5995_s26 = smov 109   ;;  %v5613_v32 = vld [vmem:[%s7987_s27 + $0x14] ss:$0 sps:$4 sm:$0xff]   ;;  %v5615_v41 = vld [vmem:[%s7987_s27 + $0x18] sm:$0xff]  }
   0xe   :  { %109 = vrot.lane.b32.xlu0 %v6112_v2, %s5990_s29  ;;  %105 = vrot.lane.b32.xlu1 %v6119_v3, %s5990_s29  ;;  %v5617_v48 = vld [vmem:[%s7987_s27 + $0x20] ss:$0 sps:$4 sm:$0xff]   ;;  %v5618_v63 = vld [vmem:[%s7987_s27 + $0x24] sm:$0xff]  }
  0x10   :  { %212 = vmatpush1.bf16.msra.mxu1 %v6105_v1 }
  0x11   :  { %213 = vmatprep.subr.bf16.mxu1 %v6125_v4 }
  0x12   :  { %99 = vrot.lane.b32.xlu0 %v6133_v5, %s5990_s29  ;;  %101 = vrot.lane.b32.xlu1 %v6125_v4, %s5990_s29 }
  0x14   :  { %214 = vmatpush1.bf16.msra.mxu1 %v6133_v5 }
  0x16   :  { %270 = vrot.lane.b32.xlu0 %v6100_v0, %s5992_s23  ;;  %272 = vrot.lane.b32.xlu1 %v6112_v2, %s5992_s23 }
  0x17   :  { %4727 = vmatmul.mubr.msk.bf16.vlgmr.msra.gmra.mxu1 %vm121_vm0, %v5614_v7 }
  0x18   :  { %241 = vmatprep.mubr.bf16.mxu1 %v5991_v6 }
  0x1a   :  { %266 = vrot.lane.b32.xlu0 %v6105_v1, %s5992_s23  ;;  %268 = vrot.lane.b32.xlu1 %v6119_v3, %s5992_s23 }
  0x1e   :  { %262 = vrot.lane.b32.xlu0 %v6133_v5, %s5992_s23  ;;  %264 = vrot.lane.b32.xlu1 %v6125_v4, %s5992_s23 }
  0x1f   :  { %4728 = vmatmul.mubr.msk.bf16.gmra.mxu1 %vm121_vm0, %v5616_v10 }
  0x20   :  { %479 = vmatprep.mubr.bf16.mxu1 %v5991_v6 }
  0x22   :  { %424 = vrot.lane.b32.xlu0 %v6112_v2, %s5993_s30  ;;  %426 = vrot.lane.b32.xlu1 %v5609_v8, %s5993_s30 }
  0x26   :  { %422 = vrot.lane.b32.xlu0 %v6100_v0, %s5993_s30  ;;  %530 = vrot.lane.b32.xlu1 %v6112_v2, %s5994_s18 }
  0x2a   :  { %532 = vrot.lane.b32.xlu0 %v5609_v8, %s5994_s18  ;;  %528 = vrot.lane.b32.xlu1 %v6100_v0, %s5994_s18 }
  0x2e   :  { %418 = vrot.lane.b32.xlu0 %v6119_v3, %s5993_s30  ;;  %420 = vrot.lane.b32.xlu1 %v5610_v9, %s5993_s30 }
  0x32   :  { %416 = vrot.lane.b32.xlu0 %v6105_v1, %s5993_s30  ;;  %524 = vrot.lane.b32.xlu1 %v6119_v3, %s5994_s18 }
  0x36   :  { %526 = vrot.lane.b32.xlu0 %v5610_v9, %s5994_s18  ;;  %522 = vrot.lane.b32.xlu1 %v6105_v1, %s5994_s18 }
  0x3a   :  { %412 = vrot.lane.b32.xlu0 %v6125_v4, %s5993_s30  ;;  %414 = vrot.lane.b32.xlu1 %v6198_v11, %s5993_s30 }
  0x3e   :  { %410 = vrot.lane.b32.xlu0 %v6133_v5, %s5993_s30  ;;  %518 = vrot.lane.b32.xlu1 %v6125_v4, %s5994_s18 }
  0x42   :  { %520 = vrot.lane.b32.xlu0 %v6198_v11, %s5994_s18  ;;  %516 = vrot.lane.b32.xlu1 %v6133_v5, %s5994_s18 }
  0x46   :  { %636 = vrot.lane.b32.xlu0 %v6112_v2, %s5995_s26  ;;  %638 = vrot.lane.b32.xlu1 %v5609_v8, %s5995_s26 }
  0x4a   :  { %634 = vrot.lane.b32.xlu0 %v6100_v0, %s5995_s26  ;;  %742 = vrot.lane.b32.xlu1 %v6112_v2, %s5996_s25 }
  0x4e   :  { %744 = vrot.lane.b32.xlu0 %v5609_v8, %s5996_s25  ;;  %740 = vrot.lane.b32.xlu1 %v6100_v0, %s5996_s25 }
  0x52   :  { %630 = vrot.lane.b32.xlu0 %v6119_v3, %s5995_s26  ;;  %632 = vrot.lane.b32.xlu1 %v5610_v9, %s5995_s26 }
  0x56   :  { %628 = vrot.lane.b32.xlu0 %v6105_v1, %s5995_s26  ;;  %736 = vrot.lane.b32.xlu1 %v6119_v3, %s5996_s25 }
  0x5a   :  { %738 = vrot.lane.b32.xlu0 %v5610_v9, %s5996_s25  ;;  %734 = vrot.lane.b32.xlu1 %v6105_v1, %s5996_s25 }
  0x5e   :  { %624 = vrot.lane.b32.xlu0 %v6125_v4, %s5995_s26  ;;  %626 = vrot.lane.b32.xlu1 %v6198_v11, %s5995_s26 }
  0x62   :  { %622 = vrot.lane.b32.xlu0 %v6133_v5, %s5995_s26  ;;  %730 = vrot.lane.b32.xlu1 %v6125_v4, %s5996_s25 }
  0x66   :  { %732 = vrot.lane.b32.xlu0 %v6198_v11, %s5996_s25  ;;  %728 = vrot.lane.b32.xlu1 %v6133_v5, %s5996_s25 }
  0x6a   :  { %848 = vrot.lane.b32.xlu0 %v6112_v2, %s5997_s28  ;;  %850 = vrot.lane.b32.xlu1 %v5609_v8, %s5997_s28 }
  0x6e   :  { %846 = vrot.lane.b32.xlu0 %v6100_v0, %s5997_s28  ;;  %954 = vrot.lane.b32.xlu1 %v6112_v2, %s5998_s0 }
  0x72   :  { %956 = vrot.lane.b32.xlu0 %v5609_v8, %s5998_s0  ;;  %952 = vrot.lane.b32.xlu1 %v6100_v0, %s5998_s0  ;;  %v5620_v8 = vld [vmem:[%s7987_s27 + $0x2c] ss:$0 sps:$4 sm:$0xff]  }
  0x76   :  { %842 = vrot.lane.b32.xlu0 %v6119_v3, %s5997_s28  ;;  %844 = vrot.lane.b32.xlu1 %v5610_v9, %s5997_s28 }
  0x7a   :  { %840 = vrot.lane.b32.xlu0 %v6105_v1, %s5997_s28  ;;  %948 = vrot.lane.b32.xlu1 %v6119_v3, %s5998_s0 }
  0x7c   :  { %v108_v12 = vpop.permute.xlu0 %107  ;;  %v104_v13 = vpop.permute.xlu1 %103 }
  0x7e   :  { %950 = vrot.lane.b32.xlu0 %v5610_v9, %s5998_s0  ;;  %946 = vrot.lane.b32.xlu1 %v6105_v1, %s5998_s0 }
  0x80   :  { %v110_v14 = vpop.permute.xlu0 %109  ;;  %v106_v15 = vpop.permute.xlu1 %105 }
  0x81   :  { %138 = vmatprep.subr.bf16.mxu0 %v110_v14  ;;  %v114_v16 = vsel %vm111_vm1, %v108_v12, %v110_v14  ;;  %v113_v19 = vsel %vm111_vm1, %v104_v13, %v106_v15  ;;  %v5621_v13 = vld [vmem:[%s7987_s27 + $0x38] ss:$0 sps:$4 sm:$0xff]  }
  0x82   :  { %139 = vmatpush1.bf16.msra.mxu0 %v114_v16  ;;  %836 = vrot.lane.b32.xlu0 %v6125_v4, %s5997_s28 }
  0x83   :  { %838 = vrot.lane.b32.xlu1 %v6198_v11, %s5997_s28  ;;  %140 = vmatprep.subr.bf16.mxu0 %v106_v15 }
  0x84   :  { %v100_v17 = vpop.permute.xlu0 %99  ;;  %v102_v18 = vpop.permute.xlu1 %101 }
  0x85   :  { %v112_v22 = vsel %vm111_vm1, %v100_v17, %v102_v18 }
  0x86   :  { %141 = vmatpush1.bf16.msra.mxu0 %v113_v19  ;;  %834 = vrot.lane.b32.xlu0 %v6133_v5, %s5997_s28 }
  0x87   :  { %942 = vrot.lane.b32.xlu1 %v6125_v4, %s5998_s0  ;;  %142 = vmatprep.subr.bf16.mxu0 %v102_v18  ;;  %v5619_v4 = vld [vmem:[%s7987_s27 + $0x30] sm:$0xff]  }
  0x88   :  { %v271_v20 = vpop.permute.xlu0 %270  ;;  %v273_v21 = vpop.permute.xlu1 %272 }
  0x89   :  { %v277_v26 = vsel %vm274_vm2, %v271_v20, %v273_v21 }
  0x8a   :  { %944 = vrot.lane.b32.xlu0 %v6198_v11, %s5998_s0  ;;  %143 = vmatpush1.bf16.msra.mxu0 %v112_v22 }
  0x8b   :  { %940 = vrot.lane.b32.xlu1 %v6133_v5, %s5998_s0  ;;  %300 = vmatprep.subr.bf16.mxu0 %v273_v21 }
  0x8c   :  { %v267_v24 = vpop.permute.xlu0 %266  ;;  %v269_v27 = vpop.permute.xlu1 %268 }
  0x8d   :  { %4723 = vmatmul.mubr.msk.bf16.vlgmr.msra.gmra.mxu0 %vm121_vm0, %v5612_v23  ;;  %v276_v30 = vsel %vm274_vm2, %v267_v24, %v269_v27 }
  0x8e   :  { %301 = vmatpush1.bf16.msra.mxu0 %v277_v26  ;;  %170 = vmatprep.mubr.bf16.mxu0 %v5991_v6 }
  0x8f   :  { %302 = vmatprep.subr.bf16.mxu0 %v269_v27  ;;  %1039 = vperm.xlu0 %5558, %v1034_v25  }
  0x90   :  { %v263_v29 = vpop.permute.xlu0 %262  ;;  %1044 = vperm.xlu1 %5559, %v1035_v28   ;;  %v265_v31 = vpop.permute.xlu1 %264 }
  0x91   :  { %v275_v35 = vsel %vm274_vm2, %v263_v29, %v265_v31 }
  0x92   :  { %303 = vmatpush1.bf16.msra.mxu0 %v276_v30 }
  0x93   :  { %304 = vmatprep.subr.bf16.mxu0 %v265_v31 }
  0x94   :  { %v425_v34 = vpop.permute.xlu0 %424  ;;  %1049 = vperm.xlu1 %5559, %v1036_v33   ;;  %v427_v36 = vpop.permute.xlu1 %426 }
  0x95   :  { %4724 = vmatmul.mubr.msk.bf16.gmra.mxu0 %vm121_vm0, %v5613_v32  ;;  %v434_v37 = vsel %vm428_vm3, %v425_v34, %v427_v36 }
  0x96   :  { %305 = vmatpush1.bf16.msra.mxu0 %v275_v35  ;;  %322 = vmatprep.mubr.bf16.mxu0 %v5991_v6 }
  0x97   :  { %457 = vmatprep.subr.bf16.mxu1 %v434_v37 }
  0x98   :  { %v423_v38 = vpop.permute.xlu0 %422  ;;  %v531_v39 = vpop.permute.xlu1 %530 }
  0x99   :  { %v433_v40 = vsel %vm428_vm3, %v423_v38, %v425_v34  ;;  %v5622_v34 = vld [vmem:[%s7987_s27 + $0x3c] sm:$0xff]  }
  0x9a   :  { %458 = vmatpush1.bf16.msra.mxu1 %v433_v40 }
  0x9c   :  { %v533_v42 = vpop.permute.xlu0 %532  ;;  %v529_v43 = vpop.permute.xlu1 %528 }
  0x9d   :  { %v540_v44 = vsel %vm534_vm4, %v531_v39, %v533_v42  ;;  %4734 = vmatmul.mubr.msk.bf16.vlgmr.msra.gmra.mxu0 %vm121_vm0, %v5615_v41  ;;  %v539_v45 = vsel %vm534_vm4, %v529_v43, %v531_v39  ;;  %v5623_v39 = vld [vmem:[%s7987_s27 + $0x48] sm:$0xff]   ;;  %v5624_v42 = vld [vmem:[%s7987_s27 + $0x44] ss:$0 sps:$4 sm:$0xff]  }
  0x9e   :  { %563 = vmatprep.subr.bf16.mxu0 %v540_v44  ;;  %332 = vmatprep.mubr.bf16.mxu0 %v5991_v6 }
  0x9f   :  { %564 = vmatpush1.bf16.msra.mxu0 %v539_v45 }
  0xa0   :  { %v419_v46 = vpop.permute.xlu0 %418  ;;  %v421_v47 = vpop.permute.xlu1 %420 }
  0xa1   :  { %v432_v49 = vsel %vm428_vm3, %v419_v46, %v421_v47  ;;  %v5625_v47 = vld [vmem:[%s7987_s27 + $0x50] ss:$0 sps:$4 sm:$0xff]  }
  0xa2   :  { %459 = vmatprep.subr.bf16.mxu1 %v432_v49 }
  0xa4   :  { %v417_v50 = vpop.permute.xlu0 %416  ;;  %v525_v51 = vpop.permute.xlu1 %524 }
  0xa5   :  { %v431_v52 = vsel %vm428_vm3, %v417_v50, %v419_v46  ;;  %4735 = vmatmul.mubr.msk.bf16.gmra.mxu0 %vm121_vm0, %v5617_v48 }
  0xa6   :  { %460 = vmatpush1.bf16.msra.mxu1 %v431_v52  ;;  %585 = vmatprep.mubr.bf16.mxu0 %v5991_v6 }
  0xa8   :  { %v527_v53 = vpop.permute.xlu0 %526  ;;  %v523_v54 = vpop.permute.xlu1 %522 }
  0xa9   :  { %v538_v55 = vsel %vm534_vm4, %v525_v51, %v527_v53  ;;  %v537_v56 = vsel %vm534_vm4, %v523_v54, %v525_v51 }
  0xaa   :  { %565 = vmatprep.subr.bf16.mxu0 %v538_v55 }
  0xab   :  { %566 = vmatpush1.bf16.msra.mxu0 %v537_v56 }
  0xac   :  { %v413_v57 = vpop.permute.xlu0 %412  ;;  %v415_v58 = vpop.permute.xlu1 %414 }
  0xad   :  { %v430_v59 = vsel %vm428_vm3, %v413_v57, %v415_v58 }
  0xae   :  { %461 = vmatprep.subr.bf16.mxu1 %v430_v59 }
  0xb0   :  { %v411_v60 = vpop.permute.xlu0 %410  ;;  %v519_v61 = vpop.permute.xlu1 %518 }
  0xb1   :  { %v429_v62 = vsel %vm428_vm3, %v411_v60, %v413_v57 }
  0xb2   :  { %462 = vmatpush1.bf16.msra.mxu1 %v429_v62 }
  0xb4   :  { %v521_v0 = vpop.permute.xlu0 %520  ;;  %v517_v1 = vpop.permute.xlu1 %516 }
  0xb5   :  { %v536_v2 = vsel %vm534_vm4, %v519_v61, %v521_v0  ;;  %4750 = vmatmul.mubr.msk.bf16.vlgmr.msra.gmra.mxu1 %vm121_vm0, %v5618_v63  ;;  %v535_v3 = vsel %vm534_vm4, %v517_v1, %v519_v61 }
  0xb6   :  { %567 = vmatprep.subr.bf16.mxu0 %v536_v2  ;;  %489 = vmatprep.mubr.bf16.mxu1 %v5991_v6 }
  0xb7   :  { %568 = vmatpush1.bf16.msra.mxu0 %v535_v3 }
  0xb8   :  { %v637_v5 = vpop.permute.xlu0 %636  ;;  %v639_v7 = vpop.permute.xlu1 %638 }
  0xb9   :  { %v646_v9 = vsel %vm640_vm5, %v637_v5, %v639_v7 }
  0xba   :  { %4757 = vmatmul.mubr.msk.bf16.vlgmr.msra.gmra.mxu0 %vm121_vm0, %v5619_v4  ;;  %669 = vmatprep.subr.bf16.mxu1 %v646_v9 }
  0xbb   :  { %595 = vmatprep.mubr.bf16.mxu0 %v5991_v6 }
  0xbc   :  { %v635_v10 = vpop.permute.xlu0 %634  ;;  %v743_v11 = vpop.permute.xlu1 %742 }
  0xbd   :  { %v645_v12 = vsel %vm640_vm5, %v635_v10, %v637_v5  ;;  %4751 = vmatmul.mubr.msk.bf16.gmra.mxu1 %vm121_vm0, %v5620_v8  ;;  %v5626_v10 = vld [vmem:[%s7987_s27 + $0x54] sm:$0xff]  }
  0xbe   :  { %670 = vmatpush1.bf16.msra.mxu1 %v645_v12  ;;  %691 = vmatprep.mubr.bf16.mxu1 %v5991_v6 }
  0xc0   :  { %v745_v14 = vpop.permute.xlu0 %744  ;;  %v741_v15 = vpop.permute.xlu1 %740 }
  0xc1   :  { %v752_v16 = vsel %vm746_vm6, %v743_v11, %v745_v14  ;;  %v751_v17 = vsel %vm746_vm6, %v741_v15, %v743_v11 }
  0xc2   :  { %775 = vmatprep.subr.bf16.mxu0 %v752_v16  ;;  %4758 = vmatmul.mubr.msk.bf16.gmra.mxu0 %vm121_vm0, %v5621_v13 }
  0xc3   :  { %776 = vmatpush1.bf16.msra.mxu0 %v751_v17  ;;  %797 = vmatprep.mubr.bf16.mxu0 %v5991_v6 }
  0xc4   :  { %v631_v18 = vpop.permute.xlu0 %630  ;;  %v633_v19 = vpop.permute.xlu1 %632 }
  0xc5   :  { %v644_v20 = vsel %vm640_vm5, %v631_v18, %v633_v19  ;;  %v5628_v19 = vld [vmem:[%s7987_s27 + $0x5c] ss:$0 sps:$4 sm:$0xff]  }
  0xc6   :  { %671 = vmatprep.subr.bf16.mxu1 %v644_v20  ;;  %v5629_v20 = vld [vmem:[%s7987_s27 + $0x68] ss:$0 sps:$4 sm:$0xff]  }
  0xc8   :  { %v629_v21 = vpop.permute.xlu0 %628  ;;  %v737_v22 = vpop.permute.xlu1 %736 }
  0xc9   :  { %v643_v23 = vsel %vm640_vm5, %v629_v21, %v631_v18  ;;  %v5627_v18 = vld [vmem:[%s7987_s27 + $0x60] sm:$0xff]  }
  0xca   :  { %672 = vmatpush1.bf16.msra.mxu1 %v643_v23 }
  0xcc   :  { %v739_v24 = vpop.permute.xlu0 %738  ;;  %v735_v25 = vpop.permute.xlu1 %734 }
  0xcd   :  { %v750_v26 = vsel %vm746_vm6, %v737_v22, %v739_v24  ;;  %v749_v27 = vsel %vm746_vm6, %v735_v25, %v737_v22 }
  0xce   :  { %777 = vmatprep.subr.bf16.mxu0 %v750_v26 }
  0xcf   :  { %778 = vmatpush1.bf16.msra.mxu0 %v749_v27 }
  0xd0   :  { %v625_v28 = vpop.permute.xlu0 %624  ;;  %v627_v29 = vpop.permute.xlu1 %626 }
  0xd1   :  { %v642_v30 = vsel %vm640_vm5, %v625_v28, %v627_v29 }
  0xd2   :  { %673 = vmatprep.subr.bf16.mxu1 %v642_v30 }
  0xd4   :  { %v623_v31 = vpop.permute.xlu0 %622  ;;  %v731_v32 = vpop.permute.xlu1 %730 }
  0xd5   :  { %v641_v33 = vsel %vm640_vm5, %v623_v31, %v625_v28 }
  0xd6   :  { %674 = vmatpush1.bf16.msra.mxu1 %v641_v33 }
  0xd7   :  { %v233_v52 = vpop.f32.mrf.mxu1 }
  0xd8   :  { %v733_v35 = vpop.permute.xlu0 %732  ;;  %v729_v36 = vpop.permute.xlu1 %728 }
  0xd9   :  { %4764 = vmatmul.mubr.msk.bf16.vlgmr.msra.gmra.mxu1 %vm121_vm0, %v5622_v34  ;;  %v748_v37 = vsel %vm746_vm6, %v731_v32, %v733_v35  ;;  %v747_v38 = vsel %vm746_vm6, %v729_v36, %v731_v32  ;;  %v235_v56 = vpop.f32.mrf.mxu1 }
  0xda   :  { %779 = vmatprep.subr.bf16.mxu0 %v748_v37  ;;  %701 = vmatprep.mubr.bf16.mxu1 %v5991_v6 }
  0xdb   :  { %780 = vmatpush1.bf16.msra.mxu0 %v747_v38  ;;  %v237_v60 = vpop.f32.mrf.mxu1 }
  0xdc   :  { %v849_v40 = vpop.permute.xlu0 %848  ;;  %v851_v41 = vpop.permute.xlu1 %850 }
  0xdd   :  { %v858_v43 = vsel %vm852_vm7, %v849_v40, %v851_v41  ;;  %v6385_v1 = vpop.f32.mrf.mxu1 }
  0xde   :  { %4771 = vmatmul.mubr.msk.bf16.vlgmr.msra.gmra.mxu0 %vm121_vm0, %v5623_v39  ;;  %881 = vmatprep.subr.bf16.mxu1 %v858_v43 }
  0xdf   :  { %807 = vmatprep.mubr.bf16.mxu0 %v5991_v6  ;;  %v243_v5 = vpop.f32.mrf.mxu1 }
  0xe0   :  { %v847_v44 = vpop.permute.xlu0 %846  ;;  %v955_v45 = vpop.permute.xlu1 %954 }
  0xe1   :  { %v857_v46 = vsel %vm852_vm7, %v847_v44, %v849_v40  ;;  %4765 = vmatmul.mubr.msk.bf16.gmra.mxu1 %vm121_vm0, %v5624_v42  ;;  %v245_v11 = vpop.f32.mrf.mxu1 }
  0xe2   :  { %882 = vmatpush1.bf16.msra.mxu1 %v857_v46  ;;  %903 = vmatprep.mubr.bf16.mxu1 %v5991_v6 }
  0xe3   :  { %v247_v12 = vpop.f32.mrf.mxu1 }
  0xe4   :  { %v957_v48 = vpop.permute.xlu0 %956  ;;  %v953_v49 = vpop.permute.xlu1 %952 }
  0xe5   :  { %v964_v50 = vsel %vm958_vm8, %v955_v45, %v957_v48  ;;  %v963_v51 = vsel %vm958_vm8, %v953_v49, %v955_v45  ;;  %v248_v16 = vpop.f32.mrf.mxu1 }
  0xe6   :  { %4772 = vmatmul.mubr.msk.bf16.gmra.mxu0 %vm121_vm0, %v5625_v47  ;;  %987 = vmatprep.subr.bf16.mxu0 %v964_v50  ;;  %v5999_v16 = vmov 0.0  }
  0xe7   :  { %988 = vmatpush1.bf16.msra.mxu0 %v963_v51  ;;  %1009 = vmatprep.mubr.bf16.mxu0 %v5991_v6 }
  0xe8   :  { %v843_v53 = vpop.permute.xlu0 %842  ;;  %v845_v54 = vpop.permute.xlu1 %844 }
  0xe9   :  { %v856_v55 = vsel %vm852_vm7, %v843_v53, %v845_v54 }
  0xea   :  { %883 = vmatprep.subr.bf16.mxu1 %v856_v55 }
  0xec   :  { %v841_v57 = vpop.permute.xlu0 %840  ;;  %v949_v58 = vpop.permute.xlu1 %948 }
  0xed   :  { %v855_v59 = vsel %vm852_vm7, %v841_v57, %v843_v53 }
  0xee   :  { %884 = vmatpush1.bf16.msra.mxu1 %v855_v59 }
  0xf0   :  { %v951_v61 = vpop.permute.xlu0 %950  ;;  %v947_v62 = vpop.permute.xlu1 %946 }
  0xf1   :  { %v962_v63 = vsel %vm958_vm8, %v949_v58, %v951_v61  ;;  %v961_v0 = vsel %vm958_vm8, %v947_v62, %v949_v58 }
  0xf2   :  { %989 = vmatprep.subr.bf16.mxu0 %v962_v63 }
  0xf3   :  { %990 = vmatpush1.bf16.msra.mxu0 %v961_v0 }
  0xf4   :  { %v837_v2 = vpop.permute.xlu0 %836 }
  0xf5   :  { %v839_v3 = vpop.permute.xlu1 %838 }
  0xf6   :  { %v854_v4 = vsel %vm852_vm7, %v837_v2, %v839_v3 }
  0xf7   :  { %885 = vmatprep.subr.bf16.mxu1 %v854_v4 }
  0xf8   :  { %v835_v7 = vpop.permute.xlu0 %834 }
  0xf9   :  { %v943_v8 = vpop.permute.xlu1 %942  ;;  %v853_v9 = vsel %vm852_vm7, %v835_v7, %v837_v2 }
  0xfa   :  { %886 = vmatpush1.bf16.msra.mxu1 %v853_v9 }
  0xfb   :  { %1349 = vmatprep.subr.mxu1 %v5999_v16 }
  0xfc   :  { %v945_v13 = vpop.permute.xlu0 %944 }
  0xfd   :  { %v941_v14 = vpop.permute.xlu1 %940  ;;  %4778 = vmatmul.mubr.msk.bf16.vlgmr.msra.gmra.mxu1 %vm121_vm0, %v5626_v10  ;;  %v960_v15 = vsel %vm958_vm8, %v943_v8, %v945_v13 }
  0xfe   :  { %v959_v17 = vsel %vm958_vm8, %v941_v14, %v943_v8  ;;  %991 = vmatprep.subr.bf16.mxu0 %v960_v15  ;;  %913 = vmatprep.mubr.bf16.mxu1 %v5991_v6 }
  0xff   :  { %992 = vmatpush1.bf16.msra.mxu0 %v959_v17  ;;  %v1322_v17 = vld [vmem:[%s7967_s3 + $0x78] sm:$0xff] }
 0x100   :  { %1350 = vmatpush1.msra.mxu1 %v1322_v17 }
 0x101   :  { %1351 = vmatprep.subr.mxu1 %v5999_v16 }
 0x102   :  { %4785 = vmatmul.mubr.msk.bf16.vlgmr.msra.gmra.mxu0 %vm121_vm0, %v5627_v18  ;;  %v1321_v18 = vld [vmem:[%s7967_s3 + $0x70] sm:$0xff] }
 0x103   :  { %1019 = vmatprep.mubr.bf16.mxu0 %v5991_v6  ;;  %1352 = vmatpush1.msra.mxu1 %v1321_v18 }
 0x104   :  { %1353 = vmatprep.subr.mxu1 %v5999_v16 }
 0x105   :  { %4779 = vmatmul.mubr.msk.bf16.gmra.mxu1 %vm121_vm0, %v5628_v19 }
 0x10a   :  { %4786 = vmatmul.mubr.msk.bf16.gmra.mxu0 %vm121_vm0, %v5629_v20 }
 0x14d   :  { %v162_v21 = vpop.f32.mrf.mxu0 }
 0x14e   :  { %v234_v28 = vadd.f32 %v233_v52, %v162_v21  ;;  %v1320_v21 = vld [vmem:[%s7967_s3 + $0x68] sm:$0xff] }
 0x14f   :  { %v164_v22 = vpop.f32.mrf.mxu0  ;;  %1354 = vmatpush1.msra.mxu1 %v1320_v21  ;;  %v1310_v21 = vld [vmem:[%s7967_s3 + $0x18] sm:$0xff] }
 0x150   :  { %v236_v30 = vadd.f32 %v235_v56, %v164_v22  ;;  %1355 = vmatprep.subr.mxu1 %v5999_v16 }
 0x151   :  { %v166_v23 = vpop.f32.mrf.mxu0 }
 0x152   :  { %v238_v32 = vadd.f32 %v237_v60, %v166_v23 }
 0x153   :  { %v6409_v24 = vpop.f32.mrf.mxu0 }
 0x155   :  { %v172_v25 = vpop.f32.mrf.mxu0 }
 0x156   :  { %v244_v37 = vadd.f32 %v243_v5, %v172_v25  ;;  %v1319_v25 = vld [vmem:[%s7967_s3 + $0x60] sm:$0xff] }
 0x157   :  { %v174_v26 = vpop.f32.mrf.mxu0  ;;  %1356 = vmatpush1.msra.mxu1 %v1319_v25 }
 0x158   :  { %v246_v39 = vadd.f32 %v245_v11, %v174_v26  ;;  %1357 = vmatprep.subr.mxu1 %v5999_v16 }
 0x159   :  { %v176_v27 = vpop.f32.mrf.mxu0 }
 0x15b   :  { %v177_v29 = vpop.f32.mrf.mxu0 }
 0x15d   :  { %v324_v6 = vpop.f32.mrf.mxu0 }
 0x15e   :  { %v341_v31 = vadd.f32 %v324_v6, %v234_v28  ;;  %v1318_v28 = vld [vmem:[%s7967_s3 + $0x58] sm:$0xff]  ;;  %v1317_v6 = vld [vmem:[%s7967_s3 + $0x50] sm:$0xff] }
 0x15f   :  { %v326_v33 = vpop.f32.mrf.mxu0  ;;  %1358 = vmatpush1.msra.mxu1 %v1318_v28 }
 0x160   :  { %v342_v34 = vadd.f32 %v326_v33, %v236_v30  ;;  %1359 = vmatprep.subr.mxu1 %v5999_v16 }
 0x161   :  { %v328_v35 = vpop.f32.mrf.mxu0  ;;  %1360 = vmatpush1.msra.mxu1 %v1317_v6 }
 0x162   :  { %v343_v36 = vadd.f32 %v328_v35, %v238_v32  ;;  %v1316_v32 = vld [vmem:[%s7967_s3 + $0x48] sm:$0xff]  ;;  %1361 = vmatprep.subr.mxu1 %v5999_v16  ;;  %v1314_v35 = vld [vmem:[%s7967_s3 + $0x38] sm:$0xff] }
 0x163   :  { %v6411_v38 = vpop.f32.mrf.mxu0  ;;  %1362 = vmatpush1.msra.mxu1 %v1316_v32 }
 0x164   :  { %1363 = vmatprep.subr.mxu1 %v5999_v16 }
 0x165   :  { %v334_v40 = vpop.f32.mrf.mxu0 }
 0x166   :  { %v345_v41 = vadd.f32 %v334_v40, %v244_v37  ;;  %v240_v37 = vadd.f32 %v6385_v1, %v6409_v24  ;;  %v1040_v1 = vpop.permute.xlu0 %1039 }
 0x167   :  { %v336_v42 = vpop.f32.mrf.mxu0 }
 0x168   :  { %v346_v43 = vadd.f32 %v336_v42, %v246_v39  ;;  %v344_v39 = vadd.f32 %v6411_v38, %v240_v37 }
 0x169   :  { %v338_v44 = vpop.f32.mrf.mxu0 }
 0x16b   :  { %v339_v45 = vpop.f32.mrf.mxu0 }
 0x175   :  { %v481_v46 = vpop.f32.mrf.mxu1 }
 0x176   :  { %v498_v47 = vadd.f32 %v481_v46, %v341_v31 }
 0x177   :  { %v483_v48 = vpop.f32.mrf.mxu1 }
 0x178   :  { %v499_v49 = vadd.f32 %v483_v48, %v342_v34  ;;  %v1315_v34 = vld [vmem:[%s7967_s3 + $0x40] sm:$0xff] }
 0x179   :  { %v485_v50 = vpop.f32.mrf.mxu1  ;;  %1364 = vmatpush1.msra.mxu1 %v1315_v34  ;;  %v1307_v34 = vld [vmem:[%s7967_s3] sm:$0xff] }
 0x17a   :  { %v587_v51 = vpop.f32.mrf.mxu0  ;;  %v500_v52 = vadd.f32 %v485_v50, %v343_v36  ;;  %1365 = vmatprep.subr.mxu1 %v5999_v16  ;;  %v1313_v36 = vld [vmem:[%s7967_s3 + $0x30] sm:$0xff] }
 0x17b   :  { %v6413_v53 = vadd.f32 %v587_v51, %v498_v47  ;;  %v6415_v54 = vpop.f32.mrf.mxu1  ;;  %1366 = vmatpush1.msra.mxu1 %v1314_v35 }
 0x17c   :  { %v589_v55 = vpop.f32.mrf.mxu0  ;;  %1367 = vmatprep.subr.mxu1 %v5999_v16  ;;  %v501_v40 = vadd.f32 %v6415_v54, %v344_v39 }
 0x17d   :  { %v6417_v56 = vadd.f32 %v589_v55, %v499_v49  ;;  %v491_v57 = vpop.f32.mrf.mxu1  ;;  %1368 = vmatpush1.msra.mxu1 %v1313_v36 }
 0x17e   :  { %v591_v58 = vpop.f32.mrf.mxu0  ;;  %v502_v59 = vadd.f32 %v491_v57, %v345_v41  ;;  %1369 = vmatprep.subr.mxu1 %v5999_v16 }
 0x17f   :  { %v6419_v60 = vadd.f32 %v591_v58, %v500_v52  ;;  %v493_v61 = vpop.f32.mrf.mxu1 }
 0x180   :  { %v6421_v62 = vpop.f32.mrf.mxu0  ;;  %v503_v63 = vadd.f32 %v493_v61, %v346_v43 }
 0x181   :  { %v495_v0 = vpop.f32.mrf.mxu1  ;;  %v607_v46 = vadd.f32 %v6421_v62, %v501_v40 }
 0x182   :  { %v597_v2 = vpop.f32.mrf.mxu0 }
 0x183   :  { %v6423_v3 = vadd.f32 %v597_v2, %v502_v59  ;;  %v496_v4 = vpop.f32.mrf.mxu1 }
 0x184   :  { %v599_v5 = vpop.f32.mrf.mxu0  ;;  %v1312_v4 = vld [vmem:[%s7967_s3 + $0x28] sm:$0xff] }
 0x185   :  { %v6425_v7 = vadd.f32 %v599_v5, %v503_v63  ;;  %1370 = vmatpush1.msra.mxu1 %v1312_v4 }
 0x186   :  { %v601_v8 = vpop.f32.mrf.mxu0  ;;  %1371 = vmatprep.subr.mxu1 %v5999_v16 }
 0x188   :  { %v602_v9 = vpop.f32.mrf.mxu0 }
 0x199   :  { %v693_v10 = vpop.f32.mrf.mxu1 }
 0x19a   :  { %v710_v41 = vadd.f32 %v693_v10, %v6413_v53 }
 0x19b   :  { %v695_v11 = vpop.f32.mrf.mxu1 }
 0x19c   :  { %v711_v43 = vadd.f32 %v695_v11, %v6417_v56  ;;  %v1045_v56 = vpop.permute.xlu1 %1044 }
 0x19d   :  { %v697_v12 = vpop.f32.mrf.mxu1 }
 0x19e   :  { %v799_v13 = vpop.f32.mrf.mxu0  ;;  %v712_v47 = vadd.f32 %v697_v12, %v6419_v60 }
 0x19f   :  { %v699_v14 = vpop.f32.mrf.mxu1  ;;  %v816_v44 = vadd.f32 %v799_v13, %v710_v41  ;;  %v1334_v41 = vld [vmem:[%s7967_s3 + $0xd8] sm:$0x1] }
 0x1a0   :  { %v801_v15 = vpop.f32.mrf.mxu0  ;;  %v713_v24 = vadd.f32 %v699_v14, %v607_v46 }
 0x1a1   :  { %v703_v19 = vpop.f32.mrf.mxu1  ;;  %v817_v48 = vadd.f32 %v801_v15, %v711_v43  ;;  %v1332_v43 = vld [vmem:[%s7967_s3 + $0xc8] sm:$0xff] }
 0x1a2   :  { %v803_v20 = vpop.f32.mrf.mxu0  ;;  %v714_v53 = vadd.f32 %v703_v19, %v6423_v3  ;;  %v1311_v3 = vld [vmem:[%s7967_s3 + $0x20] sm:$0xff] }
 0x1a3   :  { %v705_v22 = vpop.f32.mrf.mxu1  ;;  %v818_v38 = vadd.f32 %v803_v20, %v712_v47  ;;  %1372 = vmatpush1.msra.mxu1 %v1311_v3  ;;  %v1050_v20 = vpop.permute.xlu1 %1049  ;;  %v1329_v47 = vld [vmem:[%s7967_s3 + $0xb0] sm:$0xff] }
 0x1a4   :  { %v805_v23 = vpop.f32.mrf.mxu0  ;;  %v715_v63 = vadd.f32 %v705_v22, %v6425_v7  ;;  %1373 = vmatprep.subr.mxu1 %v5999_v16  ;;  %v1309_v22 = vld [vmem:[%s7967_s3 + $0x10] sm:$0xff] }
 0x1a5   :  { %v707_v26 = vpop.f32.mrf.mxu1  ;;  %v819_v58 = vadd.f32 %v805_v23, %v713_v24  ;;  %1374 = vmatpush1.msra.mxu1 %v1310_v21  ;;  %v1323_v24 = vld [vmem:[%s7967_s3 + $0x80] sm:$0xff] }
 0x1a6   :  { %v809_v27 = vpop.f32.mrf.mxu0  ;;  %1375 = vmatprep.subr.mxu1 %v5999_v16 }
 0x1a7   :  { %v708_v29 = vpop.f32.mrf.mxu1  ;;  %v820_v0 = vadd.f32 %v809_v27, %v714_v53  ;;  %1376 = vmatpush1.msra.mxu1 %v1309_v22 }
 0x1a8   :  { %v811_v30 = vpop.f32.mrf.mxu0  ;;  %1377 = vmatprep.subr.mxu1 %v5999_v16 }
 0x1a9   :  { %v821_v12 = vadd.f32 %v811_v30, %v715_v63 }
 0x1aa   :  { %v813_v31 = vpop.f32.mrf.mxu0 }
 0x1ac   :  { %v814_v33 = vpop.f32.mrf.mxu0 }
 0x1ad   :  { %v1308_v33 = vld [vmem:[%s7967_s3 + $0x8] sm:$0xff] }
 0x1ae   :  { %1378 = vmatpush1.msra.mxu1 %v1308_v33 }
 0x1af   :  { %1379 = vmatprep.subr.mxu1 %v5999_v16 }
 0x1b0   :  { %1380 = vmatpush1.msra.mxu1 %v1307_v34 }
 0x1b1   :  { %1389 = vmatprep.subr.mxu1 %v5999_v16 }
 0x1b2   :  { %4787 = vmatpush2.msk.msra.mxu1 %vm1345_vm10, %v1334_v41  ;;  %vm6006_vm10 = vmmov 0  }
 0x1b3   :  { %1391 = vmatprep.subr.mxu1 %v5999_v16 }
 0x1bd   :  { %v905_v42 = vpop.f32.mrf.mxu1 }
 0x1be   :  { %v922_v49 = vadd.f32 %v905_v42, %v816_v44  ;;  %v1333_v42 = vld [vmem:[%s7967_s3 + $0xd0] sm:$0xff]  ;;  %v1331_v44 = vld [vmem:[%s7967_s3 + $0xc0] sm:$0xff] }
 0x1bf   :  { %v907_v45 = vpop.f32.mrf.mxu1  ;;  %1392 = vmatpush2.msra.mxu1 %v1333_v42 }
 0x1c0   :  { %v923_v52 = vadd.f32 %v907_v45, %v817_v48  ;;  %1393 = vmatprep.subr.mxu1 %v5999_v16  ;;  %v1330_v45 = vld [vmem:[%s7967_s3 + $0xb8] sm:$0xff]  ;;  %v1328_v48 = vld [vmem:[%s7967_s3 + $0xa8] sm:$0xff] }
 0x1c1   :  { %v909_v50 = vpop.f32.mrf.mxu1  ;;  %1394 = vmatpush2.msra.mxu1 %v1332_v43 }
 0x1c2   :  { %v1011_v51 = vpop.f32.mrf.mxu0  ;;  %v924_v59 = vadd.f32 %v909_v50, %v818_v38  ;;  %1395 = vmatprep.subr.mxu1 %v5999_v16  ;;  %v1326_v50 = vld [vmem:[%s7967_s3 + $0x98] sm:$0xff] }
 0x1c3   :  { %v1028_v54 = vadd.f32 %v1011_v51, %v922_v49  ;;  %v911_v55 = vpop.f32.mrf.mxu1  ;;  %1396 = vmatpush2.msra.mxu1 %v1331_v44  ;;  %v1327_v49 = vld [vmem:[%s7967_s3 + $0xa0] sm:$0xff]  ;;  %v1325_v51 = vld [vmem:[%s7967_s3 + $0x90] sm:$0xff] }
 0x1c4   :  { %v1013_v57 = vpop.f32.mrf.mxu0  ;;  %v925_v5 = vadd.f32 %v911_v55, %v819_v58  ;;  %1397 = vmatprep.subr.mxu1 %v5999_v16 }
 0x1c5   :  { %v1029_v61 = vadd.f32 %v1013_v57, %v923_v52  ;;  %v6477_v62 = vadd.f32 %v1040_v1, %v1028_v54  ;;  %v915_v60 = vpop.f32.mrf.mxu1  ;;  %1398 = vmatpush2.msra.mxu1 %v1330_v45 }
 0x1c6   :  { %v1015_v2 = vpop.f32.mrf.mxu0  ;;  %v926_v14 = vadd.f32 %v915_v60, %v820_v0  ;;  %1399 = vmatprep.subr.mxu1 %v5999_v16 }
 0x1c7   :  { %v1053_v8 = vadd.f32 %v1040_v1, %v1029_v61  ;;  %v1058_v9 = vmax.f32 %v6477_v62, 0.0  ;;  %v1030_v10 = vadd.f32 %v1015_v2, %v924_v59  ;;  %v917_v11 = vpop.f32.mrf.mxu1  ;;  %1400 = vmatpush2.msra.mxu1 %v1329_v47  ;;  %v1324_v1 = vld [vmem:[%s7967_s3 + $0x88] sm:$0xff]  ;;  %s6005_s3 = smov 113  }
 0x1c8   :  { %v1017_v7 = vpop.f32.mrf.mxu0  ;;  %v927_v23 = vadd.f32 %v917_v11, %v821_v12  ;;  %1401 = vmatprep.subr.mxu1 %v5999_v16 }
 0x1c9   :  { %v1059_v13 = vmax.f32 %v1053_v8, 0.0  ;;  %v6488_v15 = vadd.f32 %v1045_v56, %v1030_v10  ;;  %v1031_v17 = vadd.f32 %v1017_v7, %v925_v5  ;;  %v919_v18 = vpop.f32.mrf.mxu1  ;;  %1402 = vmatpush2.msra.mxu1 %v1328_v48 }
 0x1ca   :  { %v1021_v19 = vpop.f32.mrf.mxu0  ;;  %1403 = vmatprep.subr.mxu1 %v5999_v16 }
 0x1cb   :  { %1066 = vst.msk [vmem:[#allocation2 + $0x8] sm:$0xff] %vm1065_vm9, %v1059_v13  ;;  %v1060_v25 = vmax.f32 %v6488_v15, 0.0  ;;  %v1055_v26 = vadd.f32 %v1045_v56, %v1031_v17  ;;  %v1032_v27 = vadd.f32 %v1021_v19, %v926_v14  ;;  %v920_v28 = vpop.f32.mrf.mxu1  ;;  %1404 = vmatpush2.msra.mxu1 %v1327_v49 }
 0x1cc   :  { %v1023_v29 = vpop.f32.mrf.mxu0  ;;  %1405 = vmatprep.subr.mxu1 %v5999_v16 }
 0x1cd   :  { %v1061_v30 = vmax.f32 %v1055_v26, 0.0  ;;  %v1056_v6 = vadd.f32 %v1050_v20, %v1032_v27  ;;  %v1033_v31 = vadd.f32 %v1023_v29, %v927_v23  ;;  %v5560_v46 = vpack.i.bf16 %v1060_v25, %v1058_v9  ;;  %1406 = vmatpush2.msra.mxu1 %v1326_v50 }
 0x1ce   :  { %v1025_v32 = vpop.f32.mrf.mxu0  ;;  %1407 = vmatprep.subr.mxu1 %v5999_v16 }
 0x1cf   :  { %1068 = vst.msk [vmem:[#allocation2 + $0x18] sm:$0xff] %vm1065_vm9, %v1061_v30  ;;  %v6508_v35 = vmax.f32 %v1056_v6, 0.0  ;;  %v1057_v36 = vadd.f32 %v1050_v20, %v1033_v31  ;;  %1408 = vmatpush2.msra.mxu1 %v1325_v51 }
 0x1d0   :  { %v1026_v37 = vpop.f32.mrf.mxu0  ;;  %1409 = vmatprep.subr.mxu1 %v5999_v16 }
 0x1d1   :  { %v1063_v39 = vmax.f32 %v1057_v36, 0.0  ;;  %1410 = vmatpush2.msra.mxu1 %v1324_v1 }
 0x1d2   :  { %v6511_v40 = vld [vmem:[#allocation2 + $0x8] sm:$0xff]  ;;  %1411 = vmatprep.subr.mxu1 %v5999_v16 }
 0x1d3   :  { %1070 = vst.msk [vmem:[#allocation2 + $0x28] sm:$0xff] %vm1065_vm9, %v1063_v39  ;;  %1141 = vrot.lane.b32.xlu0 %v6511_v40, %s5993_s30  ;;  %1085 = vrot.lane.b32.xlu1 %v6511_v40, %s5990_s29  ;;  %vm2874_vm9 = vcmask 138240  }
 0x1d4   :  { %1412 = vmatpush2.msra.mxu1 %v1323_v24 }
 0x1d6   :  { %v6590_v38 = vld [vmem:[#allocation2 + $0x18] sm:$0xff] }
 0x1d7   :  { %1197 = vrot.lane.b32.xlu0 %v6511_v40, %s5995_s26  ;;  %1113 = vrot.lane.b32.xlu1 %v6511_v40, %s5992_s23 }
 0x1da   :  { %v6620_v52 = vld [vmem:[#allocation2 + $0x28] sm:$0xff] }
 0x1db   :  { %1253 = vrot.lane.b32.xlu0 %v6511_v40, %s5997_s28  ;;  %1169 = vrot.lane.b32.xlu1 %v6511_v40, %s5994_s18 }
 0x1df   :  { %1225 = vrot.lane.b32.xlu1 %v6511_v40, %s5996_s25  ;;  %5561 = vrot.lane.b32.xlu0 %v5560_v46, %s5990_s29 }
 0x1e3   :  { %1281 = vrot.lane.b32.xlu1 %v6511_v40, %s5998_s0  ;;  %5566 = vrot.lane.b32.xlu0 %v5560_v46, %s5992_s23 }
 0x1e7   :  { %5571 = vrot.lane.b32.xlu1 %v5560_v46, %s5993_s30  ;;  %5576 = vrot.lane.b32.xlu0 %v5560_v46, %s5994_s18 }
 0x1eb   :  { %5581 = vrot.lane.b32.xlu1 %v5560_v46, %s5995_s26  ;;  %5586 = vrot.lane.b32.xlu0 %v5560_v46, %s5996_s25 }
 0x1ef   :  { %5591 = vrot.lane.b32.xlu1 %v5560_v46, %s5997_s28  ;;  %5596 = vrot.lane.b32.xlu0 %v5560_v46, %s5998_s0 }
 0x1f3   :  { %1117 = vrot.lane.b32.xlu1 %v6590_v38, %s5992_s23  ;;  %1089 = vrot.lane.b32.xlu0 %v6590_v38, %s5990_s29 }
 0x1f7   :  { %1173 = vrot.lane.b32.xlu1 %v6590_v38, %s5994_s18  ;;  %1145 = vrot.lane.b32.xlu0 %v6590_v38, %s5993_s30 }
 0x1fb   :  { %1229 = vrot.lane.b32.xlu1 %v6590_v38, %s5996_s25  ;;  %1201 = vrot.lane.b32.xlu0 %v6590_v38, %s5995_s26 }
 0x1ff   :  { %1285 = vrot.lane.b32.xlu1 %v6590_v38, %s5998_s0  ;;  %1257 = vrot.lane.b32.xlu0 %v6590_v38, %s5997_s28 }
 0x203   :  { %1119 = vrot.lane.b32.xlu1 %v6508_v35, %s5992_s23  ;;  %1091 = vrot.lane.b32.xlu0 %v6508_v35, %s5990_s29 }
 0x207   :  { %1175 = vrot.lane.b32.xlu1 %v6508_v35, %s5994_s18  ;;  %1147 = vrot.lane.b32.xlu0 %v6508_v35, %s5993_s30 }
 0x20b   :  { %1231 = vrot.lane.b32.xlu1 %v6508_v35, %s5996_s25  ;;  %1203 = vrot.lane.b32.xlu0 %v6508_v35, %s5995_s26 }
 0x20f   :  { %1093 = vrot.lane.b32.xlu1 %v6620_v52, %s5990_s29  ;;  %1259 = vrot.lane.b32.xlu0 %v6508_v35, %s5997_s28 }
 0x213   :  { %1149 = vrot.lane.b32.xlu1 %v6620_v52, %s5993_s30  ;;  %1121 = vrot.lane.b32.xlu0 %v6620_v52, %s5992_s23 }
 0x217   :  { %1205 = vrot.lane.b32.xlu1 %v6620_v52, %s5995_s26  ;;  %1177 = vrot.lane.b32.xlu0 %v6620_v52, %s5994_s18  ;;  %s6000_s18 = smov 121   ;;  %s6001_s26 = smov 120  }
 0x21b   :  { %1261 = vrot.lane.b32.xlu1 %v6620_v52, %s5997_s28  ;;  %1233 = vrot.lane.b32.xlu0 %v6620_v52, %s5996_s25 }
 0x21f   :  { %1289 = vrot.lane.b32.xlu1 %v6620_v52, %s5998_s0  ;;  %1287 = vrot.lane.b32.xlu0 %v6508_v35, %s5998_s0 }
 0x245   :  { %v1142_v54 = vpop.permute.xlu0 %1141  ;;  %v1086_v55 = vpop.permute.xlu1 %1085 }
 0x246   :  { %v1106_v53 = vmax.f32 %v6511_v40, %v1086_v55 }
 0x249   :  { %v1198_v57 = vpop.permute.xlu0 %1197  ;;  %v1114_v56 = vpop.permute.xlu1 %1113 }
 0x24a   :  { %v1134_v58 = vmax.f32 %v1106_v53, %v1114_v56 }
 0x24c   :  { %v1162_v59 = vmax.f32 %v1134_v58, %v1142_v54 }
 0x24d   :  { %v1254_v61 = vpop.permute.xlu0 %1253  ;;  %v1170_v60 = vpop.permute.xlu1 %1169 }
 0x24e   :  { %v1190_v63 = vmax.f32 %v1162_v59, %v1170_v60 }
 0x250   :  { %v1218_v0 = vmax.f32 %v1190_v63, %v1198_v57 }
 0x251   :  { %v1226_v2 = vpop.permute.xlu1 %1225  ;;  %v5562_v4 = vpop.permute.xlu0 %5561 }
 0x252   :  { %v1246_v3 = vmax.f32 %v1218_v0, %v1226_v2  ;;  %v5563_v5 = vunpack.i.l.bf16 %v5562_v4  ;;  %v5564_v40 = vunpack.i.h.bf16 %v5562_v4 }
 0x254   :  { %v1274_v8 = vmax.f32 %v1246_v3, %v1254_v61  ;;  %v1096_v12 = vsel %vm111_vm1, %v5563_v5, %v1086_v55 }
 0x255   :  { %v1282_v10 = vpop.permute.xlu1 %1281  ;;  %v5567_v11 = vpop.permute.xlu0 %5566  ;;  %v1105_v17 = vmax.f32 %v1058_v9, %v1096_v12 }
 0x256   :  { %v1302_v7 = vmax.f32 %v1274_v8, %v1282_v10  ;;  %v5568_v13 = vunpack.i.l.bf16 %v5567_v11  ;;  %v5569_v45 = vunpack.i.h.bf16 %v5567_v11 }
 0x258   :  { %v1124_v14 = vsel %vm274_vm2, %v5568_v13, %v1114_v56  ;;  %4788 = vmatprep.mubr.msk.f32.mxu1 %vm1335_vm11, %v1302_v7 }
 0x259   :  { %v5572_v18 = vpop.permute.xlu1 %5571  ;;  %v5577_v19 = vpop.permute.xlu0 %5576  ;;  %v1133_v22 = vmax.f32 %v1105_v17, %v1124_v14 }
 0x25a   :  { %v5573_v20 = vunpack.i.l.bf16 %v5572_v18  ;;  %v5578_v21 = vunpack.i.l.bf16 %v5577_v19  ;;  %v5574_v51 = vunpack.i.h.bf16 %v5572_v18 }
 0x25c   :  { %v1152_v23 = vsel %vm428_vm3, %v5573_v20, %v1142_v54  ;;  %v1180_v29 = vsel %vm534_vm4, %v5578_v21, %v1170_v60 }
 0x25d   :  { %v1161_v26 = vmax.f32 %v1133_v22, %v1152_v23  ;;  %v5582_v27 = vpop.permute.xlu1 %5581  ;;  %v5587_v28 = vpop.permute.xlu0 %5586 }
 0x25e   :  { %v5583_v30 = vunpack.i.l.bf16 %v5582_v27  ;;  %v5588_v6 = vunpack.i.l.bf16 %v5587_v28  ;;  %v5589_v0 = vunpack.i.h.bf16 %v5587_v28 }
 0x25f   :  { %v1189_v31 = vmax.f32 %v1161_v26, %v1180_v29 }
 0x260   :  { %v1208_v32 = vsel %vm640_vm5, %v5583_v30, %v1198_v57  ;;  %v1236_v34 = vsel %vm746_vm6, %v5588_v6, %v1226_v2  ;;  %v5579_v57 = vunpack.i.h.bf16 %v5577_v19 }
 0x261   :  { %v1217_v33 = vmax.f32 %v1189_v31, %v1208_v32  ;;  %v5592_v62 = vpop.permute.xlu1 %5591  ;;  %v5597_v9 = vpop.permute.xlu0 %5596 }
 0x262   :  { %v5593_v36 = vunpack.i.l.bf16 %v5592_v62  ;;  %v5598_v37 = vunpack.i.l.bf16 %v5597_v9  ;;  %v5594_v5 = vunpack.i.h.bf16 %v5592_v62  ;;  %v5599_v13 = vunpack.i.h.bf16 %v5597_v9 }
 0x263   :  { %v1245_v39 = vmax.f32 %v1217_v33, %v1236_v34 }
 0x264   :  { %v1264_v41 = vsel %vm852_vm7, %v5593_v36, %v1254_v61  ;;  %v1292_v46 = vsel %vm958_vm8, %v5598_v37, %v1282_v10  ;;  %v5584_v61 = vunpack.i.h.bf16 %v5582_v27 }
 0x265   :  { %v1273_v42 = vmax.f32 %v1245_v39, %v1264_v41  ;;  %v1118_v43 = vpop.permute.xlu1 %1117  ;;  %v1090_v44 = vpop.permute.xlu0 %1089 }
 0x266   :  { %v1097_v47 = vsel %vm111_vm1, %v5564_v40, %v1090_v44  ;;  %v1108_v48 = vmax.f32 %v6590_v38, %v1090_v44  ;;  %v1125_v1 = vsel %vm274_vm2, %v5569_v45, %v1118_v43 }
 0x267   :  { %v1301_v49 = vmax.f32 %v1273_v42, %v1292_v46  ;;  %v1107_v50 = vmax.f32 %v1060_v25, %v1097_v47 }
 0x268   :  { %v1136_v24 = vmax.f32 %v1108_v48, %v1118_v43 }
 0x269   :  { %v1174_v54 = vpop.permute.xlu1 %1173  ;;  %v1146_v55 = vpop.permute.xlu0 %1145  ;;  %v1135_v53 = vmax.f32 %v1107_v50, %v1125_v1  ;;  %1414 = vmatmul.mubr.f32.vlgmr.msra.gmra.mxu1 %v1301_v49 }
 0x26a   :  { %v1153_v56 = vsel %vm428_vm3, %v5574_v51, %v1146_v55  ;;  %v1164_v58 = vmax.f32 %v1136_v24, %v1146_v55  ;;  %v1181_v38 = vsel %vm534_vm4, %v5579_v57, %v1174_v54 }
 0x26b   :  { %v1163_v59 = vmax.f32 %v1135_v53, %v1153_v56 }
 0x26c   :  { %v1192_v60 = vmax.f32 %v1164_v58, %v1174_v54 }
 0x26d   :  { %v1230_v63 = vpop.permute.xlu1 %1229  ;;  %v1202_v15 = vpop.permute.xlu0 %1201  ;;  %v1191_v25 = vmax.f32 %v1163_v59, %v1181_v38 }
 0x26e   :  { %v1209_v2 = vsel %vm640_vm5, %v5584_v61, %v1202_v15  ;;  %v1220_v4 = vmax.f32 %v1192_v60, %v1202_v15  ;;  %v1237_v8 = vsel %vm746_vm6, %v5589_v0, %v1230_v63  ;;  %v5630_v15 = vld [vmem:[%s7968_s4] sm:$0xff]  }
 0x26f   :  { %v1219_v3 = vmax.f32 %v1191_v25, %v1209_v2  ;;  %5222 = vmatprep.mubr.msk.bf16.mxu0 %vm1460_vm13, %v5630_v15 }
 0x270   :  { %v1248_v10 = vmax.f32 %v1220_v4, %v1230_v63 }
 0x271   :  { %v1286_v11 = vpop.permute.xlu1 %1285  ;;  %v1258_v12 = vpop.permute.xlu0 %1257  ;;  %v1247_v7 = vmax.f32 %v1219_v3, %v1237_v8 }
 0x272   :  { %v1265_v14 = vsel %vm852_vm7, %v5594_v5, %v1258_v12  ;;  %v1276_v17 = vmax.f32 %v1248_v10, %v1258_v12  ;;  %v1293_v19 = vsel %vm958_vm8, %v5599_v13, %v1286_v11  ;;  %v5631_v12 = vld [vmem:[%s7968_s4 + $0x8] ss:$0 sps:$4 sm:$0xff]   ;;  %v2123_v13 = vld [vmem:[%s7969_s5] sm:$0xff] }
 0x273   :  { %v1275_v18 = vmax.f32 %v1247_v7, %v1265_v14  ;;  %v5632_v7 = vld [vmem:[%s7968_s4 + $0x18] sm:$0xff]   ;;  %v2125_v14 = vld [vmem:[%s7969_s5 + $0x10] sm:$0xff] }
 0x274   :  { %v1304_v20 = vmax.f32 %v1276_v17, %v1286_v11  ;;  %v5634_v11 = vld [vmem:[%s7968_s4 + $0xc] sm:$0xff]  }
 0x275   :  { %v1120_v21 = vpop.permute.xlu1 %1119  ;;  %v1092_v22 = vpop.permute.xlu0 %1091  ;;  %v1303_v23 = vmax.f32 %v1275_v18, %v1293_v19  ;;  %v2124_v17 = vld [vmem:[%s7969_s5 + $0x8] sm:$0xff] }
 0x276   :  { %4789 = vmatprep.mubr.msk.f32.mxu1 %vm1335_vm11, %v1304_v20 }
 0x277   :  { %1419 = vmatmul.mubr.f32.gmra.mxu1 %v1303_v23 }
 0x279   :  { %v1176_v26 = vpop.permute.xlu1 %1175  ;;  %v1148_v27 = vpop.permute.xlu0 %1147 }
 0x27d   :  { %v1232_v28 = vpop.permute.xlu1 %1231  ;;  %v1204_v29 = vpop.permute.xlu0 %1203 }
 0x281   :  { %v1094_v30 = vpop.permute.xlu1 %1093  ;;  %v1260_v6 = vpop.permute.xlu0 %1259 }
 0x282   :  { %v1098_v31 = vsel %vm111_vm1, %v1092_v22, %v1094_v30  ;;  %v1110_v32 = vmax.f32 %v6620_v52, %v1094_v30 }
 0x283   :  { %v1109_v33 = vmax.f32 %v6508_v35, %v1098_v31 }
 0x285   :  { %v1150_v62 = vpop.permute.xlu1 %1149  ;;  %v1122_v9 = vpop.permute.xlu0 %1121 }
 0x286   :  { %v1126_v34 = vsel %vm274_vm2, %v1120_v21, %v1122_v9  ;;  %v1138_v36 = vmax.f32 %v1110_v32, %v1122_v9  ;;  %v1154_v39 = vsel %vm428_vm3, %v1148_v27, %v1150_v62  ;;  %v5635_v27 = vld [vmem:[%s7968_s4 + $0x24] sm:$0xff]   ;;  %v5636_v32 = vld [vmem:[%s7968_s4 + $0x14] ss:$0 sps:$4 sm:$0xff]  }
 0x287   :  { %v1137_v37 = vmax.f32 %v1109_v33, %v1126_v34  ;;  %v5637_v33 = vld [vmem:[%s7968_s4 + $0x2c] ss:$0 sps:$4 sm:$0xff]   ;;  %v5638_v34 = vld [vmem:[%s7968_s4 + $0x3c] sm:$0xff]  }
 0x288   :  { %v1166_v40 = vmax.f32 %v1138_v36, %v1150_v62  ;;  %v5639_v36 = vld [vmem:[%s7968_s4 + $0x30] sm:$0xff]  }
 0x289   :  { %v1206_v41 = vpop.permute.xlu1 %1205  ;;  %v1165_v42 = vmax.f32 %v1137_v37, %v1154_v39  ;;  %v1178_v43 = vpop.permute.xlu0 %1177 }
 0x28a   :  { %v1182_v44 = vsel %vm534_vm4, %v1176_v26, %v1178_v43  ;;  %v1194_v45 = vmax.f32 %v1166_v40, %v1178_v43  ;;  %v1210_v52 = vsel %vm640_vm5, %v1204_v29, %v1206_v41  ;;  %v5633_v26 = vld [vmem:[%s7968_s4 + $0x20] ss:$0 sps:$4 sm:$0xff]   ;;  %v5641_v43 = vld [vmem:[%s7968_s4 + $0x44] ss:$0 sps:$4 sm:$0xff]  }
 0x28b   :  { %v1193_v46 = vmax.f32 %v1165_v42, %v1182_v44 }
 0x28c   :  { %v1222_v47 = vmax.f32 %v1194_v45, %v1206_v41  ;;  %v5640_v41 = vld [vmem:[%s7968_s4 + $0x38] ss:$0 sps:$4 sm:$0xff]   ;;  %v5642_v45 = vld [vmem:[%s7968_s4 + $0x48] sm:$0xff]  }
 0x28d   :  { %v1262_v35 = vpop.permute.xlu1 %1261  ;;  %v1221_v48 = vmax.f32 %v1193_v46, %v1210_v52  ;;  %v1234_v49 = vpop.permute.xlu0 %1233  ;;  %v5643_v46 = vld [vmem:[%s7968_s4 + $0x54] sm:$0xff]  }
 0x28e   :  { %v1238_v50 = vsel %vm746_vm6, %v1232_v28, %v1234_v49  ;;  %v1250_v51 = vmax.f32 %v1222_v47, %v1234_v49  ;;  %v1266_v24 = vsel %vm852_vm7, %v1260_v6, %v1262_v35  ;;  %v5644_v49 = vld [vmem:[%s7968_s4 + $0x50] ss:$0 sps:$4 sm:$0xff]  }
 0x28f   :  { %v1249_v1 = vmax.f32 %v1221_v48, %v1238_v50  ;;  %v5645_v50 = vld [vmem:[%s7968_s4 + $0x5c] ss:$0 sps:$4 sm:$0xff]  }
 0x290   :  { %v1278_v54 = vmax.f32 %v1250_v51, %v1262_v35  ;;  %v5646_v51 = vld [vmem:[%s7968_s4 + $0x60] sm:$0xff]  }
 0x291   :  { %v1290_v55 = vpop.permute.xlu1 %1289  ;;  %v1277_v53 = vmax.f32 %v1249_v1, %v1266_v24  ;;  %v1288_v57 = vpop.permute.xlu0 %1287 }
 0x292   :  { %v1306_v56 = vmax.f32 %v1278_v54, %v1290_v55  ;;  %v1294_v58 = vsel %vm958_vm8, %v1288_v57, %v1290_v55  ;;  %v5647_v54 = vld [vmem:[%s7968_s4 + $0x68] ss:$0 sps:$4 sm:$0xff]  }
 0x293   :  { %v1305_v59 = vmax.f32 %v1277_v53, %v1294_v58 }
 0x294   :  { %4790 = vmatprep.mubr.msk.f32.mxu1 %vm1335_vm11, %v1306_v56  ;;  %vm4667_vm11 = vcmask 7168  }
 0x295   :  { %1424 = vmatmul.mubr.f32.gmra.mxu1 %v1305_v59 }
 0x296   :  { %5214 = vmatprep.mubr.msk.bf16.mxu1 %vm1460_vm13, %v5634_v11 }
 0x329   :  { %v1415_v61 = vpop.f32.mrf.mxu1 }
 0x32a   :  { %1430 = vst.msk [vmem:[#allocation3] sm:$0xff] %vm1429_vm12, %v1415_v61 }
 0x32b   :  { %v1417_v38 = vpop.f32.mrf.mxu1 }
 0x331   :  { %v1436_v25 = vld [vmem:[#allocation3] sm:$0xff] }
 0x337   :  { %v1420_v60 = vpop.f32.mrf.mxu1 }
 0x338   :  { %1431 = vst.msk [vmem:[#allocation3 + $0x8] sm:$0xff] %vm1429_vm12, %v1420_v60 }
 0x339   :  { %v1422_v63 = vpop.f32.mrf.mxu1 }
 0x33f   :  { %v1437_v0 = vld [vmem:[#allocation3 + $0x8] sm:$0xff] }
 0x340   :  { %v1439_v2 = vpack.c.bf16 %v1437_v0, %v1436_v25 }
 0x342   :  { %1596 = vrot.lane.b32.xlu1 %v1439_v2, %s5992_s23 }
 0x346   :  { %1673 = vrot.lane.b32.xlu1 %v1439_v2, %s6000_s18 }
 0x355   :  { %v1425_v4 = vpop.f32.mrf.mxu1 }
 0x356   :  { %1432 = vst.msk [vmem:[#allocation3 + $0x10] sm:$0xff] %vm1429_vm12, %v1425_v4  ;;  %vm4645_vm12 = vcmask 4096  }
 0x357   :  { %v1427_v3 = vpop.f32.mrf.mxu1 }
 0x35d   :  { %v1438_v5 = vld [vmem:[#allocation3 + $0x10] sm:$0xff] }
 0x35e   :  { %v1440_v8 = vpack.c.bf16 %v1438_v5, %v1438_v5 }
 0x360   :  { %1752 = vrot.lane.b32.xlu1 %v1440_v8, %s6001_s26  ;;  %1598 = vrot.lane.b32.xlu0 %v1440_v8, %s5992_s23  ;;  %v1534_v10 = vsel %vm1467_vm14, %v1440_v8, 0 }
 0x361   :  { %5523 = vmatprep.subr.msk.bf16.mxu0 %vm1467_vm14, %v1440_v8 }
 0x362   :  { %5219 = vmatpush3.bf16.msra.mxu0 %v1534_v10 }
 0x363   :  { %5220 = vmatprep.subr.bf16.mxu0 %v1439_v2 }
 0x364   :  { %1750 = vrot.lane.b32.xlu1 %v1439_v2, %s6001_s26  ;;  %1675 = vrot.lane.b32.xlu0 %v1440_v8, %s6000_s18 }
 0x366   :  { %5221 = vmatpush3.bf16.msra.mxu0 %v1439_v2 }
 0x368   :  { %1906 = vrot.lane.b32.xlu1 %v1440_v8, %s6002_s24  ;;  %1457 = vrot.lane.b32.xlu0 %v1440_v8, %s5990_s29 }
 0x369   :  { %5223 = vmatmul.mubr.msk.bf16.vlgmr.msra.gmra.mxu0 %vm1460_vm13, %v5631_v12 }
 0x36a   :  { %5230 = vmatprep.mubr.msk.bf16.mxu0 %vm1460_vm13, %v5632_v7 }
 0x36c   :  { %1904 = vrot.lane.b32.xlu1 %v1439_v2, %s6002_s24  ;;  %1455 = vrot.lane.b32.xlu0 %v1439_v2, %s5990_s29 }
 0x370   :  { %2060 = vrot.lane.b32.xlu1 %v1440_v8, %s6003_s19  ;;  %1829 = vrot.lane.b32.xlu0 %v1440_v8, %s6004_s1 }
 0x374   :  { %2058 = vrot.lane.b32.xlu1 %v1439_v2, %s6003_s19  ;;  %1827 = vrot.lane.b32.xlu0 %v1439_v2, %s6004_s1 }
 0x378   :  { %2128 = vperm.xlu1 %5559, %v2123_v13   ;;  %1983 = vrot.lane.b32.xlu0 %v1440_v8, %s6005_s3 }
 0x37c   :  { %1981 = vrot.lane.b32.xlu0 %v1439_v2, %s6005_s3 }
 0x380   :  { %2138 = vperm.xlu0 %5558, %v2125_v14  }
 0x384   :  { %2133 = vperm.xlu0 %5558, %v2124_v17  }
 0x3b4   :  { %v1597_v18 = vpop.permute.xlu1 %1596 }
 0x3b8   :  { %v1674_v19 = vpop.permute.xlu1 %1673 }
 0x3d2   :  { %v1599_v20 = vpop.permute.xlu0 %1598  ;;  %v1753_v22 = vpop.permute.xlu1 %1752 }
 0x3d3   :  { %v1608_v21 = vsel %vm1467_vm14, %v1599_v20, 0  ;;  %5524 = vmatprep.subr.msk.bf16.mxu0 %vm1467_vm14, %v1599_v20  ;;  %v1762_v37 = vsel %vm1467_vm14, %v1753_v22, 0 }
 0x3d4   :  { %5227 = vmatpush3.bf16.msra.mxu0 %v1608_v21 }
 0x3d5   :  { %5228 = vmatprep.subr.bf16.mxu0 %v1597_v18 }
 0x3d6   :  { %v1676_v23 = vpop.permute.xlu0 %1675  ;;  %v1751_v6 = vpop.permute.xlu1 %1750 }
 0x3d7   :  { %v1685_v29 = vsel %vm1467_vm14, %v1676_v23, 0 }
 0x3d8   :  { %5229 = vmatpush3.bf16.msra.mxu0 %v1597_v18 }
 0x3d9   :  { %5525 = vmatprep.subr.msk.bf16.mxu0 %vm1467_vm14, %v1676_v23 }
 0x3da   :  { %v1458_v28 = vpop.permute.xlu0 %1457  ;;  %v1907_v62 = vpop.permute.xlu1 %1906 }
 0x3db   :  { %v1469_v30 = vsel %vm1467_vm14, %v1458_v28, 0  ;;  %5522 = vmatprep.subr.msk.bf16.mxu1 %vm1467_vm14, %v1458_v28  ;;  %5231 = vmatmul.mubr.msk.bf16.vlgmr.msra.gmra.mxu0 %vm1460_vm13, %v5633_v26  ;;  %v1916_v52 = vsel %vm1467_vm14, %v1907_v62, 0 }
 0x3dc   :  { %5211 = vmatpush3.bf16.msra.mxu1 %v1469_v30  ;;  %5235 = vmatpush3.bf16.msra.mxu0 %v1685_v29 }
 0x3dd   :  { %5236 = vmatprep.subr.bf16.mxu0 %v1674_v19  ;;  %5238 = vmatprep.mubr.msk.bf16.mxu0 %vm1460_vm13, %v5635_v27 }
 0x3de   :  { %v1456_v31 = vpop.permute.xlu0 %1455  ;;  %v1905_v42 = vpop.permute.xlu1 %1904 }
 0x3df   :  { %5212 = vmatprep.subr.bf16.mxu1 %v1456_v31 }
 0x3e0   :  { %5213 = vmatpush3.bf16.msra.mxu1 %v1456_v31  ;;  %5237 = vmatpush3.bf16.msra.mxu0 %v1674_v19 }
 0x3e1   :  { %5526 = vmatprep.subr.msk.bf16.mxu0 %vm1467_vm14, %v1753_v22 }
 0x3e2   :  { %v1830_v9 = vpop.permute.xlu0 %1829  ;;  %v2061_v35 = vpop.permute.xlu1 %2060 }
 0x3e3   :  { %v1839_v39 = vsel %vm1467_vm14, %v1830_v9, 0  ;;  %5215 = vmatmul.mubr.msk.bf16.vlgmr.msra.gmra.mxu1 %vm1460_vm13, %v5636_v32  ;;  %5239 = vmatmul.mubr.msk.bf16.vlgmr.msra.gmra.mxu0 %vm1460_vm13, %v5637_v33  ;;  %v2070_v1 = vsel %vm1467_vm14, %v2061_v35, 0 }
 0x3e4   :  { %5527 = vmatprep.subr.msk.bf16.mxu1 %vm1467_vm14, %v1830_v9  ;;  %5243 = vmatpush3.bf16.msra.mxu0 %v1762_v37 }
 0x3e5   :  { %5251 = vmatpush3.bf16.msra.mxu1 %v1839_v39  ;;  %5244 = vmatprep.subr.bf16.mxu0 %v1751_v6 }
 0x3e6   :  { %v1828_v40 = vpop.permute.xlu0 %1827  ;;  %5254 = vmatprep.mubr.msk.bf16.mxu1 %vm1460_vm13, %v5638_v34  ;;  %5246 = vmatprep.mubr.msk.bf16.mxu0 %vm1460_vm13, %v5639_v36  ;;  %v2059_v24 = vpop.permute.xlu1 %2058 }
 0x3e7   :  { %5252 = vmatprep.subr.bf16.mxu1 %v1828_v40 }
 0x3e8   :  { %5245 = vmatpush3.bf16.msra.mxu0 %v1751_v6 }
 0x3e9   :  { %5253 = vmatpush3.bf16.msra.mxu1 %v1828_v40  ;;  %5528 = vmatprep.subr.msk.bf16.mxu0 %vm1467_vm14, %v1907_v62 }
 0x3ea   :  { %v1984_v44 = vpop.permute.xlu0 %1983 }
 0x3eb   :  { %v1993_v47 = vsel %vm1467_vm14, %v1984_v44, 0  ;;  %5247 = vmatmul.mubr.msk.bf16.vlgmr.msra.gmra.mxu0 %vm1460_vm13, %v5640_v41  ;;  %5529 = vmatprep.subr.msk.bf16.mxu1 %vm1467_vm14, %v1984_v44 }
 0x3ec   :  { %5255 = vmatmul.mubr.msk.bf16.vlgmr.msra.gmra.mxu1 %vm1460_vm13, %v5641_v43  ;;  %5259 = vmatpush3.bf16.msra.mxu0 %v1916_v52 }
 0x3ed   :  { %5267 = vmatpush3.bf16.msra.mxu1 %v1993_v47  ;;  %5260 = vmatprep.subr.bf16.mxu0 %v1905_v42 }
 0x3ee   :  { %v1982_v48 = vpop.permute.xlu0 %1981  ;;  %5262 = vmatprep.mubr.msk.bf16.mxu0 %vm1460_vm13, %v5642_v45  ;;  %5270 = vmatprep.mubr.msk.bf16.mxu1 %vm1460_vm13, %v5643_v46 }
 0x3ef   :  { %5268 = vmatprep.subr.bf16.mxu1 %v1982_v48 }
 0x3f0   :  { %5261 = vmatpush3.bf16.msra.mxu0 %v1905_v42 }
 0x3f1   :  { %5269 = vmatpush3.bf16.msra.mxu1 %v1982_v48  ;;  %5530 = vmatprep.subr.msk.bf16.mxu0 %vm1467_vm14, %v2061_v35 }
 0x3f3   :  { %5263 = vmatmul.mubr.msk.bf16.vlgmr.msra.gmra.mxu0 %vm1460_vm13, %v5644_v49  ;;  %v2129_v35 = vpop.permute.xlu1 %2128 }
 0x3f4   :  { %5271 = vmatmul.mubr.msk.bf16.vlgmr.msra.gmra.mxu1 %vm1460_vm13, %v5645_v50  ;;  %5275 = vmatpush3.bf16.msra.mxu0 %v2070_v1 }
 0x3f5   :  { %5276 = vmatprep.subr.bf16.mxu0 %v2059_v24  ;;  %5278 = vmatprep.mubr.msk.bf16.mxu0 %vm1460_vm13, %v5646_v51 }
 0x3f8   :  { %5277 = vmatpush3.bf16.msra.mxu0 %v2059_v24 }
 0x3fb   :  { %5279 = vmatmul.mubr.msk.bf16.vlgmr.msra.gmra.mxu0 %vm1460_vm13, %v5647_v54  ;;  %v2139_v52 = vpop.permute.xlu0 %2138 }
 0x429   :  { %v5224_v55 = vpop.f32.mrf.mxu0 }
 0x42b   :  { %v1570_v53 = vpop.f32.mrf.mxu0 }
 0x42d   :  { %v5225_v57 = vpop.f32.mrf.mxu0 }
 0x42f   :  { %v1573_v56 = vpop.f32.mrf.mxu0 }
 0x49b   :  { %v5232_v58 = vpop.f32.mrf.mxu0 }
 0x49d   :  { %v1644_v59 = vpop.f32.mrf.mxu0 }
 0x49f   :  { %v5233_v61 = vpop.f32.mrf.mxu0 }
 0x4a1   :  { %v1647_v38 = vpop.f32.mrf.mxu0 }
 0x4a3   :  { %v5216_v60 = vpop.f32.mrf.mxu1  ;;  %v5240_v63 = vpop.f32.mrf.mxu0 }
 0x4a4   :  { %v1579_v0 = vadd.f32 %v5224_v55, %v5216_v60 }
 0x4a5   :  { %v1505_v15 = vpop.f32.mrf.mxu1  ;;  %v1721_v25 = vpop.f32.mrf.mxu0 }
 0x4a6   :  { %v1571_v3 = vadd.f32 %v1570_v53, %v1505_v15  ;;  %v1660_v10 = vadd.f32 %v5232_v58, %v1579_v0  ;;  %v2134_v53 = vpop.permute.xlu0 %2133  ;;  %v5649_v58 = vld [vmem:[%s7970_s6 + $0xc] sm:$0xff]   ;;  %v5652_v0 = vld [vmem:[%s7970_s6 + $0x24] sm:$0xff]  }
 0x4a7   :  { %v5217_v2 = vpop.f32.mrf.mxu1  ;;  %v5241_v4 = vpop.f32.mrf.mxu0  ;;  %5286 = vmatprep.mubr.msk.bf16.mxu1 %vm1460_vm13, %v5649_v58  ;;  %v3023_v58 = vld [vmem:[%s7972_s11 + $0x48] sm:$0xff] }
 0x4a8   :  { %v1658_v12 = vadd.f32 %v1644_v59, %v1571_v3  ;;  %v1737_v17 = vadd.f32 %v5240_v63, %v1660_v10  ;;  %v2838_v2 = vld [vmem:[%s7971_s7 + $0x10] sm:$0xff]  ;;  %v2837_v4 = vld [vmem:[%s7971_s7 + $0x8] sm:$0xff]  ;;  %v2836_v3 = vld [vmem:[%s7971_s7] sm:$0xff] }
 0x4a9   :  { %v1508_v5 = vpop.f32.mrf.mxu1  ;;  %v1724_v8 = vpop.f32.mrf.mxu0 }
 0x4aa   :  { %v1574_v7 = vadd.f32 %v1573_v56, %v1508_v5  ;;  %v1735_v20 = vadd.f32 %v1721_v25, %v1658_v12  ;;  %v5648_v56 = vld [vmem:[%s7970_s6] sm:$0xff]   ;;  %v5650_v25 = vld [vmem:[%s7970_s6 + $0x8] ss:$0 sps:$4 sm:$0xff]   ;;  %v5651_v12 = vld [vmem:[%s7970_s6 + $0x14] ss:$0 sps:$4 sm:$0xff]  }
 0x4ab   :  { %v5248_v11 = vpop.f32.mrf.mxu0  ;;  %5294 = vmatprep.mubr.msk.bf16.mxu0 %vm1460_vm13, %v5648_v56  ;;  %v3022_v56 = vld [vmem:[%s7972_s11 + $0x40] sm:$0xff] }
 0x4ac   :  { %v5256_v13 = vpop.f32.mrf.mxu1  ;;  %v1659_v21 = vadd.f32 %v1647_v38, %v1574_v7  ;;  %v1814_v22 = vadd.f32 %v5248_v11, %v1737_v17 }
 0x4ad   :  { %v1798_v14 = vpop.f32.mrf.mxu0 }
 0x4ae   :  { %v1875_v18 = vpop.f32.mrf.mxu1  ;;  %v1812_v27 = vadd.f32 %v1798_v14, %v1735_v20  ;;  %v1736_v30 = vadd.f32 %v1724_v8, %v1659_v21  ;;  %v1891_v6 = vadd.f32 %v5256_v13, %v1814_v22  ;;  %v5653_v13 = vld [vmem:[%s7970_s6 + $0x18] sm:$0xff]   ;;  %v5654_v21 = vld [vmem:[%s7970_s6 + $0x2c] ss:$0 sps:$4 sm:$0xff]   ;;  %v5655_v22 = vld [vmem:[%s7970_s6 + $0x20] ss:$0 sps:$4 sm:$0xff]  }
 0x4af   :  { %v5249_v19 = vpop.f32.mrf.mxu0 }
 0x4b0   :  { %v5257_v23 = vpop.f32.mrf.mxu1  ;;  %v1889_v33 = vadd.f32 %v1875_v18, %v1812_v27 }
 0x4b1   :  { %v1801_v26 = vpop.f32.mrf.mxu0 }
 0x4b2   :  { %v1878_v28 = vpop.f32.mrf.mxu1  ;;  %v1813_v62 = vadd.f32 %v1801_v26, %v1736_v30  ;;  %v5656_v26 = vld [vmem:[%s7970_s6 + $0x3c] sm:$0xff]  }
 0x4b3   :  { %v5264_v29 = vpop.f32.mrf.mxu0 }
 0x4b4   :  { %v5272_v31 = vpop.f32.mrf.mxu1  ;;  %v1968_v9 = vadd.f32 %v5264_v29, %v1891_v6  ;;  %v1890_v41 = vadd.f32 %v1878_v28, %v1813_v62  ;;  %v5657_v29 = vld [vmem:[%s7970_s6 + $0x30] sm:$0xff]  }
 0x4b5   :  { %v1952_v32 = vpop.f32.mrf.mxu0 }
 0x4b6   :  { %v2029_v34 = vpop.f32.mrf.mxu1  ;;  %v1966_v37 = vadd.f32 %v1952_v32, %v1889_v33  ;;  %v2045_v42 = vadd.f32 %v5272_v31, %v1968_v9  ;;  %v5658_v32 = vld [vmem:[%s7970_s6 + $0x44] ss:$0 sps:$4 sm:$0xff]   ;;  %v5659_v33 = vld [vmem:[%s7970_s6 + $0x38] ss:$0 sps:$4 sm:$0xff]   ;;  %v5660_v9 = vld [vmem:[%s7970_s6 + $0x48] sm:$0xff]  }
 0x4b7   :  { %v5265_v36 = vpop.f32.mrf.mxu0 }
 0x4b8   :  { %v5273_v39 = vpop.f32.mrf.mxu1  ;;  %v2043_v44 = vadd.f32 %v2029_v34, %v1966_v37  ;;  %v5661_v37 = vld [vmem:[%s7970_s6 + $0x54] sm:$0xff]  }
 0x4b9   :  { %v1955_v40 = vpop.f32.mrf.mxu0 }
 0x4ba   :  { %v1967_v45 = vadd.f32 %v1955_v40, %v1890_v41  ;;  %v2032_v50 = vpop.f32.mrf.mxu1 }
 0x4bb   :  { %v5280_v43 = vpop.f32.mrf.mxu0 }
 0x4bc   :  { %v2122_v46 = vadd.f32 %v5280_v43, %v2045_v42  ;;  %v2044_v1 = vadd.f32 %v2032_v50, %v1967_v45  ;;  %v5663_v42 = vld [vmem:[%s7970_s6 + $0x5c] ss:$0 sps:$4 sm:$0xff]   ;;  %v5662_v43 = vld [vmem:[%s7970_s6 + $0x50] ss:$0 sps:$4 sm:$0xff]  }
 0x4bd   :  { %v2106_v47 = vpop.f32.mrf.mxu0  ;;  %v3029_v50 = vld [vmem:[%s7972_s11 + $0x78] sm:$0xff] }
 0x4be   :  { %v2143_v48 = vadd.f32 %v2139_v52, %v2122_v46  ;;  %v2120_v49 = vadd.f32 %v2106_v47, %v2043_v44  ;;  %v5664_v44 = vld [vmem:[%s7970_s6 + $0x60] sm:$0xff]   ;;  %v5665_v52 = vld [vmem:[%s7970_s6 + $0x68] ss:$0 sps:$4 sm:$0xff]  }
 0x4bf   :  { %v5281_v51 = vpop.f32.mrf.mxu0 }
 0x4c0   :  { %2147 = vst.msk [vmem:[#allocation4 + $0x10] sm:$0xff] %vm2144_vm15, %v2143_v48  ;;  %v2141_v24 = vadd.f32 %v2129_v35, %v2120_v49  ;;  %v3028_v49 = vld [vmem:[%s7972_s11 + $0x70] sm:$0xff]  ;;  %v3026_v51 = vld [vmem:[%s7972_s11 + $0x60] sm:$0xff] }
 0x4c1   :  { %v2109_v54 = vpop.f32.mrf.mxu0 }
 0x4c2   :  { %2145 = vst.msk [vmem:[#allocation4] sm:$0xff] %vm2144_vm15, %v2141_v24  ;;  %v2121_v55 = vadd.f32 %v2109_v54, %v2044_v1  ;;  %v3037_v1 = vpack.c.bf16 %v3029_v50, %v3028_v49  ;;  %v3027_v24 = vld [vmem:[%s7972_s11 + $0x68] sm:$0xff] }
 0x4c3   :  { %v3036_v54 = vpack.c.bf16 %v3027_v24, %v3026_v51 }
 0x4c4   :  { %v2142_v57 = vadd.f32 %v2134_v53, %v2121_v55  ;;  %v3024_v55 = vld [vmem:[%s7972_s11 + $0x50] sm:$0xff]  ;;  %v3025_v53 = vld [vmem:[%s7972_s11 + $0x58] sm:$0xff] }
 0x4c6   :  { %2146 = vst.msk [vmem:[#allocation4 + $0x8] sm:$0xff] %vm2144_vm15, %v2142_v57  ;;  %v3035_v57 = vpack.c.bf16 %v3025_v53, %v3024_v55 }
 0x4c7   :  { %v2153_v59 = vld [vmem:[#allocation4 + $0x10] sm:$0xff] }
 0x4c8   :  { %v2155_v61 = vpack.c.bf16 %v2153_v59, %v2153_v59  ;;  %v3034_v59 = vpack.c.bf16 %v3023_v58, %v3022_v56 }
 0x4c9   :  { %v2151_v60 = vld [vmem:[#allocation4] sm:$0xff] }
 0x4ca   :  { %2172 = vrot.lane.b32.xlu1 %v2155_v61, %s5990_s29  ;;  %5532 = vmatprep.subr.msk.bf16.mxu0 %vm1467_vm14, %v2155_v61  ;;  %v2247_v38 = vsel %vm1467_vm14, %v2155_v61, 0 }
 0x4cb   :  { %5291 = vmatpush3.bf16.msra.mxu0 %v2247_v38  ;;  %v3021_v38 = vld [vmem:[%s7972_s11 + $0x38] sm:$0xff] }
 0x4cd   :  { %v2152_v63 = vld [vmem:[#allocation4 + $0x8] sm:$0xff] }
 0x4ce   :  { %v2154_v15 = vpack.c.bf16 %v2152_v63, %v2151_v60  ;;  %2311 = vrot.lane.b32.xlu1 %v2155_v61, %s5992_s23  ;;  %v3018_v63 = vld [vmem:[%s7972_s11 + $0x20] sm:$0xff] }
 0x4d0   :  { %2170 = vrot.lane.b32.xlu0 %v2154_v15, %s5990_s29  ;;  %5292 = vmatprep.subr.bf16.mxu0 %v2154_v15 }
 0x4d1   :  { %5293 = vmatpush3.bf16.msra.mxu0 %v2154_v15 }
 0x4d2   :  { %2388 = vrot.lane.b32.xlu1 %v2155_v61, %s6000_s18 }
 0x4d4   :  { %2309 = vrot.lane.b32.xlu0 %v2154_v15, %s5992_s23  ;;  %5295 = vmatmul.mubr.msk.bf16.vlgmr.msra.gmra.mxu0 %vm1460_vm13, %v5650_v25 }
 0x4d5   :  { %5310 = vmatprep.mubr.msk.bf16.mxu0 %vm1460_vm13, %v5652_v0  ;;  %v3016_v0 = vld [vmem:[%s7972_s11 + $0x10] sm:$0xff] }
 0x4d6   :  { %2386 = vrot.lane.b32.xlu1 %v2154_v15, %s6000_s18 }
 0x4d8   :  { %2465 = vrot.lane.b32.xlu0 %v2155_v61, %s6001_s26 }
 0x4da   :  { %2542 = vrot.lane.b32.xlu1 %v2155_v61, %s6004_s1 }
 0x4dc   :  { %2463 = vrot.lane.b32.xlu0 %v2154_v15, %s6001_s26 }
 0x4de   :  { %2540 = vrot.lane.b32.xlu1 %v2154_v15, %s6004_s1 }
 0x4e0   :  { %2619 = vrot.lane.b32.xlu0 %v2155_v61, %s6002_s24 }
 0x4e2   :  { %2696 = vrot.lane.b32.xlu1 %v2155_v61, %s6005_s3 }
 0x4e4   :  { %2617 = vrot.lane.b32.xlu0 %v2154_v15, %s6002_s24 }
 0x4e6   :  { %2694 = vrot.lane.b32.xlu1 %v2154_v15, %s6005_s3 }
 0x4e8   :  { %2773 = vrot.lane.b32.xlu0 %v2155_v61, %s6003_s19  ;;  %v3020_v61 = vld [vmem:[%s7972_s11 + $0x30] sm:$0xff] }
 0x4e9   :  { %v3033_v60 = vpack.c.bf16 %v3021_v38, %v3020_v61 }
 0x4ea   :  { %2851 = vperm.xlu1 %5559, %v2838_v2   ;;  %v3017_v2 = vld [vmem:[%s7972_s11 + $0x18] sm:$0xff] }
 0x4ec   :  { %2771 = vrot.lane.b32.xlu0 %v2154_v15, %s6003_s19  ;;  %v3019_v15 = vld [vmem:[%s7972_s11 + $0x28] sm:$0xff] }
 0x4ed   :  { %v3032_v25 = vpack.c.bf16 %v3019_v15, %v3018_v63 }
 0x4ee   :  { %2846 = vperm.xlu1 %5559, %v2837_v4   ;;  %v3031_v4 = vpack.c.bf16 %v3017_v2, %v3016_v0 }
 0x4f0   :  { %2841 = vperm.xlu0 %5558, %v2836_v3  }
 0x53c   :  { %v2173_v5 = vpop.permute.xlu1 %2172 }
 0x53d   :  { %v2182_v8 = vsel %vm1467_vm14, %v2173_v5, 0  ;;  %5531 = vmatprep.subr.msk.bf16.mxu1 %vm1467_vm14, %v2173_v5 }
 0x53e   :  { %5283 = vmatpush3.bf16.msra.mxu1 %v2182_v8 }
 0x540   :  { %v2312_v10 = vpop.permute.xlu1 %2311 }
 0x541   :  { %v2321_v18 = vsel %vm1467_vm14, %v2312_v10, 0 }
 0x542   :  { %v2171_v11 = vpop.permute.xlu0 %2170 }
 0x543   :  { %5284 = vmatprep.subr.bf16.mxu1 %v2171_v11 }
 0x544   :  { %v2389_v7 = vpop.permute.xlu1 %2388  ;;  %5285 = vmatpush3.bf16.msra.mxu1 %v2171_v11 }
 0x545   :  { %v2398_v14 = vsel %vm1467_vm14, %v2389_v7, 0  ;;  %5533 = vmatprep.subr.msk.bf16.mxu1 %vm1467_vm14, %v2312_v10  ;;  %5534 = vmatprep.subr.msk.bf16.mxu0 %vm1467_vm14, %v2389_v7 }
 0x546   :  { %v2310_v17 = vpop.permute.xlu0 %2309  ;;  %5307 = vmatpush3.bf16.msra.mxu0 %v2398_v14 }
 0x547   :  { %5287 = vmatmul.mubr.msk.bf16.vlgmr.msra.gmra.mxu1 %vm1460_vm13, %v5651_v12 }
 0x548   :  { %v2387_v19 = vpop.permute.xlu1 %2386  ;;  %5299 = vmatpush3.bf16.msra.mxu1 %v2321_v18  ;;  %5302 = vmatprep.mubr.msk.bf16.mxu1 %vm1460_vm13, %v5653_v13 }
 0x549   :  { %5300 = vmatprep.subr.bf16.mxu1 %v2310_v17  ;;  %5308 = vmatprep.subr.bf16.mxu0 %v2387_v19 }
 0x54a   :  { %v2466_v20 = vpop.permute.xlu0 %2465  ;;  %5309 = vmatpush3.bf16.msra.mxu0 %v2387_v19 }
 0x54b   :  { %v2475_v30 = vsel %vm1467_vm14, %v2466_v20, 0 }
 0x54c   :  { %v2543_v23 = vpop.permute.xlu1 %2542  ;;  %5301 = vmatpush3.bf16.msra.mxu1 %v2310_v17 }
 0x54d   :  { %v2552_v27 = vsel %vm1467_vm14, %v2543_v23, 0  ;;  %5535 = vmatprep.subr.msk.bf16.mxu1 %vm1467_vm14, %v2466_v20  ;;  %5536 = vmatprep.subr.msk.bf16.mxu0 %vm1467_vm14, %v2543_v23 }
 0x54e   :  { %v2464_v28 = vpop.permute.xlu0 %2463  ;;  %5311 = vmatmul.mubr.msk.bf16.vlgmr.msra.gmra.mxu0 %vm1460_vm13, %v5654_v21 }
 0x54f   :  { %5323 = vmatpush3.bf16.msra.mxu0 %v2552_v27  ;;  %5303 = vmatmul.mubr.msk.bf16.vlgmr.msra.gmra.mxu1 %vm1460_vm13, %v5655_v22 }
 0x550   :  { %v2541_v6 = vpop.permute.xlu1 %2540  ;;  %5315 = vmatpush3.bf16.msra.mxu1 %v2475_v30  ;;  %5326 = vmatprep.mubr.msk.bf16.mxu0 %vm1460_vm13, %v5656_v26 }
 0x551   :  { %5316 = vmatprep.subr.bf16.mxu1 %v2464_v28  ;;  %5324 = vmatprep.subr.bf16.mxu0 %v2541_v6 }
 0x552   :  { %v2620_v31 = vpop.permute.xlu0 %2619  ;;  %5318 = vmatprep.mubr.msk.bf16.mxu1 %vm1460_vm13, %v5657_v29 }
 0x553   :  { %5325 = vmatpush3.bf16.msra.mxu0 %v2541_v6  ;;  %v2629_v39 = vsel %vm1467_vm14, %v2620_v31, 0  ;;  %v2860_v6 = vlaneseq }
 0x554   :  { %v2697_v62 = vpop.permute.xlu1 %2696  ;;  %5317 = vmatpush3.bf16.msra.mxu1 %v2464_v28 }
 0x555   :  { %v2706_v34 = vsel %vm1467_vm14, %v2697_v62, 0  ;;  %5537 = vmatprep.subr.msk.bf16.mxu1 %vm1467_vm14, %v2620_v31  ;;  %5538 = vmatprep.subr.msk.bf16.mxu0 %vm1467_vm14, %v2697_v62 }
 0x556   :  { %v2618_v36 = vpop.permute.xlu0 %2617  ;;  %5327 = vmatmul.mubr.msk.bf16.vlgmr.msra.gmra.mxu0 %vm1460_vm13, %v5658_v32 }
 0x557   :  { %5339 = vmatpush3.bf16.msra.mxu0 %v2706_v34  ;;  %5319 = vmatmul.mubr.msk.bf16.vlgmr.msra.gmra.mxu1 %vm1460_vm13, %v5659_v33 }
 0x558   :  { %v2695_v40 = vpop.permute.xlu1 %2694  ;;  %5331 = vmatpush3.bf16.msra.mxu1 %v2629_v39  ;;  %5334 = vmatprep.mubr.msk.bf16.mxu1 %vm1460_vm13, %v5660_v9 }
 0x559   :  { %5332 = vmatprep.subr.bf16.mxu1 %v2618_v36  ;;  %5340 = vmatprep.subr.bf16.mxu0 %v2695_v40 }
 0x55a   :  { %v2774_v41 = vpop.permute.xlu0 %2773  ;;  %5342 = vmatprep.mubr.msk.bf16.mxu0 %vm1460_vm13, %v5661_v37 }
 0x55b   :  { %5341 = vmatpush3.bf16.msra.mxu0 %v2695_v40  ;;  %v2783_v45 = vsel %vm1467_vm14, %v2774_v41, 0  ;;  %v2861_v40 = vand.u32 127, %v2860_v6  ;;  %v5675_v6 = vld [vmem:[%s7973_s9 + $0x28] sm:$0xff]  }
 0x55c   :  { %5333 = vmatpush3.bf16.msra.mxu1 %v2618_v36  ;;  %5354 = vmatprep.subr.bf16.mxu0 %v3037_v1 }
 0x55d   :  { %5539 = vmatprep.subr.msk.bf16.mxu1 %vm1467_vm14, %v2774_v41  ;;  %vm2863_vm0 = vcmp.ge.s32.totalorder %v2861_v40, 7  ;;  %vm2864_vm1 = vcmp.lt.s32.totalorder %v2861_v40, 10  ;;  %vm2862_vm2 = vcmp.lt.s32.totalorder %v2861_v40, 3  ;;  %vm2867_vm4 = vcmp.ge.s32.totalorder %v2861_v40, 14 }
 0x55e   :  { %5343 = vmatmul.mubr.msk.bf16.vlgmr.msra.gmra.mxu0 %vm1460_vm13, %v5663_v42  ;;  %v2772_v46 = vpop.permute.xlu0 %2771  ;;  %vm2865_vm3 = vmand %vm2863_vm0, %vm2864_vm1  ;;  %vm2868_vm5 = vcmp.lt.s32.totalorder %v2861_v40, 17  ;;  %v5695_v40 = vld [vmem:[%s7973_s9 + $0x78] sm:$0xff]  }
 0x55f   :  { %5335 = vmatmul.mubr.msk.bf16.vlgmr.msra.gmra.mxu1 %vm1460_vm13, %v5662_v43  ;;  %5355 = vmatpush3.bf16.msra.mxu0 %v3037_v1  ;;  %vm2866_vm6 = vmor %vm2862_vm2, %vm2865_vm3 }
 0x560   :  { %5347 = vmatpush3.bf16.msra.mxu1 %v2783_v45  ;;  %5350 = vmatprep.mubr.msk.bf16.mxu1 %vm1460_vm13, %v5664_v44  ;;  %vm2869_vm7 = vmand %vm2867_vm4, %vm2868_vm5 }
 0x561   :  { %5348 = vmatprep.subr.bf16.mxu1 %v2772_v46  ;;  %5356 = vmatprep.subr.bf16.mxu0 %v3036_v54  ;;  %vm6955_vm8 = vmor %vm2866_vm6, %vm2869_vm7 }
 0x563   :  { %5357 = vmatpush3.bf16.msra.mxu0 %v3036_v54 }
 0x564   :  { %5349 = vmatpush3.bf16.msra.mxu1 %v2772_v46  ;;  %5358 = vmatprep.subr.bf16.mxu0 %v3035_v57 }
 0x565   :  { %v2852_v58 = vpop.permute.xlu1 %2851 }
 0x567   :  { %5351 = vmatmul.mubr.msk.bf16.vlgmr.msra.gmra.mxu1 %vm1460_vm13, %v5665_v52  ;;  %5359 = vmatpush3.bf16.msra.mxu0 %v3035_v57 }
 0x568   :  { %5360 = vmatprep.subr.bf16.mxu0 %v3034_v59 }
 0x56b   :  { %5361 = vmatpush3.bf16.msra.mxu0 %v3034_v59  ;;  %v2842_v61 = vpop.permute.xlu0 %2841 }
 0x56c   :  { %5362 = vmatprep.subr.bf16.mxu0 %v3033_v60 }
 0x56f   :  { %5363 = vmatpush3.bf16.msra.mxu0 %v3033_v60 }
 0x570   :  { %5364 = vmatprep.subr.bf16.mxu0 %v3032_v25 }
 0x573   :  { %5365 = vmatpush3.bf16.msra.mxu0 %v3032_v25  ;;  %v5680_v25 = vld [vmem:[%s7974_s8 + $0x30] sm:$0xff]  }
 0x574   :  { %5366 = vmatprep.subr.bf16.mxu0 %v3031_v4 }
 0x577   :  { %5367 = vmatpush3.bf16.msra.mxu0 %v3031_v4 }
 0x594   :  { %v5296_v47 = vpop.f32.mrf.mxu0 }
 0x596   :  { %v2283_v35 = vpop.f32.mrf.mxu0 }
 0x598   :  { %v5297_v48 = vpop.f32.mrf.mxu0 }
 0x59a   :  { %v2286_v8 = vpop.f32.mrf.mxu0 }
 0x607   :  { %v5288_v3 = vpop.f32.mrf.mxu1 }
 0x608   :  { %v2292_v19 = vadd.f32 %v5296_v47, %v5288_v3 }
 0x609   :  { %v2218_v5 = vpop.f32.mrf.mxu1 }
 0x60a   :  { %v2284_v22 = vadd.f32 %v2283_v35, %v2218_v5 }
 0x60b   :  { %v5289_v10 = vpop.f32.mrf.mxu1 }
 0x60d   :  { %v2221_v11 = vpop.f32.mrf.mxu1 }
 0x60e   :  { %v5312_v12 = vpop.f32.mrf.mxu0  ;;  %v2287_v31 = vadd.f32 %v2286_v8, %v2221_v11  ;;  %v2847_v11 = vpop.permute.xlu1 %2846 }
 0x60f   :  { %v5304_v7 = vpop.f32.mrf.mxu1 }
 0x610   :  { %v2434_v13 = vpop.f32.mrf.mxu0  ;;  %v2373_v23 = vadd.f32 %v5304_v7, %v2292_v19 }
 0x611   :  { %v2357_v14 = vpop.f32.mrf.mxu1 }
 0x612   :  { %v5313_v17 = vpop.f32.mrf.mxu0  ;;  %v2371_v28 = vadd.f32 %v2357_v14, %v2284_v22  ;;  %v2450_v32 = vadd.f32 %v5312_v12, %v2373_v23  ;;  %v5666_v23 = vld [vmem:[%s7973_s9] sm:$0xff]  }
 0x613   :  { %v5305_v18 = vpop.f32.mrf.mxu1  ;;  %5370 = vmatprep.mubr.bf16.mxu0 %v5666_v23  ;;  %v5712_v23 = vld [vmem:[%s7974_s8 + $0xb0] sm:$0xff]  }
 0x614   :  { %v2437_v20 = vpop.f32.mrf.mxu0  ;;  %v2448_v9 = vadd.f32 %v2434_v13, %v2371_v28  ;;  %v5670_v28 = vld [vmem:[%s7973_s9 + $0x10] sm:$0xff]  }
 0x615   :  { %v2360_v21 = vpop.f32.mrf.mxu1 }
 0x616   :  { %v5328_v26 = vpop.f32.mrf.mxu0  ;;  %v2372_v34 = vadd.f32 %v2360_v21, %v2287_v31  ;;  %v3015_v21 = vld [vmem:[%s7972_s11 + $0x8] sm:$0xff]  ;;  %v5678_v31 = vld [vmem:[%s7973_s9 + $0x30] sm:$0xff]  }
 0x617   :  { %v5320_v27 = vpop.f32.mrf.mxu1 }
 0x618   :  { %v2588_v29 = vpop.f32.mrf.mxu0  ;;  %v2527_v36 = vadd.f32 %v5320_v27, %v2450_v32  ;;  %v2449_v44 = vadd.f32 %v2437_v20, %v2372_v34  ;;  %v3014_v20 = vld [vmem:[%s7972_s11] sm:$0xff]  ;;  %v5679_v32 = vld [vmem:[%s7973_s9 + $0x38] sm:$0xff]  }
 0x619   :  { %v2511_v30 = vpop.f32.mrf.mxu1  ;;  %v3030_v22 = vpack.c.bf16 %v3015_v21, %v3014_v20  ;;  %v5668_v27 = vld [vmem:[%s7974_s8] sm:$0xff]   ;;  %v5687_v34 = vld [vmem:[%s7973_s9 + $0x58] sm:$0xff]  }
 0x61a   :  { %v5329_v33 = vpop.f32.mrf.mxu0  ;;  %v2525_v41 = vadd.f32 %v2511_v30, %v2448_v9  ;;  %v2604_v45 = vadd.f32 %v5328_v26, %v2527_v36  ;;  %v5667_v26 = vld [vmem:[%s7973_s9 + $0x8] sm:$0xff]   ;;  %5438 = vmatprep.mubr.msk.bf16.mxu1 %vm1460_vm13, %v5668_v27  ;;  %v5674_v30 = vld [vmem:[%s7973_s9 + $0x20] sm:$0xff]   ;;  %v5686_v9 = vld [vmem:[%s7973_s9 + $0x50] sm:$0xff]  }
 0x61b   :  { %v5321_v62 = vpop.f32.mrf.mxu1  ;;  %5368 = vmatprep.subr.bf16.mxu0 %v3030_v22  ;;  %v5682_v33 = vld [vmem:[%s7973_s9 + $0x40] sm:$0xff]  }
 0x61c   :  { %v2591_v37 = vpop.f32.mrf.mxu0  ;;  %v2602_v47 = vadd.f32 %v2588_v29, %v2525_v41  ;;  %5369 = vmatpush3.bf16.msra.mxu0 %v3030_v22  ;;  %v5671_v29 = vld [vmem:[%s7973_s9 + $0x18] sm:$0xff]   ;;  %v5683_v62 = vld [vmem:[%s7973_s9 + $0x48] sm:$0xff]   ;;  %v5690_v36 = vld [vmem:[%s7973_s9 + $0x60] sm:$0xff]  }
 0x61d   :  { %v2514_v39 = vpop.f32.mrf.mxu1  ;;  %v5698_v41 = vld [vmem:[%s7973_s9 + $0x80] sm:$0xff]   ;;  %v5709_v22 = vld [vmem:[%s7974_s8 + $0xa8] sm:$0xff]  }
 0x61e   :  { %v5344_v42 = vpop.f32.mrf.mxu0  ;;  %v2526_v35 = vadd.f32 %v2514_v39, %v2449_v44  ;;  %v5694_v39 = vld [vmem:[%s7973_s9 + $0x70] sm:$0xff]   ;;  %v5703_v44 = vld [vmem:[%s7973_s9 + $0x98] sm:$0xff]  }
 0x61f   :  { %v5336_v43 = vpop.f32.mrf.mxu1  ;;  %5371 = vmatmul.mubr.bf16.vlgmr.msra.gmra.mxu0 %v5667_v26 }
 0x620   :  { %v2742_v46 = vpop.f32.mrf.mxu0  ;;  %v2681_v48 = vadd.f32 %v5336_v43, %v2604_v45  ;;  %v2603_v24 = vadd.f32 %v2591_v37, %v2526_v35  ;;  %5374 = vmatprep.mubr.bf16.mxu0 %v5670_v28  ;;  %v5691_v37 = vld [vmem:[%s7973_s9 + $0x68] sm:$0xff]   ;;  %v5702_v43 = vld [vmem:[%s7973_s9 + $0x90] sm:$0xff]   ;;  %v5706_v45 = vld [vmem:[%s7973_s9 + $0xa0] sm:$0xff]  }
 0x621   :  { %v2665_v52 = vpop.f32.mrf.mxu1  ;;  %v5714_v35 = vld [vmem:[%s7973_s9 + $0xc0] sm:$0xff]   ;;  %v5713_v28 = vld [vmem:[%s7974_s8 + $0xb8] sm:$0xff]  }
 0x622   :  { %v5345_v49 = vpop.f32.mrf.mxu0  ;;  %v2679_v51 = vadd.f32 %v2665_v52, %v2602_v47  ;;  %v2758_v54 = vadd.f32 %v5344_v42, %v2681_v48  ;;  %v5699_v42 = vld [vmem:[%s7973_s9 + $0x88] sm:$0xff]   ;;  %v5710_v52 = vld [vmem:[%s7973_s9 + $0xb0] sm:$0xff]   ;;  %v5711_v47 = vld [vmem:[%s7973_s9 + $0xb8] sm:$0xff]  }
 0x623   :  { %v5337_v50 = vpop.f32.mrf.mxu1  ;;  %v5715_v48 = vld [vmem:[%s7973_s9 + $0xc8] sm:$0xff]   ;;  %v5718_v49 = vld [vmem:[%s7973_s9 + $0xd0] sm:$0xff]  }
 0x624   :  { %v2756_v53 = vadd.f32 %v2742_v46, %v2679_v51  ;;  %v2745_v63 = vpop.f32.mrf.mxu0  ;;  %v5707_v46 = vld [vmem:[%s7973_s9 + $0xa8] sm:$0xff]   ;;  %v5719_v50 = vld [vmem:[%s7973_s9 + $0xd8] sm:$0xff]   ;;  %v5722_v51 = vld [vmem:[%s7973_s9 + $0xe0] sm:$0xff]  }
 0x625   :  { %v2668_v1 = vpop.f32.mrf.mxu1 }
 0x626   :  { %v2680_v57 = vadd.f32 %v2668_v1, %v2603_v24  ;;  %v5723_v1 = vld [vmem:[%s7973_s9 + $0xe8] sm:$0xff]   ;;  %v5726_v24 = vld [vmem:[%s7973_s9 + $0xf0] sm:$0xff]  }
 0x627   :  { %v5352_v55 = vpop.f32.mrf.mxu1  ;;  %5375 = vmatmul.mubr.bf16.gmra.mxu0 %v5671_v29  ;;  %v5716_v29 = vld [vmem:[%s7974_s8 + $0xc0] sm:$0xff]  }
 0x628   :  { %v2835_v56 = vadd.f32 %v5352_v55, %v2758_v54  ;;  %v2757_v0 = vadd.f32 %v2745_v63, %v2680_v57  ;;  %5378 = vmatprep.mubr.bf16.mxu0 %v5674_v30  ;;  %v5727_v54 = vld [vmem:[%s7973_s9 + $0xf8] sm:$0xff]   ;;  %v5676_v63 = vld [vmem:[%s7974_s8 + $0x20] sm:$0xff]  }
 0x629   :  { %v2819_v59 = vpop.f32.mrf.mxu1 }
 0x62a   :  { %v2856_v38 = vadd.f32 %v2852_v58, %v2835_v56  ;;  %v2833_v60 = vadd.f32 %v2819_v59, %v2756_v53 }
 0x62b   :  { %v5353_v15 = vpop.f32.mrf.mxu1 }
 0x62c   :  { %v2859_v2 = vmax.f32 %v2856_v38, 0.0  ;;  %v2854_v4 = vadd.f32 %v2842_v61, %v2833_v60  ;;  %v5669_v61 = vld [vmem:[%s7974_s8 + $0x8] sm:$0xff]   ;;  %v5672_v38 = vld [vmem:[%s7974_s8 + $0x10] sm:$0xff]   ;;  %v5673_v60 = vld [vmem:[%s7974_s8 + $0x18] sm:$0xff]  }
 0x62d   :  { %v2822_v3 = vpop.f32.mrf.mxu1  ;;  %v5677_v15 = vld [vmem:[%s7974_s8 + $0x28] sm:$0xff]  }
 0x62e   :  { %v2857_v5 = vmax.f32 %v2854_v4, 0.0  ;;  %v2834_v8 = vadd.f32 %v2822_v3, %v2757_v0  ;;  %v2873_v10 = vsel %vm6955_vm8, %v2859_v2, 0.0  ;;  %v5681_v0 = vld [vmem:[%s7974_s8 + $0x38] sm:$0xff]   ;;  %v5684_v2 = vld [vmem:[%s7974_s8 + $0x40] sm:$0xff]   ;;  %v5685_v4 = vld [vmem:[%s7974_s8 + $0x48] sm:$0xff]  }
 0x62f   :  { %v2881_v12 = vsel %vm2874_vm9, %v2873_v10, -inf  ;;  %5379 = vmatmul.mubr.bf16.gmra.mxu0 %v5675_v6  ;;  %v5688_v3 = vld [vmem:[%s7974_s8 + $0x50] sm:$0xff]   ;;  %v5693_v10 = vld [vmem:[%s7974_s8 + $0x68] sm:$0xff]  }
 0x630   :  { %v2855_v7 = vadd.f32 %v2847_v11, %v2834_v8  ;;  %2882 = vmax.xlane.f32.xlu0 %v2881_v12  ;;  %v2871_v13 = vsel %vm6955_vm8, %v2857_v5, 0.0  ;;  %5382 = vmatprep.mubr.bf16.mxu0 %v5678_v31  ;;  %v5689_v5 = vld [vmem:[%s7974_s8 + $0x58] sm:$0xff]   ;;  %v5692_v8 = vld [vmem:[%s7974_s8 + $0x60] sm:$0xff]   ;;  %v5696_v11 = vld [vmem:[%s7974_s8 + $0x70] sm:$0xff]  }
 0x631   :  { %v2875_v14 = vsel %vm2874_vm9, %v2871_v13, -inf  ;;  %v5697_v12 = vld [vmem:[%s7974_s8 + $0x78] sm:$0xff]   ;;  %v5701_v13 = vld [vmem:[%s7974_s8 + $0x88] sm:$0xff]  }
 0x632   :  { %v2858_v17 = vmax.f32 %v2855_v7, 0.0  ;;  %2876 = vmax.xlane.f32.xlu1 %v2875_v14  ;;  %v5700_v7 = vld [vmem:[%s7974_s8 + $0x80] sm:$0xff]   ;;  %v5704_v14 = vld [vmem:[%s7974_s8 + $0x90] sm:$0xff]   ;;  %v5717_v31 = vld [vmem:[%s7974_s8 + $0xc8] sm:$0xff]  }
 0x634   :  { %v2872_v18 = vsel %vm6955_vm8, %v2858_v17, 0.0 }
 0x635   :  { %v2878_v19 = vsel %vm2874_vm9, %v2872_v18, -inf  ;;  %v5705_v18 = vld [vmem:[%s7974_s8 + $0x98] sm:$0xff]  }
 0x636   :  { %2879 = vmax.xlane.f32.xlu0 %v2878_v19  ;;  %v5708_v19 = vld [vmem:[%s7974_s8 + $0xa0] sm:$0xff]  }
 0x637   :  { %5383 = vmatmul.mubr.bf16.gmra.mxu0 %v5679_v32  ;;  %v5720_v32 = vld [vmem:[%s7974_s8 + $0xd0] sm:$0xff]  }
 0x638   :  { %5386 = vmatprep.mubr.bf16.mxu0 %v5682_v33 }
 0x63f   :  { %5387 = vmatmul.mubr.bf16.gmra.mxu0 %v5683_v62 }
 0x640   :  { %5390 = vmatprep.mubr.bf16.mxu0 %v5686_v9  ;;  %v5721_v9 = vld [vmem:[%s7974_s8 + $0xd8] sm:$0xff]  }
 0x647   :  { %5391 = vmatmul.mubr.bf16.gmra.mxu0 %v5687_v34  ;;  %v5724_v34 = vld [vmem:[%s7974_s8 + $0xe0] sm:$0xff]  }
 0x648   :  { %5394 = vmatprep.mubr.bf16.mxu0 %v5690_v36 }
 0x64f   :  { %5395 = vmatmul.mubr.bf16.gmra.mxu0 %v5691_v37 }
 0x650   :  { %5398 = vmatprep.mubr.bf16.mxu0 %v5694_v39  ;;  %v5725_v39 = vld [vmem:[%s7974_s8 + $0xe8] sm:$0xff]  }
 0x657   :  { %5399 = vmatmul.mubr.bf16.gmra.mxu0 %v5695_v40  ;;  %v5728_v40 = vld [vmem:[%s7974_s8 + $0xf0] sm:$0xff]  }
 0x658   :  { %5402 = vmatprep.mubr.bf16.mxu0 %v5698_v41 }
 0x65f   :  { %5403 = vmatmul.mubr.bf16.gmra.mxu0 %v5699_v42 }
 0x660   :  { %5406 = vmatprep.mubr.bf16.mxu0 %v5702_v43  ;;  %v5729_v43 = vld [vmem:[%s7974_s8 + $0xf8] sm:$0xff]  }
 0x667   :  { %5407 = vmatmul.mubr.bf16.gmra.mxu0 %v5703_v44 }
 0x668   :  { %5410 = vmatprep.mubr.bf16.mxu0 %v5706_v45 }
 0x66f   :  { %5411 = vmatmul.mubr.bf16.gmra.mxu0 %v5707_v46 }
 0x670   :  { %5414 = vmatprep.mubr.bf16.mxu0 %v5710_v52 }
 0x677   :  { %5415 = vmatmul.mubr.bf16.gmra.mxu0 %v5711_v47 }
 0x678   :  { %5418 = vmatprep.mubr.bf16.mxu0 %v5714_v35 }
 0x67f   :  { %5419 = vmatmul.mubr.bf16.gmra.mxu0 %v5715_v48 }
 0x680   :  { %5422 = vmatprep.mubr.bf16.mxu0 %v5718_v49 }
 0x687   :  { %5423 = vmatmul.mubr.bf16.gmra.mxu0 %v5719_v50 }
 0x688   :  { %5426 = vmatprep.mubr.bf16.mxu0 %v5722_v51 }
 0x68f   :  { %5427 = vmatmul.mubr.bf16.gmra.mxu0 %v5723_v1 }
 0x690   :  { %5430 = vmatprep.mubr.bf16.mxu0 %v5726_v24 }
 0x697   :  { %5431 = vmatmul.mubr.bf16.gmra.mxu0 %v5727_v54 }
 0x6b9   :  { %v2883_v55 = vpop.xlane.xlu0 %2882 }
 0x6ba   :  { %v2949_v53 = vpack.c.bf16 %v2883_v55, %v2883_v55 }
 0x6bb   :  { %v2877_v56 = vpop.xlane.xlu1 %2876 }
 0x6bc   :  { %v3776_v57 = vsel %vm1467_vm14, %v2949_v53, 0  ;;  %5540 = vmatprep.subr.msk.bf16.mxu1 %vm1467_vm14, %v2949_v53 }
 0x6bd   :  { %5435 = vmatpush3.bf16.msra.mxu1 %v3776_v57 }
 0x6bf   :  { %v2880_v58 = vpop.xlane.xlu0 %2879 }
 0x6c0   :  { %v2948_v59 = vpack.c.bf16 %v2880_v58, %v2877_v56 }
 0x6c2   :  { %5436 = vmatprep.subr.bf16.mxu1 %v2948_v59 }
 0x6c3   :  { %5437 = vmatpush3.bf16.msra.mxu1 %v2948_v59 }
 0x6c4   :  { %5502 = vmatprep.subr.bf16.mxu1 %v5999_v16 }
 0x6c6   :  { %5439 = vmatmul.mubr.msk.bf16.vlgmr.msra.gmra.mxu1 %vm1460_vm13, %v5669_v61 }
 0x6c7   :  { %5442 = vmatprep.mubr.msk.bf16.mxu1 %vm1460_vm13, %v5672_v38  ;;  %v4069_v38 = vld [vmem:[%s7975_s10 + $0x10] sm:$0xff] }
 0x6ce   :  { %5443 = vmatmul.mubr.msk.bf16.gmra.mxu1 %vm1460_vm13, %v5673_v60 }
 0x6cf   :  { %5446 = vmatprep.mubr.msk.bf16.mxu1 %vm1460_vm13, %v5676_v63 }
 0x6d6   :  { %5447 = vmatmul.mubr.msk.bf16.gmra.mxu1 %vm1460_vm13, %v5677_v15  ;;  %v4067_v15 = vld [vmem:[%s7975_s10] sm:$0xff] }
 0x6d7   :  { %5450 = vmatprep.mubr.msk.bf16.mxu1 %vm1460_vm13, %v5680_v25 }
 0x6de   :  { %5451 = vmatmul.mubr.msk.bf16.gmra.mxu1 %vm1460_vm13, %v5681_v0 }
 0x6df   :  { %5454 = vmatprep.mubr.msk.bf16.mxu1 %vm1460_vm13, %v5684_v2  ;;  %v5372_v17 = vpop.f32.mrf.mxu0 }
 0x6e1   :  { %v7152_v20 = vpop.f32.mrf.mxu0 }
 0x6e3   :  { %v7156_v21 = vpop.f32.mrf.mxu0 }
 0x6e5   :  { %v7164_v26 = vpop.f32.mrf.mxu0 }
 0x6e6   :  { %5455 = vmatmul.mubr.msk.bf16.gmra.mxu1 %vm1460_vm13, %v5685_v4 }
 0x6e7   :  { %5458 = vmatprep.mubr.msk.bf16.mxu1 %vm1460_vm13, %v5688_v3  ;;  %v7168_v27 = vpop.f32.mrf.mxu0  ;;  %v4070_v3 = vld [vmem:[%s7975_s10 + $0x18] sm:$0xff] }
 0x6e9   :  { %v7176_v30 = vpop.f32.mrf.mxu0 }
 0x6eb   :  { %v7180_v6 = vpop.f32.mrf.mxu0 }
 0x6ed   :  { %v7188_v33 = vpop.f32.mrf.mxu0 }
 0x6ee   :  { %5459 = vmatmul.mubr.msk.bf16.gmra.mxu1 %vm1460_vm13, %v5689_v5 }
 0x6ef   :  { %5462 = vmatprep.mubr.msk.bf16.mxu1 %vm1460_vm13, %v5692_v8  ;;  %v7192_v62 = vpop.f32.mrf.mxu0 }
 0x6f1   :  { %v7200_v36 = vpop.f32.mrf.mxu0 }
 0x6f3   :  { %v7204_v37 = vpop.f32.mrf.mxu0 }
 0x6f5   :  { %v7212_v41 = vpop.f32.mrf.mxu0 }
 0x6f6   :  { %5463 = vmatmul.mubr.msk.bf16.gmra.mxu1 %vm1460_vm13, %v5693_v10 }
 0x6f7   :  { %5466 = vmatprep.mubr.msk.bf16.mxu1 %vm1460_vm13, %v5696_v11  ;;  %v7216_v42 = vpop.f32.mrf.mxu0 }
 0x6f9   :  { %v7221_v44 = vpop.f32.mrf.mxu0 }
 0x6fb   :  { %v7224_v45 = vpop.f32.mrf.mxu0 }
 0x6fd   :  { %v7226_v46 = vpop.f32.mrf.mxu0 }
 0x6fe   :  { %5467 = vmatmul.mubr.msk.bf16.gmra.mxu1 %vm1460_vm13, %v5697_v12  ;;  %v4068_v12 = vld [vmem:[%s7975_s10 + $0x8] sm:$0xff] }
 0x6ff   :  { %5470 = vmatprep.mubr.msk.bf16.mxu1 %vm1460_vm13, %v5700_v7  ;;  %v7228_v52 = vpop.f32.mrf.mxu0 }
 0x701   :  { %v7230_v47 = vpop.f32.mrf.mxu0 }
 0x703   :  { %v7232_v35 = vpop.f32.mrf.mxu0 }
 0x705   :  { %v7234_v48 = vpop.f32.mrf.mxu0 }
 0x706   :  { %5471 = vmatmul.mubr.msk.bf16.gmra.mxu1 %vm1460_vm13, %v5701_v13 }
 0x707   :  { %5474 = vmatprep.mubr.msk.bf16.mxu1 %vm1460_vm13, %v5704_v14  ;;  %v7236_v49 = vpop.f32.mrf.mxu0 }
 0x709   :  { %v7238_v50 = vpop.f32.mrf.mxu0 }
 0x70b   :  { %v7240_v51 = vpop.f32.mrf.mxu0 }
 0x70d   :  { %v7242_v1 = vpop.f32.mrf.mxu0 }
 0x70e   :  { %5475 = vmatmul.mubr.msk.bf16.gmra.mxu1 %vm1460_vm13, %v5705_v18 }
 0x70f   :  { %5478 = vmatprep.mubr.msk.bf16.mxu1 %vm1460_vm13, %v5708_v19  ;;  %v7244_v24 = vpop.f32.mrf.mxu0  ;;  %v4073_v19 = vld [vmem:[%s7975_s10 + $0x30] sm:$0xff] }
 0x711   :  { %v7246_v54 = vpop.f32.mrf.mxu0 }
 0x713   :  { %v7248_v55 = vpop.f32.mrf.mxu0 }
 0x715   :  { %v7250_v53 = vpop.f32.mrf.mxu0 }
 0x716   :  { %5479 = vmatmul.mubr.msk.bf16.gmra.mxu1 %vm1460_vm13, %v5709_v22 }
 0x717   :  { %5482 = vmatprep.mubr.msk.bf16.mxu1 %vm1460_vm13, %v5712_v23  ;;  %v7252_v57 = vpop.f32.mrf.mxu0 }
 0x719   :  { %v7254_v56 = vpop.f32.mrf.mxu0 }
 0x71b   :  { %v7256_v58 = vpop.f32.mrf.mxu0 }
 0x71d   :  { %v7258_v59 = vpop.f32.mrf.mxu0 }
 0x71e   :  { %5483 = vmatmul.mubr.msk.bf16.gmra.mxu1 %vm1460_vm13, %v5713_v28  ;;  %v4071_v28 = vld [vmem:[%s7975_s10 + $0x20] sm:$0xff] }
 0x71f   :  { %5486 = vmatprep.mubr.msk.bf16.mxu1 %vm1460_vm13, %v5716_v29  ;;  %v7266_v25 = vpop.f32.mrf.mxu0 }
 0x721   :  { %v7276_v7 = vpop.f32.mrf.mxu0 }
 0x723   :  { %v7286_v29 = vpop.f32.mrf.mxu0 }
 0x726   :  { %5487 = vmatmul.mubr.msk.bf16.gmra.mxu1 %vm1460_vm13, %v5717_v31 }
 0x727   :  { %5490 = vmatprep.mubr.msk.bf16.mxu1 %vm1460_vm13, %v5720_v32 }
 0x72e   :  { %5491 = vmatmul.mubr.msk.bf16.gmra.mxu1 %vm1460_vm13, %v5721_v9 }
 0x72f   :  { %5494 = vmatprep.mubr.msk.bf16.mxu1 %vm1460_vm13, %v5724_v34  ;;  %v4074_v34 = vld [vmem:[%s7975_s10 + $0x38] sm:$0xff] }
 0x736   :  { %5495 = vmatmul.mubr.msk.bf16.gmra.mxu1 %vm1460_vm13, %v5725_v39 }
 0x737   :  { %5498 = vmatprep.mubr.msk.bf16.mxu1 %vm1460_vm13, %v5728_v40 }
 0x73e   :  { %5499 = vmatmul.mubr.msk.bf16.gmra.mxu1 %vm1460_vm13, %v5729_v43 }
 0x73f   :  { %5518 = vmatprep.mubr.msk.bf16.mxu1 %vm6006_vm10, %v5999_v16 }
 0x786   :  { %v5440_v61 = vpop.f32.mrf.mxu1 }
 0x787   :  { %v3821_v60 = vadd.f32 %v5440_v61, %v5372_v17  ;;  %v4072_v61 = vld [vmem:[%s7975_s10 + $0x28] sm:$0xff] }
 0x788   :  { %v3812_v63 = vpop.f32.mrf.mxu1 }
 0x789   :  { %v4133_v0 = vadd.f32 %v4069_v38, %v3821_v60  ;;  %v3813_v2 = vadd.f32 %v3812_v63, %v7152_v20  ;;  %v7296_v38 = vpop.f32.mrf.mxu0 }
 0x78a   :  { %v5441_v4 = vpop.f32.mrf.mxu1 }
 0x78b   :  { %v5009_v5 = vmul.f32 -1.442695, %v4133_v0  ;;  %v4131_v8 = vadd.f32 %v4067_v15, %v3813_v2  ;;  %v3824_v10 = vadd.f32 %v5441_v4, %v7156_v21  ;;  %v4077_v0 = vld [vmem:[%s7975_s10 + $0x50] sm:$0xff] }
 0x78c   :  { %v3815_v11 = vpop.f32.mrf.mxu1 }
 0x78d   :  { %v5007_v13 = vmul.f32 -1.442695, %v4131_v8  ;;  %v4134_v14 = vadd.f32 %v4070_v3, %v3824_v10  ;;  %v3816_v17 = vadd.f32 %v3815_v11, %v7164_v26  ;;  %5730 = vpow2.f32 %v5009_v5  ;;  %v4075_v5 = vld [vmem:[%s7975_s10 + $0x40] sm:$0xff]  ;;  %v7306_v8 = vpop.f32.mrf.mxu0 }
 0x78e   :  { %v5444_v18 = vpop.f32.mrf.mxu1 }
 0x78f   :  { %v5010_v20 = vmul.f32 -1.442695, %v4134_v14  ;;  %v4132_v22 = vadd.f32 %v4068_v12, %v3816_v17  ;;  %v3837_v21 = vadd.f32 %v5444_v18, %v7168_v27  ;;  %5732 = vpow2.f32 %v5007_v13 }
 0x790   :  { %v3828_v23 = vpop.f32.mrf.mxu1 }
 0x791   :  { %v5008_v31 = vmul.f32 -1.442695, %v4132_v22  ;;  %v4137_v26 = vadd.f32 %v4073_v19, %v3837_v21  ;;  %v3829_v32 = vadd.f32 %v3828_v23, %v7176_v30  ;;  %5734 = vpow2.f32 %v5010_v20  ;;  %v4076_v20 = vld [vmem:[%s7975_s10 + $0x48] sm:$0xff]  ;;  %v7316_v22 = vpop.f32.mrf.mxu0 }
 0x792   :  { %v5445_v9 = vpop.f32.mrf.mxu1 }
 0x793   :  { %v5013_v39 = vmul.f32 -1.442695, %v4137_v26  ;;  %v4135_v27 = vadd.f32 %v4071_v28, %v3829_v32  ;;  %v3840_v40 = vadd.f32 %v5445_v9, %v7180_v6  ;;  %5736 = vpow2.f32 %v5008_v31  ;;  %v4081_v26 = vld [vmem:[%s7975_s10 + $0x70] sm:$0xff] }
 0x794   :  { %v3831_v43 = vpop.f32.mrf.mxu1 }
 0x795   :  { %v5011_v60 = vmul.f32 -1.442695, %v4135_v27  ;;  %v4138_v30 = vadd.f32 %v4074_v34, %v3840_v40  ;;  %v3832_v63 = vadd.f32 %v3831_v43, %v7188_v33  ;;  %5738 = vpow2.f32 %v5013_v39  ;;  %v7323_v40 = vpop.f32.mrf.mxu0 }
 0x796   :  { %v5448_v15 = vpop.f32.mrf.mxu1 }
 0x797   :  { %v5014_v2 = vmul.f32 -1.442695, %v4138_v30  ;;  %v4136_v6 = vadd.f32 %v4072_v61, %v3832_v63  ;;  %v3853_v4 = vadd.f32 %v5448_v15, %v7192_v62  ;;  %5740 = vpow2.f32 %v5011_v60  ;;  %v4078_v62 = vld [vmem:[%s7975_s10 + $0x58] sm:$0xff]  ;;  %v4079_v60 = vld [vmem:[%s7975_s10 + $0x60] sm:$0xff] }
 0x798   :  { %v3844_v3 = vpop.f32.mrf.mxu1 }
 0x799   :  { %v5012_v10 = vmul.f32 -1.442695, %v4136_v6  ;;  %v4141_v33 = vadd.f32 %v4077_v0, %v3853_v4  ;;  %v3845_v11 = vadd.f32 %v3844_v3, %v7200_v36  ;;  %5742 = vpow2.f32 %v5014_v2 }
 0x79a   :  { %v5449_v12 = vpop.f32.mrf.mxu1  ;;  %v5731_v17 = vpop.eup %5730 }
 0x79b   :  { %v5017_v13 = vmul.f32 -1.442695, %v4141_v33  ;;  %v4139_v14 = vadd.f32 %v4075_v5, %v3845_v11  ;;  %5744 = vpow2.f32 %v5012_v10  ;;  %v3856_v18 = vadd.f32 %v5449_v12, %v7204_v37  ;;  %v4080_v10 = vld [vmem:[%s7975_s10 + $0x68] sm:$0xff]  ;;  %v7336_v33 = vpop.f32.mrf.mxu0 }
 0x79c   :  { %v3847_v19 = vpop.f32.mrf.mxu1  ;;  %v5733_v23 = vpop.eup %5732  ;;  %v4245_v32 = vadd.f32 1.0, %v5731_v17 }
 0x79d   :  { %v5015_v36 = vmul.f32 -1.442695, %v4139_v14  ;;  %v3848_v21 = vadd.f32 %v3847_v19, %v7212_v41  ;;  %5746 = vpow2.f32 %v5017_v13  ;;  %v4142_v28 = vadd.f32 %v4078_v62, %v3856_v18 }
 0x79e   :  { %v5452_v31 = vpop.f32.mrf.mxu1  ;;  %v5735_v34 = vpop.eup %5734  ;;  %v4243_v43 = vadd.f32 1.0, %v5733_v23 }
 0x79f   :  { %v4140_v37 = vadd.f32 %v4076_v20, %v3848_v21  ;;  %v3869_v9 = vadd.f32 %v5452_v31, %v7216_v42  ;;  %5748 = vpow2.f32 %v5015_v36  ;;  %v5018_v39 = vmul.f32 -1.442695, %v4142_v28  ;;  %v4082_v42 = vld [vmem:[%s7975_s10 + $0x78] sm:$0xff]  ;;  %v4085_v20 = vld [vmem:[%s7975_s10 + $0x90] sm:$0xff]  ;;  %v7346_v28 = vpop.f32.mrf.mxu0 }
 0x7a0   :  { %v3860_v27 = vpop.f32.mrf.mxu1  ;;  %v5737_v30 = vpop.eup %5736  ;;  %v4246_v0 = vadd.f32 1.0, %v5735_v34 }
 0x7a1   :  { %v5016_v41 = vmul.f32 -1.442695, %v4140_v37  ;;  %v4145_v61 = vadd.f32 %v4081_v26, %v3869_v9  ;;  %5750 = vpow2.f32 %v5018_v39  ;;  %v3861_v63 = vadd.f32 %v3860_v27, %v7221_v44 }
 0x7a2   :  { %v5453_v15 = vpop.f32.mrf.mxu1  ;;  %5752 = vrcp.f32 %v4245_v32  ;;  %v5739_v4 = vpop.eup %5738  ;;  %v4244_v11 = vadd.f32 1.0, %v5737_v30 }
 0x7a3   :  { %v5021_v2 = vmul.f32 -1.442695, %v4145_v61  ;;  %v3872_v6 = vadd.f32 %v5453_v15, %v7224_v45  ;;  %5754 = vpow2.f32 %v5016_v41  ;;  %v4143_v3 = vadd.f32 %v4079_v60, %v3861_v63  ;;  %v7356_v30 = vpop.f32.mrf.mxu0 }
 0x7a4   :  { %v3863_v5 = vpop.f32.mrf.mxu1  ;;  %v5741_v44 = vpop.eup %5740  ;;  %5756 = vrcp.f32 %v4243_v43  ;;  %v4249_v17 = vadd.f32 1.0, %v5739_v4 }
 0x7a5   :  { %v4146_v12 = vadd.f32 %v4082_v42, %v3872_v6  ;;  %v3864_v13 = vadd.f32 %v3863_v5, %v7226_v46  ;;  %5758 = vpow2.f32 %v5021_v2  ;;  %v5019_v14 = vmul.f32 -1.442695, %v4143_v3  ;;  %v4083_v46 = vld [vmem:[%s7975_s10 + $0x80] sm:$0xff] }
 0x7a6   :  { %v5456_v62 = vpop.f32.mrf.mxu1  ;;  %v5743_v45 = vpop.eup %5742  ;;  %5760 = vrcp.f32 %v4246_v0  ;;  %v4247_v36 = vadd.f32 1.0, %v5741_v44 }
 0x7a7   :  { %v5022_v18 = vmul.f32 -1.442695, %v4146_v12  ;;  %v4144_v19 = vadd.f32 %v4080_v10, %v3864_v13  ;;  %5762 = vpow2.f32 %v5019_v14  ;;  %v3885_v21 = vadd.f32 %v5456_v62, %v7228_v52  ;;  %v4086_v52 = vld [vmem:[%s7975_s10 + $0x98] sm:$0xff]  ;;  %v7368_v13 = vpop.f32.mrf.mxu0 }
 0x7a8   :  { %v3876_v23 = vpop.f32.mrf.mxu1  ;;  %v5745_v31 = vpop.eup %5744  ;;  %5764 = vrcp.f32 %v4244_v11  ;;  %v4250_v37 = vadd.f32 1.0, %v5743_v45 }
 0x7a9   :  { %v5020_v26 = vmul.f32 -1.442695, %v4144_v19  ;;  %v3877_v32 = vadd.f32 %v3876_v23, %v7230_v47  ;;  %5766 = vpow2.f32 %v5022_v18  ;;  %v4149_v9 = vadd.f32 %v4085_v20, %v3885_v21  ;;  %v4084_v47 = vld [vmem:[%s7975_s10 + $0x88] sm:$0xff]  ;;  %v4090_v20 = vld [vmem:[%s7975_s10 + $0xb8] sm:$0xff] }
 0x7aa   :  { %v5457_v34 = vpop.f32.mrf.mxu1  ;;  %v5747_v39 = vpop.eup %5746  ;;  %5768 = vrcp.f32 %v4249_v17  ;;  %v4248_v41 = vadd.f32 1.0, %v5745_v31 }
 0x7ab   :  { %v4147_v27 = vadd.f32 %v4083_v46, %v3877_v32  ;;  %v3888_v43 = vadd.f32 %v5457_v34, %v7232_v35  ;;  %5770 = vrcp.f32 %v4247_v36  ;;  %v5025_v61 = vmul.f32 -1.442695, %v4149_v9  ;;  %v4089_v35 = vld [vmem:[%s7975_s10 + $0xb0] sm:$0xff]  ;;  %v4088_v32 = vld [vmem:[%s7975_s10 + $0xa8] sm:$0xff] }
 0x7ac   :  { %v3879_v60 = vpop.f32.mrf.mxu1  ;;  %v5749_v63 = vpop.eup %5748  ;;  %5772 = vpow2.f32 %v5020_v26  ;;  %v4253_v2 = vadd.f32 1.0, %v5747_v39 }
 0x7ad   :  { %v5023_v15 = vmul.f32 -1.442695, %v4147_v27  ;;  %v4150_v42 = vadd.f32 %v4086_v52, %v3888_v43  ;;  %v3880_v0 = vadd.f32 %v3879_v60, %v7234_v48  ;;  %5774 = vrcp.f32 %v4250_v37  ;;  %v4087_v48 = vld [vmem:[%s7975_s10 + $0xa0] sm:$0xff]  ;;  %v7382_v37 = vpop.f32.mrf.mxu0 }
 0x7ae   :  { %v5460_v6 = vpop.f32.mrf.mxu1  ;;  %v5751_v4 = vpop.eup %5750  ;;  %5776 = vpow2.f32 %v5025_v61  ;;  %v4251_v11 = vadd.f32 1.0, %v5749_v63 }
 0x7af   :  { %v5026_v3 = vmul.f32 -1.442695, %v4150_v42  ;;  %v4148_v5 = vadd.f32 %v4084_v47, %v3880_v0  ;;  %v3901_v10 = vadd.f32 %v5460_v6, %v7236_v49  ;;  %v7363_v44 = vpop.eup %5752  ;;  %5778 = vrcp.f32 %v4248_v41  ;;  %v4093_v41 = vld [vmem:[%s7975_s10 + $0xd0] sm:$0xff]  ;;  %v4091_v0 = vld [vmem:[%s7975_s10 + $0xc0] sm:$0xff] }
 0x7b0   :  { %v3892_v12 = vpop.f32.mrf.mxu1  ;;  %v5755_v14 = vpop.eup %5754  ;;  %5780 = vpow2.f32 %v5023_v15  ;;  %v4254_v49 = vadd.f32 1.0, %v5751_v4 }
 0x7b1   :  { %v5024_v62 = vmul.f32 -1.442695, %v4148_v5  ;;  %v4153_v45 = vadd.f32 %v4089_v35, %v3901_v10  ;;  %v3893_v17 = vadd.f32 %v3892_v12, %v7238_v50  ;;  %v7371_v18 = vpop.eup %5756  ;;  %5782 = vrcp.f32 %v4253_v2  ;;  %v7396_v2 = vpop.f32.mrf.mxu0 }
 0x7b2   :  { %v5461_v19 = vpop.f32.mrf.mxu1  ;;  %v5759_v36 = vpop.eup %5758  ;;  %5784 = vpow2.f32 %v5026_v3  ;;  %v4252_v26 = vadd.f32 1.0, %v5755_v14 }
 0x7b3   :  { %v5029_v21 = vmul.f32 -1.442695, %v4153_v45  ;;  %v4151_v23 = vadd.f32 %v4087_v48, %v3893_v17  ;;  %v3904_v46 = vadd.f32 %v5461_v19, %v7240_v51  ;;  %v7377_v31 = vpop.eup %5760  ;;  %5786 = vrcp.f32 %v4251_v11  ;;  %v4094_v11 = vld [vmem:[%s7975_s10 + $0xd8] sm:$0xff] }
 0x7b4   :  { %v3895_v50 = vpop.f32.mrf.mxu1  ;;  %v5763_v9 = vpop.eup %5762  ;;  %5788 = vpow2.f32 %v5024_v62  ;;  %v4257_v51 = vadd.f32 1.0, %v5759_v36 }
 0x7b5   :  { %v5027_v34 = vmul.f32 -1.442695, %v4151_v23  ;;  %v4154_v52 = vadd.f32 %v4090_v20, %v3904_v46  ;;  %v3896_v39 = vadd.f32 %v3895_v50, %v7242_v1  ;;  %v7385_v27 = vpop.eup %5764  ;;  %5790 = vrcp.f32 %v4254_v49  ;;  %v7407_v49 = vpop.f32.mrf.mxu0 }
 0x7b6   :  { %v5464_v43 = vpop.f32.mrf.mxu1  ;;  %v5767_v61 = vpop.eup %5766  ;;  %5792 = vpow2.f32 %v5029_v21  ;;  %v4255_v42 = vadd.f32 1.0, %v5763_v9  ;;  %v4092_v21 = vld [vmem:[%s7975_s10 + $0xc8] sm:$0xff] }
 0x7b7   :  { %v5030_v60 = vmul.f32 -1.442695, %v4154_v52  ;;  %v4152_v47 = vadd.f32 %v4088_v32, %v3896_v39  ;;  %v3917_v63 = vadd.f32 %v5464_v43, %v7244_v24  ;;  %v7391_v15 = vpop.eup %5768  ;;  %5794 = vrcp.f32 %v4252_v26  ;;  %v4097_v26 = vld [vmem:[%s7975_s10 + $0xf0] sm:$0xff]  ;;  %v7424_v43 = vpop.f32.mrf.mxu0 }
 0x7b8   :  { %v3908_v1 = vpop.f32.mrf.mxu1  ;;  %v7398_v6 = vpop.eup %5770  ;;  %5796 = vpow2.f32 %v5027_v34  ;;  %v4258_v24 = vadd.f32 1.0, %v5767_v61 }
 0x7b9   :  { %v5028_v35 = vmul.f32 -1.442695, %v4152_v47  ;;  %v4157_v4 = vadd.f32 %v4093_v41, %v3917_v63  ;;  %v3909_v3 = vadd.f32 %v3908_v1, %v7246_v54  ;;  %v5773_v5 = vpop.eup %5772  ;;  %5798 = vrcp.f32 %v4257_v51 }
 0x7ba   :  { %v5465_v10 = vpop.f32.mrf.mxu1  ;;  %v7404_v12 = vpop.eup %5774  ;;  %5800 = vpow2.f32 %v5030_v60  ;;  %v4256_v19 = vadd.f32 1.0, %v5773_v5 }
 0x7bb   :  { %v5033_v48 = vmul.f32 -1.442695, %v4157_v4  ;;  %v4155_v14 = vadd.f32 %v4091_v0, %v3909_v3  ;;  %v3920_v62 = vadd.f32 %v5465_v10, %v7248_v55  ;;  %v5777_v45 = vpop.eup %5776  ;;  %5802 = vrcp.f32 %v4255_v42  ;;  %v4098_v3 = vld [vmem:[%s7975_s10 + $0xf8] sm:$0xff] }
 0x7bc   :  { %v3911_v17 = vpop.f32.mrf.mxu1  ;;  %v7409_v54 = vpop.eup %5778  ;;  %5804 = vpow2.f32 %v5028_v35  ;;  %v4341_v32 = vadd.f32 1.0, %v5777_v45 }
 0x7bd   :  { %v5031_v20 = vmul.f32 -1.442695, %v4155_v14  ;;  %v4158_v36 = vadd.f32 %v4094_v11, %v3920_v62  ;;  %v5781_v23 = vpop.eup %5780  ;;  %5806 = vpow2.f32 %v5033_v48  ;;  %v3912_v46 = vadd.f32 %v3911_v17, %v7250_v53  ;;  %v4095_v53 = vld [vmem:[%s7975_s10 + $0xe0] sm:$0xff]  ;;  %v7438_v11 = vpop.f32.mrf.mxu0 }
 0x7be   :  { %v5468_v55 = vpop.f32.mrf.mxu1  ;;  %v7418_v50 = vpop.eup %5782  ;;  %5808 = vrcp.f32 %v4258_v24  ;;  %v4339_v61 = vadd.f32 1.0, %v5781_v23 }
 0x7bf   :  { %v5034_v9 = vmul.f32 -1.442695, %v4158_v36  ;;  %v3933_v34 = vadd.f32 %v5468_v55, %v7252_v57  ;;  %v5785_v52 = vpop.eup %5784  ;;  %5810 = vpow2.f32 %v5031_v20  ;;  %v4156_v39 = vadd.f32 %v4092_v21, %v3912_v46 }
 0x7c0   :  { %v3924_v51 = vpop.f32.mrf.mxu1  ;;  %v7426_v41 = vpop.eup %5786  ;;  %5812 = vrcp.f32 %v4256_v19  ;;  %v4342_v0 = vadd.f32 1.0, %v5785_v52 }
 0x7c1   :  { %v4161_v60 = vadd.f32 %v4097_v26, %v3933_v34  ;;  %v3925_v47 = vadd.f32 %v3924_v51, %v7254_v56  ;;  %v5789_v63 = vpop.eup %5788  ;;  %5814 = vpow2.f32 %v5034_v9  ;;  %v5032_v57 = vmul.f32 -1.442695, %v4156_v39  ;;  %v4096_v56 = vld [vmem:[%s7975_s10 + $0xe8] sm:$0xff]  ;;  %v7449_v9 = vpop.f32.mrf.mxu0 }
 0x7c2   :  { %v5469_v42 = vpop.f32.mrf.mxu1  ;;  %v7429_v1 = vpop.eup %5790  ;;  %5816 = vrcp.f32 %v4341_v32  ;;  %v4340_v14 = vadd.f32 1.0, %v5789_v63  ;;  %v4101_v32 = vld [vmem:[%s7975_s10 + $0x110] sm:$0xff] }
 0x7c3   :  { %v5037_v35 = vmul.f32 -1.442695, %v4161_v60  ;;  %v4159_v4 = vadd.f32 %v4095_v53, %v3925_v47  ;;  %v5793_v5 = vpop.eup %5792  ;;  %5818 = vpow2.f32 %v5032_v57  ;;  %v3936_v24 = vadd.f32 %v5469_v42, %v7256_v58  ;;  %v4099_v53 = vld [vmem:[%s7975_s10 + $0x100] sm:$0xff] }
 0x7c4   :  { %v3927_v10 = vpop.f32.mrf.mxu1  ;;  %v7440_v48 = vpop.eup %5794  ;;  %5820 = vrcp.f32 %v4339_v61  ;;  %v4345_v19 = vadd.f32 1.0, %v5793_v5 }
 0x7c5   :  { %v5035_v62 = vmul.f32 -1.442695, %v4159_v4  ;;  %v3928_v45 = vadd.f32 %v3927_v10, %v7258_v59  ;;  %v5797_v17 = vpop.eup %5796  ;;  %5822 = vpow2.f32 %v5037_v35  ;;  %v4162_v20 = vadd.f32 %v4098_v3, %v3936_v24 }
 0x7c6   :  { %v5472_v36 = vpop.f32.mrf.mxu1  ;;  %v7443_v58 = vpop.eup %5798  ;;  %5824 = vrcp.f32 %v4342_v0  ;;  %v4343_v21 = vadd.f32 1.0, %v5797_v17  ;;  %v4102_v0 = vld [vmem:[%s7975_s10 + $0x118] sm:$0xff] }
 0x7c7   :  { %v4160_v23 = vadd.f32 %v4096_v56, %v3928_v45  ;;  %v3949_v46 = vadd.f32 %v5472_v36, %v7266_v25  ;;  %v5801_v55 = vpop.eup %5800  ;;  %5826 = vpow2.f32 %v5035_v62  ;;  %v5038_v26 = vmul.f32 -1.442695, %v4162_v20 }
 0x7c8   :  { %v3940_v59 = vpop.f32.mrf.mxu1  ;;  %v7451_v34 = vpop.eup %5802  ;;  %5828 = vrcp.f32 %v4340_v14  ;;  %v4346_v52 = vadd.f32 1.0, %v5801_v55 }
 0x7c9   :  { %v5805_v39 = vpop.eup %5804  ;;  %5830 = vrcp.f32 %v4345_v19  ;;  %v5036_v25 = vmul.f32 -1.442695, %v4160_v23  ;;  %v3941_v51 = vadd.f32 %v3940_v59, %v7276_v7  ;;  %v4165_v47 = vadd.f32 %v4101_v32, %v3949_v46  ;;  %v7464_v7 = vpop.f32.mrf.mxu0 }
 0x7ca   :  { %v5473_v61 = vpop.f32.mrf.mxu1  ;;  %v5807_v60 = vpop.eup %5806  ;;  %5832 = vrcp.f32 %v4343_v21  ;;  %v4344_v42 = vadd.f32 1.0, %v5805_v39 }
 0x7cb   :  { %v3952_v63 = vadd.f32 %v5473_v61, %v7286_v29  ;;  %v7459_v57 = vpop.eup %5808  ;;  %5834 = vpow2.f32 %v5038_v26  ;;  %v4163_v3 = vadd.f32 %v4099_v53, %v3941_v51  ;;  %v4349_v10 = vadd.f32 1.0, %v5807_v60  ;;  %v4100_v29 = vld [vmem:[%s7975_s10 + $0x108] sm:$0xff]  ;;  %v7478_v36 = vpop.f32.mrf.mxu0  ;;  %v4103_v26 = vld [vmem:[%s7975_s10 + $0x120] sm:$0xff] }
 0x7cc   :  { %v3943_v35 = vpop.f32.mrf.mxu1  ;;  %v5811_v4 = vpop.eup %5810  ;;  %5836 = vrcp.f32 %v4346_v52 }
 0x7cd   :  { %v3944_v5 = vadd.f32 %v3943_v35, %v7296_v38  ;;  %v7467_v24 = vpop.eup %5812  ;;  %5838 = vpow2.f32 %v5036_v25  ;;  %v4166_v62 = vadd.f32 %v4102_v0, %v3952_v63  ;;  %v4347_v19 = vadd.f32 1.0, %v5811_v4  ;;  %v4105_v38 = vld [vmem:[%s7975_s10 + $0x130] sm:$0xff]  ;;  %v7492_v61 = vpop.f32.mrf.mxu0  ;;  %v4104_v0 = vld [vmem:[%s7975_s10 + $0x128] sm:$0xff] }
 0x7ce   :  { %v5476_v56 = vpop.f32.mrf.mxu1  ;;  %v5815_v14 = vpop.eup %5814  ;;  %5840 = vtanh.f32 %v4165_v47 }
 0x7cf   :  { %v3965_v45 = vadd.f32 %v5476_v56, %v7306_v8  ;;  %v7473_v17 = vpop.eup %5816  ;;  %5842 = vrcp.f32 %v4344_v42  ;;  %v4164_v23 = vadd.f32 %v4100_v29, %v3944_v5  ;;  %v4350_v8 = vadd.f32 1.0, %v5815_v14  ;;  %v4107_v14 = vld [vmem:[%s7975_s10 + $0x140] sm:$0xff] }
 0x7d0   :  { %v3956_v20 = vpop.f32.mrf.mxu1  ;;  %v5819_v21 = vpop.eup %5818  ;;  %5844 = vtanh.f32 %v4163_v3 }
 0x7d1   :  { %v3957_v46 = vadd.f32 %v3956_v20, %v7316_v22  ;;  %v7481_v55 = vpop.eup %5820  ;;  %5846 = vrcp.f32 %v4349_v10  ;;  %v4169_v52 = vadd.f32 %v4105_v38, %v3965_v45  ;;  %v4348_v51 = vadd.f32 1.0, %v5819_v21  ;;  %v4106_v22 = vld [vmem:[%s7975_s10 + $0x138] sm:$0xff]  ;;  %v4109_v10 = vld [vmem:[%s7975_s10 + $0x150] sm:$0xff] }
 0x7d2   :  { %v5477_v32 = vpop.f32.mrf.mxu1  ;;  %v5823_v59 = vpop.eup %5822  ;;  %5848 = vtanh.f32 %v4166_v62 }
 0x7d3   :  { %v3968_v39 = vadd.f32 %v5477_v32, %v7323_v40  ;;  %v7487_v25 = vpop.eup %5824  ;;  %5850 = vrcp.f32 %v4347_v19  ;;  %v4167_v47 = vadd.f32 %v4103_v26, %v3957_v46  ;;  %v4353_v40 = vadd.f32 1.0, %v5823_v59  ;;  %v7511_v62 = vpop.f32.mrf.mxu0  ;;  %v4110_v46 = vld [vmem:[%s7975_s10 + $0x158] sm:$0xff]  ;;  %v4499_v26 = vld [vmem:[%s7976_s12] sm:$0xff] }
 0x7d4   :  { %v3959_v53 = vpop.f32.mrf.mxu1  ;;  %v5827_v60 = vpop.eup %5826  ;;  %5852 = vtanh.f32 %v4164_v23 }
 0x7d5   :  { %v3960_v63 = vadd.f32 %v3959_v53, %v7336_v33  ;;  %v7495_v42 = vpop.eup %5828  ;;  %5854 = vrcp.f32 %v4350_v8  ;;  %v4170_v3 = vadd.f32 %v4106_v22, %v3968_v39  ;;  %v4351_v29 = vadd.f32 1.0, %v5827_v60  ;;  %v7530_v22 = vpop.f32.mrf.mxu0 }
 0x7d6   :  { %v5480_v35 = vpop.f32.mrf.mxu1  ;;  %v7500_v4 = vpop.eup %5830  ;;  %5856 = vtanh.f32 %v4169_v52 }
 0x7d7   :  { %v3981_v5 = vadd.f32 %v5480_v35, %v7346_v28  ;;  %v7506_v33 = vpop.eup %5832  ;;  %5858 = vrcp.f32 %v4348_v51  ;;  %v4501_v28 = vld [vmem:[%s7976_s12 + $0x10] sm:$0xff]  ;;  %v4168_v19 = vadd.f32 %v4104_v0, %v3960_v63  ;;  %v4108_v51 = vld [vmem:[%s7975_s10 + $0x148] sm:$0xff] }
 0x7d8   :  { %v3972_v56 = vpop.f32.mrf.mxu1  ;;  %v5835_v45 = vpop.eup %5834  ;;  %5860 = vtanh.f32 %v4167_v47  ;;  %v4502_v47 = vld [vmem:[%s7976_s12 + $0x18] sm:$0xff] }
 0x7d9   :  { %v3973_v38 = vadd.f32 %v3972_v56, %v7356_v30  ;;  %v7517_v20 = vpop.eup %5836  ;;  %5862 = vrcp.f32 %v4353_v40  ;;  %v4173_v21 = vadd.f32 %v4109_v10, %v3981_v5  ;;  %v4517_v30 = vmul.f32 %v7473_v17, %v4501_v28  ;;  %v4500_v5 = vld [vmem:[%s7976_s12 + $0x8] sm:$0xff]  ;;  %v7556_v28 = vpop.f32.mrf.mxu0 }
 0x7da   :  { %v5481_v23 = vpop.f32.mrf.mxu1  ;;  %v5839_v8 = vpop.eup %5838  ;;  %5864 = vtanh.f32 %v4170_v3  ;;  %v4515_v40 = vmul.f32 %v7481_v55, %v4499_v26  ;;  %v4518_v55 = vmul.f32 %v7487_v25, %v4502_v47  ;;  %v4516_v26 = vmul.f32 %v7495_v42, %v4500_v5  ;;  %v4504_v5 = vld [vmem:[%s7976_s12 + $0x28] sm:$0xff] }
 0x7db   :  { %v4171_v32 = vadd.f32 %v4107_v14, %v3973_v38  ;;  %v3984_v59 = vadd.f32 %v5481_v23, %v7368_v13  ;;  %v5841_v52 = vpop.eup %5840  ;;  %5866 = vrcp.f32 %v4351_v29  ;;  %v4354_v38 = vadd.f32 1.0, %v5835_v45 }
 0x7dc   :  { %v3975_v39 = vpop.f32.mrf.mxu1  ;;  %v7532_v53 = vpop.eup %5842  ;;  %v4533_v60 = vmul.f32 %v5841_v52, %v7363_v44  ;;  %5868 = vtanh.f32 %v4168_v19  ;;  %v4352_v52 = vadd.f32 1.0, %v5839_v8 }
 0x7dd   :  { %v4174_v13 = vadd.f32 %v4110_v46, %v3984_v59  ;;  %v3976_v63 = vadd.f32 %v3975_v39, %v7382_v37  ;;  %v5845_v17 = vpop.eup %5844  ;;  %5870 = vtanh.f32 %v4173_v21  ;;  %v4113_v37 = vld [vmem:[%s7975_s10 + $0x170] sm:$0xff]  ;;  %v4114_v39 = vld [vmem:[%s7975_s10 + $0x178] sm:$0xff] }
 0x7de   :  { %v5484_v0 = vpop.f32.mrf.mxu1  ;;  %v7540_v35 = vpop.eup %5846  ;;  %v7542_v3 = vadd.f32 %v4533_v60, %v4517_v30  ;;  %v4531_v44 = vmul.f32 %v5845_v17, %v7371_v18  ;;  %5872 = vtanh.f32 %v4171_v32  ;;  %v4111_v18 = vld [vmem:[%s7975_s10 + $0x160] sm:$0xff]  ;;  %v4505_v21 = vld [vmem:[%s7976_s12 + $0x30] sm:$0xff]  ;;  %v4506_v17 = vld [vmem:[%s7976_s12 + $0x38] sm:$0xff] }
 0x7df   :  { %v4172_v10 = vadd.f32 %v4108_v51, %v3976_v63  ;;  %v5849_v29 = vpop.eup %5848  ;;  %5874 = vtanh.f32 %v4174_v13  ;;  %v3997_v56 = vadd.f32 %v5484_v0, %v7396_v2  ;;  %v4521_v51 = vmul.f32 %v7500_v4, %v4505_v21  ;;  %v7594_v13 = vpop.f32.mrf.mxu0  ;;  %v4115_v21 = vld [vmem:[%s7975_s10 + $0x180] sm:$0xff] }
 0x7e0   :  { %v3988_v14 = vpop.f32.mrf.mxu1  ;;  %v7558_v19 = vpop.eup %5850  ;;  %4686 = vst.msk [vmem:[%s7977_s17 + $0x10] sm:$0xff] %vm4667_vm11, %v7542_v3  ;;  %v7565_v25 = vadd.f32 %v4531_v44, %v4515_v40  ;;  %v4534_v2 = vmul.f32 %v5849_v29, %v7377_v31 }
 0x7e1   :  { %v3989_v23 = vadd.f32 %v3988_v14, %v7407_v49  ;;  %v5853_v46 = vpop.eup %5852  ;;  %5876 = vtanh.f32 %v4172_v10  ;;  %v4177_v45 = vadd.f32 %v4113_v37, %v3997_v56  ;;  %v4503_v49 = vld [vmem:[%s7976_s12 + $0x20] sm:$0xff]  ;;  %v4117_v14 = vld [vmem:[%s7975_s10 + $0x190] sm:$0xff] }
 0x7e2   :  { %v5485_v32 = vpop.f32.mrf.mxu1  ;;  %v7573_v59 = vpop.eup %5854  ;;  %4684 = vst.msk [vmem:[%s7977_s17] sm:$0xff] %vm4667_vm11, %v7565_v25  ;;  %v7580_v31 = vadd.f32 %v4534_v2, %v4518_v55  ;;  %v4532_v30 = vmul.f32 %v5853_v46, %v7385_v27  ;;  %v4112_v27 = vld [vmem:[%s7975_s10 + $0x168] sm:$0xff]  ;;  %v4519_v44 = vmul.f32 %v7506_v33, %v4503_v49  ;;  %v4509_v33 = vld [vmem:[%s7976_s12 + $0x50] sm:$0xff]  ;;  %v4507_v55 = vld [vmem:[%s7976_s12 + $0x40] sm:$0xff] }
 0x7e3   :  { %v4175_v42 = vadd.f32 %v4111_v18, %v3989_v23  ;;  %v5857_v8 = vpop.eup %5856  ;;  %5878 = vtanh.f32 %v4177_v45  ;;  %v4000_v60 = vadd.f32 %v5485_v32, %v7424_v43  ;;  %v7638_v23 = vpop.f32.mrf.mxu0  ;;  %v4510_v49 = vld [vmem:[%s7976_s12 + $0x58] sm:$0xff] }
 0x7e4   :  { %v3991_v47 = vpop.f32.mrf.mxu1  ;;  %v7596_v63 = vpop.eup %5858  ;;  %5880 = vrcp.f32 %v4354_v38  ;;  %4687 = vst.msk [vmem:[%s7977_s17 + $0x18] sm:$0xff] %vm4667_vm11, %v7580_v31  ;;  %v7603_v4 = vadd.f32 %v4532_v30, %v4516_v26  ;;  %v4537_v43 = vmul.f32 %v5857_v8, %v7391_v15  ;;  %v4522_v38 = vmul.f32 %v7517_v20, %v4506_v17 }
 0x7e5   :  { %v3992_v40 = vadd.f32 %v3991_v47, %v7438_v11  ;;  %v5861_v0 = vpop.eup %5860  ;;  %5882 = vtanh.f32 %v4175_v42  ;;  %v4178_v10 = vadd.f32 %v4114_v39, %v4000_v60  ;;  %v4523_v30 = vmul.f32 %v7558_v19, %v4507_v55 }
 0x7e6   :  { %v5488_v37 = vpop.f32.mrf.mxu1  ;;  %v7614_v29 = vpop.eup %5862  ;;  %5884 = vrcp.f32 %v4352_v52  ;;  %4685 = vst.msk [vmem:[%s7977_s17 + $0x8] sm:$0xff] %vm4667_vm11, %v7603_v4  ;;  %v7621_v15 = vadd.f32 %v4537_v43, %v4521_v51  ;;  %v4535_v11 = vmul.f32 %v5861_v0, %v7398_v6  ;;  %v4525_v52 = vmul.f32 %v7540_v35, %v4509_v33  ;;  %v4118_v35 = vld [vmem:[%s7975_s10 + $0x198] sm:$0xff]  ;;  %v4116_v0 = vld [vmem:[%s7975_s10 + $0x188] sm:$0xff] }
 0x7e7   :  { %v4176_v56 = vadd.f32 %v4112_v27, %v3992_v40  ;;  %v5865_v18 = vpop.eup %5864  ;;  %5886 = vtanh.f32 %v4178_v10  ;;  %v4013_v2 = vadd.f32 %v5488_v37, %v7449_v9  ;;  %v4520_v9 = vmul.f32 %v7532_v53, %v4504_v5  ;;  %v7672_v27 = vpop.f32.mrf.mxu0 }
 0x7e8   :  { %v4004_v6 = vpop.f32.mrf.mxu1  ;;  %v7640_v46 = vpop.eup %5866  ;;  %4690 = vst.msk [vmem:[%s7977_s17 + $0x30] sm:$0xff] %vm4667_vm11, %v7621_v15  ;;  %v7647_v26 = vadd.f32 %v4535_v11, %v4519_v44  ;;  %v4538_v20 = vmul.f32 %v5865_v18, %v7404_v12 }
 0x7e9   :  { %v4005_v45 = vadd.f32 %v4004_v6, %v7464_v7  ;;  %v5869_v32 = vpop.eup %5868  ;;  %5888 = vtanh.f32 %v4176_v56  ;;  %v4181_v42 = vadd.f32 %v4117_v14, %v4013_v2 }
 0x7ea   :  { %v5489_v39 = vpop.f32.mrf.mxu1  ;;  %v5871_v8 = vpop.eup %5870  ;;  %5890 = vtanh.f32 %v7542_v3  ;;  %4688 = vst.msk [vmem:[%s7977_s17 + $0x20] sm:$0xff] %vm4667_vm11, %v7647_v26  ;;  %v7663_v12 = vadd.f32 %v4538_v20, %v4522_v38  ;;  %v4536_v7 = vmul.f32 %v5869_v32, %v7409_v54 }
 0x7eb   :  { %v4179_v53 = vadd.f32 %v4115_v21, %v4005_v45  ;;  %v5873_v19 = vpop.eup %5872  ;;  %5892 = vtanh.f32 %v7565_v25  ;;  %v4541_v3 = vmul.f32 %v5871_v8, %v7418_v50  ;;  %v5041_v51 = vmul.f32 -1.442695, %v4181_v42  ;;  %v4514_v45 = vld [vmem:[%s7976_s12 + $0x78] sm:$0xff]  ;;  %v4120_v8 = vld [vmem:[%s7975_s10 + $0x1a8] sm:$0xff] }
 0x7ec   :  { %v4016_v60 = vadd.f32 %v5489_v39, %v7478_v36  ;;  %v4007_v47 = vpop.f32.mrf.mxu1  ;;  %v5875_v43 = vpop.eup %5874  ;;  %5894 = vtanh.f32 %v7580_v31  ;;  %4691 = vst.msk [vmem:[%s7977_s17 + $0x38] sm:$0xff] %vm4667_vm11, %v7663_v12  ;;  %v7680_v54 = vadd.f32 %v4536_v7, %v4520_v9  ;;  %v4539_v25 = vmul.f32 %v5873_v19, %v7426_v41  ;;  %v4508_v36 = vld [vmem:[%s7976_s12 + $0x48] sm:$0xff]  ;;  %v4121_v41 = vld [vmem:[%s7975_s10 + $0x1b0] sm:$0xff] }
 0x7ed   :  { %v4526_v50 = vmul.f32 %v7573_v59, %v4510_v49  ;;  %v7687_v17 = vadd.f32 %v4541_v3, %v4525_v52  ;;  %v4542_v31 = vmul.f32 %v5875_v43, %v7429_v1  ;;  %5896 = vpow2.f32 %v5041_v51  ;;  %v4513_v1 = vld [vmem:[%s7976_s12 + $0x70] sm:$0xff]  ;;  %v4122_v49 = vld [vmem:[%s7975_s10 + $0x1b8] sm:$0xff] }
 0x7ee   :  { %v4182_v40 = vadd.f32 %v4118_v35, %v4016_v60  ;;  %v5492_v44 = vpop.f32.mrf.mxu1  ;;  %v5877_v59 = vpop.eup %5876  ;;  %4689 = vst.msk [vmem:[%s7977_s17 + $0x28] sm:$0xff] %vm4667_vm11, %v7680_v54  ;;  %v7701_v5 = vadd.f32 %v4539_v25, %v4523_v30  ;;  %v5039_v10 = vmul.f32 -1.442695, %v4179_v53  ;;  %v4008_v37 = vadd.f32 %v4007_v47, %v7492_v61  ;;  %v4511_v61 = vld [vmem:[%s7976_s12 + $0x60] sm:$0xff]  ;;  %v4512_v35 = vld [vmem:[%s7976_s12 + $0x68] sm:$0xff]  ;;  %v4125_v47 = vld [vmem:[%s7975_s10 + $0x1d0] sm:$0xff] }
 0x7ef   :  { %v4029_v11 = vadd.f32 %v5492_v44, %v7511_v62  ;;  %5898 = vtanh.f32 %v7603_v4  ;;  %4694 = vst.msk [vmem:[%s7977_s17 + $0x50] sm:$0xff] %vm4667_vm11, %v7687_v17  ;;  %v7714_v33 = vadd.f32 %v4542_v31, %v4526_v50  ;;  %v4524_v55 = vmul.f32 %v7596_v63, %v4508_v36  ;;  %v4119_v62 = vld [vmem:[%s7975_s10 + $0x1a0] sm:$0xff]  ;;  %v7724_v4 = vpop.f32.mrf.mxu0 }
 0x7f0   :  { %v4540_v56 = vmul.f32 %v5877_v59, %v7440_v48  ;;  %v4020_v14 = vpop.f32.mrf.mxu1  ;;  %v5879_v18 = vpop.eup %5878  ;;  %4692 = vst.msk [vmem:[%s7977_s17 + $0x40] sm:$0xff] %vm4667_vm11, %v7701_v5  ;;  %v5042_v63 = vmul.f32 -1.442695, %v4182_v40  ;;  %v4180_v48 = vadd.f32 %v4116_v0, %v4008_v37  ;;  %5900 = vtanh.f32 %v7621_v15  ;;  %v4126_v37 = vld [vmem:[%s7975_s10 + $0x1d8] sm:$0xff] }
 0x7f1   :  { %v4185_v38 = vadd.f32 %v4121_v41, %v4029_v11  ;;  %v4021_v2 = vadd.f32 %v4020_v14, %v7530_v22  ;;  %v5881_v6 = vpop.eup %5880  ;;  %4695 = vst.msk [vmem:[%s7977_s17 + $0x58] sm:$0xff] %vm4667_vm11, %v7714_v33  ;;  %v4529_v20 = vmul.f32 %v7614_v29, %v4513_v1  ;;  %v4545_v9 = vmul.f32 %v5879_v18, %v7443_v58  ;;  %v3491_v7 = vpop.f32.mrf.mxu0  ;;  %v4124_v18 = vld [vmem:[%s7975_s10 + $0x1c8] sm:$0xff] }
 0x7f2   :  { %v7738_v21 = vadd.f32 %v4540_v56, %v4524_v55  ;;  %v5493_v22 = vpop.f32.mrf.mxu1  ;;  %v5883_v32 = vpop.eup %5882  ;;  %v4527_v15 = vmul.f32 %v7640_v46, %v4511_v61  ;;  %5902 = vpow2.f32 %v5039_v10  ;;  %v5040_v52 = vmul.f32 -1.442695, %v4180_v48 }
 0x7f3   :  { %v4183_v30 = vadd.f32 %v4119_v62, %v4021_v2  ;;  %v5885_v42 = vpop.eup %5884  ;;  %5904 = vtanh.f32 %v7647_v26  ;;  %v7755_v58 = vadd.f32 %v4545_v9, %v4529_v20  ;;  %v4543_v29 = vmul.f32 %v5883_v32, %v7451_v34  ;;  %v5432_v40 = vpop.f32.mrf.mxu0  ;;  %v4129_v2 = vld [vmem:[%s7975_s10 + $0x1f0] sm:$0xff] }
 0x7f4   :  { %4693 = vst.msk [vmem:[%s7977_s17 + $0x48] sm:$0xff] %vm4667_vm11, %v7738_v21  ;;  %v4032_v46 = vadd.f32 %v5493_v22, %v7556_v28  ;;  %v4023_v39 = vpop.f32.mrf.mxu1  ;;  %v5887_v53 = vpop.eup %5886  ;;  %v4530_v26 = vmul.f32 %v5881_v6, %v4514_v45  ;;  %5906 = vpow2.f32 %v5042_v63  ;;  %v5045_v19 = vmul.f32 -1.442695, %v4185_v38 }
 0x7f5   :  { %v4024_v3 = vadd.f32 %v4023_v39, %v7594_v13  ;;  %5908 = vtanh.f32 %v7663_v12  ;;  %4698 = vst.msk [vmem:[%s7977_s17 + $0x70] sm:$0xff] %vm4667_vm11, %v7755_v58  ;;  %v7772_v34 = vadd.f32 %v4543_v29, %v4527_v15  ;;  %v4546_v28 = vmul.f32 %v5887_v53, %v7459_v57  ;;  %v3504_v14 = vpop.f32.mrf.mxu0  ;;  %v4127_v29 = vld [vmem:[%s7975_s10 + $0x1e0] sm:$0xff] }
 0x7f6   :  { %v4186_v51 = vadd.f32 %v4122_v49, %v4032_v46  ;;  %v5496_v60 = vpop.f32.mrf.mxu1  ;;  %v5889_v43 = vpop.eup %5888  ;;  %5910 = vpow2.f32 %v5040_v52  ;;  %v5043_v13 = vmul.f32 -1.442695, %v4183_v30  ;;  %v4528_v36 = vmul.f32 %v5885_v42, %v4512_v35 }
 0x7f7   :  { %v4184_v12 = vadd.f32 %v4120_v8, %v4024_v3  ;;  %v4045_v25 = vadd.f32 %v5496_v60, %v7638_v23  ;;  %v7779_v50 = vpop.eup %5890  ;;  %5912 = vtanh.f32 %v7680_v54  ;;  %4696 = vst.msk [vmem:[%s7977_s17 + $0x60] sm:$0xff] %vm4667_vm11, %v7772_v34  ;;  %v7787_v57 = vadd.f32 %v4546_v28, %v4530_v26  ;;  %v4123_v23 = vld [vmem:[%s7975_s10 + $0x1c0] sm:$0xff]  ;;  %v5433_v32 = vpop.f32.mrf.mxu0 }
 0x7f8   :  { %v4544_v31 = vmul.f32 %v5889_v43, %v7467_v24  ;;  %v4036_v0 = vpop.f32.mrf.mxu1  ;;  %v7793_v44 = vpop.eup %5892  ;;  %5914 = vpow2.f32 %v5045_v19  ;;  %v5046_v54 = vmul.f32 -1.442695, %v4186_v51 }
 0x7f9   :  { %v4189_v41 = vadd.f32 %v4125_v47, %v4045_v25  ;;  %v4037_v59 = vadd.f32 %v4036_v0, %v7672_v27  ;;  %v7796_v1 = vpop.eup %5894  ;;  %5916 = vtanh.f32 %v7687_v17  ;;  %4699 = vst.msk [vmem:[%s7977_s17 + $0x78] sm:$0xff] %vm4667_vm11, %v7787_v57  ;;  %v5044_v27 = vmul.f32 -1.442695, %v4184_v12  ;;  %v3507_v28 = vpop.f32.mrf.mxu0  ;;  %v4128_v47 = vld [vmem:[%s7975_s10 + $0x1e8] sm:$0xff] }
 0x7fa   :  { %v7804_v24 = vadd.f32 %v4544_v31, %v4528_v36  ;;  %v5497_v10 = vpop.f32.mrf.mxu1  ;;  %v5897_v11 = vpop.eup %5896  ;;  %5918 = vpow2.f32 %v5043_v13 }
 0x7fb   :  { %v4187_v55 = vadd.f32 %v4123_v23, %v4037_v59  ;;  %v4048_v56 = vadd.f32 %v5497_v10, %v7724_v4  ;;  %5920 = vtanh.f32 %v7701_v5  ;;  %v4453_v17 = vadd.f32 1.0, %v5897_v11 }
 0x7fc   :  { %4697 = vst.msk [vmem:[%s7977_s17 + $0x68] sm:$0xff] %vm4667_vm11, %v7804_v24  ;;  %v5049_v61 = vmul.f32 -1.442695, %v4189_v41  ;;  %v4039_v62 = vpop.f32.mrf.mxu1  ;;  %v7819_v63 = vpop.eup %5898  ;;  %5922 = vpow2.f32 %v5046_v54 }
 0x7fd   :  { %v5047_v4 = vmul.f32 -1.442695, %v4187_v55  ;;  %v4190_v48 = vadd.f32 %v4126_v37, %v4048_v56  ;;  %v4040_v5 = vadd.f32 %v4039_v62, %v3491_v7  ;;  %5924 = vrcp.f32 %v4453_v17  ;;  %v7824_v6 = vpop.eup %5900  ;;  %v4130_v7 = vld [vmem:[%s7975_s10 + $0x1f8] sm:$0xff] }
 0x7fe   :  { %v5500_v38 = vpop.f32.mrf.mxu1  ;;  %5926 = vpow2.f32 %v5044_v27 }
 0x7ff   :  { %v5050_v20 = vmul.f32 -1.442695, %v4190_v48  ;;  %v4188_v9 = vadd.f32 %v4124_v18, %v4040_v5  ;;  %v4061_v45 = vadd.f32 %v5500_v38, %v5432_v40  ;;  %v5903_v22 = vpop.eup %5902  ;;  %5928 = vpow2.f32 %v5049_v61 }
 0x800   :  { %v4052_v15 = vpop.f32.mrf.mxu1  ;;  %v7826_v52 = vpop.eup %5904  ;;  %v4451_v30 = vadd.f32 1.0, %v5903_v22  ;;  %5930 = vpow2.f32 %v5047_v4 }
 0x801   :  { %v5048_v49 = vmul.f32 -1.442695, %v4188_v9  ;;  %v4193_v42 = vadd.f32 %v4129_v2, %v4061_v45  ;;  %v5907_v46 = vpop.eup %5906  ;;  %5932 = vpow2.f32 %v5050_v20  ;;  %v4053_v39 = vadd.f32 %v4052_v15, %v3504_v14 }
 0x802   :  { %v5501_v8 = vpop.f32.mrf.mxu1  ;;  %v7834_v53 = vpop.eup %5908  ;;  %5934 = vrcp.f32 %v4451_v30  ;;  %v4454_v26 = vadd.f32 1.0, %v5907_v46 }
 0x803   :  { %v5053_v35 = vmul.f32 -1.442695, %v4193_v42  ;;  %v4064_v19 = vadd.f32 %v5501_v8, %v5433_v32  ;;  %v5911_v3 = vpop.eup %5910  ;;  %5936 = vpow2.f32 %v5048_v49  ;;  %v4191_v51 = vadd.f32 %v4127_v29, %v4053_v39 }
 0x804   :  { %v4055_v60 = vpop.f32.mrf.mxu1  ;;  %v7839_v43 = vpop.eup %5912  ;;  %5938 = vrcp.f32 %v4454_v26  ;;  %v4452_v13 = vadd.f32 1.0, %v5911_v3 }
 0x805   :  { %v4194_v12 = vadd.f32 %v4130_v7, %v4064_v19  ;;  %v4056_v25 = vadd.f32 %v4055_v60, %v3507_v28  ;;  %v5915_v36 = vpop.eup %5914  ;;  %5940 = vpow2.f32 %v5053_v35  ;;  %v5051_v31 = vmul.f32 -1.442695, %v4191_v51 }
 0x806   :  { %v7841_v40 = vpop.eup %5916  ;;  %5942 = vrcp.f32 %v4452_v13  ;;  %v4457_v0 = vadd.f32 1.0, %v5915_v36 }
 0x807   :  { %v5054_v23 = vmul.f32 -1.442695, %v4194_v12  ;;  %v4192_v54 = vadd.f32 %v4128_v47, %v4056_v25  ;;  %v5919_v41 = vpop.eup %5918  ;;  %5944 = vpow2.f32 %v5051_v31 }
 0x808   :  { %v7843_v59 = vpop.eup %5920  ;;  %5946 = vrcp.f32 %v4457_v0  ;;  %v4455_v10 = vadd.f32 1.0, %v5919_v41 }
 0x809   :  { %v5052_v37 = vmul.f32 -1.442695, %v4192_v54  ;;  %v5923_v11 = vpop.eup %5922  ;;  %5948 = vpow2.f32 %v5054_v23 }
 0x80a   :  { %v5925_v27 = vpop.eup %5924  ;;  %5950 = vrcp.f32 %v4455_v10  ;;  %v4458_v55 = vadd.f32 1.0, %v5923_v11 }
 0x80b   :  { %v5927_v56 = vpop.eup %5926  ;;  %5952 = vpow2.f32 %v5052_v37  ;;  %v7846_v17 = vmul.f32 %v5925_v27, %v7779_v50 }
 0x80c   :  { %v5929_v61 = vpop.eup %5928  ;;  %5954 = vrcp.f32 %v4458_v55  ;;  %v4456_v14 = vadd.f32 1.0, %v5927_v56  ;;  %v4595_v56 = vld [vmem:[%s7979_s13] sm:$0x7] }
 0x80d   :  { %v5931_v62 = vpop.eup %5930  ;;  %5956 = vtanh.f32 %v7714_v33  ;;  %v4461_v18 = vadd.f32 1.0, %v5929_v61  ;;  %4670 = vst.msk [vmem:[%s7978_s16 + $0x10] sm:$0xff] %vm4667_vm11, %v7846_v17  ;;  %v4604_v61 = vld [vmem:[%s7980_s14] sm:$0x1f] }
 0x80e   :  { %v5933_v4 = vpop.eup %5932  ;;  %5958 = vrcp.f32 %v4456_v14  ;;  %v4459_v48 = vadd.f32 1.0, %v5931_v62 }
 0x80f   :  { %v5935_v5 = vpop.eup %5934  ;;  %5960 = vrcp.f32 %v4461_v18  ;;  %v4462_v50 = vadd.f32 1.0, %v5933_v4 }
 0x810   :  { %v5937_v38 = vpop.eup %5936  ;;  %5962 = vrcp.f32 %v4459_v48  ;;  %v7855_v2 = vmul.f32 %v5935_v5, %v7793_v44 }
 0x811   :  { %v5939_v20 = vpop.eup %5938  ;;  %5964 = vrcp.f32 %v4462_v50  ;;  %v4460_v33 = vadd.f32 1.0, %v5937_v38 }
 0x812   :  { %v5941_v9 = vpop.eup %5940  ;;  %5966 = vtanh.f32 %v7738_v21  ;;  %v7859_v45 = vmul.f32 %v5939_v20, %v7796_v1  ;;  %4668 = vst.msk [vmem:[%s7978_s16] sm:$0xff] %vm4667_vm11, %v7855_v2 }
 0x813   :  { %v5943_v22 = vpop.eup %5942  ;;  %5968 = vrcp.f32 %v4460_v33  ;;  %v4465_v32 = vadd.f32 1.0, %v5941_v9 }
 0x814   :  { %v5945_v44 = vpop.eup %5944  ;;  %5970 = vtanh.f32 %v7755_v58  ;;  %4671 = vst.msk [vmem:[%s7978_s16 + $0x18] sm:$0xff] %vm4667_vm11, %v7859_v45  ;;  %v7873_v21 = vmul.f32 %v5943_v22, %v7819_v63  ;;  %v4597_v27 = vpack.c.bf16 %v7859_v45, %v7846_v17 }
 0x815   :  { %v5947_v1 = vpop.eup %5946  ;;  %5972 = vrcp.f32 %v4465_v32  ;;  %v4463_v15 = vadd.f32 1.0, %v5945_v44 }
 0x816   :  { %v5949_v30 = vpop.eup %5948  ;;  %5974 = vtanh.f32 %v7772_v34  ;;  %v7877_v49 = vmul.f32 %v5947_v1, %v7824_v6  ;;  %4669 = vst.msk [vmem:[%s7978_s16 + $0x8] sm:$0xff] %vm4667_vm11, %v7873_v21  ;;  %v4596_v55 = vpack.c.bf16 %v7873_v21, %v7855_v2 }
 0x817   :  { %v5951_v58 = vpop.eup %5950  ;;  %5976 = vrcp.f32 %v4463_v15  ;;  %v4466_v42 = vadd.f32 1.0, %v5949_v30 }
 0x818   :  { %v5953_v63 = vpop.eup %5952  ;;  %5978 = vtanh.f32 %v7787_v57  ;;  %4674 = vst.msk [vmem:[%s7978_s16 + $0x30] sm:$0xff] %vm4667_vm11, %v7877_v49  ;;  %v4583_v34 = vmul.f32 %v5951_v58, %v7826_v52 }
 0x819   :  { %v5955_v6 = vpop.eup %5954  ;;  %5980 = vrcp.f32 %v4466_v42  ;;  %v4464_v29 = vadd.f32 1.0, %v5953_v63 }
 0x81a   :  { %v5957_v46 = vpop.eup %5956  ;;  %5982 = vtanh.f32 %v7804_v24  ;;  %v4586_v39 = vmul.f32 %v5955_v6, %v7834_v53  ;;  %4672 = vst.msk [vmem:[%s7978_s16 + $0x20] sm:$0xff] %vm4667_vm11, %v4583_v34 }
 0x81b   :  { %v5959_v57 = vpop.eup %5958  ;;  %5984 = vrcp.f32 %v4464_v29 }
 0x81c   :  { %v5961_v8 = vpop.eup %5960  ;;  %4675 = vst.msk [vmem:[%s7978_s16 + $0x38] sm:$0xff] %vm4667_vm11, %v4586_v39  ;;  %v4584_v52 = vmul.f32 %v5959_v57, %v7839_v43  ;;  %v4599_v37 = vpack.c.bf16 %v4586_v39, %v7877_v49 }
 0x81d   :  { %v5963_v7 = vpop.eup %5962  ;;  %v4589_v24 = vmul.f32 %v5961_v8, %v7841_v40 }
 0x81e   :  { %v5965_v26 = vpop.eup %5964  ;;  %v4587_v53 = vmul.f32 %v5963_v7, %v7843_v59  ;;  %4673 = vst.msk [vmem:[%s7978_s16 + $0x28] sm:$0xff] %vm4667_vm11, %v4584_v52  ;;  %v4598_v11 = vpack.c.bf16 %v4584_v52, %v4583_v34 }
 0x81f   :  { %v5967_v35 = vpop.eup %5966  ;;  %v4590_v19 = vmul.f32 %v5965_v26, %v5957_v46  ;;  %4678 = vst.msk [vmem:[%s7978_s16 + $0x50] sm:$0xff] %vm4667_vm11, %v4589_v24 }
 0x820   :  { %v5969_v3 = vpop.eup %5968  ;;  %4676 = vst.msk [vmem:[%s7978_s16 + $0x40] sm:$0xff] %vm4667_vm11, %v4587_v53 }
 0x821   :  { %v5971_v28 = vpop.eup %5970  ;;  %4679 = vst.msk [vmem:[%s7978_s16 + $0x58] sm:$0xff] %vm4667_vm11, %v4590_v19  ;;  %v4588_v51 = vmul.f32 %v5969_v3, %v5967_v35  ;;  %v4601_v59 = vpack.c.bf16 %v4590_v19, %v4589_v24 }
 0x822   :  { %v5973_v60 = vpop.eup %5972 }
 0x823   :  { %v5975_v47 = vpop.eup %5974  ;;  %v4593_v43 = vmul.f32 %v5973_v60, %v5971_v28  ;;  %4677 = vst.msk [vmem:[%s7978_s16 + $0x48] sm:$0xff] %vm4667_vm11, %v4588_v51  ;;  %v4600_v10 = vpack.c.bf16 %v4588_v51, %v4587_v53 }
 0x824   :  { %v5977_v13 = vpop.eup %5976 }
 0x825   :  { %v5979_v12 = vpop.eup %5978  ;;  %4682 = vst.msk [vmem:[%s7978_s16 + $0x70] sm:$0xff] %vm4667_vm11, %v4593_v43  ;;  %v4591_v25 = vmul.f32 %v5977_v13, %v5975_v47 }
 0x826   :  { %v5981_v36 = vpop.eup %5980 }
 0x827   :  { %v5983_v31 = vpop.eup %5982  ;;  %v4594_v40 = vmul.f32 %v5981_v36, %v5979_v12  ;;  %4680 = vst.msk [vmem:[%s7978_s16 + $0x60] sm:$0xff] %vm4667_vm11, %v4591_v25 }
 0x828   :  { %v5985_v0 = vpop.eup %5984 }
 0x829   :  { %v4603_v23 = vpack.c.bf16 %v4594_v40, %v4593_v43  ;;  %4683 = vst.msk [vmem:[%s7978_s16 + $0x78] sm:$0xff] %vm4667_vm11, %v4594_v40  ;;  %v4592_v54 = vmul.f32 %v5985_v0, %v5983_v31 }
 0x82b   :  { %5503 = vmatpush3.bf16.msra.mxu1 %v4603_v23  ;;  %4681 = vst.msk [vmem:[%s7978_s16 + $0x68] sm:$0xff] %vm4667_vm11, %v4592_v54  ;;  %v4602_v41 = vpack.c.bf16 %v4592_v54, %v4591_v25 }
 0x82c   :  { %5504 = vmatprep.subr.bf16.mxu1 %v5999_v16 }
 0x82f   :  { %5505 = vmatpush3.bf16.msra.mxu1 %v4602_v41 }
 0x830   :  { %5506 = vmatprep.subr.bf16.mxu1 %v5999_v16 }
 0x833   :  { %5507 = vmatpush3.bf16.msra.mxu1 %v4601_v59 }
 0x834   :  { %5508 = vmatprep.subr.bf16.mxu1 %v5999_v16 }
 0x837   :  { %5509 = vmatpush3.bf16.msra.mxu1 %v4600_v10 }
 0x838   :  { %5510 = vmatprep.subr.bf16.mxu1 %v5999_v16 }
 0x83b   :  { %5511 = vmatpush3.bf16.msra.mxu1 %v4599_v37 }
 0x83c   :  { %5512 = vmatprep.subr.bf16.mxu1 %v5999_v16 }
 0x83f   :  { %5513 = vmatpush3.bf16.msra.mxu1 %v4598_v11 }
 0x840   :  { %5514 = vmatprep.subr.bf16.mxu1 %v5999_v16 }
 0x843   :  { %5515 = vmatpush3.bf16.msra.mxu1 %v4597_v27 }
 0x844   :  { %5516 = vmatprep.subr.bf16.mxu1 %v5999_v16 }
 0x847   :  { %5517 = vmatpush3.bf16.msra.mxu1 %v4596_v55 }
 0x84a   :  { %5519 = vmatmul.mubr.bf16.vlgmr.msra.gmra.mxu1 %v4595_v56 }
 0x90a   :  { %v4639_v14 = vpop.f32.mrf.mxu1 }
 0x90b   :  { %v4640_v62 = vadd.f32 %v4639_v14, %v4604_v61 }
 0x90c   :  { %v5520_v17 = vpop.f32.mrf.mxu1 }
 0x90d   :  { %v4646_v18 = vsel %vm4645_vm12, %v4640_v62, -inf }
 0x90e   :  { %v4647_v16 = vrot.slane %v4646_v18, 4  ;;  %v4642_v4 = vpop.f32.mrf.mxu1 }
 0x910   :  { %v4648_v48 = vmax.f32 %v4646_v18, %v4647_v16  ;;  %v5521_v5 = vpop.f32.mrf.mxu1 }
 0x912   :  { %v4649_v50 = vrot.slane %v4648_v48, 2 }
 0x914   :  { %v4650_v38 = vmax.f32 %v4648_v48, %v4649_v50 }
 0x916   :  { %v4651_v2 = vrot.slane %v4650_v38, 1 }
 0x918   :  { %v4652_v20 = vmax.f32 %v4650_v38, %v4651_v2 }
 0x91a   :  { %v4653_v33 = vsub.f32 %v4640_v62, %v4652_v20 }
 0x91c   :  { %v4654_v9 = vmul.f32 1.442695, %v4653_v33 }
 0x91e   :  { %5986 = vpow2.f32 %v4654_v9 }
 0x92b   :  { %v5987_v45 = vpop.eup %5986 }
 0x92c   :  { %v4656_v22 = vsel %vm4645_vm12, %v5987_v45, 0.0 }
 0x92d   :  { %v4657_v32 = vrot.slane %v4656_v22, 4 }
 0x92f   :  { %v4658_v44 = vadd.f32 %v4657_v32, %v4656_v22 }
 0x931   :  { %v4659_v21 = vrot.slane %v4658_v44, 2 }
 0x933   :  { %v4660_v1 = vadd.f32 %v4659_v21, %v4658_v44 }
 0x935   :  { %v4661_v15 = vrot.slane %v4660_v1, 1 }
 0x937   :  { %v4662_v30 = vadd.f32 %v4661_v15, %v4660_v1 }
 0x939   :  { %5988 = vlog2.f32 %v4662_v30 }
 0x946   :  { %v5989_v49 = vpop.eup %5988 }
 0x947   :  { %v4664_v58 = vmul.f32 0.6931472, %v5989_v49 }
 0x949   :  { %v4665_v42 = vsub.f32 %v4653_v33, %v4664_v58 }
 0x94b   :  { %4666 = vst.msk [vmem:[%s7981_s15] sm:$0x1f] %vm4645_vm12, %v4665_v42 }

</bundles_post_ra>
